<compile_context>
chip_gen: v7x
topology: tpu7x:2x2x1
jax: 0.10.0
libtpu: 0.0.40
codegen_flags: <defaults>
</compile_context>

<pallas_src>
import jax
import jax.numpy as jnp
import numpy as np
from jax.experimental import pallas as pl
from jax.experimental.pallas import tpu as pltpu

# Architecture constants implied by the PyTorch module (28x28 input -> 320 feats).
_H_IN = _W_IN = 28
_K = 5
_C1, _C2 = 10, 20            # conv1 / conv2 output channels
_HO1, _HP1 = 24, 12          # conv1 output / pooled spatial size
_HO2, _HP2 = 8, 4            # conv2 output / pooled spatial size
_HALF = 128                  # lane width of one pooled activation row
_FC1_OUT, _FC2_OUT = 50, 10
_FC1_PAD = 128               # fc1 output padded to a full lane tile
_OUT_PAD = 128               # fc2 output padded to a full lane tile


def _round_up(n, m):
    return ((n + m - 1) // m) * m


# ---------------------------------------------------------------------------
# Fused forward kernel: one batch tile per grid step, everything stays in VMEM.
# ---------------------------------------------------------------------------
def _cnn_fused_kernel(x_ref, wb1_ref, b1_ref, wb2_ref, b2_ref,
                      wf1_ref, bf1_ref, wf2_ref, bf2_ref, o_ref,
                      m1_ref, m2_ref):
    """Whole CNN forward for one batch tile.

    x_ref   : (bt, 28*rw1) bf16, lane-flat image rows (lane = h*rw1 + w*cin + ci)
    wb1/wb2 : banded conv weights (5*rw1, 256) / (5*128, 256) bf16
    wf1/wf2 : folded fc weights (512, 128) / (128, 128) bf16
    m1/m2   : VMEM scratch for pooled+ReLU conv activations, lane-flat bf16
    """
    f32, bf16 = jnp.float32, jnp.bfloat16
    rw1 = x_ref.shape[1] // _H_IN          # padded lane width of one input row
    wb1 = wb1_ref[...]
    wb2 = wb2_ref[...]

    # ---- conv1 -> 2x2 max-pool -> (+bias) -> ReLU ---------------------------
    # For each pooled output row p: two per-output-row matmuls (conv rows 2p,
    # 2p+1) whose LHS is a contiguous 128-aligned lane slice (no relayout).
    # Even/odd output columns land in lanes [0,128)/[128,256) so the W-pool is
    # max(half0, half1) and compacts the pooled row to 128 lanes for free.
    for p in range(_HP1):
        za = jnp.dot(x_ref[:, (2 * p) * rw1:(2 * p + _K) * rw1], wb1,
                     preferred_element_type=f32)
        zb = jnp.dot(x_ref[:, (2 * p + 1) * rw1:(2 * p + 1 + _K) * rw1], wb1,
                     preferred_element_type=f32)
        y = jnp.maximum(za, zb)                         # pool over H
        y = jnp.maximum(y[:, :_HALF], y[:, _HALF:])     # pool over W
        y = jnp.maximum(y + b1_ref[...], 0.0)           # bias commutes with max
        m1_ref[:, p * _HALF:(p + 1) * _HALF] = y.astype(bf16)

    # ---- conv2 (Dropout2d == identity in eval) -> pool -> bias -> ReLU ------
    for p in range(_HP2):
        za = jnp.dot(m1_ref[:, (2 * p) * _HALF:(2 * p + _K) * _HALF], wb2,
                     preferred_element_type=f32)
        zb = jnp.dot(m1_ref[:, (2 * p + 1) * _HALF:(2 * p + 1 + _K) * _HALF], wb2,
                     preferred_element_type=f32)
        y = jnp.maximum(za, zb)
        y = jnp.maximum(y[:, :_HALF], y[:, _HALF:])
        y = jnp.maximum(y + b2_ref[...], 0.0)
        m2_ref[:, p * _HALF:(p + 1) * _HALF] = y.astype(bf16)

    # ---- fc1 + ReLU: single K=512 matmul (NCHW flatten folded into wf1) -----
    h1 = jnp.dot(m2_ref[...], wf1_ref[...], preferred_element_type=f32)
    h1 = jnp.maximum(h1 + bf1_ref[...], 0.0)

    # ---- fc2 (F.dropout == identity in eval); output lane-padded to 128 -----
    out = jnp.dot(h1.astype(bf16), wf2_ref[...], preferred_element_type=f32)
    o_ref[...] = out + bf2_ref[...]


# ---------------------------------------------------------------------------
# Parameter preparation: PyTorch layouts -> banded / folded kernel layouts.
# ---------------------------------------------------------------------------
def prepare_params(torch_params):
    """Convert PyTorch-layout weights into the fused kernel's format."""
    tp = {k: np.asarray(v, np.float32) for k, v in torch_params.items()}
    cin = tp["conv1_w"].shape[1]
    rw1 = _round_up(_W_IN * cin, _HALF)     # padded lane width of an input row

    # conv1 band: rows = (kh, w_in, ci) within the 5-row window, cols = output
    # lane parity*128 + (w_out//2)*C1 + co  (even/odd output columns split).
    w1 = tp["conv1_w"]                                   # (C1, cin, K, K)
    wb1 = np.zeros((_K * rw1, 2 * _HALF), np.float32)
    for wo in range(_HO1):
        col0 = (wo % 2) * _HALF + (wo // 2) * _C1
        for kh in range(_K):
            for kw in range(_K):
                r0 = kh * rw1 + (wo + kw) * cin
                wb1[r0:r0 + cin, col0:col0 + _C1] = w1[:, :, kh, kw].T

    # conv2 band: input rows = (kh, w_in, ci) with ci < C1 at lane w_in*C1+ci
    # inside each 128-lane pooled-row segment.
    w2 = tp["conv2_w"]                                   # (C2, C1, K, K)
    wb2 = np.zeros((_K * _HALF, 2 * _HALF), np.float32)
    for wo in range(_HO2):
        col0 = (wo % 2) * _HALF + (wo // 2) * _C2
        for kh in range(_K):
            for kw in range(_K):
                r0 = kh * _HALF + (wo + kw) * _C1
                wb2[r0:r0 + _C1, col0:col0 + _C2] = w2[:, :, kh, kw].T

    b1 = np.zeros((1, _HALF), np.float32)
    for wp in range(_HP1):
        b1[0, wp * _C1:(wp + 1) * _C1] = tp["conv1_b"]
    b2 = np.zeros((1, _HALF), np.float32)
    for wp in range(_HP2):
        b2[0, wp * _C2:(wp + 1) * _C2] = tp["conv2_b"]

    # fc1: fold the PyTorch NCHW .view(-1, 320) permutation (f = c*16 + h*4 + w)
    # into the weight, indexed by the kernel's lane-flat m2 layout
    # (row = h*128 + w*C2 + c).  Output padded to 128 columns.
    wf1 = np.zeros((_HP2 * _HALF, _FC1_PAD), np.float32)
    for h in range(_HP2):
        for w in range(_HP2):
            for c in range(_C2):
                wf1[h * _HALF + w * _C2 + c, :_FC1_OUT] = \
                    tp["fc1_w"][:, c * _HP2 * _HP2 + h * _HP2 + w]
    bf1 = np.zeros((1, _FC1_PAD), np.float32)
    bf1[0, :_FC1_OUT] = tp["fc1_b"]

    wf2 = np.zeros((_FC1_PAD, _OUT_PAD), np.float32)
    wf2[:_FC1_OUT, :_FC2_OUT] = tp["fc2_w"].T
    bf2 = np.zeros((1, _OUT_PAD), np.float32)
    bf2[0, :_FC2_OUT] = tp["fc2_b"]

    return {
        "wb1": jnp.asarray(wb1, jnp.bfloat16), "b1": jnp.asarray(b1, jnp.float32),
        "wb2": jnp.asarray(wb2, jnp.bfloat16), "b2": jnp.asarray(b2, jnp.float32),
        "wf1": jnp.asarray(wf1, jnp.bfloat16), "bf1": jnp.asarray(bf1, jnp.float32),
        "wf2": jnp.asarray(wf2, jnp.bfloat16), "bf2": jnp.asarray(bf2, jnp.float32),
    }


def init_torch_params(key, input_channels):
    """Deterministic synthetic weights in PyTorch layouts."""
    ks = jax.random.split(key, 8)

    def u(k, shape, fan_in):
        bound = 1.0 / float(np.sqrt(fan_in))
        return jax.random.uniform(k, shape, jnp.float32, -bound, bound)

    return {
        "conv1_w": u(ks[0], (_C1, input_channels, _K, _K), input_channels * _K * _K),
        "conv1_b": u(ks[1], (_C1,), input_channels * _K * _K),
        "conv2_w": u(ks[2], (_C2, _C1, _K, _K), _C1 * _K * _K),
        "conv2_b": u(ks[3], (_C2,), _C1 * _K * _K),
        "fc1_w": u(ks[4], (_FC1_OUT, 320), 320),
        "fc1_b": u(ks[5], (_FC1_OUT,), 320),
        "fc2_w": u(ks[6], (_FC2_OUT, _FC1_OUT), _FC1_OUT),
        "fc2_b": u(ks[7], (_FC2_OUT,), _FC1_OUT),
    }


# ---------------------------------------------------------------------------
# Forward pass wrappers.
# ---------------------------------------------------------------------------
def cnn_forward_rows(params, x_rows, *, batch_tile=128):
    """Forward from pre-laid-out input: x_rows (B, 28*rw1) bf16 lane-flat rows."""
    B, flat = x_rows.shape
    rw1 = flat // _H_IN
    assert flat == _H_IN * rw1 and rw1 % _HALF == 0
    assert params["wb1"].shape[0] == _K * rw1, "params built for different cin"

    bt = min(_round_up(batch_tile, 8), _round_up(B, 8))
    Bp = _round_up(B, bt)
    if Bp != B:
        x_rows = jnp.pad(x_rows, ((0, Bp - B), (0, 0)))

    out = pl.pallas_call(
        _cnn_fused_kernel,
        out_shape=jax.ShapeDtypeStruct((Bp, _OUT_PAD), jnp.float32),
        grid=(Bp // bt,),
        in_specs=[
            pl.BlockSpec((bt, _H_IN * rw1), lambda i: (i, 0)),
            pl.BlockSpec(params["wb1"].shape, lambda i: (0, 0)),
            pl.BlockSpec(params["b1"].shape, lambda i: (0, 0)),
            pl.BlockSpec(params["wb2"].shape, lambda i: (0, 0)),
            pl.BlockSpec(params["b2"].shape, lambda i: (0, 0)),
            pl.BlockSpec(params["wf1"].shape, lambda i: (0, 0)),
            pl.BlockSpec(params["bf1"].shape, lambda i: (0, 0)),
            pl.BlockSpec(params["wf2"].shape, lambda i: (0, 0)),
            pl.BlockSpec(params["bf2"].shape, lambda i: (0, 0)),
        ],
        out_specs=pl.BlockSpec((bt, _OUT_PAD), lambda i: (i, 0)),
        scratch_shapes=[
            pltpu.VMEM((bt, _HP1 * _HALF), jnp.bfloat16),   # pooled conv1 act
            pltpu.VMEM((bt, _HP2 * _HALF), jnp.bfloat16),   # pooled conv2 act
        ],
        compiler_params=pltpu.CompilerParams(
            dimension_semantics=("parallel",),
            vmem_limit_bytes=48 * 1024 * 1024),
    )(x_rows, params["wb1"], params["b1"], params["wb2"], params["b2"],
      params["wf1"], params["bf1"], params["wf2"], params["bf2"])
    return out[:B, :_FC2_OUT]


def cnn_forward(params, x_nchw, *, batch_tile=128):
    """x_nchw: (B, Cin, 28, 28) float32 -> (B, 10) float32 logits.

    batch_tile=128 is a good default across v5e/v6e/v7x (v6e can use 256); it
    is clamped to the padded batch so small batches run in a single step.
    """
    B, cin, H, W = x_nchw.shape
    assert (H, W) == (_H_IN, _W_IN), "architecture requires 28x28 inputs"
    rw1 = _round_up(_W_IN * cin, _HALF)

    # NCHW -> lane-flat bf16 rows (lane = h*rw1 + w*cin + ci), row-padded to a
    # multiple of 128 lanes so every in-kernel conv LHS slice is lane-aligned.
    # TODO(synk): if a producer can emit this layout (NHWC/bf16) directly, use
    # cnn_forward_rows and skip this relayout pass (the op is input-HBM-bound).
    x = jnp.transpose(x_nchw, (0, 2, 3, 1)).reshape(B, _H_IN, _W_IN * cin)
    x = jnp.pad(x, ((0, 0), (0, 0), (0, rw1 - _W_IN * cin)))
    x = x.reshape(B, _H_IN * rw1).astype(jnp.bfloat16)
    return cnn_forward_rows(params, x, batch_tile=batch_tile)


# ---------------------------------------------------------------------------
# Pure-JAX f32 reference (mirrors the PyTorch forward in eval mode).
# ---------------------------------------------------------------------------
def cnn_reference(torch_params, x_nchw):
    tp = {k: jnp.asarray(v, jnp.float32) for k, v in torch_params.items()}
    dn = ("NCHW", "OIHW", "NCHW")
    hp = jax.lax.Precision.HIGHEST

    def pool2x2(y):
        b, c, h, w = y.shape
        return jnp.max(y.reshape(b, c, h // 2, 2, w // 2, 2), axis=(3, 5))

    y = jax.lax.conv_general_dilated(x_nchw, tp["conv1_w"], (1, 1), "VALID",
                                     dimension_numbers=dn, precision=hp)
    y = y + tp["conv1_b"][None, :, None, None]
    y = jnp.maximum(pool2x2(y), 0.0)
    y = jax.lax.conv_general_dilated(y, tp["conv2_w"], (1, 1), "VALID",
                                     dimension_numbers=dn, precision=hp)
    y = y + tp["conv2_b"][None, :, None, None]
    y = jnp.maximum(pool2x2(y), 0.0)
    y = y.reshape(y.shape[0], -1)                       # == torch .view(-1, 320)
    y = jnp.maximum(jnp.dot(y, tp["fc1_w"].T, precision=hp) + tp["fc1_b"], 0.0)
    return jnp.dot(y, tp["fc2_w"].T, precision=hp) + tp["fc2_b"]


if __name__ == "__main__":
    key = jax.random.PRNGKey(0)
    pkey, xkey = jax.random.split(key)

    input_channels = 4
    batch = 22   # exercises batch padding; second call below exercises a multi-step grid
    x = jax.random.normal(xkey, (batch, input_channels, _H_IN, _W_IN), jnp.float32)

    torch_params = init_torch_params(pkey, input_channels)
    params = prepare_params(torch_params)

    fwd = jax.jit(cnn_forward, static_argnames=("batch_tile",))
    out = jax.block_until_ready(fwd(params, x))                       # default tile
    out_tiled = jax.block_until_ready(fwd(params, x, batch_tile=8))   # 3-step parallel grid

    ref = jax.block_until_ready(cnn_reference(torch_params, x))

    assert out.shape == (batch, _FC2_OUT) and out.dtype == jnp.float32
    np.testing.assert_allclose(np.asarray(out), np.asarray(ref), rtol=5e-2, atol=5e-2)
    np.testing.assert_allclose(np.asarray(out_tiled), np.asarray(out), rtol=1e-4, atol=1e-4)
    print("KERNEL_OK")
</pallas_src>

<mosaic_0001>
module attributes {stable_mosaic.version = 11 : i64} {
  func.func @_cnn_fused_kernel(%arg0: i32, %arg1: memref<24x3584xbf16, #tpu.memory_space<vmem>>, %arg2: memref<640x256xbf16, #tpu.memory_space<vmem>>, %arg3: memref<1x128xf32, #tpu.memory_space<vmem>>, %arg4: memref<640x256xbf16, #tpu.memory_space<vmem>>, %arg5: memref<1x128xf32, #tpu.memory_space<vmem>>, %arg6: memref<512x128xbf16, #tpu.memory_space<vmem>>, %arg7: memref<1x128xf32, #tpu.memory_space<vmem>>, %arg8: memref<128x128xbf16, #tpu.memory_space<vmem>>, %arg9: memref<1x128xf32, #tpu.memory_space<vmem>>, %arg10: memref<24x128xf32, #tpu.memory_space<vmem>>, %arg11: memref<24x1536xbf16, #tpu.memory_space<vmem>>, %arg12: memref<24x512xbf16, #tpu.memory_space<vmem>>) attributes {dimension_semantics = [#tpu.dimension_semantics<parallel>], iteration_bounds = array<i64: 1>, scalar_prefetch = 0 : i64, scratch_operands = 2 : i64, tpu.core_type = #tpu.core_type<tc>, window_params = [{transform_indices = @transform_0, window_bounds = array<i64: 24, 3584>}, {pipeline_mode = #tpu.pipeline_mode<synchronous>, transform_indices = @transform_1, window_bounds = array<i64: 640, 256>}, {pipeline_mode = #tpu.pipeline_mode<synchronous>, transform_indices = @transform_2, window_bounds = array<i64: 1, 128>}, {pipeline_mode = #tpu.pipeline_mode<synchronous>, transform_indices = @transform_3, window_bounds = array<i64: 640, 256>}, {pipeline_mode = #tpu.pipeline_mode<synchronous>, transform_indices = @transform_4, window_bounds = array<i64: 1, 128>}, {pipeline_mode = #tpu.pipeline_mode<synchronous>, transform_indices = @transform_5, window_bounds = array<i64: 512, 128>}, {pipeline_mode = #tpu.pipeline_mode<synchronous>, transform_indices = @transform_6, window_bounds = array<i64: 1, 128>}, {pipeline_mode = #tpu.pipeline_mode<synchronous>, transform_indices = @transform_7, window_bounds = array<i64: 128, 128>}, {pipeline_mode = #tpu.pipeline_mode<synchronous>, transform_indices = @transform_8, window_bounds = array<i64: 1, 128>}, {transform_indices = @transform_9, window_bounds = array<i64: 24, 128>}]} {
    %c0 = arith.constant 0 : index
    %c0_0 = arith.constant 0 : index
    %0 = vector.load %arg2[%c0, %c0_0] : memref<640x256xbf16, #tpu.memory_space<vmem>>, vector<640x256xbf16>
    %c0_1 = arith.constant 0 : index
    %c0_2 = arith.constant 0 : index
    %1 = vector.load %arg4[%c0_1, %c0_2] : memref<640x256xbf16, #tpu.memory_space<vmem>>, vector<640x256xbf16>
    %c0_3 = arith.constant 0 : index
    %c0_4 = arith.constant 0 : index
    %2 = vector.load %arg1[%c0_3, %c0_4] : memref<24x3584xbf16, #tpu.memory_space<vmem>>, vector<24x640xbf16>
    %cst = arith.constant dense<0.000000e+00> : vector<24x256xf32>
    %3 = tpu.matmul %2, %0, %cst {dimension_numbers = #tpu.dot_dimension_numbers<[1], [0], [0], [1], [0, 0, 1, 1], [], []>} : vector<24x640xbf16>, vector<640x256xbf16>, vector<24x256xf32> -> vector<24x256xf32>
    %c0_5 = arith.constant 0 : index
    %c128 = arith.constant 128 : index
    %4 = vector.load %arg1[%c0_5, %c128] : memref<24x3584xbf16, #tpu.memory_space<vmem>>, vector<24x640xbf16>
    %cst_6 = arith.constant dense<0.000000e+00> : vector<24x256xf32>
    %5 = tpu.matmul %4, %0, %cst_6 {dimension_numbers = #tpu.dot_dimension_numbers<[1], [0], [0], [1], [0, 0, 1, 1], [], []>} : vector<24x640xbf16>, vector<640x256xbf16>, vector<24x256xf32> -> vector<24x256xf32>
    %6 = arith.maximumf %3, %5 : vector<24x256xf32>
    %7 = vector.extract_strided_slice %6 {offsets = [0, 0], sizes = [24, 128], strides = [1, 1]} : vector<24x256xf32> to vector<24x128xf32>
    %8 = vector.extract_strided_slice %6 {offsets = [0, 128], sizes = [24, 128], strides = [1, 1]} : vector<24x256xf32> to vector<24x128xf32>
    %9 = arith.maximumf %7, %8 : vector<24x128xf32>
    %c0_7 = arith.constant 0 : index
    %c0_8 = arith.constant 0 : index
    %10 = vector.load %arg3[%c0_7, %c0_8] : memref<1x128xf32, #tpu.memory_space<vmem>>, vector<1x128xf32>
    %11 = vector.broadcast %10 : vector<1x128xf32> to vector<24x128xf32>
    %12 = arith.addf %9, %11 : vector<24x128xf32>
    %cst_9 = arith.constant 0.000000e+00 : f32
    %13 = vector.broadcast %cst_9 : f32 to vector<24x128xf32>
    %14 = arith.maximumf %12, %13 : vector<24x128xf32>
    %15 = arith.truncf %14 : vector<24x128xf32> to vector<24x128xbf16>
    %c0_10 = arith.constant 0 : index
    %c0_11 = arith.constant 0 : index
    %16 = vector.load %arg11[%c0_10, %c0_11] : memref<24x1536xbf16, #tpu.memory_space<vmem>>, vector<24x128xbf16>
    tpu.vector_store %arg11[%c0_10, %c0_11], %15 {strides = array<i32>} : memref<24x1536xbf16, #tpu.memory_space<vmem>>, vector<24x128xbf16>,
    %c0_12 = arith.constant 0 : index
    %c256 = arith.constant 256 : index
    %17 = vector.load %arg1[%c0_12, %c256] : memref<24x3584xbf16, #tpu.memory_space<vmem>>, vector<24x640xbf16>
    %cst_13 = arith.constant dense<0.000000e+00> : vector<24x256xf32>
    %18 = tpu.matmul %17, %0, %cst_13 {dimension_numbers = #tpu.dot_dimension_numbers<[1], [0], [0], [1], [0, 0, 1, 1], [], []>} : vector<24x640xbf16>, vector<640x256xbf16>, vector<24x256xf32> -> vector<24x256xf32>
    %c0_14 = arith.constant 0 : index
    %c384 = arith.constant 384 : index
    %19 = vector.load %arg1[%c0_14, %c384] : memref<24x3584xbf16, #tpu.memory_space<vmem>>, vector<24x640xbf16>
    %cst_15 = arith.constant dense<0.000000e+00> : vector<24x256xf32>
    %20 = tpu.matmul %19, %0, %cst_15 {dimension_numbers = #tpu.dot_dimension_numbers<[1], [0], [0], [1], [0, 0, 1, 1], [], []>} : vector<24x640xbf16>, vector<640x256xbf16>, vector<24x256xf32> -> vector<24x256xf32>
    %21 = arith.maximumf %18, %20 : vector<24x256xf32>
    %22 = vector.extract_strided_slice %21 {offsets = [0, 0], sizes = [24, 128], strides = [1, 1]} : vector<24x256xf32> to vector<24x128xf32>
    %23 = vector.extract_strided_slice %21 {offsets = [0, 128], sizes = [24, 128], strides = [1, 1]} : vector<24x256xf32> to vector<24x128xf32>
    %24 = arith.maximumf %22, %23 : vector<24x128xf32>
    %c0_16 = arith.constant 0 : index
    %c0_17 = arith.constant 0 : index
    %25 = vector.load %arg3[%c0_16, %c0_17] : memref<1x128xf32, #tpu.memory_space<vmem>>, vector<1x128xf32>
    %26 = vector.broadcast %25 : vector<1x128xf32> to vector<24x128xf32>
    %27 = arith.addf %24, %26 : vector<24x128xf32>
    %cst_18 = arith.constant 0.000000e+00 : f32
    %28 = vector.broadcast %cst_18 : f32 to vector<24x128xf32>
    %29 = arith.maximumf %27, %28 : vector<24x128xf32>
    %30 = arith.truncf %29 : vector<24x128xf32> to vector<24x128xbf16>
    %c0_19 = arith.constant 0 : index
    %c128_20 = arith.constant 128 : index
    %31 = vector.load %arg11[%c0_19, %c128_20] : memref<24x1536xbf16, #tpu.memory_space<vmem>>, vector<24x128xbf16>
    tpu.vector_store %arg11[%c0_19, %c128_20], %30 {strides = array<i32>} : memref<24x1536xbf16, #tpu.memory_space<vmem>>, vector<24x128xbf16>,
    %c0_21 = arith.constant 0 : index
    %c512 = arith.constant 512 : index
    %32 = vector.load %arg1[%c0_21, %c512] : memref<24x3584xbf16, #tpu.memory_space<vmem>>, vector<24x640xbf16>
    %cst_22 = arith.constant dense<0.000000e+00> : vector<24x256xf32>
    %33 = tpu.matmul %32, %0, %cst_22 {dimension_numbers = #tpu.dot_dimension_numbers<[1], [0], [0], [1], [0, 0, 1, 1], [], []>} : vector<24x640xbf16>, vector<640x256xbf16>, vector<24x256xf32> -> vector<24x256xf32>
    %c0_23 = arith.constant 0 : index
    %c640 = arith.constant 640 : index
    %34 = vector.load %arg1[%c0_23, %c640] : memref<24x3584xbf16, #tpu.memory_space<vmem>>, vector<24x640xbf16>
    %cst_24 = arith.constant dense<0.000000e+00> : vector<24x256xf32>
    %35 = tpu.matmul %34, %0, %cst_24 {dimension_numbers = #tpu.dot_dimension_numbers<[1], [0], [0], [1], [0, 0, 1, 1], [], []>} : vector<24x640xbf16>, vector<640x256xbf16>, vector<24x256xf32> -> vector<24x256xf32>
    %36 = arith.maximumf %33, %35 : vector<24x256xf32>
    %37 = vector.extract_strided_slice %36 {offsets = [0, 0], sizes = [24, 128], strides = [1, 1]} : vector<24x256xf32> to vector<24x128xf32>
    %38 = vector.extract_strided_slice %36 {offsets = [0, 128], sizes = [24, 128], strides = [1, 1]} : vector<24x256xf32> to vector<24x128xf32>
    %39 = arith.maximumf %37, %38 : vector<24x128xf32>
    %c0_25 = arith.constant 0 : index
    %c0_26 = arith.constant 0 : index
    %40 = vector.load %arg3[%c0_25, %c0_26] : memref<1x128xf32, #tpu.memory_space<vmem>>, vector<1x128xf32>
    %41 = vector.broadcast %40 : vector<1x128xf32> to vector<24x128xf32>
    %42 = arith.addf %39, %41 : vector<24x128xf32>
    %cst_27 = arith.constant 0.000000e+00 : f32
    %43 = vector.broadcast %cst_27 : f32 to vector<24x128xf32>
    %44 = arith.maximumf %42, %43 : vector<24x128xf32>
    %45 = arith.truncf %44 : vector<24x128xf32> to vector<24x128xbf16>
    %c0_28 = arith.constant 0 : index
    %c256_29 = arith.constant 256 : index
    %46 = vector.load %arg11[%c0_28, %c256_29] : memref<24x1536xbf16, #tpu.memory_space<vmem>>, vector<24x128xbf16>
    tpu.vector_store %arg11[%c0_28, %c256_29], %45 {strides = array<i32>} : memref<24x1536xbf16, #tpu.memory_space<vmem>>, vector<24x128xbf16>,
    %c0_30 = arith.constant 0 : index
    %c768 = arith.constant 768 : index
    %47 = vector.load %arg1[%c0_30, %c768] : memref<24x3584xbf16, #tpu.memory_space<vmem>>, vector<24x640xbf16>
    %cst_31 = arith.constant dense<0.000000e+00> : vector<24x256xf32>
    %48 = tpu.matmul %47, %0, %cst_31 {dimension_numbers = #tpu.dot_dimension_numbers<[1], [0], [0], [1], [0, 0, 1, 1], [], []>} : vector<24x640xbf16>, vector<640x256xbf16>, vector<24x256xf32> -> vector<24x256xf32>
    %c0_32 = arith.constant 0 : index
    %c896 = arith.constant 896 : index
    %49 = vector.load %arg1[%c0_32, %c896] : memref<24x3584xbf16, #tpu.memory_space<vmem>>, vector<24x640xbf16>
    %cst_33 = arith.constant dense<0.000000e+00> : vector<24x256xf32>
    %50 = tpu.matmul %49, %0, %cst_33 {dimension_numbers = #tpu.dot_dimension_numbers<[1], [0], [0], [1], [0, 0, 1, 1], [], []>} : vector<24x640xbf16>, vector<640x256xbf16>, vector<24x256xf32> -> vector<24x256xf32>
    %51 = arith.maximumf %48, %50 : vector<24x256xf32>
    %52 = vector.extract_strided_slice %51 {offsets = [0, 0], sizes = [24, 128], strides = [1, 1]} : vector<24x256xf32> to vector<24x128xf32>
    %53 = vector.extract_strided_slice %51 {offsets = [0, 128], sizes = [24, 128], strides = [1, 1]} : vector<24x256xf32> to vector<24x128xf32>
    %54 = arith.maximumf %52, %53 : vector<24x128xf32>
    %c0_34 = arith.constant 0 : index
    %c0_35 = arith.constant 0 : index
    %55 = vector.load %arg3[%c0_34, %c0_35] : memref<1x128xf32, #tpu.memory_space<vmem>>, vector<1x128xf32>
    %56 = vector.broadcast %55 : vector<1x128xf32> to vector<24x128xf32>
    %57 = arith.addf %54, %56 : vector<24x128xf32>
    %cst_36 = arith.constant 0.000000e+00 : f32
    %58 = vector.broadcast %cst_36 : f32 to vector<24x128xf32>
    %59 = arith.maximumf %57, %58 : vector<24x128xf32>
    %60 = arith.truncf %59 : vector<24x128xf32> to vector<24x128xbf16>
    %c0_37 = arith.constant 0 : index
    %c384_38 = arith.constant 384 : index
    %61 = vector.load %arg11[%c0_37, %c384_38] : memref<24x1536xbf16, #tpu.memory_space<vmem>>, vector<24x128xbf16>
    tpu.vector_store %arg11[%c0_37, %c384_38], %60 {strides = array<i32>} : memref<24x1536xbf16, #tpu.memory_space<vmem>>, vector<24x128xbf16>,
    %c0_39 = arith.constant 0 : index
    %c1024 = arith.constant 1024 : index
    %62 = vector.load %arg1[%c0_39, %c1024] : memref<24x3584xbf16, #tpu.memory_space<vmem>>, vector<24x640xbf16>
    %cst_40 = arith.constant dense<0.000000e+00> : vector<24x256xf32>
    %63 = tpu.matmul %62, %0, %cst_40 {dimension_numbers = #tpu.dot_dimension_numbers<[1], [0], [0], [1], [0, 0, 1, 1], [], []>} : vector<24x640xbf16>, vector<640x256xbf16>, vector<24x256xf32> -> vector<24x256xf32>
    %c0_41 = arith.constant 0 : index
    %c1152 = arith.constant 1152 : index
    %64 = vector.load %arg1[%c0_41, %c1152] : memref<24x3584xbf16, #tpu.memory_space<vmem>>, vector<24x640xbf16>
    %cst_42 = arith.constant dense<0.000000e+00> : vector<24x256xf32>
    %65 = tpu.matmul %64, %0, %cst_42 {dimension_numbers = #tpu.dot_dimension_numbers<[1], [0], [0], [1], [0, 0, 1, 1], [], []>} : vector<24x640xbf16>, vector<640x256xbf16>, vector<24x256xf32> -> vector<24x256xf32>
    %66 = arith.maximumf %63, %65 : vector<24x256xf32>
    %67 = vector.extract_strided_slice %66 {offsets = [0, 0], sizes = [24, 128], strides = [1, 1]} : vector<24x256xf32> to vector<24x128xf32>
    %68 = vector.extract_strided_slice %66 {offsets = [0, 128], sizes = [24, 128], strides = [1, 1]} : vector<24x256xf32> to vector<24x128xf32>
    %69 = arith.maximumf %67, %68 : vector<24x128xf32>
    %c0_43 = arith.constant 0 : index
    %c0_44 = arith.constant 0 : index
    %70 = vector.load %arg3[%c0_43, %c0_44] : memref<1x128xf32, #tpu.memory_space<vmem>>, vector<1x128xf32>
    %71 = vector.broadcast %70 : vector<1x128xf32> to vector<24x128xf32>
    %72 = arith.addf %69, %71 : vector<24x128xf32>
    %cst_45 = arith.constant 0.000000e+00 : f32
    %73 = vector.broadcast %cst_45 : f32 to vector<24x128xf32>
    %74 = arith.maximumf %72, %73 : vector<24x128xf32>
    %75 = arith.truncf %74 : vector<24x128xf32> to vector<24x128xbf16>
    %c0_46 = arith.constant 0 : index
    %c512_47 = arith.constant 512 : index
    %76 = vector.load %arg11[%c0_46, %c512_47] : memref<24x1536xbf16, #tpu.memory_space<vmem>>, vector<24x128xbf16>
    tpu.vector_store %arg11[%c0_46, %c512_47], %75 {strides = array<i32>} : memref<24x1536xbf16, #tpu.memory_space<vmem>>, vector<24x128xbf16>,
    %c0_48 = arith.constant 0 : index
    %c1280 = arith.constant 1280 : index
    %77 = vector.load %arg1[%c0_48, %c1280] : memref<24x3584xbf16, #tpu.memory_space<vmem>>, vector<24x640xbf16>
    %cst_49 = arith.constant dense<0.000000e+00> : vector<24x256xf32>
    %78 = tpu.matmul %77, %0, %cst_49 {dimension_numbers = #tpu.dot_dimension_numbers<[1], [0], [0], [1], [0, 0, 1, 1], [], []>} : vector<24x640xbf16>, vector<640x256xbf16>, vector<24x256xf32> -> vector<24x256xf32>
    %c0_50 = arith.constant 0 : index
    %c1408 = arith.constant 1408 : index
    %79 = vector.load %arg1[%c0_50, %c1408] : memref<24x3584xbf16, #tpu.memory_space<vmem>>, vector<24x640xbf16>
    %cst_51 = arith.constant dense<0.000000e+00> : vector<24x256xf32>
    %80 = tpu.matmul %79, %0, %cst_51 {dimension_numbers = #tpu.dot_dimension_numbers<[1], [0], [0], [1], [0, 0, 1, 1], [], []>} : vector<24x640xbf16>, vector<640x256xbf16>, vector<24x256xf32> -> vector<24x256xf32>
    %81 = arith.maximumf %78, %80 : vector<24x256xf32>
    %82 = vector.extract_strided_slice %81 {offsets = [0, 0], sizes = [24, 128], strides = [1, 1]} : vector<24x256xf32> to vector<24x128xf32>
    %83 = vector.extract_strided_slice %81 {offsets = [0, 128], sizes = [24, 128], strides = [1, 1]} : vector<24x256xf32> to vector<24x128xf32>
    %84 = arith.maximumf %82, %83 : vector<24x128xf32>
    %c0_52 = arith.constant 0 : index
    %c0_53 = arith.constant 0 : index
    %85 = vector.load %arg3[%c0_52, %c0_53] : memref<1x128xf32, #tpu.memory_space<vmem>>, vector<1x128xf32>
    %86 = vector.broadcast %85 : vector<1x128xf32> to vector<24x128xf32>
    %87 = arith.addf %84, %86 : vector<24x128xf32>
    %cst_54 = arith.constant 0.000000e+00 : f32
    %88 = vector.broadcast %cst_54 : f32 to vector<24x128xf32>
    %89 = arith.maximumf %87, %88 : vector<24x128xf32>
    %90 = arith.truncf %89 : vector<24x128xf32> to vector<24x128xbf16>
    %c0_55 = arith.constant 0 : index
    %c640_56 = arith.constant 640 : index
    %91 = vector.load %arg11[%c0_55, %c640_56] : memref<24x1536xbf16, #tpu.memory_space<vmem>>, vector<24x128xbf16>
    tpu.vector_store %arg11[%c0_55, %c640_56], %90 {strides = array<i32>} : memref<24x1536xbf16, #tpu.memory_space<vmem>>, vector<24x128xbf16>,
    %c0_57 = arith.constant 0 : index
    %c1536 = arith.constant 1536 : index
    %92 = vector.load %arg1[%c0_57, %c1536] : memref<24x3584xbf16, #tpu.memory_space<vmem>>, vector<24x640xbf16>
    %cst_58 = arith.constant dense<0.000000e+00> : vector<24x256xf32>
    %93 = tpu.matmul %92, %0, %cst_58 {dimension_numbers = #tpu.dot_dimension_numbers<[1], [0], [0], [1], [0, 0, 1, 1], [], []>} : vector<24x640xbf16>, vector<640x256xbf16>, vector<24x256xf32> -> vector<24x256xf32>
    %c0_59 = arith.constant 0 : index
    %c1664 = arith.constant 1664 : index
    %94 = vector.load %arg1[%c0_59, %c1664] : memref<24x3584xbf16, #tpu.memory_space<vmem>>, vector<24x640xbf16>
    %cst_60 = arith.constant dense<0.000000e+00> : vector<24x256xf32>
    %95 = tpu.matmul %94, %0, %cst_60 {dimension_numbers = #tpu.dot_dimension_numbers<[1], [0], [0], [1], [0, 0, 1, 1], [], []>} : vector<24x640xbf16>, vector<640x256xbf16>, vector<24x256xf32> -> vector<24x256xf32>
    %96 = arith.maximumf %93, %95 : vector<24x256xf32>
    %97 = vector.extract_strided_slice %96 {offsets = [0, 0], sizes = [24, 128], strides = [1, 1]} : vector<24x256xf32> to vector<24x128xf32>
    %98 = vector.extract_strided_slice %96 {offsets = [0, 128], sizes = [24, 128], strides = [1, 1]} : vector<24x256xf32> to vector<24x128xf32>
    %99 = arith.maximumf %97, %98 : vector<24x128xf32>
    %c0_61 = arith.constant 0 : index
    %c0_62 = arith.constant 0 : index
    %100 = vector.load %arg3[%c0_61, %c0_62] : memref<1x128xf32, #tpu.memory_space<vmem>>, vector<1x128xf32>
    %101 = vector.broadcast %100 : vector<1x128xf32> to vector<24x128xf32>
    %102 = arith.addf %99, %101 : vector<24x128xf32>
    %cst_63 = arith.constant 0.000000e+00 : f32
    %103 = vector.broadcast %cst_63 : f32 to vector<24x128xf32>
    %104 = arith.maximumf %102, %103 : vector<24x128xf32>
    %105 = arith.truncf %104 : vector<24x128xf32> to vector<24x128xbf16>
    %c0_64 = arith.constant 0 : index
    %c768_65 = arith.constant 768 : index
    %106 = vector.load %arg11[%c0_64, %c768_65] : memref<24x1536xbf16, #tpu.memory_space<vmem>>, vector<24x128xbf16>
    tpu.vector_store %arg11[%c0_64, %c768_65], %105 {strides = array<i32>} : memref<24x1536xbf16, #tpu.memory_space<vmem>>, vector<24x128xbf16>,
    %c0_66 = arith.constant 0 : index
    %c1792 = arith.constant 1792 : index
    %107 = vector.load %arg1[%c0_66, %c1792] : memref<24x3584xbf16, #tpu.memory_space<vmem>>, vector<24x640xbf16>
    %cst_67 = arith.constant dense<0.000000e+00> : vector<24x256xf32>
    %108 = tpu.matmul %107, %0, %cst_67 {dimension_numbers = #tpu.dot_dimension_numbers<[1], [0], [0], [1], [0, 0, 1, 1], [], []>} : vector<24x640xbf16>, vector<640x256xbf16>, vector<24x256xf32> -> vector<24x256xf32>
    %c0_68 = arith.constant 0 : index
    %c1920 = arith.constant 1920 : index
    %109 = vector.load %arg1[%c0_68, %c1920] : memref<24x3584xbf16, #tpu.memory_space<vmem>>, vector<24x640xbf16>
    %cst_69 = arith.constant dense<0.000000e+00> : vector<24x256xf32>
    %110 = tpu.matmul %109, %0, %cst_69 {dimension_numbers = #tpu.dot_dimension_numbers<[1], [0], [0], [1], [0, 0, 1, 1], [], []>} : vector<24x640xbf16>, vector<640x256xbf16>, vector<24x256xf32> -> vector<24x256xf32>
    %111 = arith.maximumf %108, %110 : vector<24x256xf32>
    %112 = vector.extract_strided_slice %111 {offsets = [0, 0], sizes = [24, 128], strides = [1, 1]} : vector<24x256xf32> to vector<24x128xf32>
    %113 = vector.extract_strided_slice %111 {offsets = [0, 128], sizes = [24, 128], strides = [1, 1]} : vector<24x256xf32> to vector<24x128xf32>
    %114 = arith.maximumf %112, %113 : vector<24x128xf32>
    %c0_70 = arith.constant 0 : index
    %c0_71 = arith.constant 0 : index
    %115 = vector.load %arg3[%c0_70, %c0_71] : memref<1x128xf32, #tpu.memory_space<vmem>>, vector<1x128xf32>
    %116 = vector.broadcast %115 : vector<1x128xf32> to vector<24x128xf32>
    %117 = arith.addf %114, %116 : vector<24x128xf32>
    %cst_72 = arith.constant 0.000000e+00 : f32
    %118 = vector.broadcast %cst_72 : f32 to vector<24x128xf32>
    %119 = arith.maximumf %117, %118 : vector<24x128xf32>
    %120 = arith.truncf %119 : vector<24x128xf32> to vector<24x128xbf16>
    %c0_73 = arith.constant 0 : index
    %c896_74 = arith.constant 896 : index
    %121 = vector.load %arg11[%c0_73, %c896_74] : memref<24x1536xbf16, #tpu.memory_space<vmem>>, vector<24x128xbf16>
    tpu.vector_store %arg11[%c0_73, %c896_74], %120 {strides = array<i32>} : memref<24x1536xbf16, #tpu.memory_space<vmem>>, vector<24x128xbf16>,
    %c0_75 = arith.constant 0 : index
    %c2048 = arith.constant 2048 : index
    %122 = vector.load %arg1[%c0_75, %c2048] : memref<24x3584xbf16, #tpu.memory_space<vmem>>, vector<24x640xbf16>
    %cst_76 = arith.constant dense<0.000000e+00> : vector<24x256xf32>
    %123 = tpu.matmul %122, %0, %cst_76 {dimension_numbers = #tpu.dot_dimension_numbers<[1], [0], [0], [1], [0, 0, 1, 1], [], []>} : vector<24x640xbf16>, vector<640x256xbf16>, vector<24x256xf32> -> vector<24x256xf32>
    %c0_77 = arith.constant 0 : index
    %c2176 = arith.constant 2176 : index
    %124 = vector.load %arg1[%c0_77, %c2176] : memref<24x3584xbf16, #tpu.memory_space<vmem>>, vector<24x640xbf16>
    %cst_78 = arith.constant dense<0.000000e+00> : vector<24x256xf32>
    %125 = tpu.matmul %124, %0, %cst_78 {dimension_numbers = #tpu.dot_dimension_numbers<[1], [0], [0], [1], [0, 0, 1, 1], [], []>} : vector<24x640xbf16>, vector<640x256xbf16>, vector<24x256xf32> -> vector<24x256xf32>
    %126 = arith.maximumf %123, %125 : vector<24x256xf32>
    %127 = vector.extract_strided_slice %126 {offsets = [0, 0], sizes = [24, 128], strides = [1, 1]} : vector<24x256xf32> to vector<24x128xf32>
    %128 = vector.extract_strided_slice %126 {offsets = [0, 128], sizes = [24, 128], strides = [1, 1]} : vector<24x256xf32> to vector<24x128xf32>
    %129 = arith.maximumf %127, %128 : vector<24x128xf32>
    %c0_79 = arith.constant 0 : index
    %c0_80 = arith.constant 0 : index
    %130 = vector.load %arg3[%c0_79, %c0_80] : memref<1x128xf32, #tpu.memory_space<vmem>>, vector<1x128xf32>
    %131 = vector.broadcast %130 : vector<1x128xf32> to vector<24x128xf32>
    %132 = arith.addf %129, %131 : vector<24x128xf32>
    %cst_81 = arith.constant 0.000000e+00 : f32
    %133 = vector.broadcast %cst_81 : f32 to vector<24x128xf32>
    %134 = arith.maximumf %132, %133 : vector<24x128xf32>
    %135 = arith.truncf %134 : vector<24x128xf32> to vector<24x128xbf16>
    %c0_82 = arith.constant 0 : index
    %c1024_83 = arith.constant 1024 : index
    %136 = vector.load %arg11[%c0_82, %c1024_83] : memref<24x1536xbf16, #tpu.memory_space<vmem>>, vector<24x128xbf16>
    tpu.vector_store %arg11[%c0_82, %c1024_83], %135 {strides = array<i32>} : memref<24x1536xbf16, #tpu.memory_space<vmem>>, vector<24x128xbf16>,
    %c0_84 = arith.constant 0 : index
    %c2304 = arith.constant 2304 : index
    %137 = vector.load %arg1[%c0_84, %c2304] : memref<24x3584xbf16, #tpu.memory_space<vmem>>, vector<24x640xbf16>
    %cst_85 = arith.constant dense<0.000000e+00> : vector<24x256xf32>
    %138 = tpu.matmul %137, %0, %cst_85 {dimension_numbers = #tpu.dot_dimension_numbers<[1], [0], [0], [1], [0, 0, 1, 1], [], []>} : vector<24x640xbf16>, vector<640x256xbf16>, vector<24x256xf32> -> vector<24x256xf32>
    %c0_86 = arith.constant 0 : index
    %c2432 = arith.constant 2432 : index
    %139 = vector.load %arg1[%c0_86, %c2432] : memref<24x3584xbf16, #tpu.memory_space<vmem>>, vector<24x640xbf16>
    %cst_87 = arith.constant dense<0.000000e+00> : vector<24x256xf32>
    %140 = tpu.matmul %139, %0, %cst_87 {dimension_numbers = #tpu.dot_dimension_numbers<[1], [0], [0], [1], [0, 0, 1, 1], [], []>} : vector<24x640xbf16>, vector<640x256xbf16>, vector<24x256xf32> -> vector<24x256xf32>
    %141 = arith.maximumf %138, %140 : vector<24x256xf32>
    %142 = vector.extract_strided_slice %141 {offsets = [0, 0], sizes = [24, 128], strides = [1, 1]} : vector<24x256xf32> to vector<24x128xf32>
    %143 = vector.extract_strided_slice %141 {offsets = [0, 128], sizes = [24, 128], strides = [1, 1]} : vector<24x256xf32> to vector<24x128xf32>
    %144 = arith.maximumf %142, %143 : vector<24x128xf32>
    %c0_88 = arith.constant 0 : index
    %c0_89 = arith.constant 0 : index
    %145 = vector.load %arg3[%c0_88, %c0_89] : memref<1x128xf32, #tpu.memory_space<vmem>>, vector<1x128xf32>
    %146 = vector.broadcast %145 : vector<1x128xf32> to vector<24x128xf32>
    %147 = arith.addf %144, %146 : vector<24x128xf32>
    %cst_90 = arith.constant 0.000000e+00 : f32
    %148 = vector.broadcast %cst_90 : f32 to vector<24x128xf32>
    %149 = arith.maximumf %147, %148 : vector<24x128xf32>
    %150 = arith.truncf %149 : vector<24x128xf32> to vector<24x128xbf16>
    %c0_91 = arith.constant 0 : index
    %c1152_92 = arith.constant 1152 : index
    %151 = vector.load %arg11[%c0_91, %c1152_92] : memref<24x1536xbf16, #tpu.memory_space<vmem>>, vector<24x128xbf16>
    tpu.vector_store %arg11[%c0_91, %c1152_92], %150 {strides = array<i32>} : memref<24x1536xbf16, #tpu.memory_space<vmem>>, vector<24x128xbf16>,
    %c0_93 = arith.constant 0 : index
    %c2560 = arith.constant 2560 : index
    %152 = vector.load %arg1[%c0_93, %c2560] : memref<24x3584xbf16, #tpu.memory_space<vmem>>, vector<24x640xbf16>
    %cst_94 = arith.constant dense<0.000000e+00> : vector<24x256xf32>
    %153 = tpu.matmul %152, %0, %cst_94 {dimension_numbers = #tpu.dot_dimension_numbers<[1], [0], [0], [1], [0, 0, 1, 1], [], []>} : vector<24x640xbf16>, vector<640x256xbf16>, vector<24x256xf32> -> vector<24x256xf32>
    %c0_95 = arith.constant 0 : index
    %c2688 = arith.constant 2688 : index
    %154 = vector.load %arg1[%c0_95, %c2688] : memref<24x3584xbf16, #tpu.memory_space<vmem>>, vector<24x640xbf16>
    %cst_96 = arith.constant dense<0.000000e+00> : vector<24x256xf32>
    %155 = tpu.matmul %154, %0, %cst_96 {dimension_numbers = #tpu.dot_dimension_numbers<[1], [0], [0], [1], [0, 0, 1, 1], [], []>} : vector<24x640xbf16>, vector<640x256xbf16>, vector<24x256xf32> -> vector<24x256xf32>
    %156 = arith.maximumf %153, %155 : vector<24x256xf32>
    %157 = vector.extract_strided_slice %156 {offsets = [0, 0], sizes = [24, 128], strides = [1, 1]} : vector<24x256xf32> to vector<24x128xf32>
    %158 = vector.extract_strided_slice %156 {offsets = [0, 128], sizes = [24, 128], strides = [1, 1]} : vector<24x256xf32> to vector<24x128xf32>
    %159 = arith.maximumf %157, %158 : vector<24x128xf32>
    %c0_97 = arith.constant 0 : index
    %c0_98 = arith.constant 0 : index
    %160 = vector.load %arg3[%c0_97, %c0_98] : memref<1x128xf32, #tpu.memory_space<vmem>>, vector<1x128xf32>
    %161 = vector.broadcast %160 : vector<1x128xf32> to vector<24x128xf32>
    %162 = arith.addf %159, %161 : vector<24x128xf32>
    %cst_99 = arith.constant 0.000000e+00 : f32
    %163 = vector.broadcast %cst_99 : f32 to vector<24x128xf32>
    %164 = arith.maximumf %162, %163 : vector<24x128xf32>
    %165 = arith.truncf %164 : vector<24x128xf32> to vector<24x128xbf16>
    %c0_100 = arith.constant 0 : index
    %c1280_101 = arith.constant 1280 : index
    %166 = vector.load %arg11[%c0_100, %c1280_101] : memref<24x1536xbf16, #tpu.memory_space<vmem>>, vector<24x128xbf16>
    tpu.vector_store %arg11[%c0_100, %c1280_101], %165 {strides = array<i32>} : memref<24x1536xbf16, #tpu.memory_space<vmem>>, vector<24x128xbf16>,
    %c0_102 = arith.constant 0 : index
    %c2816 = arith.constant 2816 : index
    %167 = vector.load %arg1[%c0_102, %c2816] : memref<24x3584xbf16, #tpu.memory_space<vmem>>, vector<24x640xbf16>
    %cst_103 = arith.constant dense<0.000000e+00> : vector<24x256xf32>
    %168 = tpu.matmul %167, %0, %cst_103 {dimension_numbers = #tpu.dot_dimension_numbers<[1], [0], [0], [1], [0, 0, 1, 1], [], []>} : vector<24x640xbf16>, vector<640x256xbf16>, vector<24x256xf32> -> vector<24x256xf32>
    %c0_104 = arith.constant 0 : index
    %c2944 = arith.constant 2944 : index
    %169 = vector.load %arg1[%c0_104, %c2944] : memref<24x3584xbf16, #tpu.memory_space<vmem>>, vector<24x640xbf16>
    %cst_105 = arith.constant dense<0.000000e+00> : vector<24x256xf32>
    %170 = tpu.matmul %169, %0, %cst_105 {dimension_numbers = #tpu.dot_dimension_numbers<[1], [0], [0], [1], [0, 0, 1, 1], [], []>} : vector<24x640xbf16>, vector<640x256xbf16>, vector<24x256xf32> -> vector<24x256xf32>
    %171 = arith.maximumf %168, %170 : vector<24x256xf32>
    %172 = vector.extract_strided_slice %171 {offsets = [0, 0], sizes = [24, 128], strides = [1, 1]} : vector<24x256xf32> to vector<24x128xf32>
    %173 = vector.extract_strided_slice %171 {offsets = [0, 128], sizes = [24, 128], strides = [1, 1]} : vector<24x256xf32> to vector<24x128xf32>
    %174 = arith.maximumf %172, %173 : vector<24x128xf32>
    %c0_106 = arith.constant 0 : index
    %c0_107 = arith.constant 0 : index
    %175 = vector.load %arg3[%c0_106, %c0_107] : memref<1x128xf32, #tpu.memory_space<vmem>>, vector<1x128xf32>
    %176 = vector.broadcast %175 : vector<1x128xf32> to vector<24x128xf32>
    %177 = arith.addf %174, %176 : vector<24x128xf32>
    %cst_108 = arith.constant 0.000000e+00 : f32
    %178 = vector.broadcast %cst_108 : f32 to vector<24x128xf32>
    %179 = arith.maximumf %177, %178 : vector<24x128xf32>
    %180 = arith.truncf %179 : vector<24x128xf32> to vector<24x128xbf16>
    %c0_109 = arith.constant 0 : index
    %c1408_110 = arith.constant 1408 : index
    %181 = vector.load %arg11[%c0_109, %c1408_110] : memref<24x1536xbf16, #tpu.memory_space<vmem>>, vector<24x128xbf16>
    tpu.vector_store %arg11[%c0_109, %c1408_110], %180 {strides = array<i32>} : memref<24x1536xbf16, #tpu.memory_space<vmem>>, vector<24x128xbf16>,
    %c0_111 = arith.constant 0 : index
    %c0_112 = arith.constant 0 : index
    %182 = vector.load %arg11[%c0_111, %c0_112] : memref<24x1536xbf16, #tpu.memory_space<vmem>>, vector<24x640xbf16>
    %cst_113 = arith.constant dense<0.000000e+00> : vector<24x256xf32>
    %183 = tpu.matmul %182, %1, %cst_113 {dimension_numbers = #tpu.dot_dimension_numbers<[1], [0], [0], [1], [0, 0, 1, 1], [], []>} : vector<24x640xbf16>, vector<640x256xbf16>, vector<24x256xf32> -> vector<24x256xf32>
    %c0_114 = arith.constant 0 : index
    %c128_115 = arith.constant 128 : index
    %184 = vector.load %arg11[%c0_114, %c128_115] : memref<24x1536xbf16, #tpu.memory_space<vmem>>, vector<24x640xbf16>
    %cst_116 = arith.constant dense<0.000000e+00> : vector<24x256xf32>
    %185 = tpu.matmul %184, %1, %cst_116 {dimension_numbers = #tpu.dot_dimension_numbers<[1], [0], [0], [1], [0, 0, 1, 1], [], []>} : vector<24x640xbf16>, vector<640x256xbf16>, vector<24x256xf32> -> vector<24x256xf32>
    %186 = arith.maximumf %183, %185 : vector<24x256xf32>
    %187 = vector.extract_strided_slice %186 {offsets = [0, 0], sizes = [24, 128], strides = [1, 1]} : vector<24x256xf32> to vector<24x128xf32>
    %188 = vector.extract_strided_slice %186 {offsets = [0, 128], sizes = [24, 128], strides = [1, 1]} : vector<24x256xf32> to vector<24x128xf32>
    %189 = arith.maximumf %187, %188 : vector<24x128xf32>
    %c0_117 = arith.constant 0 : index
    %c0_118 = arith.constant 0 : index
    %190 = vector.load %arg5[%c0_117, %c0_118] : memref<1x128xf32, #tpu.memory_space<vmem>>, vector<1x128xf32>
    %191 = vector.broadcast %190 : vector<1x128xf32> to vector<24x128xf32>
    %192 = arith.addf %189, %191 : vector<24x128xf32>
    %cst_119 = arith.constant 0.000000e+00 : f32
    %193 = vector.broadcast %cst_119 : f32 to vector<24x128xf32>
    %194 = arith.maximumf %192, %193 : vector<24x128xf32>
    %195 = arith.truncf %194 : vector<24x128xf32> to vector<24x128xbf16>
    %c0_120 = arith.constant 0 : index
    %c0_121 = arith.constant 0 : index
    %196 = vector.load %arg12[%c0_120, %c0_121] : memref<24x512xbf16, #tpu.memory_space<vmem>>, vector<24x128xbf16>
    tpu.vector_store %arg12[%c0_120, %c0_121], %195 {strides = array<i32>} : memref<24x512xbf16, #tpu.memory_space<vmem>>, vector<24x128xbf16>,
    %c0_122 = arith.constant 0 : index
    %c256_123 = arith.constant 256 : index
    %197 = vector.load %arg11[%c0_122, %c256_123] : memref<24x1536xbf16, #tpu.memory_space<vmem>>, vector<24x640xbf16>
    %cst_124 = arith.constant dense<0.000000e+00> : vector<24x256xf32>
    %198 = tpu.matmul %197, %1, %cst_124 {dimension_numbers = #tpu.dot_dimension_numbers<[1], [0], [0], [1], [0, 0, 1, 1], [], []>} : vector<24x640xbf16>, vector<640x256xbf16>, vector<24x256xf32> -> vector<24x256xf32>
    %c0_125 = arith.constant 0 : index
    %c384_126 = arith.constant 384 : index
    %199 = vector.load %arg11[%c0_125, %c384_126] : memref<24x1536xbf16, #tpu.memory_space<vmem>>, vector<24x640xbf16>
    %cst_127 = arith.constant dense<0.000000e+00> : vector<24x256xf32>
    %200 = tpu.matmul %199, %1, %cst_127 {dimension_numbers = #tpu.dot_dimension_numbers<[1], [0], [0], [1], [0, 0, 1, 1], [], []>} : vector<24x640xbf16>, vector<640x256xbf16>, vector<24x256xf32> -> vector<24x256xf32>
    %201 = arith.maximumf %198, %200 : vector<24x256xf32>
    %202 = vector.extract_strided_slice %201 {offsets = [0, 0], sizes = [24, 128], strides = [1, 1]} : vector<24x256xf32> to vector<24x128xf32>
    %203 = vector.extract_strided_slice %201 {offsets = [0, 128], sizes = [24, 128], strides = [1, 1]} : vector<24x256xf32> to vector<24x128xf32>
    %204 = arith.maximumf %202, %203 : vector<24x128xf32>
    %c0_128 = arith.constant 0 : index
    %c0_129 = arith.constant 0 : index
    %205 = vector.load %arg5[%c0_128, %c0_129] : memref<1x128xf32, #tpu.memory_space<vmem>>, vector<1x128xf32>
    %206 = vector.broadcast %205 : vector<1x128xf32> to vector<24x128xf32>
    %207 = arith.addf %204, %206 : vector<24x128xf32>
    %cst_130 = arith.constant 0.000000e+00 : f32
    %208 = vector.broadcast %cst_130 : f32 to vector<24x128xf32>
    %209 = arith.maximumf %207, %208 : vector<24x128xf32>
    %210 = arith.truncf %209 : vector<24x128xf32> to vector<24x128xbf16>
    %c0_131 = arith.constant 0 : index
    %c128_132 = arith.constant 128 : index
    %211 = vector.load %arg12[%c0_131, %c128_132] : memref<24x512xbf16, #tpu.memory_space<vmem>>, vector<24x128xbf16>
    tpu.vector_store %arg12[%c0_131, %c128_132], %210 {strides = array<i32>} : memref<24x512xbf16, #tpu.memory_space<vmem>>, vector<24x128xbf16>,
    %c0_133 = arith.constant 0 : index
    %c512_134 = arith.constant 512 : index
    %212 = vector.load %arg11[%c0_133, %c512_134] : memref<24x1536xbf16, #tpu.memory_space<vmem>>, vector<24x640xbf16>
    %cst_135 = arith.constant dense<0.000000e+00> : vector<24x256xf32>
    %213 = tpu.matmul %212, %1, %cst_135 {dimension_numbers = #tpu.dot_dimension_numbers<[1], [0], [0], [1], [0, 0, 1, 1], [], []>} : vector<24x640xbf16>, vector<640x256xbf16>, vector<24x256xf32> -> vector<24x256xf32>
    %c0_136 = arith.constant 0 : index
    %c640_137 = arith.constant 640 : index
    %214 = vector.load %arg11[%c0_136, %c640_137] : memref<24x1536xbf16, #tpu.memory_space<vmem>>, vector<24x640xbf16>
    %cst_138 = arith.constant dense<0.000000e+00> : vector<24x256xf32>
    %215 = tpu.matmul %214, %1, %cst_138 {dimension_numbers = #tpu.dot_dimension_numbers<[1], [0], [0], [1], [0, 0, 1, 1], [], []>} : vector<24x640xbf16>, vector<640x256xbf16>, vector<24x256xf32> -> vector<24x256xf32>
    %216 = arith.maximumf %213, %215 : vector<24x256xf32>
    %217 = vector.extract_strided_slice %216 {offsets = [0, 0], sizes = [24, 128], strides = [1, 1]} : vector<24x256xf32> to vector<24x128xf32>
    %218 = vector.extract_strided_slice %216 {offsets = [0, 128], sizes = [24, 128], strides = [1, 1]} : vector<24x256xf32> to vector<24x128xf32>
    %219 = arith.maximumf %217, %218 : vector<24x128xf32>
    %c0_139 = arith.constant 0 : index
    %c0_140 = arith.constant 0 : index
    %220 = vector.load %arg5[%c0_139, %c0_140] : memref<1x128xf32, #tpu.memory_space<vmem>>, vector<1x128xf32>
    %221 = vector.broadcast %220 : vector<1x128xf32> to vector<24x128xf32>
    %222 = arith.addf %219, %221 : vector<24x128xf32>
    %cst_141 = arith.constant 0.000000e+00 : f32
    %223 = vector.broadcast %cst_141 : f32 to vector<24x128xf32>
    %224 = arith.maximumf %222, %223 : vector<24x128xf32>
    %225 = arith.truncf %224 : vector<24x128xf32> to vector<24x128xbf16>
    %c0_142 = arith.constant 0 : index
    %c256_143 = arith.constant 256 : index
    %226 = vector.load %arg12[%c0_142, %c256_143] : memref<24x512xbf16, #tpu.memory_space<vmem>>, vector<24x128xbf16>
    tpu.vector_store %arg12[%c0_142, %c256_143], %225 {strides = array<i32>} : memref<24x512xbf16, #tpu.memory_space<vmem>>, vector<24x128xbf16>,
    %c0_144 = arith.constant 0 : index
    %c768_145 = arith.constant 768 : index
    %227 = vector.load %arg11[%c0_144, %c768_145] : memref<24x1536xbf16, #tpu.memory_space<vmem>>, vector<24x640xbf16>
    %cst_146 = arith.constant dense<0.000000e+00> : vector<24x256xf32>
    %228 = tpu.matmul %227, %1, %cst_146 {dimension_numbers = #tpu.dot_dimension_numbers<[1], [0], [0], [1], [0, 0, 1, 1], [], []>} : vector<24x640xbf16>, vector<640x256xbf16>, vector<24x256xf32> -> vector<24x256xf32>
    %c0_147 = arith.constant 0 : index
    %c896_148 = arith.constant 896 : index
    %229 = vector.load %arg11[%c0_147, %c896_148] : memref<24x1536xbf16, #tpu.memory_space<vmem>>, vector<24x640xbf16>
    %cst_149 = arith.constant dense<0.000000e+00> : vector<24x256xf32>
    %230 = tpu.matmul %229, %1, %cst_149 {dimension_numbers = #tpu.dot_dimension_numbers<[1], [0], [0], [1], [0, 0, 1, 1], [], []>} : vector<24x640xbf16>, vector<640x256xbf16>, vector<24x256xf32> -> vector<24x256xf32>
    %231 = arith.maximumf %228, %230 : vector<24x256xf32>
    %232 = vector.extract_strided_slice %231 {offsets = [0, 0], sizes = [24, 128], strides = [1, 1]} : vector<24x256xf32> to vector<24x128xf32>
    %233 = vector.extract_strided_slice %231 {offsets = [0, 128], sizes = [24, 128], strides = [1, 1]} : vector<24x256xf32> to vector<24x128xf32>
    %234 = arith.maximumf %232, %233 : vector<24x128xf32>
    %c0_150 = arith.constant 0 : index
    %c0_151 = arith.constant 0 : index
    %235 = vector.load %arg5[%c0_150, %c0_151] : memref<1x128xf32, #tpu.memory_space<vmem>>, vector<1x128xf32>
    %236 = vector.broadcast %235 : vector<1x128xf32> to vector<24x128xf32>
    %237 = arith.addf %234, %236 : vector<24x128xf32>
    %cst_152 = arith.constant 0.000000e+00 : f32
    %238 = vector.broadcast %cst_152 : f32 to vector<24x128xf32>
    %239 = arith.maximumf %237, %238 : vector<24x128xf32>
    %240 = arith.truncf %239 : vector<24x128xf32> to vector<24x128xbf16>
    %c0_153 = arith.constant 0 : index
    %c384_154 = arith.constant 384 : index
    %241 = vector.load %arg12[%c0_153, %c384_154] : memref<24x512xbf16, #tpu.memory_space<vmem>>, vector<24x128xbf16>
    tpu.vector_store %arg12[%c0_153, %c384_154], %240 {strides = array<i32>} : memref<24x512xbf16, #tpu.memory_space<vmem>>, vector<24x128xbf16>,
    %c0_155 = arith.constant 0 : index
    %c0_156 = arith.constant 0 : index
    %242 = vector.load %arg12[%c0_155, %c0_156] : memref<24x512xbf16, #tpu.memory_space<vmem>>, vector<24x512xbf16>
    %c0_157 = arith.constant 0 : index
    %c0_158 = arith.constant 0 : index
    %243 = vector.load %arg6[%c0_157, %c0_158] : memref<512x128xbf16, #tpu.memory_space<vmem>>, vector<512x128xbf16>
    %cst_159 = arith.constant dense<0.000000e+00> : vector<24x128xf32>
    %244 = tpu.matmul %242, %243, %cst_159 {dimension_numbers = #tpu.dot_dimension_numbers<[1], [0], [0], [1], [0, 0, 1, 1], [], []>} : vector<24x512xbf16>, vector<512x128xbf16>, vector<24x128xf32> -> vector<24x128xf32>
    %c0_160 = arith.constant 0 : index
    %c0_161 = arith.constant 0 : index
    %245 = vector.load %arg7[%c0_160, %c0_161] : memref<1x128xf32, #tpu.memory_space<vmem>>, vector<1x128xf32>
    %246 = vector.broadcast %245 : vector<1x128xf32> to vector<24x128xf32>
    %247 = arith.addf %244, %246 : vector<24x128xf32>
    %cst_162 = arith.constant 0.000000e+00 : f32
    %248 = vector.broadcast %cst_162 : f32 to vector<24x128xf32>
    %249 = arith.maximumf %247, %248 : vector<24x128xf32>
    %250 = arith.truncf %249 : vector<24x128xf32> to vector<24x128xbf16>
    %c0_163 = arith.constant 0 : index
    %c0_164 = arith.constant 0 : index
    %251 = vector.load %arg8[%c0_163, %c0_164] : memref<128x128xbf16, #tpu.memory_space<vmem>>, vector<128x128xbf16>
    %cst_165 = arith.constant dense<0.000000e+00> : vector<24x128xf32>
    %252 = tpu.matmul %250, %251, %cst_165 {dimension_numbers = #tpu.dot_dimension_numbers<[1], [0], [0], [1], [0, 0, 1, 1], [], []>} : vector<24x128xbf16>, vector<128x128xbf16>, vector<24x128xf32> -> vector<24x128xf32>
    %c0_166 = arith.constant 0 : index
    %c0_167 = arith.constant 0 : index
    %253 = vector.load %arg9[%c0_166, %c0_167] : memref<1x128xf32, #tpu.memory_space<vmem>>, vector<1x128xf32>
    %254 = vector.broadcast %253 : vector<1x128xf32> to vector<24x128xf32>
    %255 = arith.addf %252, %254 : vector<24x128xf32>
    %c0_168 = arith.constant 0 : index
    %c0_169 = arith.constant 0 : index
    %256 = vector.load %arg10[%c0_168, %c0_169] : memref<24x128xf32, #tpu.memory_space<vmem>>, vector<24x128xf32>
    tpu.vector_store %arg10[%c0_168, %c0_169], %255 {strides = array<i32>} : memref<24x128xf32, #tpu.memory_space<vmem>>, vector<24x128xf32>,
    return
  }
  func.func @transform_0(%arg0: i32) -> (i32, i32) {
    %c0_i32 = arith.constant 0 : i32
    %c0_i32_0 = arith.constant 0 : i32
    return %arg0, %c0_i32 : i32, i32
  }
  func.func @transform_1(%arg0: i32) -> (i32, i32) {
    %c0_i32 = arith.constant 0 : i32
    %c0_i32_0 = arith.constant 0 : i32
    %c0_i32_1 = arith.constant 0 : i32
    return %c0_i32, %c0_i32_0 : i32, i32
  }
  func.func @transform_2(%arg0: i32) -> (i32, i32) {
    %c0_i32 = arith.constant 0 : i32
    %c0_i32_0 = arith.constant 0 : i32
    %c0_i32_1 = arith.constant 0 : i32
    return %c0_i32, %c0_i32_0 : i32, i32
  }
  func.func @transform_3(%arg0: i32) -> (i32, i32) {
    %c0_i32 = arith.constant 0 : i32
    %c0_i32_0 = arith.constant 0 : i32
    %c0_i32_1 = arith.constant 0 : i32
    return %c0_i32, %c0_i32_0 : i32, i32
  }
  func.func @transform_4(%arg0: i32) -> (i32, i32) {
    %c0_i32 = arith.constant 0 : i32
    %c0_i32_0 = arith.constant 0 : i32
    %c0_i32_1 = arith.constant 0 : i32
    return %c0_i32, %c0_i32_0 : i32, i32
  }
  func.func @transform_5(%arg0: i32) -> (i32, i32) {
    %c0_i32 = arith.constant 0 : i32
    %c0_i32_0 = arith.constant 0 : i32
    %c0_i32_1 = arith.constant 0 : i32
    return %c0_i32, %c0_i32_0 : i32, i32
  }
  func.func @transform_6(%arg0: i32) -> (i32, i32) {
    %c0_i32 = arith.constant 0 : i32
    %c0_i32_0 = arith.constant 0 : i32
    %c0_i32_1 = arith.constant 0 : i32
    return %c0_i32, %c0_i32_0 : i32, i32
  }
  func.func @transform_7(%arg0: i32) -> (i32, i32) {
    %c0_i32 = arith.constant 0 : i32
    %c0_i32_0 = arith.constant 0 : i32
    %c0_i32_1 = arith.constant 0 : i32
    return %c0_i32, %c0_i32_0 : i32, i32
  }
  func.func @transform_8(%arg0: i32) -> (i32, i32) {
    %c0_i32 = arith.constant 0 : i32
    %c0_i32_0 = arith.constant 0 : i32
    %c0_i32_1 = arith.constant 0 : i32
    return %c0_i32, %c0_i32_0 : i32, i32
  }
  func.func @transform_9(%arg0: i32) -> (i32, i32) {
    %c0_i32 = arith.constant 0 : i32
    %c0_i32_0 = arith.constant 0 : i32
    return %arg0, %c0_i32 : i32, i32
  }
}

</mosaic_0001>

<bundles_post_ra>
// kernel: cnn_forward.1
= control target key start
LH: loop header
LB: loop body
LE: loop exit
PB: predicated region body
PF: predicated region fallthrough
CT: control target
= control target key end

     0   :  { %s16974_s1 = inlined_call_operand.vmem [shape: bf16[640,256], index: 1, kind: input, shape index: {}]   ;;  %s16975_s0 = inlined_call_operand.vmem [shape: bf16[24,3584], index: 0, kind: input, shape index: {}]   ;;  %s16976_s2 = inlined_call_operand.vmem [shape: f32[1,128], index: 2, kind: input, shape index: {}]   ;;  %s16977_s3 = inlined_call_operand.vmem [shape: bf16[640,256], index: 3, kind: input, shape index: {}]   ;;  %s16978_s4 = inlined_call_operand.vmem [shape: f32[1,128], index: 4, kind: input, shape index: {}]   ;;  %s16979_s5 = inlined_call_operand.vmem [shape: bf16[512,128], index: 5, kind: input, shape index: {}]   ;;  %s16980_s7 = inlined_call_operand.vmem [shape: bf16[128,128], index: 7, kind: input, shape index: {}]   ;;  %s16981_s6 = inlined_call_operand.vmem [shape: f32[1,128], index: 6, kind: input, shape index: {}]   ;;  %s16982_s8 = inlined_call_operand.vmem [shape: f32[1,128], index: 8, kind: input, shape index: {}]   ;;  %s16983_s9 = inlined_call_operand.vmem [shape: f32[24,128], index: 9, kind: output, shape index: {}]  }
   0x1   :  { %v10952_v0 = vld [vmem:[%s16974_s1 + $0x4] ss:$8 sps:$4 sm:$0xff]   ;;  %v10957_v1 = vld [vmem:[%s16974_s1] ss:$8 sps:$4 sm:$0xff]   ;;  %v10964_v2 = vld [vmem:[%s16974_s1 + $0x14] ss:$8 sps:$4 sm:$0xff]  }
   0x2   :  { %646 = vmatprep.subr.bf16.mxu0 %v10952_v0  ;;  %852 = vmatprep.subr.bf16.mxu1 %v10952_v0  ;;  %v10971_v3 = vld [vmem:[%s16974_s1 + $0x10] ss:$8 sps:$4 sm:$0xff]   ;;  %v10978_v4 = vld [vmem:[%s16974_s1 + $0x24] ss:$8 sps:$4 sm:$0xff]   ;;  %v10985_v5 = vld [vmem:[%s16974_s1 + $0x20] ss:$8 sps:$4 sm:$0xff]  }
   0x3   :  { %647 = vmatpush1.bf16.msra.mxu0 %v10957_v1  ;;  %853 = vmatpush1.bf16.msra.mxu1 %v10957_v1  ;;  %v10992_v6 = vld [vmem:[%s16974_s1 + $0x34] ss:$8 sps:$4 sm:$0xff]   ;;  %v10999_v7 = vld [vmem:[%s16974_s1 + $0x30] ss:$8 sps:$4 sm:$0xff]   ;;  %v11006_v8 = vld [vmem:[%s16974_s1 + $0x44] ss:$8 sps:$4 sm:$0xff]  }
   0x4   :  { %648 = vmatprep.subr.bf16.mxu0 %v10964_v2  ;;  %854 = vmatprep.subr.bf16.mxu1 %v10964_v2  ;;  %v11013_v9 = vld [vmem:[%s16974_s1 + $0x40] ss:$8 sps:$4 sm:$0xff]   ;;  %v11020_v10 = vld [vmem:[%s16974_s1 + $0x54] ss:$8 sps:$4 sm:$0xff]   ;;  %v11027_v11 = vld [vmem:[%s16974_s1 + $0x50] ss:$8 sps:$4 sm:$0xff]  }
   0x5   :  { %v11034_v12 = vld [vmem:[%s16974_s1 + $0x64] ss:$8 sps:$4 sm:$0xff]   ;;  %v11044_v14 = vld [vmem:[%s16974_s1 + $0x60] ss:$8 sps:$4 sm:$0xff]   ;;  %v11051_v15 = vld [vmem:[%s16974_s1 + $0x74] ss:$8 sps:$4 sm:$0xff]  }
   0x6   :  { %v10014_v13 = vld [vmem:[%s16975_s0 + $0x4] ss:$112 sps:$4 sm:$0xff]   ;;  %v10019_v16 = vld [vmem:[%s16975_s0 + $0x8] ss:$112 sps:$4 sm:$0xff]   ;;  %v10012_v35 = vld [vmem:[%s16975_s0] ss:$112 sps:$4 sm:$0xff]  }
   0x7   :  { %649 = vmatpush1.bf16.msra.mxu0 %v10971_v3  ;;  %855 = vmatpush1.bf16.msra.mxu1 %v10971_v3  ;;  %v11061_v17 = vld [vmem:[%s16974_s1 + $0x70] ss:$8 sps:$4 sm:$0xff]   ;;  %v11068_v18 = vld [vmem:[%s16974_s1 + $0x84] ss:$8 sps:$4 sm:$0xff]   ;;  %v11075_v19 = vld [vmem:[%s16974_s1 + $0x80] ss:$8 sps:$4 sm:$0xff]  }
   0x8   :  { %650 = vmatprep.subr.bf16.mxu0 %v10978_v4  ;;  %856 = vmatprep.subr.bf16.mxu1 %v10978_v4  ;;  %v11082_v20 = vld [vmem:[%s16974_s1 + $0x94] ss:$8 sps:$4 sm:$0xff]   ;;  %v11089_v21 = vld [vmem:[%s16974_s1 + $0x90] ss:$8 sps:$4 sm:$0xff]   ;;  %v11096_v22 = vld [vmem:[%s16974_s1 + $0xa4] ss:$8 sps:$4 sm:$0xff]  }
   0x9   :  { %678 = vmatprep.mubr.bf16.mxu0 %v10014_v13  ;;  %884 = vmatprep.mubr.bf16.mxu1 %v10019_v16  ;;  %v11103_v23 = vld [vmem:[%s16974_s1 + $0xa0] ss:$8 sps:$4 sm:$0xff]   ;;  %v11110_v24 = vld [vmem:[%s16974_s1 + $0xb4] ss:$8 sps:$4 sm:$0xff]   ;;  %v11117_v25 = vld [vmem:[%s16974_s1 + $0xb0] ss:$8 sps:$4 sm:$0xff]  }
   0xa   :  { %v11124_v26 = vld [vmem:[%s16974_s1 + $0xc4] ss:$8 sps:$4 sm:$0xff]   ;;  %v11131_v27 = vld [vmem:[%s16974_s1 + $0xc0] ss:$8 sps:$4 sm:$0xff]   ;;  %v11138_v28 = vld [vmem:[%s16974_s1 + $0xd4] ss:$8 sps:$4 sm:$0xff]  }
   0xb   :  { %651 = vmatpush1.bf16.msra.mxu0 %v10985_v5  ;;  %857 = vmatpush1.bf16.msra.mxu1 %v10985_v5  ;;  %v11145_v29 = vld [vmem:[%s16974_s1 + $0xd0] ss:$8 sps:$4 sm:$0xff]   ;;  %v11152_v30 = vld [vmem:[%s16974_s1 + $0xe4] ss:$8 sps:$4 sm:$0xff]   ;;  %v11159_v31 = vld [vmem:[%s16974_s1 + $0xe0] ss:$8 sps:$4 sm:$0xff]  }
   0xc   :  { %652 = vmatprep.subr.bf16.mxu0 %v10992_v6  ;;  %858 = vmatprep.subr.bf16.mxu1 %v10992_v6  ;;  %v11166_v32 = vld [vmem:[%s16974_s1 + $0xf4] ss:$8 sps:$4 sm:$0xff]   ;;  %v11173_v33 = vld [vmem:[%s16974_s1 + $0xf0] ss:$8 sps:$4 sm:$0xff]   ;;  %v11178_v34 = vld [vmem:[%s16974_s1 + $0x104] ss:$8 sps:$4 sm:$0xff]  }
   0xd   :  { %v10017_v36 = vld [vmem:[%s16975_s0 + $0x4] ss:$112 sps:$4 sm:$0xff]   ;;  %v11191_v37 = vld [vmem:[%s16974_s1 + $0x100] ss:$8 sps:$4 sm:$0xff]   ;;  %v11211_v41 = vld [vmem:[%s16974_s1 + $0x110] ss:$8 sps:$4 sm:$0xff]  }
   0xe   :  { %v199_v38 = vld [vmem:[%s16975_s0 + $0xe0] sm:$0xff]  ;;  %v11204_v40 = vld [vmem:[%s16974_s1 + $0x114] ss:$8 sps:$4 sm:$0xff]   ;;  %v11249_v51 = vld [vmem:[%s16974_s1 + $0x130] ss:$8 sps:$4 sm:$0xff]  }
   0xf   :  { %653 = vmatpush1.bf16.msra.mxu0 %v10999_v7  ;;  %859 = vmatpush1.bf16.msra.mxu1 %v10999_v7  ;;  %v805_v39 = vld [vmem:[%s16975_s0 + $0xe4] sm:$0xff]  ;;  %v8729_v42 = vcombine.high %v199_v38, %v199_v38  ;;  %v11230_v46 = vld [vmem:[%s16974_s1 + $0x134] ss:$8 sps:$4 sm:$0xff]   ;;  %v8728_v47 = vcombine.low %v199_v38, %v199_v38  ;;  %v11242_v50 = vld [vmem:[%s16975_s0 + $0x10] ss:$112 sps:$4 sm:$0xff]  }
  0x10   :  { %654 = vmatprep.subr.bf16.mxu0 %v11006_v8  ;;  %860 = vmatprep.subr.bf16.mxu1 %v11006_v8  ;;  %v8819_v43 = vcombine.high %v805_v39, %v805_v39  ;;  %v11216_v44 = vld [vmem:[%s16974_s1 + $0x124] ss:$8 sps:$4 sm:$0xff]   ;;  %v11225_v45 = vld [vmem:[%s16974_s1 + $0x120] ss:$8 sps:$4 sm:$0xff]   ;;  %v8818_v48 = vcombine.low %v805_v39, %v805_v39  ;;  %v11270_v54 = vld [vmem:[%s16974_s1 + $0x154] ss:$8 sps:$4 sm:$0xff]  }
  0x11   :  { %v11237_v49 = vld [vmem:[%s16975_s0 + $0xc] ss:$112 sps:$4 sm:$0xff]   ;;  %v11263_v53 = vld [vmem:[%s16974_s1 + $0x140] ss:$8 sps:$4 sm:$0xff]   ;;  %v11279_v55 = vld [vmem:[%s16974_s1 + $0x150] ss:$8 sps:$4 sm:$0xff]  }
  0x12   :  { %v11254_v52 = vld [vmem:[%s16974_s1 + $0x144] ss:$8 sps:$4 sm:$0xff]   ;;  %v11293_v57 = vld [vmem:[%s16974_s1 + $0x160] ss:$8 sps:$4 sm:$0xff]   ;;  %v11298_v58 = vld [vmem:[%s16974_s1 + $0x174] ss:$8 sps:$4 sm:$0xff]  }
  0x13   :  { %655 = vmatpush1.bf16.msra.mxu0 %v11013_v9  ;;  %861 = vmatpush1.bf16.msra.mxu1 %v11013_v9  ;;  %v11284_v56 = vld [vmem:[%s16974_s1 + $0x164] ss:$8 sps:$4 sm:$0xff]   ;;  %v11307_v59 = vld [vmem:[%s16974_s1 + $0x170] ss:$8 sps:$4 sm:$0xff]   ;;  %v11321_v61 = vld [vmem:[%s16974_s1 + $0x180] ss:$8 sps:$4 sm:$0xff]  }
  0x14   :  { %656 = vmatprep.subr.bf16.mxu0 %v11020_v10  ;;  %862 = vmatprep.subr.bf16.mxu1 %v11020_v10  ;;  %v11312_v60 = vld [vmem:[%s16974_s1 + $0x184] ss:$8 sps:$4 sm:$0xff]   ;;  %v11326_v62 = vld [vmem:[%s16974_s1 + $0x194] ss:$8 sps:$4 sm:$0xff]   ;;  %v11335_v63 = vld [vmem:[%s16974_s1 + $0x190] ss:$8 sps:$4 sm:$0xff]  }
  0x15   :  { %17435 = vst [vmem:[#allocation4_spill] sm:$0xff] %v11335_v63  ;;  %v11344_v13 = vld [vmem:[%s16974_s1 + $0x1a4] ss:$8 sps:$4 sm:$0xff]   ;;  %v11351_v16 = vld [vmem:[%s16974_s1 + $0x1a0] ss:$8 sps:$4 sm:$0xff]  }
  0x16   :  { %17436 = vst [vmem:[#allocation5_spill] sm:$0xff] %v11344_v13  ;;  %17437 = vst [vmem:[#allocation6_spill] sm:$0xff] %v11351_v16  ;;  %v11372_v38 = vld [vmem:[%s16974_s1 + $0x1c4] ss:$8 sps:$4 sm:$0xff]   ;;  %v11379_v39 = vld [vmem:[%s16974_s1 + $0x1c0] ss:$8 sps:$4 sm:$0xff]  }
  0x17   :  { %657 = vmatpush1.bf16.msra.mxu0 %v11027_v11  ;;  %863 = vmatpush1.bf16.msra.mxu1 %v11027_v11  ;;  %17440 = vst [vmem:[#allocation9_spill] sm:$0xff] %v11372_v38  ;;  %17441 = vst [vmem:[#allocation10_spill] sm:$0xff] %v11379_v39 }
  0x18   :  { %658 = vmatprep.subr.bf16.mxu0 %v11034_v12  ;;  %864 = vmatprep.subr.bf16.mxu1 %v11034_v12 }
  0x1b   :  { %659 = vmatpush1.bf16.msra.mxu0 %v11044_v14  ;;  %865 = vmatpush1.bf16.msra.mxu1 %v11044_v14 }
  0x1c   :  { %660 = vmatprep.subr.bf16.mxu0 %v11051_v15  ;;  %866 = vmatprep.subr.bf16.mxu1 %v11051_v15 }
  0x1f   :  { %661 = vmatpush1.bf16.msra.mxu0 %v11061_v17  ;;  %867 = vmatpush1.bf16.msra.mxu1 %v11061_v17 }
  0x20   :  { %662 = vmatprep.subr.bf16.mxu0 %v11068_v18  ;;  %868 = vmatprep.subr.bf16.mxu1 %v11068_v18 }
  0x23   :  { %663 = vmatpush1.bf16.msra.mxu0 %v11075_v19  ;;  %869 = vmatpush1.bf16.msra.mxu1 %v11075_v19 }
  0x24   :  { %664 = vmatprep.subr.bf16.mxu0 %v11082_v20  ;;  %870 = vmatprep.subr.bf16.mxu1 %v11082_v20 }
  0x27   :  { %665 = vmatpush1.bf16.msra.mxu0 %v11089_v21  ;;  %871 = vmatpush1.bf16.msra.mxu1 %v11089_v21 }
  0x28   :  { %666 = vmatprep.subr.bf16.mxu0 %v11096_v22  ;;  %872 = vmatprep.subr.bf16.mxu1 %v11096_v22 }
  0x2b   :  { %667 = vmatpush1.bf16.msra.mxu0 %v11103_v23  ;;  %873 = vmatpush1.bf16.msra.mxu1 %v11103_v23 }
  0x2c   :  { %668 = vmatprep.subr.bf16.mxu0 %v11110_v24  ;;  %874 = vmatprep.subr.bf16.mxu1 %v11110_v24 }
  0x2f   :  { %669 = vmatpush1.bf16.msra.mxu0 %v11117_v25  ;;  %875 = vmatpush1.bf16.msra.mxu1 %v11117_v25 }
  0x30   :  { %670 = vmatprep.subr.bf16.mxu0 %v11124_v26  ;;  %876 = vmatprep.subr.bf16.mxu1 %v11124_v26 }
  0x33   :  { %671 = vmatpush1.bf16.msra.mxu0 %v11131_v27  ;;  %877 = vmatpush1.bf16.msra.mxu1 %v11131_v27 }
  0x34   :  { %672 = vmatprep.subr.bf16.mxu0 %v11138_v28  ;;  %878 = vmatprep.subr.bf16.mxu1 %v11138_v28 }
  0x37   :  { %673 = vmatpush1.bf16.msra.mxu0 %v11145_v29  ;;  %879 = vmatpush1.bf16.msra.mxu1 %v11145_v29 }
  0x38   :  { %674 = vmatprep.subr.bf16.mxu0 %v11152_v30  ;;  %880 = vmatprep.subr.bf16.mxu1 %v11152_v30 }
  0x3b   :  { %675 = vmatpush1.bf16.msra.mxu0 %v11159_v31  ;;  %881 = vmatpush1.bf16.msra.mxu1 %v11159_v31 }
  0x3c   :  { %676 = vmatprep.subr.bf16.mxu0 %v11166_v32  ;;  %882 = vmatprep.subr.bf16.mxu1 %v11166_v32 }
  0x3f   :  { %677 = vmatpush1.bf16.msra.mxu0 %v11173_v33  ;;  %883 = vmatpush1.bf16.msra.mxu1 %v11173_v33 }
  0x40   :  { %697 = vmatprep.subr.bf16.mxu0 %v11178_v34  ;;  %903 = vmatprep.subr.bf16.mxu1 %v11178_v34 }
  0x42   :  { %679 = vmatmul.mubr.bf16.vlgmr.msra.gmra.mrb[0].mxu0 %v10012_v35  ;;  %885 = vmatmul.mubr.bf16.vlgmr.msra.gmra.mrb[0].mxu1 %v10017_v36  ;;  %v11358_v35 = vld [vmem:[%s16974_s1 + $0x1b4] ss:$8 sps:$4 sm:$0xff]   ;;  %v11365_v36 = vld [vmem:[%s16974_s1 + $0x1b0] ss:$8 sps:$4 sm:$0xff]  }
  0x43   :  { %698 = vmatpush1.bf16.msra.mxu0 %v11191_v37  ;;  %904 = vmatpush1.bf16.msra.mxu1 %v11191_v37  ;;  %17438 = vst [vmem:[#allocation7_spill] sm:$0xff] %v11358_v35  ;;  %17439 = vst [vmem:[#allocation8_spill] sm:$0xff] %v11365_v36 }
  0x44   :  { %699 = vmatprep.subr.bf16.mxu0 %v11204_v40  ;;  %905 = vmatprep.subr.bf16.mxu1 %v11204_v40 }
  0x45   :  { %688 = vmatprep.mubr.bf16.mxu0 %v8729_v42  ;;  %894 = vmatprep.mubr.bf16.mxu1 %v8819_v43  ;;  %v11386_v42 = vld [vmem:[%s16974_s1 + $0x1d4] ss:$8 sps:$4 sm:$0xff]   ;;  %v11393_v43 = vld [vmem:[%s16974_s1 + $0x1d0] ss:$8 sps:$4 sm:$0xff]  }
  0x46   :  { %17442 = vst [vmem:[#allocation11_spill] sm:$0xff] %v11386_v42  ;;  %17443 = vst [vmem:[#allocation12_spill] sm:$0xff] %v11393_v43 }
  0x47   :  { %700 = vmatpush1.bf16.msra.mxu0 %v11211_v41  ;;  %906 = vmatpush1.bf16.msra.mxu1 %v11211_v41 }
  0x48   :  { %701 = vmatprep.subr.bf16.mxu0 %v11216_v44  ;;  %907 = vmatprep.subr.bf16.mxu1 %v11216_v44 }
  0x4a   :  { %689 = vmatmul.mubr.bf16.gmra.mrb[4].mxu0 %v8728_v47  ;;  %895 = vmatmul.mubr.bf16.gmra.mrb[4].mxu1 %v8818_v48  ;;  %v11400_v47 = vld [vmem:[%s16974_s1 + $0x1e4] ss:$8 sps:$4 sm:$0xff]   ;;  %v11407_v48 = vld [vmem:[%s16974_s1 + $0x1e0] ss:$8 sps:$4 sm:$0xff]  }
  0x4b   :  { %702 = vmatpush1.bf16.msra.mxu0 %v11225_v45  ;;  %908 = vmatpush1.bf16.msra.mxu1 %v11225_v45  ;;  %17444 = vst [vmem:[#allocation13_spill] sm:$0xff] %v11400_v47  ;;  %17445 = vst [vmem:[#allocation14_spill] sm:$0xff] %v11407_v48 }
  0x4c   :  { %703 = vmatprep.subr.bf16.mxu0 %v11230_v46  ;;  %909 = vmatprep.subr.bf16.mxu1 %v11230_v46 }
  0x4d   :  { %729 = vmatprep.mubr.bf16.mxu0 %v11237_v49  ;;  %935 = vmatprep.mubr.bf16.mxu1 %v11242_v50 }
  0x4f   :  { %704 = vmatpush1.bf16.msra.mxu0 %v11249_v51  ;;  %910 = vmatpush1.bf16.msra.mxu1 %v11249_v51 }
  0x50   :  { %705 = vmatprep.subr.bf16.mxu0 %v11254_v52  ;;  %911 = vmatprep.subr.bf16.mxu1 %v11254_v52 }
  0x53   :  { %706 = vmatpush1.bf16.msra.mxu0 %v11263_v53  ;;  %912 = vmatpush1.bf16.msra.mxu1 %v11263_v53 }
  0x54   :  { %707 = vmatprep.subr.bf16.mxu0 %v11270_v54  ;;  %913 = vmatprep.subr.bf16.mxu1 %v11270_v54 }
  0x57   :  { %708 = vmatpush1.bf16.msra.mxu0 %v11279_v55  ;;  %914 = vmatpush1.bf16.msra.mxu1 %v11279_v55 }
  0x58   :  { %709 = vmatprep.subr.bf16.mxu0 %v11284_v56  ;;  %915 = vmatprep.subr.bf16.mxu1 %v11284_v56 }
  0x5b   :  { %710 = vmatpush1.bf16.msra.mxu0 %v11293_v57  ;;  %916 = vmatpush1.bf16.msra.mxu1 %v11293_v57 }
  0x5c   :  { %711 = vmatprep.subr.bf16.mxu0 %v11298_v58  ;;  %917 = vmatprep.subr.bf16.mxu1 %v11298_v58 }
  0x5f   :  { %712 = vmatpush1.bf16.msra.mxu0 %v11307_v59  ;;  %918 = vmatpush1.bf16.msra.mxu1 %v11307_v59 }
  0x60   :  { %713 = vmatprep.subr.bf16.mxu0 %v11312_v60  ;;  %919 = vmatprep.subr.bf16.mxu1 %v11312_v60 }
  0x63   :  { %714 = vmatpush1.bf16.msra.mxu0 %v11321_v61  ;;  %920 = vmatpush1.bf16.msra.mxu1 %v11321_v61 }
  0x64   :  { %715 = vmatprep.subr.bf16.mxu0 %v11326_v62  ;;  %921 = vmatprep.subr.bf16.mxu1 %v11326_v62 }
  0x67   :  { %716 = vmatpush1.bf16.msra.mxu0 %v11335_v63  ;;  %922 = vmatpush1.bf16.msra.mxu1 %v11335_v63 }
  0x68   :  { %717 = vmatprep.subr.bf16.mxu0 %v11344_v13  ;;  %923 = vmatprep.subr.bf16.mxu1 %v11344_v13 }
  0x6b   :  { %718 = vmatpush1.bf16.msra.mxu0 %v11351_v16  ;;  %924 = vmatpush1.bf16.msra.mxu1 %v11351_v16 }
  0x6c   :  { %719 = vmatprep.subr.bf16.mxu0 %v11358_v35  ;;  %925 = vmatprep.subr.bf16.mxu1 %v11358_v35  ;;  %v11458_v35 = vld [vmem:[%s16974_s1 + $0x214] ss:$8 sps:$4 sm:$0xff]  }
  0x6d   :  { %17450 = vst [vmem:[#allocation19_spill] sm:$0xff] %v11458_v35 }
  0x6f   :  { %720 = vmatpush1.bf16.msra.mxu0 %v11365_v36  ;;  %926 = vmatpush1.bf16.msra.mxu1 %v11365_v36  ;;  %v11451_v36 = vld [vmem:[%s16974_s1 + $0x200] ss:$8 sps:$4 sm:$0xff]  }
  0x70   :  { %721 = vmatprep.subr.bf16.mxu0 %v11372_v38  ;;  %927 = vmatprep.subr.bf16.mxu1 %v11372_v38  ;;  %v200_v38 = vld [vmem:[%s16975_s0 + $0xe8] sm:$0xff]  ;;  %17449 = vst [vmem:[#allocation18_spill] sm:$0xff] %v11451_v36 }
  0x71   :  { %v11460_v16 = vcombine.high %v200_v38, %v200_v38  ;;  %v11482_v63 = vcombine.low %v200_v38, %v200_v38  ;;  %v11498_v38 = vld [vmem:[%s16974_s1 + $0x234] ss:$8 sps:$4 sm:$0xff]  }
  0x72   :  { %17454 = vst [vmem:[#allocation23_spill] sm:$0xff] %v11498_v38 }
  0x73   :  { %722 = vmatpush1.bf16.msra.mxu0 %v11379_v39  ;;  %928 = vmatpush1.bf16.msra.mxu1 %v11379_v39  ;;  %v11433_v39 = vld [vmem:[%s16975_s0 + $0x8] ss:$112 sps:$4 sm:$0xff]  }
  0x74   :  { %723 = vmatprep.subr.bf16.mxu0 %v11386_v42  ;;  %929 = vmatprep.subr.bf16.mxu1 %v11386_v42  ;;  %v11414_v42 = vld [vmem:[%s16974_s1 + $0x1f4] ss:$8 sps:$4 sm:$0xff]  }
  0x75   :  { %17446 = vst [vmem:[#allocation15_spill] sm:$0xff] %v11414_v42 }
  0x77   :  { %724 = vmatpush1.bf16.msra.mxu0 %v11393_v43  ;;  %930 = vmatpush1.bf16.msra.mxu1 %v11393_v43  ;;  %v11421_v43 = vld [vmem:[%s16974_s1 + $0x1f0] ss:$8 sps:$4 sm:$0xff]  }
  0x78   :  { %725 = vmatprep.subr.bf16.mxu0 %v11400_v47  ;;  %931 = vmatprep.subr.bf16.mxu1 %v11400_v47  ;;  %17447 = vst [vmem:[#allocation16_spill] sm:$0xff] %v11421_v43  ;;  %v11428_v47 = vld [vmem:[%s16974_s1 + $0x204] ss:$8 sps:$4 sm:$0xff]  }
  0x79   :  { %17448 = vst [vmem:[#allocation17_spill] sm:$0xff] %v11428_v47 }
  0x7b   :  { %726 = vmatpush1.bf16.msra.mxu0 %v11407_v48  ;;  %932 = vmatpush1.bf16.msra.mxu1 %v11407_v48  ;;  %v11438_v48 = vld [vmem:[%s16975_s0 + $0xc] ss:$112 sps:$4 sm:$0xff]  }
  0x7c   :  { %727 = vmatprep.subr.bf16.mxu0 %v11414_v42  ;;  %933 = vmatprep.subr.bf16.mxu1 %v11414_v42  ;;  %v806_v42 = vld [vmem:[%s16975_s0 + $0xec] sm:$0xff] }
  0x7d   :  { %v11462_v13 = vcombine.high %v806_v42, %v806_v42 }
  0x7f   :  { %728 = vmatpush1.bf16.msra.mxu0 %v11421_v43  ;;  %934 = vmatpush1.bf16.msra.mxu1 %v11421_v43  ;;  %v11478_v43 = vld [vmem:[%s16974_s1 + $0x224] ss:$8 sps:$4 sm:$0xff]  }
  0x80   :  { %748 = vmatprep.subr.bf16.mxu0 %v11428_v47  ;;  %954 = vmatprep.subr.bf16.mxu1 %v11428_v47  ;;  %v11471_v47 = vld [vmem:[%s16974_s1 + $0x210] ss:$8 sps:$4 sm:$0xff]   ;;  %17452 = vst [vmem:[#allocation21_spill] sm:$0xff] %v11478_v43 }
  0x81   :  { %17451 = vst [vmem:[#allocation20_spill] sm:$0xff] %v11471_v47 }
  0x82   :  { %730 = vmatmul.mubr.bf16.vlgmr.msra.gmra.mrb[0].mxu0 %v11433_v39  ;;  %936 = vmatmul.mubr.bf16.vlgmr.msra.gmra.mrb[0].mxu1 %v11438_v48 }
  0x83   :  { %749 = vmatpush1.bf16.msra.mxu0 %v11451_v36  ;;  %955 = vmatpush1.bf16.msra.mxu1 %v11451_v36  ;;  %v11484_v36 = vcombine.low %v806_v42, %v806_v42  ;;  %v11507_v42 = vld [vmem:[%s16974_s1 + $0x230] ss:$8 sps:$4 sm:$0xff]  }
  0x84   :  { %750 = vmatprep.subr.bf16.mxu0 %v11458_v35  ;;  %956 = vmatprep.subr.bf16.mxu1 %v11458_v35  ;;  %v11491_v35 = vld [vmem:[%s16974_s1 + $0x220] ss:$8 sps:$4 sm:$0xff]   ;;  %17455 = vst [vmem:[#allocation24_spill] sm:$0xff] %v11507_v42 }
  0x85   :  { %739 = vmatprep.mubr.bf16.mxu0 %v11460_v16  ;;  %945 = vmatprep.mubr.bf16.mxu1 %v11462_v13  ;;  %17453 = vst [vmem:[#allocation22_spill] sm:$0xff] %v11491_v35 }
  0x87   :  { %751 = vmatpush1.bf16.msra.mxu0 %v11471_v47  ;;  %957 = vmatpush1.bf16.msra.mxu1 %v11471_v47  ;;  %v17024_v47 = vmov 0  }
  0x88   :  { %752 = vmatprep.subr.bf16.mxu0 %v11478_v43  ;;  %958 = vmatprep.subr.bf16.mxu1 %v11478_v43  ;;  %v11514_v43 = vld [vmem:[%s16974_s1 + $0x244] ss:$8 sps:$4 sm:$0xff]  }
  0x89   :  { %17456 = vst [vmem:[#allocation25_spill] sm:$0xff] %v11514_v43 }
  0x8a   :  { %740 = vmatmul.mubr.bf16.gmra.mrb[4].mxu0 %v11482_v63  ;;  %946 = vmatmul.mubr.bf16.gmra.mrb[4].mxu1 %v11484_v36 }
  0x8b   :  { %753 = vmatpush1.bf16.msra.mxu0 %v11491_v35  ;;  %959 = vmatpush1.bf16.msra.mxu1 %v11491_v35  ;;  %v11523_v35 = vld [vmem:[%s16974_s1 + $0x240] ss:$8 sps:$4 sm:$0xff]  }
  0x8c   :  { %754 = vmatprep.subr.bf16.mxu0 %v11498_v38  ;;  %960 = vmatprep.subr.bf16.mxu1 %v11498_v38  ;;  %17457 = vst [vmem:[#allocation26_spill] sm:$0xff] %v11523_v35  ;;  %v11530_v38 = vld [vmem:[%s16974_s1 + $0x254] ss:$8 sps:$4 sm:$0xff]  }
  0x8d   :  { %780 = vmatprep.mubr.bf16.mxu0 %v17024_v47  ;;  %986 = vmatprep.mubr.bf16.mxu1 %v17024_v47  ;;  %17458 = vst [vmem:[#allocation27_spill] sm:$0xff] %v11530_v38  ;;  %v11537_v47 = vld [vmem:[%s16974_s1 + $0x250] ss:$8 sps:$4 sm:$0xff]  }
  0x8e   :  { %17459 = vst [vmem:[#allocation28_spill] sm:$0xff] %v11537_v47 }
  0x8f   :  { %755 = vmatpush1.bf16.msra.mxu0 %v11507_v42  ;;  %961 = vmatpush1.bf16.msra.mxu1 %v11507_v42  ;;  %v10105_v42 = vld [vmem:[%s16975_s0 + $0x14] ss:$112 sps:$4 sm:$0xff]  }
  0x90   :  { %756 = vmatprep.subr.bf16.mxu0 %v11514_v43  ;;  %962 = vmatprep.subr.bf16.mxu1 %v11514_v43  ;;  %v11544_v43 = vld [vmem:[%s16974_s1 + $0x264] ss:$8 sps:$4 sm:$0xff]  }
  0x91   :  { %17460 = vst [vmem:[#allocation29_spill] sm:$0xff] %v11544_v43 }
  0x93   :  { %757 = vmatpush1.bf16.msra.mxu0 %v11523_v35  ;;  %963 = vmatpush1.bf16.msra.mxu1 %v11523_v35  ;;  %v11551_v35 = vld [vmem:[%s16974_s1 + $0x260] ss:$8 sps:$4 sm:$0xff]  }
  0x94   :  { %758 = vmatprep.subr.bf16.mxu0 %v11530_v38  ;;  %964 = vmatprep.subr.bf16.mxu1 %v11530_v38  ;;  %v11558_v38 = vld [vmem:[%s16974_s1 + $0x274] ss:$8 sps:$4 sm:$0xff]  }
  0x95   :  { %17461 = vst [vmem:[#allocation30_spill] sm:$0xff] %v11558_v38 }
  0x97   :  { %759 = vmatpush1.bf16.msra.mxu0 %v11537_v47  ;;  %965 = vmatpush1.bf16.msra.mxu1 %v11537_v47  ;;  %v11565_v47 = vld [vmem:[%s16974_s1 + $0x270] ss:$8 sps:$4 sm:$0xff]  }
  0x98   :  { %760 = vmatprep.subr.bf16.mxu0 %v11544_v43  ;;  %966 = vmatprep.subr.bf16.mxu1 %v11544_v43  ;;  %17462 = vst [vmem:[#allocation31_spill] sm:$0xff] %v11565_v47  ;;  %v10104_v43 = vld [vmem:[%s16975_s0 + $0x10] ss:$112 sps:$4 sm:$0xff]  }
  0x9b   :  { %761 = vmatpush1.bf16.msra.mxu0 %v11551_v35  ;;  %967 = vmatpush1.bf16.msra.mxu1 %v11551_v35 }
  0x9c   :  { %762 = vmatprep.subr.bf16.mxu0 %v11558_v38  ;;  %968 = vmatprep.subr.bf16.mxu1 %v11558_v38  ;;  %v17463_v38 = vmov 0  }
  0x9f   :  { %763 = vmatpush1.bf16.msra.mxu0 %v11565_v47  ;;  %969 = vmatpush1.bf16.msra.mxu1 %v11565_v47  ;;  %v10106_v47 = vld [vmem:[%s16975_s0 + $0xf0] ss:$0 sps:$4 sm:$0xff]  }
  0xa0   :  { %1096 = vmatprep.subr.bf16.mxu0 %v10952_v0  ;;  %1302 = vmatprep.subr.bf16.mxu1 %v10952_v0  ;;  %v10107_v0 = vld [vmem:[%s16975_s0 + $0xf4] ss:$0 sps:$4 sm:$0xff]  }
  0xa2   :  { %781 = vmatmul.mubr.bf16.vlgmr.msra.gmra.mrb[0].mxu0 %v10104_v43  ;;  %987 = vmatmul.mubr.bf16.vlgmr.msra.gmra.mrb[0].mxu1 %v10105_v42  ;;  %v11893_v43 = vld [vmem:[%s16974_s1 + $0x50] ss:$8 sps:$4 sm:$0xff]   ;;  %v11914_v42 = vld [vmem:[%s16974_s1 + $0x74] ss:$8 sps:$4 sm:$0xff]  }
  0xa3   :  { %1097 = vmatpush1.bf16.msra.mxu0 %v10957_v1  ;;  %1303 = vmatpush1.bf16.msra.mxu1 %v10957_v1  ;;  %v11668_v1 = vld [vmem:[%s16975_s0 + $0x14] ss:$112 sps:$4 sm:$0xff]  }
  0xa4   :  { %1098 = vmatprep.subr.bf16.mxu0 %v10964_v2  ;;  %1304 = vmatprep.subr.bf16.mxu1 %v10964_v2  ;;  %v11673_v2 = vld [vmem:[%s16975_s0 + $0x18] ss:$112 sps:$4 sm:$0xff]  }
  0xa5   :  { %790 = vmatprep.mubr.bf16.mxu0 %v17463_v38  ;;  %996 = vmatprep.mubr.bf16.mxu1 %v17463_v38 }
  0xa7   :  { %1099 = vmatpush1.bf16.msra.mxu0 %v10971_v3  ;;  %1305 = vmatpush1.bf16.msra.mxu1 %v10971_v3  ;;  %v17464_v3 = vld [vmem:[#allocation4_spill] sm:$0xff] }
  0xa8   :  { %1100 = vmatprep.subr.bf16.mxu0 %v10978_v4  ;;  %1306 = vmatprep.subr.bf16.mxu1 %v10978_v4  ;;  %v17465_v4 = vld [vmem:[#allocation5_spill] sm:$0xff] }
  0xaa   :  { %791 = vmatmul.mubr.bf16.gmra.mrb[4].mxu0 %v10106_v47  ;;  %997 = vmatmul.mubr.bf16.gmra.mrb[4].mxu1 %v10107_v0  ;;  %v11900_v47 = vld [vmem:[%s16974_s1 + $0x64] ss:$8 sps:$4 sm:$0xff]   ;;  %v11921_v0 = vld [vmem:[%s16974_s1 + $0x70] ss:$8 sps:$4 sm:$0xff]  }
  0xab   :  { %1101 = vmatpush1.bf16.msra.mxu0 %v10985_v5  ;;  %1307 = vmatpush1.bf16.msra.mxu1 %v10985_v5  ;;  %v17466_v5 = vld [vmem:[#allocation6_spill] sm:$0xff] }
  0xac   :  { %1102 = vmatprep.subr.bf16.mxu0 %v10992_v6  ;;  %1308 = vmatprep.subr.bf16.mxu1 %v10992_v6  ;;  %v17467_v6 = vld [vmem:[#allocation7_spill] sm:$0xff] }
  0xad   :  { %1128 = vmatprep.mubr.bf16.mxu0 %v11237_v49  ;;  %1334 = vmatprep.mubr.bf16.mxu1 %v11242_v50  ;;  %v10119_v49 = vld [vmem:[%s16975_s0 + $0x1c] ss:$112 sps:$4 sm:$0xff]  }
  0xae   :  { %v17491_v50 = vld [vmem:[#allocation31_spill] sm:$0xff] }
  0xaf   :  { %1103 = vmatpush1.bf16.msra.mxu0 %v10999_v7  ;;  %1309 = vmatpush1.bf16.msra.mxu1 %v10999_v7  ;;  %v17468_v7 = vld [vmem:[#allocation8_spill] sm:$0xff] }
  0xb0   :  { %1104 = vmatprep.subr.bf16.mxu0 %v11006_v8  ;;  %1310 = vmatprep.subr.bf16.mxu1 %v11006_v8  ;;  %v17469_v8 = vld [vmem:[#allocation9_spill] sm:$0xff]  ;;  %17496 = vst [vmem:[#allocation8_spill] sm:$0xff] %v11893_v43 }
  0xb1   :  { %17497 = vst [vmem:[#allocation9_spill] sm:$0xff] %v11900_v47 }
  0xb3   :  { %1105 = vmatpush1.bf16.msra.mxu0 %v11013_v9  ;;  %1311 = vmatpush1.bf16.msra.mxu1 %v11013_v9  ;;  %v17470_v9 = vld [vmem:[#allocation10_spill] sm:$0xff] }
  0xb4   :  { %1106 = vmatprep.subr.bf16.mxu0 %v11020_v10  ;;  %1312 = vmatprep.subr.bf16.mxu1 %v11020_v10  ;;  %v17471_v10 = vld [vmem:[#allocation11_spill] sm:$0xff] }
  0xb5   :  { %17499 = vst [vmem:[#allocation11_spill] sm:$0xff] %v11914_v42 }
  0xb7   :  { %1107 = vmatpush1.bf16.msra.mxu0 %v11027_v11  ;;  %1313 = vmatpush1.bf16.msra.mxu1 %v11027_v11  ;;  %v17472_v11 = vld [vmem:[#allocation12_spill] sm:$0xff] }
  0xb8   :  { %1108 = vmatprep.subr.bf16.mxu0 %v11034_v12  ;;  %1314 = vmatprep.subr.bf16.mxu1 %v11034_v12  ;;  %v17473_v12 = vld [vmem:[#allocation13_spill] sm:$0xff]  ;;  %17500 = vst [vmem:[#allocation12_spill] sm:$0xff] %v11921_v0 }
  0xbb   :  { %1109 = vmatpush1.bf16.msra.mxu0 %v11044_v14  ;;  %1315 = vmatpush1.bf16.msra.mxu1 %v11044_v14  ;;  %v17474_v14 = vld [vmem:[#allocation14_spill] sm:$0xff] }
  0xbc   :  { %1110 = vmatprep.subr.bf16.mxu0 %v11051_v15  ;;  %1316 = vmatprep.subr.bf16.mxu1 %v11051_v15  ;;  %v17475_v15 = vld [vmem:[#allocation15_spill] sm:$0xff] }
  0xbf   :  { %1111 = vmatpush1.bf16.msra.mxu0 %v11061_v17  ;;  %1317 = vmatpush1.bf16.msra.mxu1 %v11061_v17  ;;  %v11734_v17 = vld [vmem:[%s16975_s0 + $0x10] ss:$112 sps:$4 sm:$0xff]  }
  0xc0   :  { %1112 = vmatprep.subr.bf16.mxu0 %v11068_v18  ;;  %1318 = vmatprep.subr.bf16.mxu1 %v11068_v18  ;;  %v11739_v18 = vld [vmem:[%s16975_s0 + $0x14] ss:$112 sps:$4 sm:$0xff]  }
  0xc3   :  { %1113 = vmatpush1.bf16.msra.mxu0 %v11075_v19  ;;  %1319 = vmatpush1.bf16.msra.mxu1 %v11075_v19  ;;  %v1050_v19 = vld [vmem:[%s16975_s0 + $0xf0] sm:$0xff] }
  0xc4   :  { %1114 = vmatprep.subr.bf16.mxu0 %v11082_v20  ;;  %1320 = vmatprep.subr.bf16.mxu1 %v11082_v20  ;;  %v1256_v20 = vld [vmem:[%s16975_s0 + $0xf4] sm:$0xff] }
  0xc7   :  { %1115 = vmatpush1.bf16.msra.mxu0 %v11089_v21  ;;  %1321 = vmatpush1.bf16.msra.mxu1 %v11089_v21  ;;  %v17476_v21 = vld [vmem:[#allocation16_spill] sm:$0xff] }
  0xc8   :  { %1116 = vmatprep.subr.bf16.mxu0 %v11096_v22  ;;  %1322 = vmatprep.subr.bf16.mxu1 %v11096_v22  ;;  %v17477_v22 = vld [vmem:[#allocation17_spill] sm:$0xff] }
  0xcb   :  { %1117 = vmatpush1.bf16.msra.mxu0 %v11103_v23  ;;  %1323 = vmatpush1.bf16.msra.mxu1 %v11103_v23  ;;  %v11751_v23 = vcombine.high %v1050_v19, %v1050_v19 }
  0xcc   :  { %1118 = vmatprep.subr.bf16.mxu0 %v11110_v24  ;;  %1324 = vmatprep.subr.bf16.mxu1 %v11110_v24  ;;  %v11753_v24 = vcombine.high %v1256_v20, %v1256_v20 }
  0xcf   :  { %1119 = vmatpush1.bf16.msra.mxu0 %v11117_v25  ;;  %1325 = vmatpush1.bf16.msra.mxu1 %v11117_v25  ;;  %v17478_v25 = vld [vmem:[#allocation18_spill] sm:$0xff] }
  0xd0   :  { %1120 = vmatprep.subr.bf16.mxu0 %v11124_v26  ;;  %1326 = vmatprep.subr.bf16.mxu1 %v11124_v26  ;;  %v17479_v26 = vld [vmem:[#allocation19_spill] sm:$0xff] }
  0xd3   :  { %1121 = vmatpush1.bf16.msra.mxu0 %v11131_v27  ;;  %1327 = vmatpush1.bf16.msra.mxu1 %v11131_v27  ;;  %v11763_v27 = vcombine.low %v1050_v19, %v1050_v19  ;;  %v11942_v19 = vld [vmem:[%s16974_s1 + $0x94] ss:$8 sps:$4 sm:$0xff]  }
  0xd4   :  { %1122 = vmatprep.subr.bf16.mxu0 %v11138_v28  ;;  %1328 = vmatprep.subr.bf16.mxu1 %v11138_v28  ;;  %v11765_v28 = vcombine.low %v1256_v20, %v1256_v20  ;;  %17503 = vst [vmem:[#allocation15_spill] sm:$0xff] %v11942_v19  ;;  %v11949_v20 = vld [vmem:[%s16974_s1 + $0x90] ss:$8 sps:$4 sm:$0xff]  }
  0xd5   :  { %17504 = vst [vmem:[#allocation16_spill] sm:$0xff] %v11949_v20 }
  0xd7   :  { %1123 = vmatpush1.bf16.msra.mxu0 %v11145_v29  ;;  %1329 = vmatpush1.bf16.msra.mxu1 %v11145_v29  ;;  %v17480_v29 = vld [vmem:[#allocation20_spill] sm:$0xff] }
  0xd8   :  { %1124 = vmatprep.subr.bf16.mxu0 %v11152_v30  ;;  %1330 = vmatprep.subr.bf16.mxu1 %v11152_v30  ;;  %v17481_v30 = vld [vmem:[#allocation21_spill] sm:$0xff] }
  0xdb   :  { %1125 = vmatpush1.bf16.msra.mxu0 %v11159_v31  ;;  %1331 = vmatpush1.bf16.msra.mxu1 %v11159_v31  ;;  %v17482_v31 = vld [vmem:[#allocation22_spill] sm:$0xff] }
  0xdc   :  { %1126 = vmatprep.subr.bf16.mxu0 %v11166_v32  ;;  %1332 = vmatprep.subr.bf16.mxu1 %v11166_v32  ;;  %v17483_v32 = vld [vmem:[#allocation23_spill] sm:$0xff] }
  0xdf   :  { %1127 = vmatpush1.bf16.msra.mxu0 %v11173_v33  ;;  %1333 = vmatpush1.bf16.msra.mxu1 %v11173_v33  ;;  %v17484_v33 = vld [vmem:[#allocation24_spill] sm:$0xff] }
  0xe0   :  { %1147 = vmatprep.subr.bf16.mxu0 %v11178_v34  ;;  %1353 = vmatprep.subr.bf16.mxu1 %v11178_v34  ;;  %v17485_v34 = vld [vmem:[#allocation25_spill] sm:$0xff] }
  0xe2   :  { %1129 = vmatmul.mubr.bf16.vlgmr.msra.gmra.mrb[8].mxu0 %v11433_v39  ;;  %1335 = vmatmul.mubr.bf16.vlgmr.msra.gmra.mrb[8].mxu1 %v11438_v48  ;;  %v11886_v39 = vld [vmem:[%s16974_s1 + $0x54] ss:$8 sps:$4 sm:$0xff]   ;;  %v11907_v48 = vld [vmem:[%s16974_s1 + $0x60] ss:$8 sps:$4 sm:$0xff]  }
  0xe3   :  { %1148 = vmatpush1.bf16.msra.mxu0 %v11191_v37  ;;  %1354 = vmatpush1.bf16.msra.mxu1 %v11191_v37  ;;  %v17486_v37 = vld [vmem:[#allocation26_spill] sm:$0xff]  ;;  %17495 = vst [vmem:[#allocation7_spill] sm:$0xff] %v11886_v39  ;;  %17498 = vst [vmem:[#allocation10_spill] sm:$0xff] %v11907_v48 }
  0xe4   :  { %1149 = vmatprep.subr.bf16.mxu0 %v11204_v40  ;;  %1355 = vmatprep.subr.bf16.mxu1 %v11204_v40  ;;  %v17487_v40 = vld [vmem:[#allocation27_spill] sm:$0xff] }
  0xe5   :  { %1138 = vmatprep.mubr.bf16.mxu0 %v11460_v16  ;;  %1344 = vmatprep.mubr.bf16.mxu1 %v11462_v13  ;;  %v11865_v13 = vld [vmem:[%s16974_s1 + $0x30] ss:$8 sps:$4 sm:$0xff]   ;;  %v11872_v16 = vld [vmem:[%s16974_s1 + $0x44] ss:$8 sps:$4 sm:$0xff]  }
  0xe6   :  { %17492 = vst [vmem:[#allocation4_spill] sm:$0xff] %v11865_v13  ;;  %17493 = vst [vmem:[#allocation5_spill] sm:$0xff] %v11872_v16 }
  0xe7   :  { %1150 = vmatpush1.bf16.msra.mxu0 %v11211_v41  ;;  %1356 = vmatpush1.bf16.msra.mxu1 %v11211_v41  ;;  %v17488_v41 = vld [vmem:[#allocation28_spill] sm:$0xff] }
  0xe8   :  { %1151 = vmatprep.subr.bf16.mxu0 %v11216_v44  ;;  %1357 = vmatprep.subr.bf16.mxu1 %v11216_v44  ;;  %v17489_v44 = vld [vmem:[#allocation29_spill] sm:$0xff] }
  0xea   :  { %1139 = vmatmul.mubr.bf16.gmra.mrb[12].mxu0 %v11482_v63  ;;  %1345 = vmatmul.mubr.bf16.gmra.mrb[12].mxu1 %v11484_v36  ;;  %v11856_v63 = vld [vmem:[%s16974_s1 + $0x34] ss:$8 sps:$4 sm:$0xff]   ;;  %v11879_v36 = vld [vmem:[%s16974_s1 + $0x40] ss:$8 sps:$4 sm:$0xff]  }
  0xeb   :  { %1152 = vmatpush1.bf16.msra.mxu0 %v11225_v45  ;;  %1358 = vmatpush1.bf16.msra.mxu1 %v11225_v45  ;;  %v17490_v45 = vld [vmem:[#allocation30_spill] sm:$0xff]  ;;  %17494 = vst [vmem:[#allocation6_spill] sm:$0xff] %v11879_v36 }
  0xec   :  { %1153 = vmatprep.subr.bf16.mxu0 %v11230_v46  ;;  %1359 = vmatprep.subr.bf16.mxu1 %v11230_v46  ;;  %v10118_v46 = vld [vmem:[%s16975_s0 + $0x18] ss:$112 sps:$4 sm:$0xff]  }
  0xed   :  { %1179 = vmatprep.mubr.bf16.mxu0 %v11668_v1  ;;  %1385 = vmatprep.mubr.bf16.mxu1 %v11673_v2 }
  0xef   :  { %1154 = vmatpush1.bf16.msra.mxu0 %v11249_v51  ;;  %1360 = vmatpush1.bf16.msra.mxu1 %v11249_v51  ;;  %v11806_v51 = vld [vmem:[%s16974_s1 + $0x4] ss:$8 sps:$4 sm:$0xff]  }
  0xf0   :  { %1155 = vmatprep.subr.bf16.mxu0 %v11254_v52  ;;  %1361 = vmatprep.subr.bf16.mxu1 %v11254_v52  ;;  %v11813_v52 = vld [vmem:[%s16974_s1] ss:$8 sps:$4 sm:$0xff]  }
  0xf3   :  { %1156 = vmatpush1.bf16.msra.mxu0 %v11263_v53  ;;  %1362 = vmatpush1.bf16.msra.mxu1 %v11263_v53  ;;  %v11820_v53 = vld [vmem:[%s16974_s1 + $0x14] ss:$8 sps:$4 sm:$0xff]  }
  0xf4   :  { %1157 = vmatprep.subr.bf16.mxu0 %v11270_v54  ;;  %1363 = vmatprep.subr.bf16.mxu1 %v11270_v54  ;;  %v10120_v54 = vld [vmem:[%s16975_s0 + $0xf8] ss:$0 sps:$4 sm:$0xff]  }
  0xf7   :  { %1158 = vmatpush1.bf16.msra.mxu0 %v11279_v55  ;;  %1364 = vmatpush1.bf16.msra.mxu1 %v11279_v55  ;;  %v10121_v55 = vld [vmem:[%s16975_s0 + $0xfc] ss:$0 sps:$4 sm:$0xff]  }
  0xf8   :  { %1159 = vmatprep.subr.bf16.mxu0 %v11284_v56  ;;  %1365 = vmatprep.subr.bf16.mxu1 %v11284_v56  ;;  %v11835_v56 = vld [vmem:[%s16974_s1 + $0x10] ss:$8 sps:$4 sm:$0xff]  }
  0xfb   :  { %1160 = vmatpush1.bf16.msra.mxu0 %v11293_v57  ;;  %1366 = vmatpush1.bf16.msra.mxu1 %v11293_v57  ;;  %v11842_v57 = vld [vmem:[%s16974_s1 + $0x24] ss:$8 sps:$4 sm:$0xff]  }
  0xfc   :  { %1161 = vmatprep.subr.bf16.mxu0 %v11298_v58  ;;  %1367 = vmatprep.subr.bf16.mxu1 %v11298_v58  ;;  %v11849_v58 = vld [vmem:[%s16974_s1 + $0x20] ss:$8 sps:$4 sm:$0xff]  }
  0xff   :  { %1162 = vmatpush1.bf16.msra.mxu0 %v11307_v59  ;;  %1368 = vmatpush1.bf16.msra.mxu1 %v11307_v59 }
 0x100   :  { %1163 = vmatprep.subr.bf16.mxu0 %v11312_v60  ;;  %1369 = vmatprep.subr.bf16.mxu1 %v11312_v60 }
 0x103   :  { %1164 = vmatpush1.bf16.msra.mxu0 %v11321_v61  ;;  %1370 = vmatpush1.bf16.msra.mxu1 %v11321_v61 }
 0x104   :  { %1165 = vmatprep.subr.bf16.mxu0 %v11326_v62  ;;  %1371 = vmatprep.subr.bf16.mxu1 %v11326_v62 }
 0x107   :  { %1166 = vmatpush1.bf16.msra.mxu0 %v17464_v3  ;;  %1372 = vmatpush1.bf16.msra.mxu1 %v17464_v3 }
 0x108   :  { %1167 = vmatprep.subr.bf16.mxu0 %v17465_v4  ;;  %1373 = vmatprep.subr.bf16.mxu1 %v17465_v4 }
 0x10b   :  { %1168 = vmatpush1.bf16.msra.mxu0 %v17466_v5  ;;  %1374 = vmatpush1.bf16.msra.mxu1 %v17466_v5 }
 0x10c   :  { %1169 = vmatprep.subr.bf16.mxu0 %v17467_v6  ;;  %1375 = vmatprep.subr.bf16.mxu1 %v17467_v6 }
 0x10f   :  { %1170 = vmatpush1.bf16.msra.mxu0 %v17468_v7  ;;  %1376 = vmatpush1.bf16.msra.mxu1 %v17468_v7 }
 0x110   :  { %1171 = vmatprep.subr.bf16.mxu0 %v17469_v8  ;;  %1377 = vmatprep.subr.bf16.mxu1 %v17469_v8 }
 0x113   :  { %1172 = vmatpush1.bf16.msra.mxu0 %v17470_v9  ;;  %1378 = vmatpush1.bf16.msra.mxu1 %v17470_v9 }
 0x114   :  { %1173 = vmatprep.subr.bf16.mxu0 %v17471_v10  ;;  %1379 = vmatprep.subr.bf16.mxu1 %v17471_v10 }
 0x117   :  { %1174 = vmatpush1.bf16.msra.mxu0 %v17472_v11  ;;  %1380 = vmatpush1.bf16.msra.mxu1 %v17472_v11 }
 0x118   :  { %1175 = vmatprep.subr.bf16.mxu0 %v17473_v12  ;;  %1381 = vmatprep.subr.bf16.mxu1 %v17473_v12 }
 0x11b   :  { %1176 = vmatpush1.bf16.msra.mxu0 %v17474_v14  ;;  %1382 = vmatpush1.bf16.msra.mxu1 %v17474_v14 }
 0x11c   :  { %1177 = vmatprep.subr.bf16.mxu0 %v17475_v15  ;;  %1383 = vmatprep.subr.bf16.mxu1 %v17475_v15 }
 0x11f   :  { %1178 = vmatpush1.bf16.msra.mxu0 %v17476_v21  ;;  %1384 = vmatpush1.bf16.msra.mxu1 %v17476_v21 }
 0x120   :  { %1198 = vmatprep.subr.bf16.mxu0 %v17477_v22  ;;  %1404 = vmatprep.subr.bf16.mxu1 %v17477_v22 }
 0x122   :  { %1180 = vmatmul.mubr.bf16.vlgmr.msra.gmra.mrb[8].mxu0 %v11734_v17  ;;  %1386 = vmatmul.mubr.bf16.vlgmr.msra.gmra.mrb[8].mxu1 %v11739_v18 }
 0x123   :  { %1199 = vmatpush1.bf16.msra.mxu0 %v17478_v25  ;;  %1405 = vmatpush1.bf16.msra.mxu1 %v17478_v25 }
 0x124   :  { %1200 = vmatprep.subr.bf16.mxu0 %v17479_v26  ;;  %1406 = vmatprep.subr.bf16.mxu1 %v17479_v26 }
 0x125   :  { %1189 = vmatprep.mubr.bf16.mxu0 %v11751_v23  ;;  %1395 = vmatprep.mubr.bf16.mxu1 %v11753_v24 }
 0x127   :  { %1201 = vmatpush1.bf16.msra.mxu0 %v17480_v29  ;;  %1407 = vmatpush1.bf16.msra.mxu1 %v17480_v29 }
 0x128   :  { %1202 = vmatprep.subr.bf16.mxu0 %v17481_v30  ;;  %1408 = vmatprep.subr.bf16.mxu1 %v17481_v30 }
 0x12a   :  { %1190 = vmatmul.mubr.bf16.gmra.mrb[12].mxu0 %v11763_v27  ;;  %1396 = vmatmul.mubr.bf16.gmra.mrb[12].mxu1 %v11765_v28 }
 0x12b   :  { %1203 = vmatpush1.bf16.msra.mxu0 %v17482_v31  ;;  %1409 = vmatpush1.bf16.msra.mxu1 %v17482_v31 }
 0x12c   :  { %1204 = vmatprep.subr.bf16.mxu0 %v17483_v32  ;;  %1410 = vmatprep.subr.bf16.mxu1 %v17483_v32 }
 0x12d   :  { %1230 = vmatprep.mubr.bf16.mxu0 %v17463_v38  ;;  %1436 = vmatprep.mubr.bf16.mxu1 %v17463_v38 }
 0x12f   :  { %1205 = vmatpush1.bf16.msra.mxu0 %v17484_v33  ;;  %1411 = vmatpush1.bf16.msra.mxu1 %v17484_v33 }
 0x130   :  { %1206 = vmatprep.subr.bf16.mxu0 %v17485_v34  ;;  %1412 = vmatprep.subr.bf16.mxu1 %v17485_v34 }
 0x133   :  { %1207 = vmatpush1.bf16.msra.mxu0 %v17486_v37  ;;  %1413 = vmatpush1.bf16.msra.mxu1 %v17486_v37 }
 0x134   :  { %1208 = vmatprep.subr.bf16.mxu0 %v17487_v40  ;;  %1414 = vmatprep.subr.bf16.mxu1 %v17487_v40 }
 0x137   :  { %1209 = vmatpush1.bf16.msra.mxu0 %v17488_v41  ;;  %1415 = vmatpush1.bf16.msra.mxu1 %v17488_v41 }
 0x138   :  { %1210 = vmatprep.subr.bf16.mxu0 %v17489_v44  ;;  %1416 = vmatprep.subr.bf16.mxu1 %v17489_v44 }
 0x13b   :  { %1211 = vmatpush1.bf16.msra.mxu0 %v11551_v35  ;;  %1417 = vmatpush1.bf16.msra.mxu1 %v11551_v35 }
 0x13c   :  { %1212 = vmatprep.subr.bf16.mxu0 %v17490_v45  ;;  %1418 = vmatprep.subr.bf16.mxu1 %v17490_v45 }
 0x13f   :  { %1213 = vmatpush1.bf16.msra.mxu0 %v17491_v50  ;;  %1419 = vmatpush1.bf16.msra.mxu1 %v17491_v50 }
 0x140   :  { %1546 = vmatprep.subr.bf16.mxu0 %v11806_v51  ;;  %1752 = vmatprep.subr.bf16.mxu1 %v11806_v51 }
 0x142   :  { %1231 = vmatmul.mubr.bf16.vlgmr.msra.gmra.mrb[8].mxu0 %v10118_v46  ;;  %1437 = vmatmul.mubr.bf16.vlgmr.msra.gmra.mrb[8].mxu1 %v10119_v49  ;;  %v11956_v46 = vld [vmem:[%s16974_s1 + $0xa4] ss:$8 sps:$4 sm:$0xff]   ;;  %v11963_v49 = vld [vmem:[%s16974_s1 + $0xa0] ss:$8 sps:$4 sm:$0xff]  }
 0x143   :  { %1547 = vmatpush1.bf16.msra.mxu0 %v11813_v52  ;;  %1753 = vmatpush1.bf16.msra.mxu1 %v11813_v52  ;;  %17505 = vst [vmem:[#allocation17_spill] sm:$0xff] %v11956_v46  ;;  %17506 = vst [vmem:[#allocation18_spill] sm:$0xff] %v11963_v49 }
 0x144   :  { %1548 = vmatprep.subr.bf16.mxu0 %v11820_v53  ;;  %1754 = vmatprep.subr.bf16.mxu1 %v11820_v53 }
 0x145   :  { %1240 = vmatprep.mubr.bf16.mxu0 %v17463_v38  ;;  %1446 = vmatprep.mubr.bf16.mxu1 %v17463_v38 }
 0x147   :  { %1549 = vmatpush1.bf16.msra.mxu0 %v11835_v56  ;;  %1755 = vmatpush1.bf16.msra.mxu1 %v11835_v56 }
 0x148   :  { %1550 = vmatprep.subr.bf16.mxu0 %v11842_v57  ;;  %1756 = vmatprep.subr.bf16.mxu1 %v11842_v57 }
 0x14a   :  { %1241 = vmatmul.mubr.bf16.gmra.mrb[12].mxu0 %v10120_v54  ;;  %1447 = vmatmul.mubr.bf16.gmra.mrb[12].mxu1 %v10121_v55  ;;  %v11970_v54 = vld [vmem:[%s16974_s1 + $0xb4] ss:$8 sps:$4 sm:$0xff]   ;;  %v11977_v55 = vld [vmem:[%s16974_s1 + $0xb0] ss:$8 sps:$4 sm:$0xff]  }
 0x14b   :  { %1551 = vmatpush1.bf16.msra.mxu0 %v11849_v58  ;;  %1757 = vmatpush1.bf16.msra.mxu1 %v11849_v58  ;;  %17507 = vst [vmem:[#allocation19_spill] sm:$0xff] %v11970_v54  ;;  %17508 = vst [vmem:[#allocation20_spill] sm:$0xff] %v11977_v55 }
 0x14c   :  { %1552 = vmatprep.subr.bf16.mxu0 %v11856_v63  ;;  %1758 = vmatprep.subr.bf16.mxu1 %v11856_v63 }
 0x14d   :  { %1578 = vmatprep.mubr.bf16.mxu0 %v11668_v1  ;;  %1784 = vmatprep.mubr.bf16.mxu1 %v11673_v2  ;;  %v11928_v1 = vld [vmem:[%s16974_s1 + $0x84] ss:$8 sps:$4 sm:$0xff]   ;;  %v11935_v2 = vld [vmem:[%s16974_s1 + $0x80] ss:$8 sps:$4 sm:$0xff]  }
 0x14e   :  { %17501 = vst [vmem:[#allocation13_spill] sm:$0xff] %v11928_v1  ;;  %17502 = vst [vmem:[#allocation14_spill] sm:$0xff] %v11935_v2 }
 0x14f   :  { %1553 = vmatpush1.bf16.msra.mxu0 %v11865_v13  ;;  %1759 = vmatpush1.bf16.msra.mxu1 %v11865_v13  ;;  %v12040_v13 = vld [vmem:[%s16974_s1 + $0xf0] ss:$8 sps:$4 sm:$0xff]  }
 0x150   :  { %1554 = vmatprep.subr.bf16.mxu0 %v11872_v16  ;;  %1760 = vmatprep.subr.bf16.mxu1 %v11872_v16 }
 0x153   :  { %1555 = vmatpush1.bf16.msra.mxu0 %v11879_v36  ;;  %1761 = vmatpush1.bf16.msra.mxu1 %v11879_v36 }
 0x154   :  { %1556 = vmatprep.subr.bf16.mxu0 %v11886_v39  ;;  %1762 = vmatprep.subr.bf16.mxu1 %v11886_v39 }
 0x157   :  { %1557 = vmatpush1.bf16.msra.mxu0 %v11893_v43  ;;  %1763 = vmatpush1.bf16.msra.mxu1 %v11893_v43 }
 0x158   :  { %1558 = vmatprep.subr.bf16.mxu0 %v11900_v47  ;;  %1764 = vmatprep.subr.bf16.mxu1 %v11900_v47 }
 0x15b   :  { %1559 = vmatpush1.bf16.msra.mxu0 %v11907_v48  ;;  %1765 = vmatpush1.bf16.msra.mxu1 %v11907_v48 }
 0x15c   :  { %1560 = vmatprep.subr.bf16.mxu0 %v11914_v42  ;;  %1766 = vmatprep.subr.bf16.mxu1 %v11914_v42 }
 0x15f   :  { %1561 = vmatpush1.bf16.msra.mxu0 %v11921_v0  ;;  %1767 = vmatpush1.bf16.msra.mxu1 %v11921_v0 }
 0x160   :  { %1562 = vmatprep.subr.bf16.mxu0 %v11928_v1  ;;  %1768 = vmatprep.subr.bf16.mxu1 %v11928_v1 }
 0x163   :  { %1563 = vmatpush1.bf16.msra.mxu0 %v11935_v2  ;;  %1769 = vmatpush1.bf16.msra.mxu1 %v11935_v2 }
 0x164   :  { %1564 = vmatprep.subr.bf16.mxu0 %v11942_v19  ;;  %1770 = vmatprep.subr.bf16.mxu1 %v11942_v19 }
 0x167   :  { %1565 = vmatpush1.bf16.msra.mxu0 %v11949_v20  ;;  %1771 = vmatpush1.bf16.msra.mxu1 %v11949_v20 }
 0x168   :  { %1566 = vmatprep.subr.bf16.mxu0 %v11956_v46  ;;  %1772 = vmatprep.subr.bf16.mxu1 %v11956_v46 }
 0x16b   :  { %1567 = vmatpush1.bf16.msra.mxu0 %v11963_v49  ;;  %1773 = vmatpush1.bf16.msra.mxu1 %v11963_v49  ;;  %v11984_v49 = vld [vmem:[%s16974_s1 + $0xc4] ss:$8 sps:$4 sm:$0xff]  }
 0x16c   :  { %1568 = vmatprep.subr.bf16.mxu0 %v11970_v54  ;;  %1774 = vmatprep.subr.bf16.mxu1 %v11970_v54  ;;  %17509 = vst [vmem:[#allocation21_spill] sm:$0xff] %v11984_v49  ;;  %v11991_v54 = vld [vmem:[%s16974_s1 + $0xc0] ss:$8 sps:$4 sm:$0xff]  }
 0x16d   :  { %17510 = vst [vmem:[#allocation22_spill] sm:$0xff] %v11991_v54 }
 0x16f   :  { %1569 = vmatpush1.bf16.msra.mxu0 %v11977_v55  ;;  %1775 = vmatpush1.bf16.msra.mxu1 %v11977_v55  ;;  %v11998_v55 = vld [vmem:[%s16974_s1 + $0xd4] ss:$8 sps:$4 sm:$0xff]  }
 0x170   :  { %1570 = vmatprep.subr.bf16.mxu0 %v11984_v49  ;;  %1776 = vmatprep.subr.bf16.mxu1 %v11984_v49  ;;  %17511 = vst [vmem:[#allocation23_spill] sm:$0xff] %v11998_v55 }
 0x173   :  { %1571 = vmatpush1.bf16.msra.mxu0 %v11991_v54  ;;  %1777 = vmatpush1.bf16.msra.mxu1 %v11991_v54  ;;  %v12005_v54 = vld [vmem:[%s16974_s1 + $0xd0] ss:$8 sps:$4 sm:$0xff]  }
 0x174   :  { %1572 = vmatprep.subr.bf16.mxu0 %v11998_v55  ;;  %1778 = vmatprep.subr.bf16.mxu1 %v11998_v55  ;;  %17512 = vst [vmem:[#allocation24_spill] sm:$0xff] %v12005_v54  ;;  %v12012_v55 = vld [vmem:[%s16976_s2] ss:$0 sm:$0xff] }
 0x175   :  { %v782_v46 = vpop.f32.mrb[0].mxu0  ;;  %v988_v49 = vpop.f32.mrb[0].mxu1 }
 0x176   :  { %v1005_v20 = vmax.f32 %v782_v46, %v988_v49  ;;  %v784_v19 = vpop.f32.mrb[1].mxu0  ;;  %v990_v2 = vpop.f32.mrb[1].mxu1 }
 0x177   :  { %v1006_v1 = vmax.f32 %v784_v19, %v990_v2  ;;  %v786_v0 = vpop.f32.mrb[2].mxu0  ;;  %v992_v42 = vpop.f32.mrb[2].mxu1  ;;  %1573 = vmatpush1.bf16.msra.mxu0 %v12005_v54  ;;  %1779 = vmatpush1.bf16.msra.mxu1 %v12005_v54  ;;  %v12017_v2 = vld [vmem:[%s16974_s1 + $0xe4] ss:$8 sps:$4 sm:$0xff]  }
 0x178   :  { %v1007_v46 = vmax.f32 %v786_v0, %v992_v42  ;;  %v788_v49 = vpop.f32.mrb[3].mxu0  ;;  %v994_v48 = vpop.f32.mrb[3].mxu1  ;;  %17513 = vst [vmem:[#allocation25_spill] sm:$0xff] %v12017_v2  ;;  %1574 = vmatprep.subr.bf16.mxu0 %v12017_v2  ;;  %1780 = vmatprep.subr.bf16.mxu1 %v12017_v2  ;;  %v12025_v42 = vld [vmem:[%s16974_s1 + $0xe0] ss:$8 sps:$4 sm:$0xff]  }
 0x179   :  { %v1011_v19 = vmax.f32 %v1005_v20, %v1006_v1  ;;  %v1008_v47 = vmax.f32 %v788_v49, %v994_v48  ;;  %17514 = vst [vmem:[#allocation26_spill] sm:$0xff] %v12025_v42  ;;  %v12032_v0 = vld [vmem:[%s16974_s1 + $0xf4] ss:$8 sps:$4 sm:$0xff]  }
 0x17b   :  { %v1021_v54 = vadd.f32 %v12012_v55, %v1011_v19  ;;  %v1012_v43 = vmax.f32 %v1007_v46, %v1008_v47  ;;  %1575 = vmatpush1.bf16.msra.mxu0 %v12025_v42  ;;  %1781 = vmatpush1.bf16.msra.mxu1 %v12025_v42 }
 0x17c   :  { %1576 = vmatprep.subr.bf16.mxu0 %v12032_v0  ;;  %1782 = vmatprep.subr.bf16.mxu1 %v12032_v0 }
 0x17d   :  { %v1024_v48 = vmax.f32 %v1021_v54, 0.0  ;;  %v1022_v47 = vadd.f32 %v12012_v55, %v1012_v43  ;;  %v792_v1 = vpop.f32.mrb[4].mxu0  ;;  %v998_v20 = vpop.f32.mrb[4].mxu1 }
 0x17e   :  { %v1009_v46 = vmax.f32 %v792_v1, %v998_v20  ;;  %v794_v49 = vpop.f32.mrb[5].mxu0  ;;  %v1000_v19 = vpop.f32.mrb[5].mxu1  ;;  %v12047_v1 = vld [vmem:[%s16974_s1 + $0x104] ss:$8 sps:$4 sm:$0xff]   ;;  %v12099_v20 = vld [vmem:[%s16974_s1 + $0x120] ss:$8 sps:$4 sm:$0xff]  }
 0x17f   :  { %v9317_v2 = vpack.c.bf16 %v1024_v48, %v1024_v48  ;;  %v1025_v39 = vmax.f32 %v1022_v47, 0.0  ;;  %v1010_v42 = vmax.f32 %v794_v49, %v1000_v19  ;;  %v796_v36 = vpop.f32.mrb[6].mxu0  ;;  %v1002_v16 = vpop.f32.mrb[6].mxu1  ;;  %1577 = vmatpush1.bf16.msra.mxu0 %v12040_v13  ;;  %1783 = vmatpush1.bf16.msra.mxu1 %v12040_v13  ;;  %v12057_v47 = vld [vmem:[%s16974_s1 + $0x100] ss:$8 sps:$4 sm:$0xff]  }
 0x180   :  { %v797_v43 = vpop.f32.mrb[7].mxu0  ;;  %v1003_v54 = vpop.f32.mrb[7].mxu1  ;;  %1597 = vmatprep.subr.bf16.mxu0 %v12047_v1  ;;  %1803 = vmatprep.subr.bf16.mxu1 %v12047_v1  ;;  %v12129_v49 = vld [vmem:[%s16974_s1 + $0x140] ss:$8 sps:$4 sm:$0xff]   ;;  %v12136_v19 = vld [vmem:[%s16974_s1 + $0x154] ss:$8 sps:$4 sm:$0xff]  }
 0x181   :  { %1040 = vst [vmem:[#allocation2] sm:$0xf] %v9317_v2  ;;  %v9318_v16 = vpack.c.bf16 %v1025_v39, %v1025_v39  ;;  %v1013_v36 = vmax.f32 %v1009_v46, %v1010_v42  ;;  %v12064_v39 = vld [vmem:[%s16974_s1 + $0x114] ss:$8 sps:$4 sm:$0xff]   ;;  %v12073_v2 = vld [vmem:[%s16974_s1 + $0x110] ss:$8 sps:$4 sm:$0xff]  }
 0x182   :  { %1579 = vmatmul.mubr.bf16.vlgmr.msra.gmra.mrb[16].mxu0 %v11734_v17  ;;  %1785 = vmatmul.mubr.bf16.vlgmr.msra.gmra.mrb[16].mxu1 %v11739_v18  ;;  %v12080_v42 = vld [vmem:[%s16974_s1 + $0x124] ss:$8 sps:$4 sm:$0xff]   ;;  %v12106_v46 = vld [vmem:[%s16974_s1 + $0x134] ss:$8 sps:$4 sm:$0xff]   ;;  %v12143_v43 = vld [vmem:[%s16974_s1 + $0x150] ss:$8 sps:$4 sm:$0xff]  }
 0x183   :  { %1041 = vst [vmem:[#allocation2 + $0x30] sm:$0xf] %v9318_v16  ;;  %v1023_v48 = vadd.f32 %v12012_v55, %v1013_v36  ;;  %1598 = vmatpush1.bf16.msra.mxu0 %v12057_v47  ;;  %1804 = vmatpush1.bf16.msra.mxu1 %v12057_v47  ;;  %v12150_v54 = vld [vmem:[%s16974_s1 + $0x164] ss:$8 sps:$4 sm:$0xff]   ;;  %v12157_v16 = vld [vmem:[%s16974_s1 + $0x160] ss:$8 sps:$4 sm:$0xff]  }
 0x184   :  { %1599 = vmatprep.subr.bf16.mxu0 %v12064_v39  ;;  %1805 = vmatprep.subr.bf16.mxu1 %v12064_v39  ;;  %v12164_v36 = vld [vmem:[%s16974_s1 + $0x174] ss:$8 sps:$4 sm:$0xff]  }
 0x185   :  { %v1026_v17 = vmax.f32 %v1023_v48, 0.0  ;;  %1588 = vmatprep.mubr.bf16.mxu0 %v11751_v23  ;;  %1794 = vmatprep.mubr.bf16.mxu1 %v11753_v24  ;;  %v12087_v23 = vld [vmem:[%s16975_s0 + $0x1c] ss:$112 sps:$4 sm:$0xff]   ;;  %v12092_v24 = vld [vmem:[%s16975_s0 + $0x20] ss:$112 sps:$4 sm:$0xff]  }
 0x187   :  { %v9319_v18 = vpack.c.bf16 %v1026_v17, %v1026_v17  ;;  %1600 = vmatpush1.bf16.msra.mxu0 %v12073_v2  ;;  %1806 = vmatpush1.bf16.msra.mxu1 %v12073_v2 }
 0x188   :  { %1601 = vmatprep.subr.bf16.mxu0 %v12080_v42  ;;  %1807 = vmatprep.subr.bf16.mxu1 %v12080_v42 }
 0x189   :  { %1042 = vst [vmem:[#allocation2 + $0x60] sm:$0xf] %v9319_v18 }
 0x18a   :  { %1589 = vmatmul.mubr.bf16.gmra.mrb[20].mxu0 %v11763_v27  ;;  %1795 = vmatmul.mubr.bf16.gmra.mrb[20].mxu1 %v11765_v28  ;;  %v12115_v27 = vld [vmem:[%s16974_s1 + $0x130] ss:$8 sps:$4 sm:$0xff]   ;;  %v12122_v28 = vld [vmem:[%s16974_s1 + $0x144] ss:$8 sps:$4 sm:$0xff]  }
 0x18b   :  { %1602 = vmatpush1.bf16.msra.mxu0 %v12099_v20  ;;  %1808 = vmatpush1.bf16.msra.mxu1 %v12099_v20 }
 0x18c   :  { %1603 = vmatprep.subr.bf16.mxu0 %v12106_v46  ;;  %1809 = vmatprep.subr.bf16.mxu1 %v12106_v46 }
 0x18d   :  { %1629 = vmatprep.mubr.bf16.mxu0 %v12087_v23  ;;  %1835 = vmatprep.mubr.bf16.mxu1 %v12092_v24 }
 0x18f   :  { %1604 = vmatpush1.bf16.msra.mxu0 %v12115_v27  ;;  %1810 = vmatpush1.bf16.msra.mxu1 %v12115_v27 }
 0x190   :  { %1605 = vmatprep.subr.bf16.mxu0 %v12122_v28  ;;  %1811 = vmatprep.subr.bf16.mxu1 %v12122_v28 }
 0x193   :  { %1606 = vmatpush1.bf16.msra.mxu0 %v12129_v49  ;;  %1812 = vmatpush1.bf16.msra.mxu1 %v12129_v49 }
 0x194   :  { %1607 = vmatprep.subr.bf16.mxu0 %v12136_v19  ;;  %1813 = vmatprep.subr.bf16.mxu1 %v12136_v19 }
 0x197   :  { %1608 = vmatpush1.bf16.msra.mxu0 %v12143_v43  ;;  %1814 = vmatpush1.bf16.msra.mxu1 %v12143_v43 }
 0x198   :  { %1609 = vmatprep.subr.bf16.mxu0 %v12150_v54  ;;  %1815 = vmatprep.subr.bf16.mxu1 %v12150_v54 }
 0x19b   :  { %1610 = vmatpush1.bf16.msra.mxu0 %v12157_v16  ;;  %1816 = vmatpush1.bf16.msra.mxu1 %v12157_v16 }
 0x19c   :  { %1611 = vmatprep.subr.bf16.mxu0 %v12164_v36  ;;  %1817 = vmatprep.subr.bf16.mxu1 %v12164_v36 }
 0x19f   :  { %1612 = vmatpush1.bf16.msra.mxu0 %v11307_v59  ;;  %1818 = vmatpush1.bf16.msra.mxu1 %v11307_v59  ;;  %v12203_v59 = vld [vmem:[%s16975_s0 + $0x18] ss:$112 sps:$4 sm:$0xff]  }
 0x1a0   :  { %1613 = vmatprep.subr.bf16.mxu0 %v11312_v60  ;;  %1819 = vmatprep.subr.bf16.mxu1 %v11312_v60  ;;  %v12208_v60 = vld [vmem:[%s16975_s0 + $0x1c] ss:$112 sps:$4 sm:$0xff]  }
 0x1a3   :  { %1614 = vmatpush1.bf16.msra.mxu0 %v11321_v61  ;;  %1820 = vmatpush1.bf16.msra.mxu1 %v11321_v61  ;;  %v1500_v61 = vld [vmem:[%s16975_s0 + $0xf8] sm:$0xff] }
 0x1a4   :  { %1615 = vmatprep.subr.bf16.mxu0 %v11326_v62  ;;  %1821 = vmatprep.subr.bf16.mxu1 %v11326_v62  ;;  %v1706_v62 = vld [vmem:[%s16975_s0 + $0xfc] sm:$0xff] }
 0x1a7   :  { %1616 = vmatpush1.bf16.msra.mxu0 %v17464_v3  ;;  %1822 = vmatpush1.bf16.msra.mxu1 %v17464_v3  ;;  %v12220_v3 = vcombine.high %v1500_v61, %v1500_v61 }
 0x1a8   :  { %1617 = vmatprep.subr.bf16.mxu0 %v17465_v4  ;;  %1823 = vmatprep.subr.bf16.mxu1 %v17465_v4  ;;  %v12222_v4 = vcombine.high %v1706_v62, %v1706_v62 }
 0x1ab   :  { %1618 = vmatpush1.bf16.msra.mxu0 %v17466_v5  ;;  %1824 = vmatpush1.bf16.msra.mxu1 %v17466_v5  ;;  %v12232_v5 = vcombine.low %v1500_v61, %v1500_v61 }
 0x1ac   :  { %1619 = vmatprep.subr.bf16.mxu0 %v17467_v6  ;;  %1825 = vmatprep.subr.bf16.mxu1 %v17467_v6  ;;  %v12234_v6 = vcombine.low %v1706_v62, %v1706_v62 }
 0x1af   :  { %1620 = vmatpush1.bf16.msra.mxu0 %v17468_v7  ;;  %1826 = vmatpush1.bf16.msra.mxu1 %v17468_v7  ;;  %v10132_v7 = vld [vmem:[%s16975_s0 + $0x20] ss:$112 sps:$4 sm:$0xff]  }
 0x1b0   :  { %1621 = vmatprep.subr.bf16.mxu0 %v17469_v8  ;;  %1827 = vmatprep.subr.bf16.mxu1 %v17469_v8  ;;  %v10133_v8 = vld [vmem:[%s16975_s0 + $0x24] ss:$112 sps:$4 sm:$0xff]  }
 0x1b3   :  { %1622 = vmatpush1.bf16.msra.mxu0 %v17470_v9  ;;  %1828 = vmatpush1.bf16.msra.mxu1 %v17470_v9  ;;  %v10135_v9 = vld [vmem:[%s16975_s0 + $0x104] ss:$0 sps:$4 sm:$0xff]  }
 0x1b4   :  { %1623 = vmatprep.subr.bf16.mxu0 %v17471_v10  ;;  %1829 = vmatprep.subr.bf16.mxu1 %v17471_v10  ;;  %v17515_v10 = vld [vmem:[#allocation4_spill] sm:$0xff] }
 0x1b7   :  { %1624 = vmatpush1.bf16.msra.mxu0 %v17472_v11  ;;  %1830 = vmatpush1.bf16.msra.mxu1 %v17472_v11  ;;  %v17516_v11 = vld [vmem:[#allocation5_spill] sm:$0xff] }
 0x1b8   :  { %1625 = vmatprep.subr.bf16.mxu0 %v17473_v12  ;;  %1831 = vmatprep.subr.bf16.mxu1 %v17473_v12  ;;  %v17517_v12 = vld [vmem:[#allocation6_spill] sm:$0xff] }
 0x1bb   :  { %1626 = vmatpush1.bf16.msra.mxu0 %v17474_v14  ;;  %1832 = vmatpush1.bf16.msra.mxu1 %v17474_v14  ;;  %v17518_v14 = vld [vmem:[#allocation7_spill] sm:$0xff] }
 0x1bc   :  { %1627 = vmatprep.subr.bf16.mxu0 %v17475_v15  ;;  %1833 = vmatprep.subr.bf16.mxu1 %v17475_v15  ;;  %v17519_v15 = vld [vmem:[#allocation8_spill] sm:$0xff] }
 0x1bf   :  { %1628 = vmatpush1.bf16.msra.mxu0 %v17476_v21  ;;  %1834 = vmatpush1.bf16.msra.mxu1 %v17476_v21  ;;  %v17520_v21 = vld [vmem:[#allocation9_spill] sm:$0xff] }
 0x1c0   :  { %1648 = vmatprep.subr.bf16.mxu0 %v17477_v22  ;;  %1854 = vmatprep.subr.bf16.mxu1 %v17477_v22  ;;  %v17521_v22 = vld [vmem:[#allocation10_spill] sm:$0xff] }
 0x1c2   :  { %1630 = vmatmul.mubr.bf16.vlgmr.msra.gmra.mrb[16].mxu0 %v12203_v59  ;;  %1836 = vmatmul.mubr.bf16.vlgmr.msra.gmra.mrb[16].mxu1 %v12208_v60 }
 0x1c3   :  { %1649 = vmatpush1.bf16.msra.mxu0 %v17478_v25  ;;  %1855 = vmatpush1.bf16.msra.mxu1 %v17478_v25  ;;  %v17522_v25 = vld [vmem:[#allocation11_spill] sm:$0xff] }
 0x1c4   :  { %1650 = vmatprep.subr.bf16.mxu0 %v17479_v26  ;;  %1856 = vmatprep.subr.bf16.mxu1 %v17479_v26  ;;  %v17523_v26 = vld [vmem:[#allocation12_spill] sm:$0xff] }
 0x1c5   :  { %1639 = vmatprep.mubr.bf16.mxu0 %v12220_v3  ;;  %1845 = vmatprep.mubr.bf16.mxu1 %v12222_v4 }
 0x1c7   :  { %1651 = vmatpush1.bf16.msra.mxu0 %v17480_v29  ;;  %1857 = vmatpush1.bf16.msra.mxu1 %v17480_v29  ;;  %v17524_v29 = vld [vmem:[#allocation13_spill] sm:$0xff] }
 0x1c8   :  { %1652 = vmatprep.subr.bf16.mxu0 %v17481_v30  ;;  %1858 = vmatprep.subr.bf16.mxu1 %v17481_v30  ;;  %v17525_v30 = vld [vmem:[#allocation14_spill] sm:$0xff] }
 0x1ca   :  { %1640 = vmatmul.mubr.bf16.gmra.mrb[20].mxu0 %v12232_v5  ;;  %1846 = vmatmul.mubr.bf16.gmra.mrb[20].mxu1 %v12234_v6 }
 0x1cb   :  { %1653 = vmatpush1.bf16.msra.mxu0 %v17482_v31  ;;  %1859 = vmatpush1.bf16.msra.mxu1 %v17482_v31  ;;  %v17526_v31 = vld [vmem:[#allocation15_spill] sm:$0xff] }
 0x1cc   :  { %1654 = vmatprep.subr.bf16.mxu0 %v17483_v32  ;;  %1860 = vmatprep.subr.bf16.mxu1 %v17483_v32  ;;  %v17527_v32 = vld [vmem:[#allocation16_spill] sm:$0xff] }
 0x1cd   :  { %1680 = vmatprep.mubr.bf16.mxu0 %v17463_v38  ;;  %1886 = vmatprep.mubr.bf16.mxu1 %v17463_v38 }
 0x1cf   :  { %1655 = vmatpush1.bf16.msra.mxu0 %v17484_v33  ;;  %1861 = vmatpush1.bf16.msra.mxu1 %v17484_v33  ;;  %v17528_v33 = vld [vmem:[#allocation17_spill] sm:$0xff] }
 0x1d0   :  { %1656 = vmatprep.subr.bf16.mxu0 %v17485_v34  ;;  %1862 = vmatprep.subr.bf16.mxu1 %v17485_v34  ;;  %v17529_v34 = vld [vmem:[#allocation18_spill] sm:$0xff] }
 0x1d3   :  { %1657 = vmatpush1.bf16.msra.mxu0 %v17486_v37  ;;  %1863 = vmatpush1.bf16.msra.mxu1 %v17486_v37  ;;  %v17530_v37 = vld [vmem:[#allocation19_spill] sm:$0xff] }
 0x1d4   :  { %1658 = vmatprep.subr.bf16.mxu0 %v17487_v40  ;;  %1864 = vmatprep.subr.bf16.mxu1 %v17487_v40  ;;  %v17531_v40 = vld [vmem:[#allocation20_spill] sm:$0xff] }
 0x1d7   :  { %1659 = vmatpush1.bf16.msra.mxu0 %v17488_v41  ;;  %1865 = vmatpush1.bf16.msra.mxu1 %v17488_v41  ;;  %v17532_v41 = vld [vmem:[#allocation21_spill] sm:$0xff] }
 0x1d8   :  { %1660 = vmatprep.subr.bf16.mxu0 %v17489_v44  ;;  %1866 = vmatprep.subr.bf16.mxu1 %v17489_v44  ;;  %v17533_v44 = vld [vmem:[#allocation22_spill] sm:$0xff] }
 0x1db   :  { %1661 = vmatpush1.bf16.msra.mxu0 %v11551_v35  ;;  %1867 = vmatpush1.bf16.msra.mxu1 %v11551_v35  ;;  %v10134_v35 = vld [vmem:[%s16975_s0 + $0x100] ss:$0 sps:$4 sm:$0xff]  }
 0x1dc   :  { %1662 = vmatprep.subr.bf16.mxu0 %v17490_v45  ;;  %1868 = vmatprep.subr.bf16.mxu1 %v17490_v45  ;;  %v17534_v45 = vld [vmem:[#allocation23_spill] sm:$0xff] }
 0x1df   :  { %1663 = vmatpush1.bf16.msra.mxu0 %v17491_v50  ;;  %1869 = vmatpush1.bf16.msra.mxu1 %v17491_v50 }
 0x1e0   :  { %1996 = vmatprep.subr.bf16.mxu0 %v11806_v51  ;;  %2202 = vmatprep.subr.bf16.mxu1 %v11806_v51 }
 0x1e2   :  { %1681 = vmatmul.mubr.bf16.vlgmr.msra.gmra.mrb[16].mxu0 %v10132_v7  ;;  %1887 = vmatmul.mubr.bf16.vlgmr.msra.gmra.mrb[16].mxu1 %v10133_v8  ;;  %v17535_v7 = vld [vmem:[#allocation24_spill] sm:$0xff] }
 0x1e3   :  { %1997 = vmatpush1.bf16.msra.mxu0 %v11813_v52  ;;  %2203 = vmatpush1.bf16.msra.mxu1 %v11813_v52 }
 0x1e4   :  { %1998 = vmatprep.subr.bf16.mxu0 %v11820_v53  ;;  %2204 = vmatprep.subr.bf16.mxu1 %v11820_v53 }
 0x1e5   :  { %1690 = vmatprep.mubr.bf16.mxu0 %v17463_v38  ;;  %1896 = vmatprep.mubr.bf16.mxu1 %v17463_v38 }
 0x1e7   :  { %1999 = vmatpush1.bf16.msra.mxu0 %v11835_v56  ;;  %2205 = vmatpush1.bf16.msra.mxu1 %v11835_v56 }
 0x1e8   :  { %2000 = vmatprep.subr.bf16.mxu0 %v11842_v57  ;;  %2206 = vmatprep.subr.bf16.mxu1 %v11842_v57 }
 0x1ea   :  { %1691 = vmatmul.mubr.bf16.gmra.mrb[20].mxu0 %v10134_v35  ;;  %1897 = vmatmul.mubr.bf16.gmra.mrb[20].mxu1 %v10135_v9 }
 0x1eb   :  { %2001 = vmatpush1.bf16.msra.mxu0 %v11849_v58  ;;  %2207 = vmatpush1.bf16.msra.mxu1 %v11849_v58 }
 0x1ec   :  { %2002 = vmatprep.subr.bf16.mxu0 %v11856_v63  ;;  %2208 = vmatprep.subr.bf16.mxu1 %v11856_v63 }
 0x1ed   :  { %2028 = vmatprep.mubr.bf16.mxu0 %v12087_v23  ;;  %2234 = vmatprep.mubr.bf16.mxu1 %v12092_v24 }
 0x1ef   :  { %2003 = vmatpush1.bf16.msra.mxu0 %v17515_v10  ;;  %2209 = vmatpush1.bf16.msra.mxu1 %v17515_v10 }
 0x1f0   :  { %2004 = vmatprep.subr.bf16.mxu0 %v17516_v11  ;;  %2210 = vmatprep.subr.bf16.mxu1 %v17516_v11 }
 0x1f3   :  { %2005 = vmatpush1.bf16.msra.mxu0 %v17517_v12  ;;  %2211 = vmatpush1.bf16.msra.mxu1 %v17517_v12 }
 0x1f4   :  { %2006 = vmatprep.subr.bf16.mxu0 %v17518_v14  ;;  %2212 = vmatprep.subr.bf16.mxu1 %v17518_v14 }
 0x1f7   :  { %2007 = vmatpush1.bf16.msra.mxu0 %v17519_v15  ;;  %2213 = vmatpush1.bf16.msra.mxu1 %v17519_v15 }
 0x1f8   :  { %2008 = vmatprep.subr.bf16.mxu0 %v17520_v21  ;;  %2214 = vmatprep.subr.bf16.mxu1 %v17520_v21 }
 0x1fb   :  { %2009 = vmatpush1.bf16.msra.mxu0 %v17521_v22  ;;  %2215 = vmatpush1.bf16.msra.mxu1 %v17521_v22 }
 0x1fc   :  { %2010 = vmatprep.subr.bf16.mxu0 %v17522_v25  ;;  %2216 = vmatprep.subr.bf16.mxu1 %v17522_v25 }
 0x1ff   :  { %2011 = vmatpush1.bf16.msra.mxu0 %v17523_v26  ;;  %2217 = vmatpush1.bf16.msra.mxu1 %v17523_v26 }
 0x200   :  { %2012 = vmatprep.subr.bf16.mxu0 %v17524_v29  ;;  %2218 = vmatprep.subr.bf16.mxu1 %v17524_v29 }
 0x203   :  { %2013 = vmatpush1.bf16.msra.mxu0 %v17525_v30  ;;  %2219 = vmatpush1.bf16.msra.mxu1 %v17525_v30 }
 0x204   :  { %2014 = vmatprep.subr.bf16.mxu0 %v17526_v31  ;;  %2220 = vmatprep.subr.bf16.mxu1 %v17526_v31 }
 0x207   :  { %2015 = vmatpush1.bf16.msra.mxu0 %v17527_v32  ;;  %2221 = vmatpush1.bf16.msra.mxu1 %v17527_v32 }
 0x208   :  { %2016 = vmatprep.subr.bf16.mxu0 %v17528_v33  ;;  %2222 = vmatprep.subr.bf16.mxu1 %v17528_v33 }
 0x20b   :  { %2017 = vmatpush1.bf16.msra.mxu0 %v17529_v34  ;;  %2223 = vmatpush1.bf16.msra.mxu1 %v17529_v34 }
 0x20c   :  { %2018 = vmatprep.subr.bf16.mxu0 %v17530_v37  ;;  %2224 = vmatprep.subr.bf16.mxu1 %v17530_v37 }
 0x20f   :  { %2019 = vmatpush1.bf16.msra.mxu0 %v17531_v40  ;;  %2225 = vmatpush1.bf16.msra.mxu1 %v17531_v40  ;;  %v17537_v40 = vld [vmem:[#allocation26_spill] sm:$0xff] }
 0x210   :  { %2020 = vmatprep.subr.bf16.mxu0 %v17532_v41  ;;  %2226 = vmatprep.subr.bf16.mxu1 %v17532_v41 }
 0x213   :  { %2021 = vmatpush1.bf16.msra.mxu0 %v17533_v44  ;;  %2227 = vmatpush1.bf16.msra.mxu1 %v17533_v44  ;;  %v17536_v44 = vld [vmem:[#allocation25_spill] sm:$0xff] }
 0x214   :  { %2022 = vmatprep.subr.bf16.mxu0 %v17534_v45  ;;  %2228 = vmatprep.subr.bf16.mxu1 %v17534_v45 }
 0x215   :  { %v1232_v50 = vpop.f32.mrb[8].mxu0  ;;  %v1438_v48 = vpop.f32.mrb[8].mxu1 }
 0x216   :  { %v1455_v17 = vmax.f32 %v1232_v50, %v1438_v48  ;;  %v1234_v18 = vpop.f32.mrb[9].mxu0  ;;  %v1440_v23 = vpop.f32.mrb[9].mxu1 }
 0x217   :  { %v1456_v24 = vmax.f32 %v1234_v18, %v1440_v23  ;;  %v1236_v61 = vpop.f32.mrb[10].mxu0  ;;  %v1442_v62 = vpop.f32.mrb[10].mxu1  ;;  %2023 = vmatpush1.bf16.msra.mxu0 %v17535_v7  ;;  %2229 = vmatpush1.bf16.msra.mxu1 %v17535_v7 }
 0x218   :  { %v1457_v8 = vmax.f32 %v1236_v61, %v1442_v62  ;;  %v1238_v35 = vpop.f32.mrb[11].mxu0  ;;  %v1444_v9 = vpop.f32.mrb[11].mxu1  ;;  %2024 = vmatprep.subr.bf16.mxu0 %v17536_v44  ;;  %2230 = vmatprep.subr.bf16.mxu1 %v17536_v44 }
 0x219   :  { %v1461_v45 = vmax.f32 %v1455_v17, %v1456_v24  ;;  %v1458_v41 = vmax.f32 %v1238_v35, %v1444_v9 }
 0x21b   :  { %v1471_v50 = vadd.f32 %v12012_v55, %v1461_v45  ;;  %v1462_v48 = vmax.f32 %v1457_v8, %v1458_v41  ;;  %2025 = vmatpush1.bf16.msra.mxu0 %v17537_v40  ;;  %2231 = vmatpush1.bf16.msra.mxu1 %v17537_v40 }
 0x21c   :  { %2026 = vmatprep.subr.bf16.mxu0 %v12032_v0  ;;  %2232 = vmatprep.subr.bf16.mxu1 %v12032_v0 }
 0x21d   :  { %v1474_v18 = vmax.f32 %v1471_v50, 0.0  ;;  %v1472_v23 = vadd.f32 %v12012_v55, %v1462_v48  ;;  %v1242_v61 = vpop.f32.mrb[12].mxu0  ;;  %v1448_v62 = vpop.f32.mrb[12].mxu1 }
 0x21e   :  { %v1459_v7 = vmax.f32 %v1242_v61, %v1448_v62  ;;  %v1244_v44 = vpop.f32.mrb[13].mxu0  ;;  %v1450_v17 = vpop.f32.mrb[13].mxu1  ;;  %v12449_v61 = vld [vmem:[%s16974_s1 + $0x1b4] ss:$8 sps:$4 sm:$0xff]   ;;  %v12456_v62 = vld [vmem:[%s16974_s1 + $0x1b0] ss:$8 sps:$4 sm:$0xff]  }
 0x21f   :  { %v9320_v24 = vpack.c.bf16 %v1474_v18, %v1474_v18  ;;  %v1475_v35 = vmax.f32 %v1472_v23, 0.0  ;;  %v1460_v45 = vmax.f32 %v1244_v44, %v1450_v17  ;;  %v1246_v41 = vpop.f32.mrb[14].mxu0  ;;  %v1452_v8 = vpop.f32.mrb[14].mxu1  ;;  %2027 = vmatpush1.bf16.msra.mxu0 %v12040_v13  ;;  %2233 = vmatpush1.bf16.msra.mxu1 %v12040_v13  ;;  %v12435_v18 = vld [vmem:[%s16974_s1 + $0x1a4] ss:$8 sps:$4 sm:$0xff]  }
 0x220   :  { %v1247_v9 = vpop.f32.mrb[15].mxu0  ;;  %v1453_v40 = vpop.f32.mrb[15].mxu1  ;;  %2047 = vmatprep.subr.bf16.mxu0 %v12047_v1  ;;  %2253 = vmatprep.subr.bf16.mxu1 %v12047_v1  ;;  %v12442_v23 = vld [vmem:[%s16974_s1 + $0x1a0] ss:$8 sps:$4 sm:$0xff]   ;;  %v12463_v17 = vld [vmem:[%s16974_s1 + $0x1c4] ss:$8 sps:$4 sm:$0xff]  }
 0x221   :  { %1490 = vst [vmem:[#allocation2 + $0x4] sm:$0xf] %v9320_v24  ;;  %v9321_v50 = vpack.c.bf16 %v1475_v35, %v1475_v35  ;;  %v1463_v48 = vmax.f32 %v1459_v7, %v1460_v45  ;;  %v12470_v24 = vld [vmem:[%s16974_s1 + $0x1c0] ss:$8 sps:$4 sm:$0xff]   ;;  %v12477_v35 = vld [vmem:[%s16974_s1 + $0x1d4] ss:$8 sps:$4 sm:$0xff]  }
 0x222   :  { %2029 = vmatmul.mubr.bf16.vlgmr.msra.gmra.mrb[24].mxu0 %v12203_v59  ;;  %2235 = vmatmul.mubr.bf16.vlgmr.msra.gmra.mrb[24].mxu1 %v12208_v60  ;;  %v12371_v59 = vld [vmem:[%s16975_s0 + $0x28] ss:$112 sps:$4 sm:$0xff]   ;;  %17538 = vst [vmem:[#allocation27_spill] sm:$0xff] %v12477_v35  ;;  %v12491_v41 = vld [vmem:[%s16974_s1 + $0x1e4] ss:$8 sps:$4 sm:$0xff]  }
 0x223   :  { %1491 = vst [vmem:[#allocation2 + $0x34] sm:$0xf] %v9321_v50  ;;  %v1473_v44 = vadd.f32 %v12012_v55, %v1463_v48  ;;  %2048 = vmatpush1.bf16.msra.mxu0 %v12057_v47  ;;  %2254 = vmatpush1.bf16.msra.mxu1 %v12057_v47  ;;  %v12366_v55 = vld [vmem:[%s16975_s0 + $0x24] ss:$112 sps:$4 sm:$0xff]   ;;  %v12400_v60 = vld [vmem:[%s16974_s1 + $0x170] ss:$8 sps:$4 sm:$0xff]  }
 0x224   :  { %2049 = vmatprep.subr.bf16.mxu0 %v12064_v39  ;;  %2255 = vmatprep.subr.bf16.mxu1 %v12064_v39  ;;  %v12484_v45 = vld [vmem:[%s16974_s1 + $0x1d0] ss:$8 sps:$4 sm:$0xff]   ;;  %17540 = vst [vmem:[#allocation29_spill] sm:$0xff] %v12491_v41  ;;  %v12498_v8 = vld [vmem:[%s16974_s1 + $0x1e0] ss:$8 sps:$4 sm:$0xff]  }
 0x225   :  { %v1476_v40 = vmax.f32 %v1473_v44, 0.0  ;;  %2038 = vmatprep.mubr.bf16.mxu0 %v12220_v3  ;;  %2244 = vmatprep.mubr.bf16.mxu1 %v12222_v4  ;;  %v12407_v3 = vld [vmem:[%s16974_s1 + $0x184] ss:$8 sps:$4 sm:$0xff]   ;;  %v12414_v4 = vld [vmem:[%s16974_s1 + $0x180] ss:$8 sps:$4 sm:$0xff]   ;;  %17539 = vst [vmem:[#allocation28_spill] sm:$0xff] %v12484_v45 }
 0x226   :  { %17541 = vst [vmem:[#allocation30_spill] sm:$0xff] %v12498_v8  ;;  %v12505_v9 = vld [vmem:[%s16974_s1 + $0x1f4] ss:$8 sps:$4 sm:$0xff]   ;;  %v12512_v50 = vld [vmem:[%s16975_s0 + $0x20] ss:$112 sps:$4 sm:$0xff]  }
 0x227   :  { %v9322_v7 = vpack.c.bf16 %v1476_v40, %v1476_v40  ;;  %2050 = vmatpush1.bf16.msra.mxu0 %v12073_v2  ;;  %2256 = vmatpush1.bf16.msra.mxu1 %v12073_v2  ;;  %17542 = vst [vmem:[#allocation31_spill] sm:$0xff] %v12505_v9  ;;  %v12517_v48 = vld [vmem:[%s16975_s0 + $0x24] ss:$112 sps:$4 sm:$0xff]  }
 0x228   :  { %2051 = vmatprep.subr.bf16.mxu0 %v12080_v42  ;;  %2257 = vmatprep.subr.bf16.mxu1 %v12080_v42  ;;  %v1950_v44 = vld [vmem:[%s16975_s0 + $0x100] sm:$0xff] }
 0x229   :  { %1492 = vst [vmem:[#allocation2 + $0x64] sm:$0xf] %v9322_v7  ;;  %v2156_v40 = vld [vmem:[%s16975_s0 + $0x104] sm:$0xff]  ;;  %v12528_v7 = vld [vmem:[%s16974_s1 + $0x1f0] ss:$8 sps:$4 sm:$0xff]  }
 0x22a   :  { %2039 = vmatmul.mubr.bf16.gmra.mrb[28].mxu0 %v12232_v5  ;;  %2245 = vmatmul.mubr.bf16.gmra.mrb[28].mxu1 %v12234_v6  ;;  %v12421_v5 = vld [vmem:[%s16974_s1 + $0x194] ss:$8 sps:$4 sm:$0xff]   ;;  %v12428_v6 = vld [vmem:[%s16974_s1 + $0x190] ss:$8 sps:$4 sm:$0xff]   ;;  %17543 = vst [vmem:[#allocation4_spill] sm:$0xff] %v12528_v7 }
 0x22b   :  { %2052 = vmatpush1.bf16.msra.mxu0 %v12099_v20  ;;  %2258 = vmatpush1.bf16.msra.mxu1 %v12099_v20 }
 0x22c   :  { %2053 = vmatprep.subr.bf16.mxu0 %v12106_v46  ;;  %2259 = vmatprep.subr.bf16.mxu1 %v12106_v46 }
 0x22d   :  { %2079 = vmatprep.mubr.bf16.mxu0 %v12366_v55  ;;  %2285 = vmatprep.mubr.bf16.mxu1 %v12371_v59 }
 0x22f   :  { %2054 = vmatpush1.bf16.msra.mxu0 %v12115_v27  ;;  %2260 = vmatpush1.bf16.msra.mxu1 %v12115_v27 }
 0x230   :  { %2055 = vmatprep.subr.bf16.mxu0 %v12122_v28  ;;  %2261 = vmatprep.subr.bf16.mxu1 %v12122_v28 }
 0x233   :  { %2056 = vmatpush1.bf16.msra.mxu0 %v12129_v49  ;;  %2262 = vmatpush1.bf16.msra.mxu1 %v12129_v49 }
 0x234   :  { %2057 = vmatprep.subr.bf16.mxu0 %v12136_v19  ;;  %2263 = vmatprep.subr.bf16.mxu1 %v12136_v19 }
 0x237   :  { %2058 = vmatpush1.bf16.msra.mxu0 %v12143_v43  ;;  %2264 = vmatpush1.bf16.msra.mxu1 %v12143_v43 }
 0x238   :  { %2059 = vmatprep.subr.bf16.mxu0 %v12150_v54  ;;  %2265 = vmatprep.subr.bf16.mxu1 %v12150_v54 }
 0x23b   :  { %2060 = vmatpush1.bf16.msra.mxu0 %v12157_v16  ;;  %2266 = vmatpush1.bf16.msra.mxu1 %v12157_v16 }
 0x23c   :  { %2061 = vmatprep.subr.bf16.mxu0 %v12164_v36  ;;  %2267 = vmatprep.subr.bf16.mxu1 %v12164_v36 }
 0x23f   :  { %2062 = vmatpush1.bf16.msra.mxu0 %v12400_v60  ;;  %2268 = vmatpush1.bf16.msra.mxu1 %v12400_v60 }
 0x240   :  { %2063 = vmatprep.subr.bf16.mxu0 %v12407_v3  ;;  %2269 = vmatprep.subr.bf16.mxu1 %v12407_v3 }
 0x243   :  { %2064 = vmatpush1.bf16.msra.mxu0 %v12414_v4  ;;  %2270 = vmatpush1.bf16.msra.mxu1 %v12414_v4 }
 0x244   :  { %2065 = vmatprep.subr.bf16.mxu0 %v12421_v5  ;;  %2271 = vmatprep.subr.bf16.mxu1 %v12421_v5 }
 0x247   :  { %2066 = vmatpush1.bf16.msra.mxu0 %v12428_v6  ;;  %2272 = vmatpush1.bf16.msra.mxu1 %v12428_v6 }
 0x248   :  { %2067 = vmatprep.subr.bf16.mxu0 %v12435_v18  ;;  %2273 = vmatprep.subr.bf16.mxu1 %v12435_v18 }
 0x24b   :  { %2068 = vmatpush1.bf16.msra.mxu0 %v12442_v23  ;;  %2274 = vmatpush1.bf16.msra.mxu1 %v12442_v23 }
 0x24c   :  { %2069 = vmatprep.subr.bf16.mxu0 %v12449_v61  ;;  %2275 = vmatprep.subr.bf16.mxu1 %v12449_v61 }
 0x24f   :  { %2070 = vmatpush1.bf16.msra.mxu0 %v12456_v62  ;;  %2276 = vmatpush1.bf16.msra.mxu1 %v12456_v62 }
 0x250   :  { %2071 = vmatprep.subr.bf16.mxu0 %v12463_v17  ;;  %2277 = vmatprep.subr.bf16.mxu1 %v12463_v17 }
 0x253   :  { %2072 = vmatpush1.bf16.msra.mxu0 %v12470_v24  ;;  %2278 = vmatpush1.bf16.msra.mxu1 %v12470_v24 }
 0x254   :  { %2073 = vmatprep.subr.bf16.mxu0 %v12477_v35  ;;  %2279 = vmatprep.subr.bf16.mxu1 %v12477_v35  ;;  %v12563_v35 = vcombine.low %v2156_v40, %v2156_v40 }
 0x257   :  { %2074 = vmatpush1.bf16.msra.mxu0 %v12484_v45  ;;  %2280 = vmatpush1.bf16.msra.mxu1 %v12484_v45  ;;  %v12561_v45 = vcombine.low %v1950_v44, %v1950_v44 }
 0x258   :  { %2075 = vmatprep.subr.bf16.mxu0 %v12491_v41  ;;  %2281 = vmatprep.subr.bf16.mxu1 %v12491_v41  ;;  %v12541_v41 = vcombine.high %v2156_v40, %v2156_v40  ;;  %v12591_v40 = vld [vmem:[%s16974_s1 + $0x234] ss:$8 sps:$4 sm:$0xff]  }
 0x259   :  { %17550 = vst [vmem:[#allocation11_spill] sm:$0xff] %v12591_v40 }
 0x25b   :  { %2076 = vmatpush1.bf16.msra.mxu0 %v12498_v8  ;;  %2282 = vmatpush1.bf16.msra.mxu1 %v12498_v8  ;;  %v12539_v8 = vcombine.high %v1950_v44, %v1950_v44  ;;  %v12584_v44 = vld [vmem:[%s16974_s1 + $0x220] ss:$8 sps:$4 sm:$0xff]  }
 0x25c   :  { %2077 = vmatprep.subr.bf16.mxu0 %v12505_v9  ;;  %2283 = vmatprep.subr.bf16.mxu1 %v12505_v9  ;;  %v12535_v9 = vld [vmem:[%s16974_s1 + $0x204] ss:$8 sps:$4 sm:$0xff]   ;;  %17549 = vst [vmem:[#allocation10_spill] sm:$0xff] %v12584_v44 }
 0x25d   :  { %17544 = vst [vmem:[#allocation5_spill] sm:$0xff] %v12535_v9 }
 0x25f   :  { %2078 = vmatpush1.bf16.msra.mxu0 %v12528_v7  ;;  %2284 = vmatpush1.bf16.msra.mxu1 %v12528_v7  ;;  %v12548_v7 = vld [vmem:[%s16974_s1 + $0x200] ss:$8 sps:$4 sm:$0xff]  }
 0x260   :  { %2098 = vmatprep.subr.bf16.mxu0 %v12535_v9  ;;  %2304 = vmatprep.subr.bf16.mxu1 %v12535_v9  ;;  %17545 = vst [vmem:[#allocation6_spill] sm:$0xff] %v12548_v7  ;;  %v12555_v9 = vld [vmem:[%s16974_s1 + $0x214] ss:$8 sps:$4 sm:$0xff]  }
 0x261   :  { %17546 = vst [vmem:[#allocation7_spill] sm:$0xff] %v12555_v9 }
 0x262   :  { %2080 = vmatmul.mubr.bf16.vlgmr.msra.gmra.mrb[24].mxu0 %v12512_v50  ;;  %2286 = vmatmul.mubr.bf16.vlgmr.msra.gmra.mrb[24].mxu1 %v12517_v48 }
 0x263   :  { %2099 = vmatpush1.bf16.msra.mxu0 %v12548_v7  ;;  %2305 = vmatpush1.bf16.msra.mxu1 %v12548_v7  ;;  %v12568_v7 = vld [vmem:[%s16974_s1 + $0x210] ss:$8 sps:$4 sm:$0xff]  }
 0x264   :  { %2100 = vmatprep.subr.bf16.mxu0 %v12555_v9  ;;  %2306 = vmatprep.subr.bf16.mxu1 %v12555_v9  ;;  %17547 = vst [vmem:[#allocation8_spill] sm:$0xff] %v12568_v7  ;;  %v12575_v9 = vld [vmem:[%s16974_s1 + $0x224] ss:$8 sps:$4 sm:$0xff]  }
 0x265   :  { %2089 = vmatprep.mubr.bf16.mxu0 %v12539_v8  ;;  %2295 = vmatprep.mubr.bf16.mxu1 %v12541_v41  ;;  %17548 = vst [vmem:[#allocation9_spill] sm:$0xff] %v12575_v9 }
 0x267   :  { %2101 = vmatpush1.bf16.msra.mxu0 %v12568_v7  ;;  %2307 = vmatpush1.bf16.msra.mxu1 %v12568_v7  ;;  %v10147_v7 = vld [vmem:[%s16975_s0 + $0x2c] ss:$112 sps:$4 sm:$0xff]  }
 0x268   :  { %2102 = vmatprep.subr.bf16.mxu0 %v12575_v9  ;;  %2308 = vmatprep.subr.bf16.mxu1 %v12575_v9  ;;  %v12600_v9 = vld [vmem:[%s16974_s1 + $0x230] ss:$8 sps:$4 sm:$0xff]  }
 0x269   :  { %17551 = vst [vmem:[#allocation12_spill] sm:$0xff] %v12600_v9 }
 0x26a   :  { %2090 = vmatmul.mubr.bf16.gmra.mrb[28].mxu0 %v12561_v45  ;;  %2296 = vmatmul.mubr.bf16.gmra.mrb[28].mxu1 %v12563_v35 }
 0x26b   :  { %2103 = vmatpush1.bf16.msra.mxu0 %v12584_v44  ;;  %2309 = vmatpush1.bf16.msra.mxu1 %v12584_v44  ;;  %v12607_v44 = vld [vmem:[%s16974_s1 + $0x244] ss:$8 sps:$4 sm:$0xff]  }
 0x26c   :  { %2104 = vmatprep.subr.bf16.mxu0 %v12591_v40  ;;  %2310 = vmatprep.subr.bf16.mxu1 %v12591_v40  ;;  %17552 = vst [vmem:[#allocation13_spill] sm:$0xff] %v12607_v44  ;;  %v12614_v40 = vld [vmem:[%s16974_s1 + $0x240] ss:$8 sps:$4 sm:$0xff]  }
 0x26d   :  { %2130 = vmatprep.mubr.bf16.mxu0 %v17463_v38  ;;  %2336 = vmatprep.mubr.bf16.mxu1 %v17463_v38  ;;  %17553 = vst [vmem:[#allocation14_spill] sm:$0xff] %v12614_v40 }
 0x26f   :  { %2105 = vmatpush1.bf16.msra.mxu0 %v12600_v9  ;;  %2311 = vmatpush1.bf16.msra.mxu1 %v12600_v9  ;;  %v12621_v9 = vld [vmem:[%s16974_s1 + $0x254] ss:$8 sps:$4 sm:$0xff]  }
 0x270   :  { %2106 = vmatprep.subr.bf16.mxu0 %v12607_v44  ;;  %2312 = vmatprep.subr.bf16.mxu1 %v12607_v44  ;;  %17554 = vst [vmem:[#allocation15_spill] sm:$0xff] %v12621_v9  ;;  %v12628_v44 = vld [vmem:[%s16974_s1 + $0x250] ss:$8 sps:$4 sm:$0xff]  }
 0x271   :  { %17555 = vst [vmem:[#allocation16_spill] sm:$0xff] %v12628_v44 }
 0x273   :  { %2107 = vmatpush1.bf16.msra.mxu0 %v12614_v40  ;;  %2313 = vmatpush1.bf16.msra.mxu1 %v12614_v40  ;;  %v12635_v40 = vld [vmem:[%s16974_s1 + $0x264] ss:$8 sps:$4 sm:$0xff]  }
 0x274   :  { %2108 = vmatprep.subr.bf16.mxu0 %v12621_v9  ;;  %2314 = vmatprep.subr.bf16.mxu1 %v12621_v9  ;;  %17556 = vst [vmem:[#allocation17_spill] sm:$0xff] %v12635_v40  ;;  %v12642_v9 = vld [vmem:[%s16974_s1 + $0x260] ss:$8 sps:$4 sm:$0xff]  }
 0x275   :  { %17557 = vst [vmem:[#allocation18_spill] sm:$0xff] %v12642_v9 }
 0x277   :  { %2109 = vmatpush1.bf16.msra.mxu0 %v12628_v44  ;;  %2315 = vmatpush1.bf16.msra.mxu1 %v12628_v44  ;;  %v12649_v44 = vld [vmem:[%s16974_s1 + $0x274] ss:$8 sps:$4 sm:$0xff]  }
 0x278   :  { %2110 = vmatprep.subr.bf16.mxu0 %v12635_v40  ;;  %2316 = vmatprep.subr.bf16.mxu1 %v12635_v40  ;;  %v10146_v40 = vld [vmem:[%s16975_s0 + $0x28] ss:$112 sps:$4 sm:$0xff]  }
 0x27b   :  { %2111 = vmatpush1.bf16.msra.mxu0 %v12642_v9  ;;  %2317 = vmatpush1.bf16.msra.mxu1 %v12642_v9  ;;  %v12662_v9 = vld [vmem:[%s16974_s1 + $0x270] ss:$8 sps:$4 sm:$0xff]  }
 0x27c   :  { %2112 = vmatprep.subr.bf16.mxu0 %v12649_v44  ;;  %2318 = vmatprep.subr.bf16.mxu1 %v12649_v44  ;;  %17558 = vst [vmem:[#allocation19_spill] sm:$0xff] %v12662_v9 }
 0x27f   :  { %2113 = vmatpush1.bf16.msra.mxu0 %v12662_v9  ;;  %2319 = vmatpush1.bf16.msra.mxu1 %v12662_v9  ;;  %v10148_v9 = vld [vmem:[%s16975_s0 + $0x108] ss:$0 sps:$4 sm:$0xff]  }
 0x280   :  { %2446 = vmatprep.subr.bf16.mxu0 %v11806_v51  ;;  %2652 = vmatprep.subr.bf16.mxu1 %v11806_v51  ;;  %v10149_v51 = vld [vmem:[%s16975_s0 + $0x10c] ss:$0 sps:$4 sm:$0xff]  }
 0x282   :  { %2131 = vmatmul.mubr.bf16.vlgmr.msra.gmra.mrb[24].mxu0 %v10146_v40  ;;  %2337 = vmatmul.mubr.bf16.vlgmr.msra.gmra.mrb[24].mxu1 %v10147_v7 }
 0x283   :  { %2447 = vmatpush1.bf16.msra.mxu0 %v11813_v52  ;;  %2653 = vmatpush1.bf16.msra.mxu1 %v11813_v52  ;;  %v17559_v52 = vld [vmem:[#allocation20_spill] sm:$0xff] }
 0x284   :  { %2448 = vmatprep.subr.bf16.mxu0 %v11820_v53  ;;  %2654 = vmatprep.subr.bf16.mxu1 %v11820_v53  ;;  %v17560_v53 = vld [vmem:[#allocation21_spill] sm:$0xff] }
 0x285   :  { %2140 = vmatprep.mubr.bf16.mxu0 %v17463_v38  ;;  %2346 = vmatprep.mubr.bf16.mxu1 %v17463_v38 }
 0x287   :  { %2449 = vmatpush1.bf16.msra.mxu0 %v11835_v56  ;;  %2655 = vmatpush1.bf16.msra.mxu1 %v11835_v56  ;;  %v17561_v56 = vld [vmem:[#allocation22_spill] sm:$0xff] }
 0x288   :  { %2450 = vmatprep.subr.bf16.mxu0 %v11842_v57  ;;  %2656 = vmatprep.subr.bf16.mxu1 %v11842_v57  ;;  %v17562_v57 = vld [vmem:[#allocation23_spill] sm:$0xff] }
 0x28a   :  { %2141 = vmatmul.mubr.bf16.gmra.mrb[28].mxu0 %v10148_v9  ;;  %2347 = vmatmul.mubr.bf16.gmra.mrb[28].mxu1 %v10149_v51 }
 0x28b   :  { %2451 = vmatpush1.bf16.msra.mxu0 %v11849_v58  ;;  %2657 = vmatpush1.bf16.msra.mxu1 %v11849_v58 }
 0x28c   :  { %2452 = vmatprep.subr.bf16.mxu0 %v11856_v63  ;;  %2658 = vmatprep.subr.bf16.mxu1 %v11856_v63 }
 0x28d   :  { %2478 = vmatprep.mubr.bf16.mxu0 %v12366_v55  ;;  %2684 = vmatprep.mubr.bf16.mxu1 %v12371_v59  ;;  %v17565_v55 = vld [vmem:[#allocation26_spill] sm:$0xff] }
 0x28f   :  { %2453 = vmatpush1.bf16.msra.mxu0 %v17515_v10  ;;  %2659 = vmatpush1.bf16.msra.mxu1 %v17515_v10 }
 0x290   :  { %2454 = vmatprep.subr.bf16.mxu0 %v17516_v11  ;;  %2660 = vmatprep.subr.bf16.mxu1 %v17516_v11 }
 0x293   :  { %2455 = vmatpush1.bf16.msra.mxu0 %v17517_v12  ;;  %2661 = vmatpush1.bf16.msra.mxu1 %v17517_v12 }
 0x294   :  { %2456 = vmatprep.subr.bf16.mxu0 %v17518_v14  ;;  %2662 = vmatprep.subr.bf16.mxu1 %v17518_v14 }
 0x297   :  { %2457 = vmatpush1.bf16.msra.mxu0 %v17519_v15  ;;  %2663 = vmatpush1.bf16.msra.mxu1 %v17519_v15 }
 0x298   :  { %2458 = vmatprep.subr.bf16.mxu0 %v17520_v21  ;;  %2664 = vmatprep.subr.bf16.mxu1 %v17520_v21 }
 0x29b   :  { %2459 = vmatpush1.bf16.msra.mxu0 %v17521_v22  ;;  %2665 = vmatpush1.bf16.msra.mxu1 %v17521_v22  ;;  %v17563_v22 = vld [vmem:[#allocation24_spill] sm:$0xff] }
 0x29c   :  { %2460 = vmatprep.subr.bf16.mxu0 %v17522_v25  ;;  %2666 = vmatprep.subr.bf16.mxu1 %v17522_v25  ;;  %v12735_v25 = vld [vmem:[%s16976_s2] ss:$0 sm:$0xff] }
 0x29f   :  { %2461 = vmatpush1.bf16.msra.mxu0 %v17523_v26  ;;  %2667 = vmatpush1.bf16.msra.mxu1 %v17523_v26 }
 0x2a0   :  { %2462 = vmatprep.subr.bf16.mxu0 %v17524_v29  ;;  %2668 = vmatprep.subr.bf16.mxu1 %v17524_v29 }
 0x2a3   :  { %2463 = vmatpush1.bf16.msra.mxu0 %v17525_v30  ;;  %2669 = vmatpush1.bf16.msra.mxu1 %v17525_v30 }
 0x2a4   :  { %2464 = vmatprep.subr.bf16.mxu0 %v17526_v31  ;;  %2670 = vmatprep.subr.bf16.mxu1 %v17526_v31  ;;  %v17564_v31 = vld [vmem:[#allocation25_spill] sm:$0xff] }
 0x2a7   :  { %2465 = vmatpush1.bf16.msra.mxu0 %v17527_v32  ;;  %2671 = vmatpush1.bf16.msra.mxu1 %v17527_v32 }
 0x2a8   :  { %2466 = vmatprep.subr.bf16.mxu0 %v17528_v33  ;;  %2672 = vmatprep.subr.bf16.mxu1 %v17528_v33 }
 0x2ab   :  { %2467 = vmatpush1.bf16.msra.mxu0 %v17529_v34  ;;  %2673 = vmatpush1.bf16.msra.mxu1 %v17529_v34 }
 0x2ac   :  { %2468 = vmatprep.subr.bf16.mxu0 %v17530_v37  ;;  %2674 = vmatprep.subr.bf16.mxu1 %v17530_v37 }
 0x2af   :  { %2469 = vmatpush1.bf16.msra.mxu0 %v17559_v52  ;;  %2675 = vmatpush1.bf16.msra.mxu1 %v17559_v52 }
 0x2b0   :  { %2470 = vmatprep.subr.bf16.mxu0 %v17560_v53  ;;  %2676 = vmatprep.subr.bf16.mxu1 %v17560_v53 }
 0x2b3   :  { %2471 = vmatpush1.bf16.msra.mxu0 %v17561_v56  ;;  %2677 = vmatpush1.bf16.msra.mxu1 %v17561_v56 }
 0x2b4   :  { %2472 = vmatprep.subr.bf16.mxu0 %v17562_v57  ;;  %2678 = vmatprep.subr.bf16.mxu1 %v17562_v57 }
 0x2b5   :  { %v1682_v58 = vpop.f32.mrb[16].mxu0  ;;  %v1888_v63 = vpop.f32.mrb[16].mxu1 }
 0x2b6   :  { %v1905_v10 = vmax.f32 %v1682_v58, %v1888_v63  ;;  %v1684_v11 = vpop.f32.mrb[17].mxu0  ;;  %v1890_v12 = vpop.f32.mrb[17].mxu1 }
 0x2b7   :  { %v1906_v14 = vmax.f32 %v1684_v11, %v1890_v12  ;;  %v1686_v15 = vpop.f32.mrb[18].mxu0  ;;  %v1892_v21 = vpop.f32.mrb[18].mxu1  ;;  %2473 = vmatpush1.bf16.msra.mxu0 %v17563_v22  ;;  %2679 = vmatpush1.bf16.msra.mxu1 %v17563_v22  ;;  %v17577_v22 = vld [vmem:[#allocation10_spill] sm:$0xff] }
 0x2b8   :  { %v1907_v26 = vmax.f32 %v1686_v15, %v1892_v21  ;;  %v1688_v29 = vpop.f32.mrb[19].mxu0  ;;  %v1894_v30 = vpop.f32.mrb[19].mxu1  ;;  %2474 = vmatprep.subr.bf16.mxu0 %v17564_v31  ;;  %2680 = vmatprep.subr.bf16.mxu1 %v17564_v31  ;;  %v17576_v21 = vld [vmem:[#allocation9_spill] sm:$0xff]  ;;  %v17581_v31 = vld [vmem:[#allocation14_spill] sm:$0xff] }
 0x2b9   :  { %v1911_v32 = vmax.f32 %v1905_v10, %v1906_v14  ;;  %v1908_v33 = vmax.f32 %v1688_v29, %v1894_v30  ;;  %v17579_v29 = vld [vmem:[#allocation12_spill] sm:$0xff]  ;;  %v17580_v30 = vld [vmem:[#allocation13_spill] sm:$0xff] }
 0x2bb   :  { %v1921_v34 = vadd.f32 %v12735_v25, %v1911_v32  ;;  %v1912_v37 = vmax.f32 %v1907_v26, %v1908_v33  ;;  %2475 = vmatpush1.bf16.msra.mxu0 %v17565_v55  ;;  %2681 = vmatpush1.bf16.msra.mxu1 %v17565_v55  ;;  %v17578_v26 = vld [vmem:[#allocation11_spill] sm:$0xff]  ;;  %v17583_v33 = vld [vmem:[#allocation16_spill] sm:$0xff] }
 0x2bc   :  { %2476 = vmatprep.subr.bf16.mxu0 %v12032_v0  ;;  %2682 = vmatprep.subr.bf16.mxu1 %v12032_v0  ;;  %v17582_v32 = vld [vmem:[#allocation15_spill] sm:$0xff]  ;;  %v10160_v55 = vld [vmem:[%s16975_s0 + $0x30] ss:$112 sps:$4 sm:$0xff]  }
 0x2bd   :  { %v1924_v59 = vmax.f32 %v1921_v34, 0.0  ;;  %v1922_v9 = vadd.f32 %v12735_v25, %v1912_v37  ;;  %v1692_v7 = vpop.f32.mrb[20].mxu0  ;;  %v1898_v40 = vpop.f32.mrb[20].mxu1  ;;  %v17584_v34 = vld [vmem:[#allocation17_spill] sm:$0xff]  ;;  %v17585_v37 = vld [vmem:[#allocation18_spill] sm:$0xff] }
 0x2be   :  { %v1909_v51 = vmax.f32 %v1692_v7, %v1898_v40  ;;  %v1694_v52 = vpop.f32.mrb[21].mxu0  ;;  %v1900_v53 = vpop.f32.mrb[21].mxu1  ;;  %v12903_v7 = vld [vmem:[%s16974_s1 + $0x4] ss:$8 sps:$4 sm:$0xff]   ;;  %v12910_v40 = vld [vmem:[%s16974_s1] ss:$8 sps:$4 sm:$0xff]  }
 0x2bf   :  { %v9323_v56 = vpack.c.bf16 %v1924_v59, %v1924_v59  ;;  %v1925_v57 = vmax.f32 %v1922_v9, 0.0  ;;  %v1910_v58 = vmax.f32 %v1694_v52, %v1900_v53  ;;  %v1696_v63 = vpop.f32.mrb[22].mxu0  ;;  %v1902_v10 = vpop.f32.mrb[22].mxu1  ;;  %2477 = vmatpush1.bf16.msra.mxu0 %v12040_v13  ;;  %2683 = vmatpush1.bf16.msra.mxu1 %v12040_v13  ;;  %v10161_v59 = vld [vmem:[%s16975_s0 + $0x34] ss:$112 sps:$4 sm:$0xff]   ;;  %v17586_v9 = vld [vmem:[#allocation19_spill] sm:$0xff] }
 0x2c0   :  { %v1697_v11 = vpop.f32.mrb[23].mxu0  ;;  %v1903_v12 = vpop.f32.mrb[23].mxu1  ;;  %2497 = vmatprep.subr.bf16.mxu0 %v12047_v1  ;;  %2703 = vmatprep.subr.bf16.mxu1 %v12047_v1  ;;  %v10162_v52 = vld [vmem:[%s16975_s0 + $0x110] ss:$0 sps:$4 sm:$0xff]   ;;  %v10163_v53 = vld [vmem:[%s16975_s0 + $0x114] ss:$0 sps:$4 sm:$0xff]  }
 0x2c1   :  { %1940 = vst [vmem:[#allocation2 + $0x8] sm:$0xf] %v9323_v56  ;;  %v9324_v0 = vpack.c.bf16 %v1925_v57, %v1925_v57  ;;  %v1913_v14 = vmax.f32 %v1909_v51, %v1910_v58  ;;  %v12917_v51 = vld [vmem:[%s16974_s1 + $0x14] ss:$8 sps:$4 sm:$0xff]   ;;  %v12932_v56 = vld [vmem:[%s16974_s1 + $0x10] ss:$8 sps:$4 sm:$0xff]  }
 0x2c2   :  { %2479 = vmatmul.mubr.bf16.vlgmr.msra.gmra.mrb[32].mxu0 %v12512_v50  ;;  %2685 = vmatmul.mubr.bf16.vlgmr.msra.gmra.mrb[32].mxu1 %v12517_v48  ;;  %v17575_v48 = vld [vmem:[#allocation8_spill] sm:$0xff]  ;;  %v12953_v63 = vld [vmem:[%s16974_s1 + $0x34] ss:$8 sps:$4 sm:$0xff]   ;;  %v12962_v10 = vld [vmem:[%s16974_s1 + $0x30] ss:$8 sps:$4 sm:$0xff]  }
 0x2c3   :  { %1941 = vst [vmem:[#allocation2 + $0x38] sm:$0xf] %v9324_v0  ;;  %v1923_v15 = vadd.f32 %v12735_v25, %v1913_v14  ;;  %2498 = vmatpush1.bf16.msra.mxu0 %v12057_v47  ;;  %2704 = vmatpush1.bf16.msra.mxu1 %v12057_v47  ;;  %v12765_v47 = vld [vmem:[%s16975_s0 + $0x2c] ss:$112 sps:$4 sm:$0xff]   ;;  %v12946_v58 = vld [vmem:[%s16974_s1 + $0x20] ss:$8 sps:$4 sm:$0xff]  }
 0x2c4   :  { %2499 = vmatprep.subr.bf16.mxu0 %v12064_v39  ;;  %2705 = vmatprep.subr.bf16.mxu1 %v12064_v39  ;;  %v12770_v39 = vld [vmem:[%s16975_s0 + $0x30] ss:$112 sps:$4 sm:$0xff]   ;;  %v12939_v57 = vld [vmem:[%s16974_s1 + $0x24] ss:$8 sps:$4 sm:$0xff]   ;;  %17587 = vst [vmem:[#allocation20_spill] sm:$0xff] %v12962_v10 }
 0x2c5   :  { %v1926_v13 = vmax.f32 %v1923_v15, 0.0  ;;  %2488 = vmatprep.mubr.bf16.mxu0 %v12539_v8  ;;  %2694 = vmatprep.mubr.bf16.mxu1 %v12541_v41  ;;  %v17574_v41 = vld [vmem:[#allocation7_spill] sm:$0xff]  ;;  %v12969_v11 = vld [vmem:[%s16974_s1 + $0x44] ss:$8 sps:$4 sm:$0xff]   ;;  %v12976_v12 = vld [vmem:[%s16974_s1 + $0x40] ss:$8 sps:$4 sm:$0xff]  }
 0x2c6   :  { %17588 = vst [vmem:[#allocation21_spill] sm:$0xff] %v12969_v11  ;;  %17589 = vst [vmem:[#allocation22_spill] sm:$0xff] %v12976_v12  ;;  %v12983_v0 = vld [vmem:[%s16974_s1 + $0x54] ss:$8 sps:$4 sm:$0xff]   ;;  %v12990_v14 = vld [vmem:[%s16974_s1 + $0x50] ss:$8 sps:$4 sm:$0xff]  }
 0x2c7   :  { %v9325_v1 = vpack.c.bf16 %v1926_v13, %v1926_v13  ;;  %2500 = vmatpush1.bf16.msra.mxu0 %v12073_v2  ;;  %2706 = vmatpush1.bf16.msra.mxu1 %v12073_v2  ;;  %v17566_v2 = vld [vmem:[#allocation27_spill] sm:$0xff]  ;;  %17590 = vst [vmem:[#allocation23_spill] sm:$0xff] %v12983_v0  ;;  %17591 = vst [vmem:[#allocation24_spill] sm:$0xff] %v12990_v14  ;;  %v12997_v15 = vld [vmem:[%s16974_s1 + $0x64] ss:$8 sps:$4 sm:$0xff]  }
 0x2c8   :  { %2501 = vmatprep.subr.bf16.mxu0 %v12080_v42  ;;  %2707 = vmatprep.subr.bf16.mxu1 %v12080_v42  ;;  %v17567_v42 = vld [vmem:[#allocation28_spill] sm:$0xff]  ;;  %17592 = vst [vmem:[#allocation25_spill] sm:$0xff] %v12997_v15 }
 0x2c9   :  { %1942 = vst [vmem:[#allocation2 + $0x68] sm:$0xf] %v9325_v1  ;;  %v13004_v13 = vld [vmem:[%s16974_s1 + $0x60] ss:$8 sps:$4 sm:$0xff]   ;;  %v13011_v1 = vld [vmem:[%s16974_s1 + $0x74] ss:$8 sps:$4 sm:$0xff]  }
 0x2ca   :  { %2489 = vmatmul.mubr.bf16.gmra.mrb[36].mxu0 %v12561_v45  ;;  %2695 = vmatmul.mubr.bf16.gmra.mrb[36].mxu1 %v12563_v35  ;;  %v17573_v45 = vld [vmem:[#allocation6_spill] sm:$0xff]  ;;  %17593 = vst [vmem:[#allocation26_spill] sm:$0xff] %v13004_v13  ;;  %17594 = vst [vmem:[#allocation27_spill] sm:$0xff] %v13011_v1 }
 0x2cb   :  { %2502 = vmatpush1.bf16.msra.mxu0 %v12099_v20  ;;  %2708 = vmatpush1.bf16.msra.mxu1 %v12099_v20  ;;  %v17568_v20 = vld [vmem:[#allocation29_spill] sm:$0xff] }
 0x2cc   :  { %2503 = vmatprep.subr.bf16.mxu0 %v12106_v46  ;;  %2709 = vmatprep.subr.bf16.mxu1 %v12106_v46  ;;  %v17569_v46 = vld [vmem:[#allocation30_spill] sm:$0xff] }
 0x2cd   :  { %2529 = vmatprep.mubr.bf16.mxu0 %v12765_v47  ;;  %2735 = vmatprep.mubr.bf16.mxu1 %v12770_v39 }
 0x2cf   :  { %2504 = vmatpush1.bf16.msra.mxu0 %v12115_v27  ;;  %2710 = vmatpush1.bf16.msra.mxu1 %v12115_v27  ;;  %v17570_v27 = vld [vmem:[#allocation31_spill] sm:$0xff] }
 0x2d0   :  { %2505 = vmatprep.subr.bf16.mxu0 %v12122_v28  ;;  %2711 = vmatprep.subr.bf16.mxu1 %v12122_v28  ;;  %v12831_v28 = vld [vmem:[%s16975_s0 + $0x28] ss:$112 sps:$4 sm:$0xff]  }
 0x2d3   :  { %2506 = vmatpush1.bf16.msra.mxu0 %v12129_v49  ;;  %2712 = vmatpush1.bf16.msra.mxu1 %v12129_v49  ;;  %v12836_v49 = vld [vmem:[%s16975_s0 + $0x2c] ss:$112 sps:$4 sm:$0xff]  }
 0x2d4   :  { %2507 = vmatprep.subr.bf16.mxu0 %v12136_v19  ;;  %2713 = vmatprep.subr.bf16.mxu1 %v12136_v19  ;;  %v2400_v19 = vld [vmem:[%s16975_s0 + $0x108] sm:$0xff] }
 0x2d5   :  { %v12860_v8 = vcombine.low %v2400_v19, %v2400_v19 }
 0x2d7   :  { %2508 = vmatpush1.bf16.msra.mxu0 %v12143_v43  ;;  %2714 = vmatpush1.bf16.msra.mxu1 %v12143_v43  ;;  %v2606_v43 = vld [vmem:[%s16975_s0 + $0x10c] sm:$0xff] }
 0x2d8   :  { %2509 = vmatprep.subr.bf16.mxu0 %v12150_v54  ;;  %2715 = vmatprep.subr.bf16.mxu1 %v12150_v54  ;;  %v17571_v54 = vld [vmem:[#allocation4_spill] sm:$0xff]  ;;  %v12850_v35 = vcombine.high %v2606_v43, %v2606_v43  ;;  %v12862_v50 = vcombine.low %v2606_v43, %v2606_v43  ;;  %v13039_v43 = vld [vmem:[%s16974_s1 + $0x94] ss:$8 sps:$4 sm:$0xff]  }
 0x2d9   :  { %17598 = vst [vmem:[#allocation31_spill] sm:$0xff] %v13039_v43 }
 0x2db   :  { %2510 = vmatpush1.bf16.msra.mxu0 %v12157_v16  ;;  %2716 = vmatpush1.bf16.msra.mxu1 %v12157_v16  ;;  %v17572_v16 = vld [vmem:[#allocation5_spill] sm:$0xff] }
 0x2dc   :  { %2511 = vmatprep.subr.bf16.mxu0 %v12164_v36  ;;  %2717 = vmatprep.subr.bf16.mxu1 %v12164_v36  ;;  %v12848_v36 = vcombine.high %v2400_v19, %v2400_v19  ;;  %v13032_v19 = vld [vmem:[%s16974_s1 + $0x80] ss:$8 sps:$4 sm:$0xff]  }
 0x2dd   :  { %17597 = vst [vmem:[#allocation30_spill] sm:$0xff] %v13032_v19 }
 0x2df   :  { %2512 = vmatpush1.bf16.msra.mxu0 %v12400_v60  ;;  %2718 = vmatpush1.bf16.msra.mxu1 %v12400_v60 }
 0x2e0   :  { %2513 = vmatprep.subr.bf16.mxu0 %v12407_v3  ;;  %2719 = vmatprep.subr.bf16.mxu1 %v12407_v3 }
 0x2e3   :  { %2514 = vmatpush1.bf16.msra.mxu0 %v12414_v4  ;;  %2720 = vmatpush1.bf16.msra.mxu1 %v12414_v4 }
 0x2e4   :  { %2515 = vmatprep.subr.bf16.mxu0 %v12421_v5  ;;  %2721 = vmatprep.subr.bf16.mxu1 %v12421_v5 }
 0x2e7   :  { %2516 = vmatpush1.bf16.msra.mxu0 %v12428_v6  ;;  %2722 = vmatpush1.bf16.msra.mxu1 %v12428_v6 }
 0x2e8   :  { %2517 = vmatprep.subr.bf16.mxu0 %v12435_v18  ;;  %2723 = vmatprep.subr.bf16.mxu1 %v12435_v18 }
 0x2eb   :  { %2518 = vmatpush1.bf16.msra.mxu0 %v12442_v23  ;;  %2724 = vmatpush1.bf16.msra.mxu1 %v12442_v23 }
 0x2ec   :  { %2519 = vmatprep.subr.bf16.mxu0 %v12449_v61  ;;  %2725 = vmatprep.subr.bf16.mxu1 %v12449_v61 }
 0x2ef   :  { %2520 = vmatpush1.bf16.msra.mxu0 %v12456_v62  ;;  %2726 = vmatpush1.bf16.msra.mxu1 %v12456_v62 }
 0x2f0   :  { %2521 = vmatprep.subr.bf16.mxu0 %v12463_v17  ;;  %2727 = vmatprep.subr.bf16.mxu1 %v12463_v17 }
 0x2f3   :  { %2522 = vmatpush1.bf16.msra.mxu0 %v12470_v24  ;;  %2728 = vmatpush1.bf16.msra.mxu1 %v12470_v24 }
 0x2f4   :  { %2523 = vmatprep.subr.bf16.mxu0 %v17566_v2  ;;  %2729 = vmatprep.subr.bf16.mxu1 %v17566_v2 }
 0x2f7   :  { %2524 = vmatpush1.bf16.msra.mxu0 %v17567_v42  ;;  %2730 = vmatpush1.bf16.msra.mxu1 %v17567_v42 }
 0x2f8   :  { %2525 = vmatprep.subr.bf16.mxu0 %v17568_v20  ;;  %2731 = vmatprep.subr.bf16.mxu1 %v17568_v20 }
 0x2fb   :  { %2526 = vmatpush1.bf16.msra.mxu0 %v17569_v46  ;;  %2732 = vmatpush1.bf16.msra.mxu1 %v17569_v46 }
 0x2fc   :  { %2527 = vmatprep.subr.bf16.mxu0 %v17570_v27  ;;  %2733 = vmatprep.subr.bf16.mxu1 %v17570_v27 }
 0x2ff   :  { %2528 = vmatpush1.bf16.msra.mxu0 %v17571_v54  ;;  %2734 = vmatpush1.bf16.msra.mxu1 %v17571_v54 }
 0x300   :  { %2548 = vmatprep.subr.bf16.mxu0 %v17572_v16  ;;  %2754 = vmatprep.subr.bf16.mxu1 %v17572_v16 }
 0x302   :  { %2530 = vmatmul.mubr.bf16.vlgmr.msra.gmra.mrb[32].mxu0 %v12831_v28  ;;  %2736 = vmatmul.mubr.bf16.vlgmr.msra.gmra.mrb[32].mxu1 %v12836_v49 }
 0x303   :  { %2549 = vmatpush1.bf16.msra.mxu0 %v17573_v45  ;;  %2755 = vmatpush1.bf16.msra.mxu1 %v17573_v45 }
 0x304   :  { %2550 = vmatprep.subr.bf16.mxu0 %v17574_v41  ;;  %2756 = vmatprep.subr.bf16.mxu1 %v17574_v41 }
 0x305   :  { %2539 = vmatprep.mubr.bf16.mxu0 %v12848_v36  ;;  %2745 = vmatprep.mubr.bf16.mxu1 %v12850_v35 }
 0x307   :  { %2551 = vmatpush1.bf16.msra.mxu0 %v17575_v48  ;;  %2757 = vmatpush1.bf16.msra.mxu1 %v17575_v48 }
 0x308   :  { %2552 = vmatprep.subr.bf16.mxu0 %v17576_v21  ;;  %2758 = vmatprep.subr.bf16.mxu1 %v17576_v21 }
 0x30a   :  { %2540 = vmatmul.mubr.bf16.gmra.mrb[36].mxu0 %v12860_v8  ;;  %2746 = vmatmul.mubr.bf16.gmra.mrb[36].mxu1 %v12862_v50 }
 0x30b   :  { %2553 = vmatpush1.bf16.msra.mxu0 %v17577_v22  ;;  %2759 = vmatpush1.bf16.msra.mxu1 %v17577_v22 }
 0x30c   :  { %2554 = vmatprep.subr.bf16.mxu0 %v17578_v26  ;;  %2760 = vmatprep.subr.bf16.mxu1 %v17578_v26 }
 0x30d   :  { %2580 = vmatprep.mubr.bf16.mxu0 %v17463_v38  ;;  %2786 = vmatprep.mubr.bf16.mxu1 %v17463_v38 }
 0x30f   :  { %2555 = vmatpush1.bf16.msra.mxu0 %v17579_v29  ;;  %2761 = vmatpush1.bf16.msra.mxu1 %v17579_v29 }
 0x310   :  { %2556 = vmatprep.subr.bf16.mxu0 %v17580_v30  ;;  %2762 = vmatprep.subr.bf16.mxu1 %v17580_v30 }
 0x313   :  { %2557 = vmatpush1.bf16.msra.mxu0 %v17581_v31  ;;  %2763 = vmatpush1.bf16.msra.mxu1 %v17581_v31 }
 0x314   :  { %2558 = vmatprep.subr.bf16.mxu0 %v17582_v32  ;;  %2764 = vmatprep.subr.bf16.mxu1 %v17582_v32 }
 0x317   :  { %2559 = vmatpush1.bf16.msra.mxu0 %v17583_v33  ;;  %2765 = vmatpush1.bf16.msra.mxu1 %v17583_v33 }
 0x318   :  { %2560 = vmatprep.subr.bf16.mxu0 %v17584_v34  ;;  %2766 = vmatprep.subr.bf16.mxu1 %v17584_v34 }
 0x31b   :  { %2561 = vmatpush1.bf16.msra.mxu0 %v17585_v37  ;;  %2767 = vmatpush1.bf16.msra.mxu1 %v17585_v37 }
 0x31c   :  { %2562 = vmatprep.subr.bf16.mxu0 %v12649_v44  ;;  %2768 = vmatprep.subr.bf16.mxu1 %v12649_v44 }
 0x31f   :  { %2563 = vmatpush1.bf16.msra.mxu0 %v17586_v9  ;;  %2769 = vmatpush1.bf16.msra.mxu1 %v17586_v9 }
 0x320   :  { %2896 = vmatprep.subr.bf16.mxu0 %v12903_v7  ;;  %3102 = vmatprep.subr.bf16.mxu1 %v12903_v7 }
 0x322   :  { %2581 = vmatmul.mubr.bf16.vlgmr.msra.gmra.mrb[32].mxu0 %v10160_v55  ;;  %2787 = vmatmul.mubr.bf16.vlgmr.msra.gmra.mrb[32].mxu1 %v10161_v59  ;;  %v13046_v55 = vld [vmem:[%s16974_s1 + $0x90] ss:$8 sps:$4 sm:$0xff]   ;;  %v13053_v59 = vld [vmem:[%s16974_s1 + $0xa4] ss:$8 sps:$4 sm:$0xff]  }
 0x323   :  { %2897 = vmatpush1.bf16.msra.mxu0 %v12910_v40  ;;  %3103 = vmatpush1.bf16.msra.mxu1 %v12910_v40  ;;  %17599 = vst [vmem:[#allocation4_spill] sm:$0xff] %v13046_v55  ;;  %17600 = vst [vmem:[#allocation5_spill] sm:$0xff] %v13053_v59 }
 0x324   :  { %2898 = vmatprep.subr.bf16.mxu0 %v12917_v51  ;;  %3104 = vmatprep.subr.bf16.mxu1 %v12917_v51 }
 0x325   :  { %2590 = vmatprep.mubr.bf16.mxu0 %v17463_v38  ;;  %2796 = vmatprep.mubr.bf16.mxu1 %v17463_v38 }
 0x327   :  { %2899 = vmatpush1.bf16.msra.mxu0 %v12932_v56  ;;  %3105 = vmatpush1.bf16.msra.mxu1 %v12932_v56 }
 0x328   :  { %2900 = vmatprep.subr.bf16.mxu0 %v12939_v57  ;;  %3106 = vmatprep.subr.bf16.mxu1 %v12939_v57 }
 0x32a   :  { %2591 = vmatmul.mubr.bf16.gmra.mrb[36].mxu0 %v10162_v52  ;;  %2797 = vmatmul.mubr.bf16.gmra.mrb[36].mxu1 %v10163_v53  ;;  %v13060_v52 = vld [vmem:[%s16974_s1 + $0xa0] ss:$8 sps:$4 sm:$0xff]   ;;  %v13067_v53 = vld [vmem:[%s16974_s1 + $0xb4] ss:$8 sps:$4 sm:$0xff]  }
 0x32b   :  { %2901 = vmatpush1.bf16.msra.mxu0 %v12946_v58  ;;  %3107 = vmatpush1.bf16.msra.mxu1 %v12946_v58  ;;  %17601 = vst [vmem:[#allocation6_spill] sm:$0xff] %v13060_v52  ;;  %17602 = vst [vmem:[#allocation7_spill] sm:$0xff] %v13067_v53 }
 0x32c   :  { %2902 = vmatprep.subr.bf16.mxu0 %v12953_v63  ;;  %3108 = vmatprep.subr.bf16.mxu1 %v12953_v63 }
 0x32d   :  { %2928 = vmatprep.mubr.bf16.mxu0 %v12765_v47  ;;  %3134 = vmatprep.mubr.bf16.mxu1 %v12770_v39  ;;  %v13018_v47 = vld [vmem:[%s16974_s1 + $0x70] ss:$8 sps:$4 sm:$0xff]   ;;  %v13025_v39 = vld [vmem:[%s16974_s1 + $0x84] ss:$8 sps:$4 sm:$0xff]  }
 0x32e   :  { %17595 = vst [vmem:[#allocation28_spill] sm:$0xff] %v13018_v47  ;;  %17596 = vst [vmem:[#allocation29_spill] sm:$0xff] %v13025_v39 }
 0x32f   :  { %2903 = vmatpush1.bf16.msra.mxu0 %v12962_v10  ;;  %3109 = vmatpush1.bf16.msra.mxu1 %v12962_v10  ;;  %v13132_v10 = vld [vmem:[%s16974_s1 + $0xf0] ss:$8 sps:$4 sm:$0xff]  }
 0x330   :  { %2904 = vmatprep.subr.bf16.mxu0 %v12969_v11  ;;  %3110 = vmatprep.subr.bf16.mxu1 %v12969_v11 }
 0x333   :  { %2905 = vmatpush1.bf16.msra.mxu0 %v12976_v12  ;;  %3111 = vmatpush1.bf16.msra.mxu1 %v12976_v12 }
 0x334   :  { %2906 = vmatprep.subr.bf16.mxu0 %v12983_v0  ;;  %3112 = vmatprep.subr.bf16.mxu1 %v12983_v0 }
 0x337   :  { %2907 = vmatpush1.bf16.msra.mxu0 %v12990_v14  ;;  %3113 = vmatpush1.bf16.msra.mxu1 %v12990_v14 }
 0x338   :  { %2908 = vmatprep.subr.bf16.mxu0 %v12997_v15  ;;  %3114 = vmatprep.subr.bf16.mxu1 %v12997_v15 }
 0x33b   :  { %2909 = vmatpush1.bf16.msra.mxu0 %v13004_v13  ;;  %3115 = vmatpush1.bf16.msra.mxu1 %v13004_v13 }
 0x33c   :  { %2910 = vmatprep.subr.bf16.mxu0 %v13011_v1  ;;  %3116 = vmatprep.subr.bf16.mxu1 %v13011_v1 }
 0x33f   :  { %2911 = vmatpush1.bf16.msra.mxu0 %v13018_v47  ;;  %3117 = vmatpush1.bf16.msra.mxu1 %v13018_v47 }
 0x340   :  { %2912 = vmatprep.subr.bf16.mxu0 %v13025_v39  ;;  %3118 = vmatprep.subr.bf16.mxu1 %v13025_v39 }
 0x343   :  { %2913 = vmatpush1.bf16.msra.mxu0 %v13032_v19  ;;  %3119 = vmatpush1.bf16.msra.mxu1 %v13032_v19 }
 0x344   :  { %2914 = vmatprep.subr.bf16.mxu0 %v13039_v43  ;;  %3120 = vmatprep.subr.bf16.mxu1 %v13039_v43 }
 0x347   :  { %2915 = vmatpush1.bf16.msra.mxu0 %v13046_v55  ;;  %3121 = vmatpush1.bf16.msra.mxu1 %v13046_v55 }
 0x348   :  { %2916 = vmatprep.subr.bf16.mxu0 %v13053_v59  ;;  %3122 = vmatprep.subr.bf16.mxu1 %v13053_v59  ;;  %v13074_v59 = vld [vmem:[%s16974_s1 + $0xb0] ss:$8 sps:$4 sm:$0xff]  }
 0x349   :  { %17603 = vst [vmem:[#allocation8_spill] sm:$0xff] %v13074_v59 }
 0x34b   :  { %2917 = vmatpush1.bf16.msra.mxu0 %v13060_v52  ;;  %3123 = vmatpush1.bf16.msra.mxu1 %v13060_v52  ;;  %v13081_v52 = vld [vmem:[%s16974_s1 + $0xc4] ss:$8 sps:$4 sm:$0xff]  }
 0x34c   :  { %2918 = vmatprep.subr.bf16.mxu0 %v13067_v53  ;;  %3124 = vmatprep.subr.bf16.mxu1 %v13067_v53  ;;  %17604 = vst [vmem:[#allocation9_spill] sm:$0xff] %v13081_v52  ;;  %v13088_v53 = vld [vmem:[%s16974_s1 + $0xc0] ss:$8 sps:$4 sm:$0xff]  }
 0x34d   :  { %17605 = vst [vmem:[#allocation10_spill] sm:$0xff] %v13088_v53 }
 0x34f   :  { %2919 = vmatpush1.bf16.msra.mxu0 %v13074_v59  ;;  %3125 = vmatpush1.bf16.msra.mxu1 %v13074_v59  ;;  %v13095_v59 = vld [vmem:[%s16974_s1 + $0xd4] ss:$8 sps:$4 sm:$0xff]  }
 0x350   :  { %2920 = vmatprep.subr.bf16.mxu0 %v13081_v52  ;;  %3126 = vmatprep.subr.bf16.mxu1 %v13081_v52  ;;  %17606 = vst [vmem:[#allocation11_spill] sm:$0xff] %v13095_v59 }
 0x353   :  { %2921 = vmatpush1.bf16.msra.mxu0 %v13088_v53  ;;  %3127 = vmatpush1.bf16.msra.mxu1 %v13088_v53  ;;  %v13102_v53 = vld [vmem:[%s16974_s1 + $0xd0] ss:$8 sps:$4 sm:$0xff]  }
 0x354   :  { %2922 = vmatprep.subr.bf16.mxu0 %v13095_v59  ;;  %3128 = vmatprep.subr.bf16.mxu1 %v13095_v59  ;;  %17607 = vst [vmem:[#allocation12_spill] sm:$0xff] %v13102_v53 }
 0x355   :  { %v2132_v55 = vpop.f32.mrb[24].mxu0  ;;  %v2338_v52 = vpop.f32.mrb[24].mxu1 }
 0x356   :  { %v2355_v43 = vmax.f32 %v2132_v55, %v2338_v52  ;;  %v2134_v19 = vpop.f32.mrb[25].mxu0  ;;  %v2340_v39 = vpop.f32.mrb[25].mxu1  ;;  %v13109_v55 = vld [vmem:[%s16974_s1 + $0xe4] ss:$8 sps:$4 sm:$0xff]  }
 0x357   :  { %v2356_v47 = vmax.f32 %v2134_v19, %v2340_v39  ;;  %v2136_v1 = vpop.f32.mrb[26].mxu0  ;;  %v2342_v13 = vpop.f32.mrb[26].mxu1  ;;  %2923 = vmatpush1.bf16.msra.mxu0 %v13102_v53  ;;  %3129 = vmatpush1.bf16.msra.mxu1 %v13102_v53  ;;  %17608 = vst [vmem:[#allocation13_spill] sm:$0xff] %v13109_v55 }
 0x358   :  { %v2357_v15 = vmax.f32 %v2136_v1, %v2342_v13  ;;  %v2138_v14 = vpop.f32.mrb[27].mxu0  ;;  %v2344_v59 = vpop.f32.mrb[27].mxu1  ;;  %2924 = vmatprep.subr.bf16.mxu0 %v13109_v55  ;;  %3130 = vmatprep.subr.bf16.mxu1 %v13109_v55  ;;  %v13117_v13 = vld [vmem:[%s16974_s1 + $0xe0] ss:$8 sps:$4 sm:$0xff]   ;;  %v13124_v1 = vld [vmem:[%s16974_s1 + $0xf4] ss:$8 sps:$4 sm:$0xff]  }
 0x359   :  { %v2361_v39 = vmax.f32 %v2355_v43, %v2356_v47  ;;  %v2358_v19 = vmax.f32 %v2138_v14, %v2344_v59  ;;  %17609 = vst [vmem:[#allocation14_spill] sm:$0xff] %v13117_v13 }
 0x35b   :  { %v2371_v52 = vadd.f32 %v12735_v25, %v2361_v39  ;;  %v2362_v0 = vmax.f32 %v2357_v15, %v2358_v19  ;;  %2925 = vmatpush1.bf16.msra.mxu0 %v13117_v13  ;;  %3131 = vmatpush1.bf16.msra.mxu1 %v13117_v13 }
 0x35c   :  { %2926 = vmatprep.subr.bf16.mxu0 %v13124_v1  ;;  %3132 = vmatprep.subr.bf16.mxu1 %v13124_v1 }
 0x35d   :  { %v2374_v14 = vmax.f32 %v2371_v52, 0.0  ;;  %v2372_v15 = vadd.f32 %v12735_v25, %v2362_v0  ;;  %v2142_v47 = vpop.f32.mrb[28].mxu0  ;;  %v2348_v43 = vpop.f32.mrb[28].mxu1 }
 0x35e   :  { %v2359_v59 = vmax.f32 %v2142_v47, %v2348_v43  ;;  %v2144_v39 = vpop.f32.mrb[29].mxu0  ;;  %v2350_v19 = vpop.f32.mrb[29].mxu1  ;;  %v13139_v47 = vld [vmem:[%s16974_s1 + $0x104] ss:$8 sps:$4 sm:$0xff]   ;;  %v13198_v43 = vld [vmem:[%s16974_s1 + $0x134] ss:$8 sps:$4 sm:$0xff]  }
 0x35f   :  { %v9326_v55 = vpack.c.bf16 %v2374_v14, %v2374_v14  ;;  %v2375_v53 = vmax.f32 %v2372_v15, 0.0  ;;  %v2360_v13 = vmax.f32 %v2144_v39, %v2350_v19  ;;  %v2146_v12 = vpop.f32.mrb[30].mxu0  ;;  %v2352_v11 = vpop.f32.mrb[30].mxu1  ;;  %2927 = vmatpush1.bf16.msra.mxu0 %v13132_v10  ;;  %3133 = vmatpush1.bf16.msra.mxu1 %v13132_v10  ;;  %v13149_v15 = vld [vmem:[%s16974_s1 + $0x100] ss:$8 sps:$4 sm:$0xff]  }
 0x360   :  { %v2147_v0 = vpop.f32.mrb[31].mxu0  ;;  %v2353_v52 = vpop.f32.mrb[31].mxu1  ;;  %2947 = vmatprep.subr.bf16.mxu0 %v13139_v47  ;;  %3153 = vmatprep.subr.bf16.mxu1 %v13139_v47  ;;  %v13228_v39 = vld [vmem:[%s16974_s1 + $0x154] ss:$8 sps:$4 sm:$0xff]   ;;  %v13235_v19 = vld [vmem:[%s16974_s1 + $0x150] ss:$8 sps:$4 sm:$0xff]  }
 0x361   :  { %2390 = vst [vmem:[#allocation2 + $0xc] sm:$0xf] %v9326_v55  ;;  %v9327_v11 = vpack.c.bf16 %v2375_v53, %v2375_v53  ;;  %v2363_v12 = vmax.f32 %v2359_v59, %v2360_v13  ;;  %v13156_v53 = vld [vmem:[%s16974_s1 + $0x114] ss:$8 sps:$4 sm:$0xff]   ;;  %v13172_v55 = vld [vmem:[%s16974_s1 + $0x124] ss:$8 sps:$4 sm:$0xff]  }
 0x362   :  { %2929 = vmatmul.mubr.bf16.vlgmr.msra.gmra.mrb[40].mxu0 %v12831_v28  ;;  %3135 = vmatmul.mubr.bf16.vlgmr.msra.gmra.mrb[40].mxu1 %v12836_v49  ;;  %v13165_v49 = vld [vmem:[%s16974_s1 + $0x110] ss:$8 sps:$4 sm:$0xff]   ;;  %v13191_v13 = vld [vmem:[%s16974_s1 + $0x120] ss:$8 sps:$4 sm:$0xff]   ;;  %v13242_v0 = vld [vmem:[%s16974_s1 + $0x164] ss:$8 sps:$4 sm:$0xff]  }
 0x363   :  { %2391 = vst [vmem:[#allocation2 + $0x3c] sm:$0xf] %v9327_v11  ;;  %v2373_v14 = vadd.f32 %v12735_v25, %v2363_v12  ;;  %2948 = vmatpush1.bf16.msra.mxu0 %v13149_v15  ;;  %3154 = vmatpush1.bf16.msra.mxu1 %v13149_v15  ;;  %v13221_v59 = vld [vmem:[%s16974_s1 + $0x140] ss:$8 sps:$4 sm:$0xff]   ;;  %v13256_v11 = vld [vmem:[%s16974_s1 + $0x174] ss:$8 sps:$4 sm:$0xff]  }
 0x364   :  { %2949 = vmatprep.subr.bf16.mxu0 %v13156_v53  ;;  %3155 = vmatprep.subr.bf16.mxu1 %v13156_v53  ;;  %v13249_v52 = vld [vmem:[%s16974_s1 + $0x160] ss:$8 sps:$4 sm:$0xff]  }
 0x365   :  { %v2376_v28 = vmax.f32 %v2373_v14, 0.0  ;;  %2938 = vmatprep.mubr.bf16.mxu0 %v12848_v36  ;;  %3144 = vmatprep.mubr.bf16.mxu1 %v12850_v35  ;;  %v13179_v36 = vld [vmem:[%s16975_s0 + $0x34] ss:$112 sps:$4 sm:$0xff]   ;;  %v13184_v35 = vld [vmem:[%s16975_s0 + $0x38] ss:$112 sps:$4 sm:$0xff]  }
 0x367   :  { %v9328_v25 = vpack.c.bf16 %v2376_v28, %v2376_v28  ;;  %2950 = vmatpush1.bf16.msra.mxu0 %v13165_v49  ;;  %3156 = vmatpush1.bf16.msra.mxu1 %v13165_v49 }
 0x368   :  { %2951 = vmatprep.subr.bf16.mxu0 %v13172_v55  ;;  %3157 = vmatprep.subr.bf16.mxu1 %v13172_v55 }
 0x369   :  { %2392 = vst [vmem:[#allocation2 + $0x6c] sm:$0xf] %v9328_v25 }
 0x36a   :  { %2939 = vmatmul.mubr.bf16.gmra.mrb[44].mxu0 %v12860_v8  ;;  %3145 = vmatmul.mubr.bf16.gmra.mrb[44].mxu1 %v12862_v50  ;;  %v13207_v8 = vld [vmem:[%s16974_s1 + $0x130] ss:$8 sps:$4 sm:$0xff]   ;;  %v13214_v50 = vld [vmem:[%s16974_s1 + $0x144] ss:$8 sps:$4 sm:$0xff]  }
 0x36b   :  { %2952 = vmatpush1.bf16.msra.mxu0 %v13191_v13  ;;  %3158 = vmatpush1.bf16.msra.mxu1 %v13191_v13 }
 0x36c   :  { %2953 = vmatprep.subr.bf16.mxu0 %v13198_v43  ;;  %3159 = vmatprep.subr.bf16.mxu1 %v13198_v43 }
 0x36d   :  { %2979 = vmatprep.mubr.bf16.mxu0 %v13179_v36  ;;  %3185 = vmatprep.mubr.bf16.mxu1 %v13184_v35 }
 0x36f   :  { %2954 = vmatpush1.bf16.msra.mxu0 %v13207_v8  ;;  %3160 = vmatpush1.bf16.msra.mxu1 %v13207_v8 }
 0x370   :  { %2955 = vmatprep.subr.bf16.mxu0 %v13214_v50  ;;  %3161 = vmatprep.subr.bf16.mxu1 %v13214_v50 }
 0x373   :  { %2956 = vmatpush1.bf16.msra.mxu0 %v13221_v59  ;;  %3162 = vmatpush1.bf16.msra.mxu1 %v13221_v59 }
 0x374   :  { %2957 = vmatprep.subr.bf16.mxu0 %v13228_v39  ;;  %3163 = vmatprep.subr.bf16.mxu1 %v13228_v39 }
 0x377   :  { %2958 = vmatpush1.bf16.msra.mxu0 %v13235_v19  ;;  %3164 = vmatpush1.bf16.msra.mxu1 %v13235_v19 }
 0x378   :  { %2959 = vmatprep.subr.bf16.mxu0 %v13242_v0  ;;  %3165 = vmatprep.subr.bf16.mxu1 %v13242_v0 }
 0x37b   :  { %2960 = vmatpush1.bf16.msra.mxu0 %v13249_v52  ;;  %3166 = vmatpush1.bf16.msra.mxu1 %v13249_v52 }
 0x37c   :  { %2961 = vmatprep.subr.bf16.mxu0 %v13256_v11  ;;  %3167 = vmatprep.subr.bf16.mxu1 %v13256_v11 }
 0x37f   :  { %2962 = vmatpush1.bf16.msra.mxu0 %v12400_v60  ;;  %3168 = vmatpush1.bf16.msra.mxu1 %v12400_v60  ;;  %v13295_v60 = vld [vmem:[%s16975_s0 + $0x30] ss:$112 sps:$4 sm:$0xff]  }
 0x380   :  { %2963 = vmatprep.subr.bf16.mxu0 %v12407_v3  ;;  %3169 = vmatprep.subr.bf16.mxu1 %v12407_v3  ;;  %v13300_v3 = vld [vmem:[%s16975_s0 + $0x34] ss:$112 sps:$4 sm:$0xff]  }
 0x383   :  { %2964 = vmatpush1.bf16.msra.mxu0 %v12414_v4  ;;  %3170 = vmatpush1.bf16.msra.mxu1 %v12414_v4  ;;  %v2850_v4 = vld [vmem:[%s16975_s0 + $0x110] sm:$0xff] }
 0x384   :  { %2965 = vmatprep.subr.bf16.mxu0 %v12421_v5  ;;  %3171 = vmatprep.subr.bf16.mxu1 %v12421_v5  ;;  %v3056_v5 = vld [vmem:[%s16975_s0 + $0x114] sm:$0xff] }
 0x387   :  { %2966 = vmatpush1.bf16.msra.mxu0 %v12428_v6  ;;  %3172 = vmatpush1.bf16.msra.mxu1 %v12428_v6  ;;  %v13312_v6 = vcombine.high %v2850_v4, %v2850_v4 }
 0x388   :  { %2967 = vmatprep.subr.bf16.mxu0 %v12435_v18  ;;  %3173 = vmatprep.subr.bf16.mxu1 %v12435_v18  ;;  %v13314_v18 = vcombine.high %v3056_v5, %v3056_v5 }
 0x38b   :  { %2968 = vmatpush1.bf16.msra.mxu0 %v12442_v23  ;;  %3174 = vmatpush1.bf16.msra.mxu1 %v12442_v23  ;;  %v13324_v23 = vcombine.low %v2850_v4, %v2850_v4 }
 0x38c   :  { %2969 = vmatprep.subr.bf16.mxu0 %v12449_v61  ;;  %3175 = vmatprep.subr.bf16.mxu1 %v12449_v61  ;;  %v13326_v61 = vcombine.low %v3056_v5, %v3056_v5  ;;  %v17630_v5 = vld [vmem:[#allocation12_spill] sm:$0xff] }
 0x38f   :  { %2970 = vmatpush1.bf16.msra.mxu0 %v12456_v62  ;;  %3176 = vmatpush1.bf16.msra.mxu1 %v12456_v62  ;;  %v10174_v62 = vld [vmem:[%s16975_s0 + $0x38] ss:$112 sps:$4 sm:$0xff]  }
 0x390   :  { %2971 = vmatprep.subr.bf16.mxu0 %v12463_v17  ;;  %3177 = vmatprep.subr.bf16.mxu1 %v12463_v17  ;;  %v10175_v17 = vld [vmem:[%s16975_s0 + $0x3c] ss:$112 sps:$4 sm:$0xff]  }
 0x393   :  { %2972 = vmatpush1.bf16.msra.mxu0 %v12470_v24  ;;  %3178 = vmatpush1.bf16.msra.mxu1 %v12470_v24  ;;  %v10176_v24 = vld [vmem:[%s16975_s0 + $0x118] ss:$0 sps:$4 sm:$0xff]  }
 0x394   :  { %2973 = vmatprep.subr.bf16.mxu0 %v17566_v2  ;;  %3179 = vmatprep.subr.bf16.mxu1 %v17566_v2  ;;  %v17610_v2 = vld [vmem:[#allocation20_spill] sm:$0xff] }
 0x397   :  { %2974 = vmatpush1.bf16.msra.mxu0 %v17567_v42  ;;  %3180 = vmatpush1.bf16.msra.mxu1 %v17567_v42  ;;  %v17611_v42 = vld [vmem:[#allocation21_spill] sm:$0xff] }
 0x398   :  { %2975 = vmatprep.subr.bf16.mxu0 %v17568_v20  ;;  %3181 = vmatprep.subr.bf16.mxu1 %v17568_v20  ;;  %v17612_v20 = vld [vmem:[#allocation22_spill] sm:$0xff] }
 0x39b   :  { %2976 = vmatpush1.bf16.msra.mxu0 %v17569_v46  ;;  %3182 = vmatpush1.bf16.msra.mxu1 %v17569_v46  ;;  %v17613_v46 = vld [vmem:[#allocation23_spill] sm:$0xff] }
 0x39c   :  { %2977 = vmatprep.subr.bf16.mxu0 %v17570_v27  ;;  %3183 = vmatprep.subr.bf16.mxu1 %v17570_v27  ;;  %v17614_v27 = vld [vmem:[#allocation24_spill] sm:$0xff] }
 0x39f   :  { %2978 = vmatpush1.bf16.msra.mxu0 %v17571_v54  ;;  %3184 = vmatpush1.bf16.msra.mxu1 %v17571_v54  ;;  %v17615_v54 = vld [vmem:[#allocation25_spill] sm:$0xff] }
 0x3a0   :  { %2998 = vmatprep.subr.bf16.mxu0 %v17572_v16  ;;  %3204 = vmatprep.subr.bf16.mxu1 %v17572_v16  ;;  %v17616_v16 = vld [vmem:[#allocation26_spill] sm:$0xff] }
 0x3a2   :  { %2980 = vmatmul.mubr.bf16.vlgmr.msra.gmra.mrb[40].mxu0 %v13295_v60  ;;  %3186 = vmatmul.mubr.bf16.vlgmr.msra.gmra.mrb[40].mxu1 %v13300_v3 }
 0x3a3   :  { %2999 = vmatpush1.bf16.msra.mxu0 %v17573_v45  ;;  %3205 = vmatpush1.bf16.msra.mxu1 %v17573_v45  ;;  %v17617_v45 = vld [vmem:[#allocation27_spill] sm:$0xff] }
 0x3a4   :  { %3000 = vmatprep.subr.bf16.mxu0 %v17574_v41  ;;  %3206 = vmatprep.subr.bf16.mxu1 %v17574_v41  ;;  %v17618_v41 = vld [vmem:[#allocation28_spill] sm:$0xff] }
 0x3a5   :  { %2989 = vmatprep.mubr.bf16.mxu0 %v13312_v6  ;;  %3195 = vmatprep.mubr.bf16.mxu1 %v13314_v18 }
 0x3a7   :  { %3001 = vmatpush1.bf16.msra.mxu0 %v17575_v48  ;;  %3207 = vmatpush1.bf16.msra.mxu1 %v17575_v48  ;;  %v17619_v48 = vld [vmem:[#allocation29_spill] sm:$0xff] }
 0x3a8   :  { %3002 = vmatprep.subr.bf16.mxu0 %v17576_v21  ;;  %3208 = vmatprep.subr.bf16.mxu1 %v17576_v21  ;;  %v17620_v21 = vld [vmem:[#allocation30_spill] sm:$0xff] }
 0x3aa   :  { %2990 = vmatmul.mubr.bf16.gmra.mrb[44].mxu0 %v13324_v23  ;;  %3196 = vmatmul.mubr.bf16.gmra.mrb[44].mxu1 %v13326_v61 }
 0x3ab   :  { %3003 = vmatpush1.bf16.msra.mxu0 %v17577_v22  ;;  %3209 = vmatpush1.bf16.msra.mxu1 %v17577_v22  ;;  %v17621_v22 = vld [vmem:[#allocation31_spill] sm:$0xff] }
 0x3ac   :  { %3004 = vmatprep.subr.bf16.mxu0 %v17578_v26  ;;  %3210 = vmatprep.subr.bf16.mxu1 %v17578_v26  ;;  %v17622_v26 = vld [vmem:[#allocation4_spill] sm:$0xff] }
 0x3ad   :  { %3030 = vmatprep.mubr.bf16.mxu0 %v17463_v38  ;;  %3236 = vmatprep.mubr.bf16.mxu1 %v17463_v38 }
 0x3af   :  { %3005 = vmatpush1.bf16.msra.mxu0 %v17579_v29  ;;  %3211 = vmatpush1.bf16.msra.mxu1 %v17579_v29  ;;  %v17623_v29 = vld [vmem:[#allocation5_spill] sm:$0xff] }
 0x3b0   :  { %3006 = vmatprep.subr.bf16.mxu0 %v17580_v30  ;;  %3212 = vmatprep.subr.bf16.mxu1 %v17580_v30  ;;  %v17624_v30 = vld [vmem:[#allocation6_spill] sm:$0xff] }
 0x3b3   :  { %3007 = vmatpush1.bf16.msra.mxu0 %v17581_v31  ;;  %3213 = vmatpush1.bf16.msra.mxu1 %v17581_v31  ;;  %v17625_v31 = vld [vmem:[#allocation7_spill] sm:$0xff] }
 0x3b4   :  { %3008 = vmatprep.subr.bf16.mxu0 %v17582_v32  ;;  %3214 = vmatprep.subr.bf16.mxu1 %v17582_v32  ;;  %v17626_v32 = vld [vmem:[#allocation8_spill] sm:$0xff] }
 0x3b7   :  { %3009 = vmatpush1.bf16.msra.mxu0 %v17583_v33  ;;  %3215 = vmatpush1.bf16.msra.mxu1 %v17583_v33  ;;  %v17627_v33 = vld [vmem:[#allocation9_spill] sm:$0xff] }
 0x3b8   :  { %3010 = vmatprep.subr.bf16.mxu0 %v17584_v34  ;;  %3216 = vmatprep.subr.bf16.mxu1 %v17584_v34  ;;  %v17628_v34 = vld [vmem:[#allocation10_spill] sm:$0xff] }
 0x3bb   :  { %3011 = vmatpush1.bf16.msra.mxu0 %v17585_v37  ;;  %3217 = vmatpush1.bf16.msra.mxu1 %v17585_v37  ;;  %v17629_v37 = vld [vmem:[#allocation11_spill] sm:$0xff] }
 0x3bc   :  { %3012 = vmatprep.subr.bf16.mxu0 %v12649_v44  ;;  %3218 = vmatprep.subr.bf16.mxu1 %v12649_v44  ;;  %v10177_v44 = vld [vmem:[%s16975_s0 + $0x11c] ss:$0 sps:$4 sm:$0xff]  }
 0x3bf   :  { %3013 = vmatpush1.bf16.msra.mxu0 %v17586_v9  ;;  %3219 = vmatpush1.bf16.msra.mxu1 %v17586_v9 }
 0x3c0   :  { %3346 = vmatprep.subr.bf16.mxu0 %v12903_v7  ;;  %3552 = vmatprep.subr.bf16.mxu1 %v12903_v7 }
 0x3c2   :  { %3031 = vmatmul.mubr.bf16.vlgmr.msra.gmra.mrb[40].mxu0 %v10174_v62  ;;  %3237 = vmatmul.mubr.bf16.vlgmr.msra.gmra.mrb[40].mxu1 %v10175_v17  ;;  %v13433_v62 = vld [vmem:[%s16976_s2] ss:$0 sm:$0xff] }
 0x3c3   :  { %3347 = vmatpush1.bf16.msra.mxu0 %v12910_v40  ;;  %3553 = vmatpush1.bf16.msra.mxu1 %v12910_v40 }
 0x3c4   :  { %3348 = vmatprep.subr.bf16.mxu0 %v12917_v51  ;;  %3554 = vmatprep.subr.bf16.mxu1 %v12917_v51 }
 0x3c5   :  { %3040 = vmatprep.mubr.bf16.mxu0 %v17463_v38  ;;  %3246 = vmatprep.mubr.bf16.mxu1 %v17463_v38 }
 0x3c7   :  { %3349 = vmatpush1.bf16.msra.mxu0 %v12932_v56  ;;  %3555 = vmatpush1.bf16.msra.mxu1 %v12932_v56 }
 0x3c8   :  { %3350 = vmatprep.subr.bf16.mxu0 %v12939_v57  ;;  %3556 = vmatprep.subr.bf16.mxu1 %v12939_v57 }
 0x3ca   :  { %3041 = vmatmul.mubr.bf16.gmra.mrb[44].mxu0 %v10176_v24  ;;  %3247 = vmatmul.mubr.bf16.gmra.mrb[44].mxu1 %v10177_v44 }
 0x3cb   :  { %3351 = vmatpush1.bf16.msra.mxu0 %v12946_v58  ;;  %3557 = vmatpush1.bf16.msra.mxu1 %v12946_v58 }
 0x3cc   :  { %3352 = vmatprep.subr.bf16.mxu0 %v12953_v63  ;;  %3558 = vmatprep.subr.bf16.mxu1 %v12953_v63 }
 0x3cd   :  { %3378 = vmatprep.mubr.bf16.mxu0 %v13179_v36  ;;  %3584 = vmatprep.mubr.bf16.mxu1 %v13184_v35 }
 0x3cf   :  { %3353 = vmatpush1.bf16.msra.mxu0 %v17610_v2  ;;  %3559 = vmatpush1.bf16.msra.mxu1 %v17610_v2 }
 0x3d0   :  { %3354 = vmatprep.subr.bf16.mxu0 %v17611_v42  ;;  %3560 = vmatprep.subr.bf16.mxu1 %v17611_v42 }
 0x3d3   :  { %3355 = vmatpush1.bf16.msra.mxu0 %v17612_v20  ;;  %3561 = vmatpush1.bf16.msra.mxu1 %v17612_v20 }
 0x3d4   :  { %3356 = vmatprep.subr.bf16.mxu0 %v17613_v46  ;;  %3562 = vmatprep.subr.bf16.mxu1 %v17613_v46 }
 0x3d7   :  { %3357 = vmatpush1.bf16.msra.mxu0 %v17614_v27  ;;  %3563 = vmatpush1.bf16.msra.mxu1 %v17614_v27 }
 0x3d8   :  { %3358 = vmatprep.subr.bf16.mxu0 %v17615_v54  ;;  %3564 = vmatprep.subr.bf16.mxu1 %v17615_v54 }
 0x3db   :  { %3359 = vmatpush1.bf16.msra.mxu0 %v17616_v16  ;;  %3565 = vmatpush1.bf16.msra.mxu1 %v17616_v16 }
 0x3dc   :  { %3360 = vmatprep.subr.bf16.mxu0 %v17617_v45  ;;  %3566 = vmatprep.subr.bf16.mxu1 %v17617_v45 }
 0x3df   :  { %3361 = vmatpush1.bf16.msra.mxu0 %v17618_v41  ;;  %3567 = vmatpush1.bf16.msra.mxu1 %v17618_v41 }
 0x3e0   :  { %3362 = vmatprep.subr.bf16.mxu0 %v17619_v48  ;;  %3568 = vmatprep.subr.bf16.mxu1 %v17619_v48 }
 0x3e3   :  { %3363 = vmatpush1.bf16.msra.mxu0 %v17620_v21  ;;  %3569 = vmatpush1.bf16.msra.mxu1 %v17620_v21 }
 0x3e4   :  { %3364 = vmatprep.subr.bf16.mxu0 %v17621_v22  ;;  %3570 = vmatprep.subr.bf16.mxu1 %v17621_v22 }
 0x3e7   :  { %3365 = vmatpush1.bf16.msra.mxu0 %v17622_v26  ;;  %3571 = vmatpush1.bf16.msra.mxu1 %v17622_v26 }
 0x3e8   :  { %3366 = vmatprep.subr.bf16.mxu0 %v17623_v29  ;;  %3572 = vmatprep.subr.bf16.mxu1 %v17623_v29 }
 0x3eb   :  { %3367 = vmatpush1.bf16.msra.mxu0 %v17624_v30  ;;  %3573 = vmatpush1.bf16.msra.mxu1 %v17624_v30 }
 0x3ec   :  { %3368 = vmatprep.subr.bf16.mxu0 %v17625_v31  ;;  %3574 = vmatprep.subr.bf16.mxu1 %v17625_v31 }
 0x3ef   :  { %3369 = vmatpush1.bf16.msra.mxu0 %v17626_v32  ;;  %3575 = vmatpush1.bf16.msra.mxu1 %v17626_v32 }
 0x3f0   :  { %3370 = vmatprep.subr.bf16.mxu0 %v17627_v33  ;;  %3576 = vmatprep.subr.bf16.mxu1 %v17627_v33 }
 0x3f3   :  { %3371 = vmatpush1.bf16.msra.mxu0 %v17628_v34  ;;  %3577 = vmatpush1.bf16.msra.mxu1 %v17628_v34  ;;  %v17632_v34 = vld [vmem:[#allocation14_spill] sm:$0xff] }
 0x3f4   :  { %3372 = vmatprep.subr.bf16.mxu0 %v17629_v37  ;;  %3578 = vmatprep.subr.bf16.mxu1 %v17629_v37  ;;  %v17631_v37 = vld [vmem:[#allocation13_spill] sm:$0xff] }
 0x3f5   :  { %v2582_v9 = vpop.f32.mrb[32].mxu0  ;;  %v2788_v12 = vpop.f32.mrb[32].mxu1 }
 0x3f6   :  { %v2805_v14 = vmax.f32 %v2582_v9, %v2788_v12  ;;  %v2584_v28 = vpop.f32.mrb[33].mxu0  ;;  %v2790_v25 = vpop.f32.mrb[33].mxu1 }
 0x3f7   :  { %v2806_v36 = vmax.f32 %v2584_v28, %v2790_v25  ;;  %v2586_v35 = vpop.f32.mrb[34].mxu0  ;;  %v2792_v4 = vpop.f32.mrb[34].mxu1  ;;  %3373 = vmatpush1.bf16.msra.mxu0 %v17630_v5  ;;  %3579 = vmatpush1.bf16.msra.mxu1 %v17630_v5 }
 0x3f8   :  { %v2807_v17 = vmax.f32 %v2586_v35, %v2792_v4  ;;  %v2588_v24 = vpop.f32.mrb[35].mxu0  ;;  %v2794_v44 = vpop.f32.mrb[35].mxu1  ;;  %3374 = vmatprep.subr.bf16.mxu0 %v17631_v37  ;;  %3580 = vmatprep.subr.bf16.mxu1 %v17631_v37 }
 0x3f9   :  { %v2811_v9 = vmax.f32 %v2805_v14, %v2806_v36  ;;  %v2808_v12 = vmax.f32 %v2588_v24, %v2794_v44 }
 0x3fb   :  { %v2821_v28 = vadd.f32 %v13433_v62, %v2811_v9  ;;  %v2812_v25 = vmax.f32 %v2807_v17, %v2808_v12  ;;  %3375 = vmatpush1.bf16.msra.mxu0 %v17632_v34  ;;  %3581 = vmatpush1.bf16.msra.mxu1 %v17632_v34 }
 0x3fc   :  { %3376 = vmatprep.subr.bf16.mxu0 %v13124_v1  ;;  %3582 = vmatprep.subr.bf16.mxu1 %v13124_v1 }
 0x3fd   :  { %v2824_v35 = vmax.f32 %v2821_v28, 0.0  ;;  %v2822_v4 = vadd.f32 %v13433_v62, %v2812_v25  ;;  %v2592_v5 = vpop.f32.mrb[36].mxu0  ;;  %v2798_v33 = vpop.f32.mrb[36].mxu1  ;;  %v13532_v25 = vld [vmem:[%s16974_s1 + $0x1a4] ss:$8 sps:$4 sm:$0xff]  }
 0x3fe   :  { %v2809_v32 = vmax.f32 %v2592_v5, %v2798_v33  ;;  %v2594_v37 = vpop.f32.mrb[37].mxu0  ;;  %v2800_v14 = vpop.f32.mrb[37].mxu1  ;;  %v13525_v5 = vld [vmem:[%s16974_s1 + $0x190] ss:$8 sps:$4 sm:$0xff]  }
 0x3ff   :  { %v9329_v36 = vpack.c.bf16 %v2824_v35, %v2824_v35  ;;  %v2825_v24 = vmax.f32 %v2822_v4, 0.0  ;;  %v2810_v44 = vmax.f32 %v2594_v37, %v2800_v14  ;;  %v2596_v17 = vpop.f32.mrb[38].mxu0  ;;  %v2802_v9 = vpop.f32.mrb[38].mxu1  ;;  %3377 = vmatpush1.bf16.msra.mxu0 %v13132_v10  ;;  %3583 = vmatpush1.bf16.msra.mxu1 %v13132_v10  ;;  %v13539_v35 = vld [vmem:[%s16974_s1 + $0x1a0] ss:$8 sps:$4 sm:$0xff]  }
 0x400   :  { %v2597_v12 = vpop.f32.mrb[39].mxu0  ;;  %v2803_v34 = vpop.f32.mrb[39].mxu1  ;;  %3397 = vmatprep.subr.bf16.mxu0 %v13139_v47  ;;  %3603 = vmatprep.subr.bf16.mxu1 %v13139_v47  ;;  %v13546_v4 = vld [vmem:[%s16974_s1 + $0x1b4] ss:$8 sps:$4 sm:$0xff]   ;;  %v13553_v14 = vld [vmem:[%s16974_s1 + $0x1b0] ss:$8 sps:$4 sm:$0xff]  }
 0x401   :  { %2840 = vst [vmem:[#allocation2 + $0x10] sm:$0xf] %v9329_v36  ;;  %v9330_v28 = vpack.c.bf16 %v2825_v24, %v2825_v24  ;;  %v2813_v33 = vmax.f32 %v2809_v32, %v2810_v44  ;;  %v13560_v36 = vld [vmem:[%s16974_s1 + $0x1c4] ss:$8 sps:$4 sm:$0xff]   ;;  %v13567_v24 = vld [vmem:[%s16974_s1 + $0x1c0] ss:$8 sps:$4 sm:$0xff]  }
 0x402   :  { %3379 = vmatmul.mubr.bf16.vlgmr.msra.gmra.mrb[48].mxu0 %v13295_v60  ;;  %3585 = vmatmul.mubr.bf16.vlgmr.msra.gmra.mrb[48].mxu1 %v13300_v3  ;;  %v13463_v60 = vld [vmem:[%s16975_s0 + $0x3c] ss:$112 sps:$4 sm:$0xff]   ;;  %v13468_v3 = vld [vmem:[%s16975_s0 + $0x40] ss:$112 sps:$4 sm:$0xff]   ;;  %17633 = vst [vmem:[#allocation15_spill] sm:$0xff] %v13567_v24 }
 0x403   :  { %2841 = vst [vmem:[#allocation2 + $0x40] sm:$0xf] %v9330_v28  ;;  %v2823_v37 = vadd.f32 %v13433_v62, %v2813_v33  ;;  %3398 = vmatpush1.bf16.msra.mxu0 %v13149_v15  ;;  %3604 = vmatpush1.bf16.msra.mxu1 %v13149_v15  ;;  %v13574_v44 = vld [vmem:[%s16974_s1 + $0x1d4] ss:$8 sps:$4 sm:$0xff]   ;;  %v13581_v17 = vld [vmem:[%s16974_s1 + $0x1d0] ss:$8 sps:$4 sm:$0xff]  }
 0x404   :  { %3399 = vmatprep.subr.bf16.mxu0 %v13156_v53  ;;  %3605 = vmatprep.subr.bf16.mxu1 %v13156_v53  ;;  %17634 = vst [vmem:[#allocation16_spill] sm:$0xff] %v13574_v44  ;;  %17635 = vst [vmem:[#allocation17_spill] sm:$0xff] %v13581_v17  ;;  %v13588_v9 = vld [vmem:[%s16974_s1 + $0x1e4] ss:$8 sps:$4 sm:$0xff]   ;;  %v13595_v12 = vld [vmem:[%s16974_s1 + $0x1e0] ss:$8 sps:$4 sm:$0xff]  }
 0x405   :  { %v2826_v34 = vmax.f32 %v2823_v37, 0.0  ;;  %3388 = vmatprep.mubr.bf16.mxu0 %v13312_v6  ;;  %3594 = vmatprep.mubr.bf16.mxu1 %v13314_v18  ;;  %v13497_v6 = vld [vmem:[%s16974_s1 + $0x170] ss:$8 sps:$4 sm:$0xff]   ;;  %v13504_v18 = vld [vmem:[%s16974_s1 + $0x184] ss:$8 sps:$4 sm:$0xff]   ;;  %17636 = vst [vmem:[#allocation18_spill] sm:$0xff] %v13588_v9 }
 0x406   :  { %17637 = vst [vmem:[#allocation19_spill] sm:$0xff] %v13595_v12  ;;  %v13602_v28 = vld [vmem:[%s16974_s1 + $0x1f4] ss:$8 sps:$4 sm:$0xff]   ;;  %v13609_v33 = vld [vmem:[%s16975_s0 + $0x38] ss:$112 sps:$4 sm:$0xff]  }
 0x407   :  { %v9331_v32 = vpack.c.bf16 %v2826_v34, %v2826_v34  ;;  %3400 = vmatpush1.bf16.msra.mxu0 %v13165_v49  ;;  %3606 = vmatpush1.bf16.msra.mxu1 %v13165_v49  ;;  %17638 = vst [vmem:[#allocation20_spill] sm:$0xff] %v13602_v28  ;;  %v13614_v37 = vld [vmem:[%s16975_s0 + $0x3c] ss:$112 sps:$4 sm:$0xff]  }
 0x408   :  { %3401 = vmatprep.subr.bf16.mxu0 %v13172_v55  ;;  %3607 = vmatprep.subr.bf16.mxu1 %v13172_v55  ;;  %v3300_v34 = vld [vmem:[%s16975_s0 + $0x118] sm:$0xff] }
 0x409   :  { %2842 = vst [vmem:[#allocation2 + $0x70] sm:$0xf] %v9331_v32  ;;  %v3506_v32 = vld [vmem:[%s16975_s0 + $0x11c] sm:$0xff] }
 0x40a   :  { %3389 = vmatmul.mubr.bf16.gmra.mrb[52].mxu0 %v13324_v23  ;;  %3595 = vmatmul.mubr.bf16.gmra.mrb[52].mxu1 %v13326_v61  ;;  %v13511_v23 = vld [vmem:[%s16974_s1 + $0x180] ss:$8 sps:$4 sm:$0xff]   ;;  %v13518_v61 = vld [vmem:[%s16974_s1 + $0x194] ss:$8 sps:$4 sm:$0xff]  }
 0x40b   :  { %3402 = vmatpush1.bf16.msra.mxu0 %v13191_v13  ;;  %3608 = vmatpush1.bf16.msra.mxu1 %v13191_v13 }
 0x40c   :  { %3403 = vmatprep.subr.bf16.mxu0 %v13198_v43  ;;  %3609 = vmatprep.subr.bf16.mxu1 %v13198_v43 }
 0x40d   :  { %3429 = vmatprep.mubr.bf16.mxu0 %v13463_v60  ;;  %3635 = vmatprep.mubr.bf16.mxu1 %v13468_v3 }
 0x40f   :  { %3404 = vmatpush1.bf16.msra.mxu0 %v13207_v8  ;;  %3610 = vmatpush1.bf16.msra.mxu1 %v13207_v8 }
 0x410   :  { %3405 = vmatprep.subr.bf16.mxu0 %v13214_v50  ;;  %3611 = vmatprep.subr.bf16.mxu1 %v13214_v50 }
 0x413   :  { %3406 = vmatpush1.bf16.msra.mxu0 %v13221_v59  ;;  %3612 = vmatpush1.bf16.msra.mxu1 %v13221_v59 }
 0x414   :  { %3407 = vmatprep.subr.bf16.mxu0 %v13228_v39  ;;  %3613 = vmatprep.subr.bf16.mxu1 %v13228_v39 }
 0x417   :  { %3408 = vmatpush1.bf16.msra.mxu0 %v13235_v19  ;;  %3614 = vmatpush1.bf16.msra.mxu1 %v13235_v19 }
 0x418   :  { %3409 = vmatprep.subr.bf16.mxu0 %v13242_v0  ;;  %3615 = vmatprep.subr.bf16.mxu1 %v13242_v0 }
 0x41b   :  { %3410 = vmatpush1.bf16.msra.mxu0 %v13249_v52  ;;  %3616 = vmatpush1.bf16.msra.mxu1 %v13249_v52 }
 0x41c   :  { %3411 = vmatprep.subr.bf16.mxu0 %v13256_v11  ;;  %3617 = vmatprep.subr.bf16.mxu1 %v13256_v11 }
 0x41f   :  { %3412 = vmatpush1.bf16.msra.mxu0 %v13497_v6  ;;  %3618 = vmatpush1.bf16.msra.mxu1 %v13497_v6 }
 0x420   :  { %3413 = vmatprep.subr.bf16.mxu0 %v13504_v18  ;;  %3619 = vmatprep.subr.bf16.mxu1 %v13504_v18 }
 0x423   :  { %3414 = vmatpush1.bf16.msra.mxu0 %v13511_v23  ;;  %3620 = vmatpush1.bf16.msra.mxu1 %v13511_v23 }
 0x424   :  { %3415 = vmatprep.subr.bf16.mxu0 %v13518_v61  ;;  %3621 = vmatprep.subr.bf16.mxu1 %v13518_v61 }
 0x427   :  { %3416 = vmatpush1.bf16.msra.mxu0 %v13525_v5  ;;  %3622 = vmatpush1.bf16.msra.mxu1 %v13525_v5 }
 0x428   :  { %3417 = vmatprep.subr.bf16.mxu0 %v13532_v25  ;;  %3623 = vmatprep.subr.bf16.mxu1 %v13532_v25 }
 0x42b   :  { %3418 = vmatpush1.bf16.msra.mxu0 %v13539_v35  ;;  %3624 = vmatpush1.bf16.msra.mxu1 %v13539_v35 }
 0x42c   :  { %3419 = vmatprep.subr.bf16.mxu0 %v13546_v4  ;;  %3625 = vmatprep.subr.bf16.mxu1 %v13546_v4 }
 0x42f   :  { %3420 = vmatpush1.bf16.msra.mxu0 %v13553_v14  ;;  %3626 = vmatpush1.bf16.msra.mxu1 %v13553_v14 }
 0x430   :  { %3421 = vmatprep.subr.bf16.mxu0 %v13560_v36  ;;  %3627 = vmatprep.subr.bf16.mxu1 %v13560_v36 }
 0x433   :  { %3422 = vmatpush1.bf16.msra.mxu0 %v13567_v24  ;;  %3628 = vmatpush1.bf16.msra.mxu1 %v13567_v24  ;;  %v13660_v24 = vcombine.low %v3506_v32, %v3506_v32 }
 0x434   :  { %3423 = vmatprep.subr.bf16.mxu0 %v13574_v44  ;;  %3629 = vmatprep.subr.bf16.mxu1 %v13574_v44  ;;  %v13658_v44 = vcombine.low %v3300_v34, %v3300_v34 }
 0x437   :  { %3424 = vmatpush1.bf16.msra.mxu0 %v13581_v17  ;;  %3630 = vmatpush1.bf16.msra.mxu1 %v13581_v17  ;;  %v13638_v17 = vcombine.high %v3506_v32, %v3506_v32  ;;  %v13688_v32 = vld [vmem:[%s16974_s1 + $0x234] ss:$8 sps:$4 sm:$0xff]  }
 0x438   :  { %3425 = vmatprep.subr.bf16.mxu0 %v13588_v9  ;;  %3631 = vmatprep.subr.bf16.mxu1 %v13588_v9  ;;  %v13636_v9 = vcombine.high %v3300_v34, %v3300_v34  ;;  %v13681_v34 = vld [vmem:[%s16974_s1 + $0x220] ss:$8 sps:$4 sm:$0xff]   ;;  %17646 = vst [vmem:[#allocation28_spill] sm:$0xff] %v13688_v32 }
 0x439   :  { %17645 = vst [vmem:[#allocation27_spill] sm:$0xff] %v13681_v34 }
 0x43b   :  { %3426 = vmatpush1.bf16.msra.mxu0 %v13595_v12  ;;  %3632 = vmatpush1.bf16.msra.mxu1 %v13595_v12  ;;  %v13632_v12 = vld [vmem:[%s16974_s1 + $0x204] ss:$8 sps:$4 sm:$0xff]  }
 0x43c   :  { %3427 = vmatprep.subr.bf16.mxu0 %v13602_v28  ;;  %3633 = vmatprep.subr.bf16.mxu1 %v13602_v28  ;;  %v13625_v28 = vld [vmem:[%s16974_s1 + $0x1f0] ss:$8 sps:$4 sm:$0xff]   ;;  %17640 = vst [vmem:[#allocation22_spill] sm:$0xff] %v13632_v12 }
 0x43d   :  { %17639 = vst [vmem:[#allocation21_spill] sm:$0xff] %v13625_v28 }
 0x43f   :  { %3428 = vmatpush1.bf16.msra.mxu0 %v13625_v28  ;;  %3634 = vmatpush1.bf16.msra.mxu1 %v13625_v28  ;;  %v13645_v28 = vld [vmem:[%s16974_s1 + $0x200] ss:$8 sps:$4 sm:$0xff]  }
 0x440   :  { %3448 = vmatprep.subr.bf16.mxu0 %v13632_v12  ;;  %3654 = vmatprep.subr.bf16.mxu1 %v13632_v12  ;;  %17641 = vst [vmem:[#allocation23_spill] sm:$0xff] %v13645_v28  ;;  %v13652_v12 = vld [vmem:[%s16974_s1 + $0x214] ss:$8 sps:$4 sm:$0xff]  }
 0x441   :  { %17642 = vst [vmem:[#allocation24_spill] sm:$0xff] %v13652_v12 }
 0x442   :  { %3430 = vmatmul.mubr.bf16.vlgmr.msra.gmra.mrb[48].mxu0 %v13609_v33  ;;  %3636 = vmatmul.mubr.bf16.vlgmr.msra.gmra.mrb[48].mxu1 %v13614_v37 }
 0x443   :  { %3449 = vmatpush1.bf16.msra.mxu0 %v13645_v28  ;;  %3655 = vmatpush1.bf16.msra.mxu1 %v13645_v28  ;;  %v13665_v28 = vld [vmem:[%s16974_s1 + $0x210] ss:$8 sps:$4 sm:$0xff]  }
 0x444   :  { %3450 = vmatprep.subr.bf16.mxu0 %v13652_v12  ;;  %3656 = vmatprep.subr.bf16.mxu1 %v13652_v12  ;;  %17643 = vst [vmem:[#allocation25_spill] sm:$0xff] %v13665_v28  ;;  %v13672_v12 = vld [vmem:[%s16974_s1 + $0x224] ss:$8 sps:$4 sm:$0xff]  }
 0x445   :  { %3439 = vmatprep.mubr.bf16.mxu0 %v13636_v9  ;;  %3645 = vmatprep.mubr.bf16.mxu1 %v13638_v17  ;;  %17644 = vst [vmem:[#allocation26_spill] sm:$0xff] %v13672_v12 }
 0x447   :  { %3451 = vmatpush1.bf16.msra.mxu0 %v13665_v28  ;;  %3657 = vmatpush1.bf16.msra.mxu1 %v13665_v28  ;;  %v10189_v28 = vld [vmem:[%s16975_s0 + $0x44] ss:$112 sps:$4 sm:$0xff]  }
 0x448   :  { %3452 = vmatprep.subr.bf16.mxu0 %v13672_v12  ;;  %3658 = vmatprep.subr.bf16.mxu1 %v13672_v12  ;;  %v13697_v12 = vld [vmem:[%s16974_s1 + $0x230] ss:$8 sps:$4 sm:$0xff]  }
 0x449   :  { %17647 = vst [vmem:[#allocation29_spill] sm:$0xff] %v13697_v12 }
 0x44a   :  { %3440 = vmatmul.mubr.bf16.gmra.mrb[52].mxu0 %v13658_v44  ;;  %3646 = vmatmul.mubr.bf16.gmra.mrb[52].mxu1 %v13660_v24 }
 0x44b   :  { %3453 = vmatpush1.bf16.msra.mxu0 %v13681_v34  ;;  %3659 = vmatpush1.bf16.msra.mxu1 %v13681_v34  ;;  %v13704_v34 = vld [vmem:[%s16974_s1 + $0x244] ss:$8 sps:$4 sm:$0xff]  }
 0x44c   :  { %3454 = vmatprep.subr.bf16.mxu0 %v13688_v32  ;;  %3660 = vmatprep.subr.bf16.mxu1 %v13688_v32  ;;  %17648 = vst [vmem:[#allocation30_spill] sm:$0xff] %v13704_v34  ;;  %v13711_v32 = vld [vmem:[%s16974_s1 + $0x240] ss:$8 sps:$4 sm:$0xff]  }
 0x44d   :  { %3480 = vmatprep.mubr.bf16.mxu0 %v17463_v38  ;;  %3686 = vmatprep.mubr.bf16.mxu1 %v17463_v38  ;;  %17649 = vst [vmem:[#allocation31_spill] sm:$0xff] %v13711_v32 }
 0x44f   :  { %3455 = vmatpush1.bf16.msra.mxu0 %v13697_v12  ;;  %3661 = vmatpush1.bf16.msra.mxu1 %v13697_v12  ;;  %v13718_v12 = vld [vmem:[%s16974_s1 + $0x254] ss:$8 sps:$4 sm:$0xff]  }
 0x450   :  { %3456 = vmatprep.subr.bf16.mxu0 %v13704_v34  ;;  %3662 = vmatprep.subr.bf16.mxu1 %v13704_v34  ;;  %17650 = vst [vmem:[#allocation4_spill] sm:$0xff] %v13718_v12  ;;  %v13725_v34 = vld [vmem:[%s16974_s1 + $0x250] ss:$8 sps:$4 sm:$0xff]  }
 0x451   :  { %17651 = vst [vmem:[#allocation5_spill] sm:$0xff] %v13725_v34 }
 0x453   :  { %3457 = vmatpush1.bf16.msra.mxu0 %v13711_v32  ;;  %3663 = vmatpush1.bf16.msra.mxu1 %v13711_v32  ;;  %v13732_v32 = vld [vmem:[%s16974_s1 + $0x264] ss:$8 sps:$4 sm:$0xff]  }
 0x454   :  { %3458 = vmatprep.subr.bf16.mxu0 %v13718_v12  ;;  %3664 = vmatprep.subr.bf16.mxu1 %v13718_v12  ;;  %17652 = vst [vmem:[#allocation6_spill] sm:$0xff] %v13732_v32  ;;  %v13739_v12 = vld [vmem:[%s16974_s1 + $0x260] ss:$8 sps:$4 sm:$0xff]  }
 0x455   :  { %17653 = vst [vmem:[#allocation7_spill] sm:$0xff] %v13739_v12 }
 0x457   :  { %3459 = vmatpush1.bf16.msra.mxu0 %v13725_v34  ;;  %3665 = vmatpush1.bf16.msra.mxu1 %v13725_v34  ;;  %v13746_v34 = vld [vmem:[%s16974_s1 + $0x274] ss:$8 sps:$4 sm:$0xff]  }
 0x458   :  { %3460 = vmatprep.subr.bf16.mxu0 %v13732_v32  ;;  %3666 = vmatprep.subr.bf16.mxu1 %v13732_v32  ;;  %v10188_v32 = vld [vmem:[%s16975_s0 + $0x40] ss:$112 sps:$4 sm:$0xff]  }
 0x45b   :  { %3461 = vmatpush1.bf16.msra.mxu0 %v13739_v12  ;;  %3667 = vmatpush1.bf16.msra.mxu1 %v13739_v12  ;;  %v13759_v12 = vld [vmem:[%s16974_s1 + $0x270] ss:$8 sps:$4 sm:$0xff]  }
 0x45c   :  { %3462 = vmatprep.subr.bf16.mxu0 %v13746_v34  ;;  %3668 = vmatprep.subr.bf16.mxu1 %v13746_v34  ;;  %17654 = vst [vmem:[#allocation32_spill] sm:$0xff] %v13759_v12 }
 0x45f   :  { %3463 = vmatpush1.bf16.msra.mxu0 %v13759_v12  ;;  %3669 = vmatpush1.bf16.msra.mxu1 %v13759_v12  ;;  %v10190_v12 = vld [vmem:[%s16975_s0 + $0x120] ss:$0 sps:$4 sm:$0xff]  }
 0x460   :  { %3796 = vmatprep.subr.bf16.mxu0 %v12903_v7  ;;  %4002 = vmatprep.subr.bf16.mxu1 %v12903_v7  ;;  %v10191_v7 = vld [vmem:[%s16975_s0 + $0x124] ss:$0 sps:$4 sm:$0xff]  }
 0x462   :  { %3481 = vmatmul.mubr.bf16.vlgmr.msra.gmra.mrb[48].mxu0 %v10188_v32  ;;  %3687 = vmatmul.mubr.bf16.vlgmr.msra.gmra.mrb[48].mxu1 %v10189_v28 }
 0x463   :  { %3797 = vmatpush1.bf16.msra.mxu0 %v12910_v40  ;;  %4003 = vmatpush1.bf16.msra.mxu1 %v12910_v40  ;;  %v17655_v40 = vld [vmem:[#allocation8_spill] sm:$0xff] }
 0x464   :  { %3798 = vmatprep.subr.bf16.mxu0 %v12917_v51  ;;  %4004 = vmatprep.subr.bf16.mxu1 %v12917_v51  ;;  %v17656_v51 = vld [vmem:[#allocation9_spill] sm:$0xff] }
 0x465   :  { %3490 = vmatprep.mubr.bf16.mxu0 %v17463_v38  ;;  %3696 = vmatprep.mubr.bf16.mxu1 %v17463_v38 }
 0x467   :  { %3799 = vmatpush1.bf16.msra.mxu0 %v12932_v56  ;;  %4005 = vmatpush1.bf16.msra.mxu1 %v12932_v56  ;;  %v17657_v56 = vld [vmem:[#allocation10_spill] sm:$0xff] }
 0x468   :  { %3800 = vmatprep.subr.bf16.mxu0 %v12939_v57  ;;  %4006 = vmatprep.subr.bf16.mxu1 %v12939_v57  ;;  %v17658_v57 = vld [vmem:[#allocation11_spill] sm:$0xff] }
 0x46a   :  { %3491 = vmatmul.mubr.bf16.gmra.mrb[52].mxu0 %v10190_v12  ;;  %3697 = vmatmul.mubr.bf16.gmra.mrb[52].mxu1 %v10191_v7 }
 0x46b   :  { %3801 = vmatpush1.bf16.msra.mxu0 %v12946_v58  ;;  %4007 = vmatpush1.bf16.msra.mxu1 %v12946_v58 }
 0x46c   :  { %3802 = vmatprep.subr.bf16.mxu0 %v12953_v63  ;;  %4008 = vmatprep.subr.bf16.mxu1 %v12953_v63 }
 0x46d   :  { %3828 = vmatprep.mubr.bf16.mxu0 %v13463_v60  ;;  %4034 = vmatprep.mubr.bf16.mxu1 %v13468_v3 }
 0x46f   :  { %3803 = vmatpush1.bf16.msra.mxu0 %v17610_v2  ;;  %4009 = vmatpush1.bf16.msra.mxu1 %v17610_v2 }
 0x470   :  { %3804 = vmatprep.subr.bf16.mxu0 %v17611_v42  ;;  %4010 = vmatprep.subr.bf16.mxu1 %v17611_v42 }
 0x473   :  { %3805 = vmatpush1.bf16.msra.mxu0 %v17612_v20  ;;  %4011 = vmatpush1.bf16.msra.mxu1 %v17612_v20 }
 0x474   :  { %3806 = vmatprep.subr.bf16.mxu0 %v17613_v46  ;;  %4012 = vmatprep.subr.bf16.mxu1 %v17613_v46 }
 0x477   :  { %3807 = vmatpush1.bf16.msra.mxu0 %v17614_v27  ;;  %4013 = vmatpush1.bf16.msra.mxu1 %v17614_v27 }
 0x478   :  { %3808 = vmatprep.subr.bf16.mxu0 %v17615_v54  ;;  %4014 = vmatprep.subr.bf16.mxu1 %v17615_v54 }
 0x47b   :  { %3809 = vmatpush1.bf16.msra.mxu0 %v17616_v16  ;;  %4015 = vmatpush1.bf16.msra.mxu1 %v17616_v16  ;;  %v17659_v16 = vld [vmem:[#allocation12_spill] sm:$0xff] }
 0x47c   :  { %3810 = vmatprep.subr.bf16.mxu0 %v17617_v45  ;;  %4016 = vmatprep.subr.bf16.mxu1 %v17617_v45 }
 0x47f   :  { %3811 = vmatpush1.bf16.msra.mxu0 %v17618_v41  ;;  %4017 = vmatpush1.bf16.msra.mxu1 %v17618_v41 }
 0x480   :  { %3812 = vmatprep.subr.bf16.mxu0 %v17619_v48  ;;  %4018 = vmatprep.subr.bf16.mxu1 %v17619_v48 }
 0x483   :  { %3813 = vmatpush1.bf16.msra.mxu0 %v17620_v21  ;;  %4019 = vmatpush1.bf16.msra.mxu1 %v17620_v21  ;;  %v17660_v21 = vld [vmem:[#allocation13_spill] sm:$0xff] }
 0x484   :  { %3814 = vmatprep.subr.bf16.mxu0 %v17621_v22  ;;  %4020 = vmatprep.subr.bf16.mxu1 %v17621_v22 }
 0x487   :  { %3815 = vmatpush1.bf16.msra.mxu0 %v17622_v26  ;;  %4021 = vmatpush1.bf16.msra.mxu1 %v17622_v26 }
 0x488   :  { %3816 = vmatprep.subr.bf16.mxu0 %v17623_v29  ;;  %4022 = vmatprep.subr.bf16.mxu1 %v17623_v29 }
 0x48b   :  { %3817 = vmatpush1.bf16.msra.mxu0 %v17624_v30  ;;  %4023 = vmatpush1.bf16.msra.mxu1 %v17624_v30 }
 0x48c   :  { %3818 = vmatprep.subr.bf16.mxu0 %v17625_v31  ;;  %4024 = vmatprep.subr.bf16.mxu1 %v17625_v31  ;;  %v17661_v31 = vld [vmem:[#allocation14_spill] sm:$0xff] }
 0x48f   :  { %3819 = vmatpush1.bf16.msra.mxu0 %v17655_v40  ;;  %4025 = vmatpush1.bf16.msra.mxu1 %v17655_v40 }
 0x490   :  { %3820 = vmatprep.subr.bf16.mxu0 %v17656_v51  ;;  %4026 = vmatprep.subr.bf16.mxu1 %v17656_v51 }
 0x493   :  { %3821 = vmatpush1.bf16.msra.mxu0 %v17657_v56  ;;  %4027 = vmatpush1.bf16.msra.mxu1 %v17657_v56 }
 0x494   :  { %3822 = vmatprep.subr.bf16.mxu0 %v17658_v57  ;;  %4028 = vmatprep.subr.bf16.mxu1 %v17658_v57 }
 0x495   :  { %v3032_v58 = vpop.f32.mrb[40].mxu0  ;;  %v3238_v63 = vpop.f32.mrb[40].mxu1 }
 0x496   :  { %v3255_v2 = vmax.f32 %v3032_v58, %v3238_v63  ;;  %v3034_v42 = vpop.f32.mrb[41].mxu0  ;;  %v3240_v20 = vpop.f32.mrb[41].mxu1 }
 0x497   :  { %v3256_v46 = vmax.f32 %v3034_v42, %v3240_v20  ;;  %v3036_v27 = vpop.f32.mrb[42].mxu0  ;;  %v3242_v54 = vpop.f32.mrb[42].mxu1  ;;  %3823 = vmatpush1.bf16.msra.mxu0 %v17659_v16  ;;  %4029 = vmatpush1.bf16.msra.mxu1 %v17659_v16  ;;  %v17675_v16 = vld [vmem:[#allocation28_spill] sm:$0xff] }
 0x498   :  { %v3257_v45 = vmax.f32 %v3036_v27, %v3242_v54  ;;  %v3038_v41 = vpop.f32.mrb[43].mxu0  ;;  %v3244_v48 = vpop.f32.mrb[43].mxu1  ;;  %3824 = vmatprep.subr.bf16.mxu0 %v17660_v21  ;;  %4030 = vmatprep.subr.bf16.mxu1 %v17660_v21  ;;  %v17673_v27 = vld [vmem:[#allocation26_spill] sm:$0xff]  ;;  %v17674_v54 = vld [vmem:[#allocation27_spill] sm:$0xff]  ;;  %v17679_v21 = vld [vmem:[#allocation4_spill] sm:$0xff] }
 0x499   :  { %v3261_v22 = vmax.f32 %v3255_v2, %v3256_v46  ;;  %v3258_v26 = vmax.f32 %v3038_v41, %v3244_v48  ;;  %v17677_v41 = vld [vmem:[#allocation30_spill] sm:$0xff]  ;;  %v17678_v48 = vld [vmem:[#allocation31_spill] sm:$0xff] }
 0x49b   :  { %v3271_v29 = vadd.f32 %v13433_v62, %v3261_v22  ;;  %v3262_v30 = vmax.f32 %v3257_v45, %v3258_v26  ;;  %3825 = vmatpush1.bf16.msra.mxu0 %v17661_v31  ;;  %4031 = vmatpush1.bf16.msra.mxu1 %v17661_v31  ;;  %v17676_v45 = vld [vmem:[#allocation29_spill] sm:$0xff]  ;;  %v17681_v26 = vld [vmem:[#allocation6_spill] sm:$0xff] }
 0x49c   :  { %3826 = vmatprep.subr.bf16.mxu0 %v13124_v1  ;;  %4032 = vmatprep.subr.bf16.mxu1 %v13124_v1  ;;  %v17680_v22 = vld [vmem:[#allocation5_spill] sm:$0xff] }
 0x49d   :  { %v3274_v60 = vmax.f32 %v3271_v29, 0.0  ;;  %v3272_v3 = vadd.f32 %v13433_v62, %v3262_v30  ;;  %v3042_v12 = vpop.f32.mrb[44].mxu0  ;;  %v3248_v28 = vpop.f32.mrb[44].mxu1  ;;  %v17682_v29 = vld [vmem:[#allocation7_spill] sm:$0xff] }
 0x49e   :  { %v3259_v32 = vmax.f32 %v3042_v12, %v3248_v28  ;;  %v3044_v7 = vpop.f32.mrb[45].mxu0  ;;  %v3250_v40 = vpop.f32.mrb[45].mxu1  ;;  %v10202_v30 = vld [vmem:[%s16975_s0 + $0x48] ss:$112 sps:$4 sm:$0xff]   ;;  %v10203_v31 = vld [vmem:[%s16975_s0 + $0x4c] ss:$112 sps:$4 sm:$0xff]  }
 0x49f   :  { %v9332_v51 = vpack.c.bf16 %v3274_v60, %v3274_v60  ;;  %v3275_v56 = vmax.f32 %v3272_v3, 0.0  ;;  %v3260_v57 = vmax.f32 %v3044_v7, %v3250_v40  ;;  %v3046_v58 = vpop.f32.mrb[46].mxu0  ;;  %v3252_v63 = vpop.f32.mrb[46].mxu1  ;;  %3827 = vmatpush1.bf16.msra.mxu0 %v13132_v10  ;;  %4033 = vmatpush1.bf16.msra.mxu1 %v13132_v10  ;;  %v17683_v60 = vld [vmem:[#allocation32_spill] sm:$0xff]  ;;  %v14009_v28 = vld [vmem:[%s16974_s1 + $0x14] ss:$8 sps:$4 sm:$0xff]  }
 0x4a0   :  { %v3047_v2 = vpop.f32.mrb[47].mxu0  ;;  %v3253_v42 = vpop.f32.mrb[47].mxu1  ;;  %3847 = vmatprep.subr.bf16.mxu0 %v13139_v47  ;;  %4053 = vmatprep.subr.bf16.mxu1 %v13139_v47  ;;  %v13995_v3 = vld [vmem:[%s16974_s1 + $0x4] ss:$8 sps:$4 sm:$0xff]   ;;  %v14002_v12 = vld [vmem:[%s16974_s1] ss:$8 sps:$4 sm:$0xff]  }
 0x4a1   :  { %3290 = vst [vmem:[#allocation2 + $0x14] sm:$0xf] %v9332_v51  ;;  %v9333_v1 = vpack.c.bf16 %v3275_v56, %v3275_v56  ;;  %v3263_v20 = vmax.f32 %v3259_v32, %v3260_v57  ;;  %v10204_v32 = vld [vmem:[%s16975_s0 + $0x128] ss:$0 sps:$4 sm:$0xff]   ;;  %v10205_v7 = vld [vmem:[%s16975_s0 + $0x12c] ss:$0 sps:$4 sm:$0xff]  }
 0x4a2   :  { %3829 = vmatmul.mubr.bf16.vlgmr.msra.gmra.mrb[56].mxu0 %v13609_v33  ;;  %4035 = vmatmul.mubr.bf16.vlgmr.msra.gmra.mrb[56].mxu1 %v13614_v37  ;;  %v17672_v37 = vld [vmem:[#allocation25_spill] sm:$0xff]  ;;  %v14024_v40 = vld [vmem:[%s16974_s1 + $0x10] ss:$8 sps:$4 sm:$0xff]   ;;  %v14045_v57 = vld [vmem:[%s16974_s1 + $0x34] ss:$8 sps:$4 sm:$0xff]  }
 0x4a3   :  { %3291 = vst [vmem:[#allocation2 + $0x44] sm:$0xf] %v9333_v1  ;;  %v3273_v46 = vadd.f32 %v13433_v62, %v3263_v20  ;;  %3848 = vmatpush1.bf16.msra.mxu0 %v13149_v15  ;;  %4054 = vmatpush1.bf16.msra.mxu1 %v13149_v15  ;;  %v13857_v15 = vld [vmem:[%s16975_s0 + $0x44] ss:$112 sps:$4 sm:$0xff]   ;;  %v14038_v56 = vld [vmem:[%s16974_s1 + $0x20] ss:$8 sps:$4 sm:$0xff]  }
 0x4a4   :  { %3849 = vmatprep.subr.bf16.mxu0 %v13156_v53  ;;  %4055 = vmatprep.subr.bf16.mxu1 %v13156_v53  ;;  %v13862_v53 = vld [vmem:[%s16975_s0 + $0x48] ss:$112 sps:$4 sm:$0xff]   ;;  %v14031_v51 = vld [vmem:[%s16974_s1 + $0x24] ss:$8 sps:$4 sm:$0xff]   ;;  %v14075_v42 = vld [vmem:[%s16974_s1 + $0x54] ss:$8 sps:$4 sm:$0xff]  }
 0x4a5   :  { %v3276_v10 = vmax.f32 %v3273_v46, 0.0  ;;  %3838 = vmatprep.mubr.bf16.mxu0 %v13636_v9  ;;  %4044 = vmatprep.mubr.bf16.mxu1 %v13638_v17  ;;  %v17671_v17 = vld [vmem:[#allocation24_spill] sm:$0xff]  ;;  %v14054_v58 = vld [vmem:[%s16974_s1 + $0x30] ss:$8 sps:$4 sm:$0xff]   ;;  %17687 = vst [vmem:[#allocation11_spill] sm:$0xff] %v14075_v42 }
 0x4a6   :  { %17684 = vst [vmem:[#allocation8_spill] sm:$0xff] %v14054_v58  ;;  %v14061_v63 = vld [vmem:[%s16974_s1 + $0x44] ss:$8 sps:$4 sm:$0xff]   ;;  %v14068_v2 = vld [vmem:[%s16974_s1 + $0x40] ss:$8 sps:$4 sm:$0xff]  }
 0x4a7   :  { %v9334_v47 = vpack.c.bf16 %v3276_v10, %v3276_v10  ;;  %3850 = vmatpush1.bf16.msra.mxu0 %v13165_v49  ;;  %4056 = vmatpush1.bf16.msra.mxu1 %v13165_v49  ;;  %v17662_v49 = vld [vmem:[#allocation15_spill] sm:$0xff]  ;;  %17685 = vst [vmem:[#allocation9_spill] sm:$0xff] %v14061_v63  ;;  %17686 = vst [vmem:[#allocation10_spill] sm:$0xff] %v14068_v2  ;;  %v14089_v20 = vld [vmem:[%s16974_s1 + $0x64] ss:$8 sps:$4 sm:$0xff]  }
 0x4a8   :  { %3851 = vmatprep.subr.bf16.mxu0 %v13172_v55  ;;  %4057 = vmatprep.subr.bf16.mxu1 %v13172_v55  ;;  %v17663_v55 = vld [vmem:[#allocation16_spill] sm:$0xff]  ;;  %v14082_v1 = vld [vmem:[%s16974_s1 + $0x50] ss:$8 sps:$4 sm:$0xff]   ;;  %17689 = vst [vmem:[#allocation13_spill] sm:$0xff] %v14089_v20  ;;  %v14103_v10 = vld [vmem:[%s16974_s1 + $0x74] ss:$8 sps:$4 sm:$0xff]  }
 0x4a9   :  { %3292 = vst [vmem:[#allocation2 + $0x74] sm:$0xf] %v9334_v47  ;;  %17688 = vst [vmem:[#allocation12_spill] sm:$0xff] %v14082_v1  ;;  %v14096_v46 = vld [vmem:[%s16974_s1 + $0x60] ss:$8 sps:$4 sm:$0xff]  }
 0x4aa   :  { %3839 = vmatmul.mubr.bf16.gmra.mrb[60].mxu0 %v13658_v44  ;;  %4045 = vmatmul.mubr.bf16.gmra.mrb[60].mxu1 %v13660_v24  ;;  %v17670_v44 = vld [vmem:[#allocation23_spill] sm:$0xff]  ;;  %17690 = vst [vmem:[#allocation14_spill] sm:$0xff] %v14096_v46  ;;  %17691 = vst [vmem:[#allocation15_spill] sm:$0xff] %v14103_v10 }
 0x4ab   :  { %3852 = vmatpush1.bf16.msra.mxu0 %v13191_v13  ;;  %4058 = vmatpush1.bf16.msra.mxu1 %v13191_v13  ;;  %v17664_v13 = vld [vmem:[#allocation17_spill] sm:$0xff]  ;;  %v14110_v47 = vld [vmem:[%s16974_s1 + $0x70] ss:$8 sps:$4 sm:$0xff]  }
 0x4ac   :  { %3853 = vmatprep.subr.bf16.mxu0 %v13198_v43  ;;  %4059 = vmatprep.subr.bf16.mxu1 %v13198_v43  ;;  %v17665_v43 = vld [vmem:[#allocation18_spill] sm:$0xff]  ;;  %17692 = vst [vmem:[#allocation16_spill] sm:$0xff] %v14110_v47 }
 0x4ad   :  { %3879 = vmatprep.mubr.bf16.mxu0 %v13857_v15  ;;  %4085 = vmatprep.mubr.bf16.mxu1 %v13862_v53 }
 0x4af   :  { %3854 = vmatpush1.bf16.msra.mxu0 %v13207_v8  ;;  %4060 = vmatpush1.bf16.msra.mxu1 %v13207_v8  ;;  %v17666_v8 = vld [vmem:[#allocation19_spill] sm:$0xff] }
 0x4b0   :  { %3855 = vmatprep.subr.bf16.mxu0 %v13214_v50  ;;  %4061 = vmatprep.subr.bf16.mxu1 %v13214_v50  ;;  %v17667_v50 = vld [vmem:[#allocation20_spill] sm:$0xff] }
 0x4b3   :  { %3856 = vmatpush1.bf16.msra.mxu0 %v13221_v59  ;;  %4062 = vmatpush1.bf16.msra.mxu1 %v13221_v59  ;;  %v13923_v59 = vld [vmem:[%s16975_s0 + $0x40] ss:$112 sps:$4 sm:$0xff]  }
 0x4b4   :  { %3857 = vmatprep.subr.bf16.mxu0 %v13228_v39  ;;  %4063 = vmatprep.subr.bf16.mxu1 %v13228_v39  ;;  %v13928_v39 = vld [vmem:[%s16975_s0 + $0x44] ss:$112 sps:$4 sm:$0xff]  }
 0x4b7   :  { %3858 = vmatpush1.bf16.msra.mxu0 %v13235_v19  ;;  %4064 = vmatpush1.bf16.msra.mxu1 %v13235_v19  ;;  %v3750_v19 = vld [vmem:[%s16975_s0 + $0x120] sm:$0xff] }
 0x4b8   :  { %3859 = vmatprep.subr.bf16.mxu0 %v13242_v0  ;;  %4065 = vmatprep.subr.bf16.mxu1 %v13242_v0  ;;  %v3956_v0 = vld [vmem:[%s16975_s0 + $0x124] sm:$0xff]  ;;  %v13940_v62 = vcombine.high %v3750_v19, %v3750_v19  ;;  %v13952_v9 = vcombine.low %v3750_v19, %v3750_v19  ;;  %v14131_v19 = vld [vmem:[%s16974_s1 + $0x94] ss:$8 sps:$4 sm:$0xff]  }
 0x4b9   :  { %v13942_v24 = vcombine.high %v3956_v0, %v3956_v0  ;;  %v13954_v33 = vcombine.low %v3956_v0, %v3956_v0  ;;  %17695 = vst [vmem:[#allocation19_spill] sm:$0xff] %v14131_v19  ;;  %v14138_v0 = vld [vmem:[%s16974_s1 + $0x90] ss:$8 sps:$4 sm:$0xff]  }
 0x4ba   :  { %17696 = vst [vmem:[#allocation20_spill] sm:$0xff] %v14138_v0 }
 0x4bb   :  { %3860 = vmatpush1.bf16.msra.mxu0 %v13249_v52  ;;  %4066 = vmatpush1.bf16.msra.mxu1 %v13249_v52  ;;  %v17668_v52 = vld [vmem:[#allocation21_spill] sm:$0xff] }
 0x4bc   :  { %3861 = vmatprep.subr.bf16.mxu0 %v13256_v11  ;;  %4067 = vmatprep.subr.bf16.mxu1 %v13256_v11  ;;  %v17669_v11 = vld [vmem:[#allocation22_spill] sm:$0xff] }
 0x4bf   :  { %3862 = vmatpush1.bf16.msra.mxu0 %v13497_v6  ;;  %4068 = vmatpush1.bf16.msra.mxu1 %v13497_v6 }
 0x4c0   :  { %3863 = vmatprep.subr.bf16.mxu0 %v13504_v18  ;;  %4069 = vmatprep.subr.bf16.mxu1 %v13504_v18 }
 0x4c3   :  { %3864 = vmatpush1.bf16.msra.mxu0 %v13511_v23  ;;  %4070 = vmatpush1.bf16.msra.mxu1 %v13511_v23 }
 0x4c4   :  { %3865 = vmatprep.subr.bf16.mxu0 %v13518_v61  ;;  %4071 = vmatprep.subr.bf16.mxu1 %v13518_v61 }
 0x4c7   :  { %3866 = vmatpush1.bf16.msra.mxu0 %v13525_v5  ;;  %4072 = vmatpush1.bf16.msra.mxu1 %v13525_v5 }
 0x4c8   :  { %3867 = vmatprep.subr.bf16.mxu0 %v13532_v25  ;;  %4073 = vmatprep.subr.bf16.mxu1 %v13532_v25 }
 0x4cb   :  { %3868 = vmatpush1.bf16.msra.mxu0 %v13539_v35  ;;  %4074 = vmatpush1.bf16.msra.mxu1 %v13539_v35 }
 0x4cc   :  { %3869 = vmatprep.subr.bf16.mxu0 %v13546_v4  ;;  %4075 = vmatprep.subr.bf16.mxu1 %v13546_v4 }
 0x4cf   :  { %3870 = vmatpush1.bf16.msra.mxu0 %v13553_v14  ;;  %4076 = vmatpush1.bf16.msra.mxu1 %v13553_v14 }
 0x4d0   :  { %3871 = vmatprep.subr.bf16.mxu0 %v13560_v36  ;;  %4077 = vmatprep.subr.bf16.mxu1 %v13560_v36 }
 0x4d3   :  { %3872 = vmatpush1.bf16.msra.mxu0 %v17662_v49  ;;  %4078 = vmatpush1.bf16.msra.mxu1 %v17662_v49 }
 0x4d4   :  { %3873 = vmatprep.subr.bf16.mxu0 %v17663_v55  ;;  %4079 = vmatprep.subr.bf16.mxu1 %v17663_v55 }
 0x4d7   :  { %3874 = vmatpush1.bf16.msra.mxu0 %v17664_v13  ;;  %4080 = vmatpush1.bf16.msra.mxu1 %v17664_v13 }
 0x4d8   :  { %3875 = vmatprep.subr.bf16.mxu0 %v17665_v43  ;;  %4081 = vmatprep.subr.bf16.mxu1 %v17665_v43 }
 0x4db   :  { %3876 = vmatpush1.bf16.msra.mxu0 %v17666_v8  ;;  %4082 = vmatpush1.bf16.msra.mxu1 %v17666_v8 }
 0x4dc   :  { %3877 = vmatprep.subr.bf16.mxu0 %v17667_v50  ;;  %4083 = vmatprep.subr.bf16.mxu1 %v17667_v50 }
 0x4df   :  { %3878 = vmatpush1.bf16.msra.mxu0 %v17668_v52  ;;  %4084 = vmatpush1.bf16.msra.mxu1 %v17668_v52 }
 0x4e0   :  { %3898 = vmatprep.subr.bf16.mxu0 %v17669_v11  ;;  %4104 = vmatprep.subr.bf16.mxu1 %v17669_v11 }
 0x4e2   :  { %3880 = vmatmul.mubr.bf16.vlgmr.msra.gmra.mrb[56].mxu0 %v13923_v59  ;;  %4086 = vmatmul.mubr.bf16.vlgmr.msra.gmra.mrb[56].mxu1 %v13928_v39 }
 0x4e3   :  { %3899 = vmatpush1.bf16.msra.mxu0 %v17670_v44  ;;  %4105 = vmatpush1.bf16.msra.mxu1 %v17670_v44 }
 0x4e4   :  { %3900 = vmatprep.subr.bf16.mxu0 %v17671_v17  ;;  %4106 = vmatprep.subr.bf16.mxu1 %v17671_v17 }
 0x4e5   :  { %3889 = vmatprep.mubr.bf16.mxu0 %v13940_v62  ;;  %4095 = vmatprep.mubr.bf16.mxu1 %v13942_v24 }
 0x4e7   :  { %3901 = vmatpush1.bf16.msra.mxu0 %v17672_v37  ;;  %4107 = vmatpush1.bf16.msra.mxu1 %v17672_v37 }
 0x4e8   :  { %3902 = vmatprep.subr.bf16.mxu0 %v17673_v27  ;;  %4108 = vmatprep.subr.bf16.mxu1 %v17673_v27 }
 0x4ea   :  { %3890 = vmatmul.mubr.bf16.gmra.mrb[60].mxu0 %v13952_v9  ;;  %4096 = vmatmul.mubr.bf16.gmra.mrb[60].mxu1 %v13954_v33 }
 0x4eb   :  { %3903 = vmatpush1.bf16.msra.mxu0 %v17674_v54  ;;  %4109 = vmatpush1.bf16.msra.mxu1 %v17674_v54 }
 0x4ec   :  { %3904 = vmatprep.subr.bf16.mxu0 %v17675_v16  ;;  %4110 = vmatprep.subr.bf16.mxu1 %v17675_v16 }
 0x4ed   :  { %3930 = vmatprep.mubr.bf16.mxu0 %v17463_v38  ;;  %4136 = vmatprep.mubr.bf16.mxu1 %v17463_v38 }
 0x4ef   :  { %3905 = vmatpush1.bf16.msra.mxu0 %v17676_v45  ;;  %4111 = vmatpush1.bf16.msra.mxu1 %v17676_v45 }
 0x4f0   :  { %3906 = vmatprep.subr.bf16.mxu0 %v17677_v41  ;;  %4112 = vmatprep.subr.bf16.mxu1 %v17677_v41 }
 0x4f3   :  { %3907 = vmatpush1.bf16.msra.mxu0 %v17678_v48  ;;  %4113 = vmatpush1.bf16.msra.mxu1 %v17678_v48 }
 0x4f4   :  { %3908 = vmatprep.subr.bf16.mxu0 %v17679_v21  ;;  %4114 = vmatprep.subr.bf16.mxu1 %v17679_v21 }
 0x4f7   :  { %3909 = vmatpush1.bf16.msra.mxu0 %v17680_v22  ;;  %4115 = vmatpush1.bf16.msra.mxu1 %v17680_v22 }
 0x4f8   :  { %3910 = vmatprep.subr.bf16.mxu0 %v17681_v26  ;;  %4116 = vmatprep.subr.bf16.mxu1 %v17681_v26 }
 0x4fb   :  { %3911 = vmatpush1.bf16.msra.mxu0 %v17682_v29  ;;  %4117 = vmatpush1.bf16.msra.mxu1 %v17682_v29 }
 0x4fc   :  { %3912 = vmatprep.subr.bf16.mxu0 %v13746_v34  ;;  %4118 = vmatprep.subr.bf16.mxu1 %v13746_v34 }
 0x4ff   :  { %3913 = vmatpush1.bf16.msra.mxu0 %v17683_v60  ;;  %4119 = vmatpush1.bf16.msra.mxu1 %v17683_v60 }
 0x500   :  { %4246 = vmatprep.subr.bf16.mxu0 %v13995_v3  ;;  %4452 = vmatprep.subr.bf16.mxu1 %v13995_v3 }
 0x502   :  { %3931 = vmatmul.mubr.bf16.vlgmr.msra.gmra.mrb[56].mxu0 %v10202_v30  ;;  %4137 = vmatmul.mubr.bf16.vlgmr.msra.gmra.mrb[56].mxu1 %v10203_v31  ;;  %v14145_v30 = vld [vmem:[%s16974_s1 + $0xa4] ss:$8 sps:$4 sm:$0xff]   ;;  %v14152_v31 = vld [vmem:[%s16974_s1 + $0xa0] ss:$8 sps:$4 sm:$0xff]  }
 0x503   :  { %4247 = vmatpush1.bf16.msra.mxu0 %v14002_v12  ;;  %4453 = vmatpush1.bf16.msra.mxu1 %v14002_v12  ;;  %17697 = vst [vmem:[#allocation21_spill] sm:$0xff] %v14145_v30  ;;  %17698 = vst [vmem:[#allocation22_spill] sm:$0xff] %v14152_v31 }
 0x504   :  { %4248 = vmatprep.subr.bf16.mxu0 %v14009_v28  ;;  %4454 = vmatprep.subr.bf16.mxu1 %v14009_v28 }
 0x505   :  { %3940 = vmatprep.mubr.bf16.mxu0 %v17463_v38  ;;  %4146 = vmatprep.mubr.bf16.mxu1 %v17463_v38 }
 0x507   :  { %4249 = vmatpush1.bf16.msra.mxu0 %v14024_v40  ;;  %4455 = vmatpush1.bf16.msra.mxu1 %v14024_v40 }
 0x508   :  { %4250 = vmatprep.subr.bf16.mxu0 %v14031_v51  ;;  %4456 = vmatprep.subr.bf16.mxu1 %v14031_v51 }
 0x50a   :  { %3941 = vmatmul.mubr.bf16.gmra.mrb[60].mxu0 %v10204_v32  ;;  %4147 = vmatmul.mubr.bf16.gmra.mrb[60].mxu1 %v10205_v7  ;;  %v14159_v32 = vld [vmem:[%s16974_s1 + $0xb4] ss:$8 sps:$4 sm:$0xff]   ;;  %v14166_v7 = vld [vmem:[%s16974_s1 + $0xb0] ss:$8 sps:$4 sm:$0xff]  }
 0x50b   :  { %4251 = vmatpush1.bf16.msra.mxu0 %v14038_v56  ;;  %4457 = vmatpush1.bf16.msra.mxu1 %v14038_v56  ;;  %17699 = vst [vmem:[#allocation23_spill] sm:$0xff] %v14159_v32  ;;  %17700 = vst [vmem:[#allocation24_spill] sm:$0xff] %v14166_v7 }
 0x50c   :  { %4252 = vmatprep.subr.bf16.mxu0 %v14045_v57  ;;  %4458 = vmatprep.subr.bf16.mxu1 %v14045_v57 }
 0x50d   :  { %4278 = vmatprep.mubr.bf16.mxu0 %v13857_v15  ;;  %4484 = vmatprep.mubr.bf16.mxu1 %v13862_v53  ;;  %v14117_v15 = vld [vmem:[%s16974_s1 + $0x84] ss:$8 sps:$4 sm:$0xff]   ;;  %v14124_v53 = vld [vmem:[%s16974_s1 + $0x80] ss:$8 sps:$4 sm:$0xff]  }
 0x50e   :  { %17693 = vst [vmem:[#allocation17_spill] sm:$0xff] %v14117_v15  ;;  %17694 = vst [vmem:[#allocation18_spill] sm:$0xff] %v14124_v53 }
 0x50f   :  { %4253 = vmatpush1.bf16.msra.mxu0 %v14054_v58  ;;  %4459 = vmatpush1.bf16.msra.mxu1 %v14054_v58  ;;  %v14229_v58 = vld [vmem:[%s16974_s1 + $0xf0] ss:$8 sps:$4 sm:$0xff]  }
 0x510   :  { %4254 = vmatprep.subr.bf16.mxu0 %v14061_v63  ;;  %4460 = vmatprep.subr.bf16.mxu1 %v14061_v63 }
 0x513   :  { %4255 = vmatpush1.bf16.msra.mxu0 %v14068_v2  ;;  %4461 = vmatpush1.bf16.msra.mxu1 %v14068_v2 }
 0x514   :  { %4256 = vmatprep.subr.bf16.mxu0 %v14075_v42  ;;  %4462 = vmatprep.subr.bf16.mxu1 %v14075_v42 }
 0x517   :  { %4257 = vmatpush1.bf16.msra.mxu0 %v14082_v1  ;;  %4463 = vmatpush1.bf16.msra.mxu1 %v14082_v1 }
 0x518   :  { %4258 = vmatprep.subr.bf16.mxu0 %v14089_v20  ;;  %4464 = vmatprep.subr.bf16.mxu1 %v14089_v20 }
 0x51b   :  { %4259 = vmatpush1.bf16.msra.mxu0 %v14096_v46  ;;  %4465 = vmatpush1.bf16.msra.mxu1 %v14096_v46 }
 0x51c   :  { %4260 = vmatprep.subr.bf16.mxu0 %v14103_v10  ;;  %4466 = vmatprep.subr.bf16.mxu1 %v14103_v10 }
 0x51f   :  { %4261 = vmatpush1.bf16.msra.mxu0 %v14110_v47  ;;  %4467 = vmatpush1.bf16.msra.mxu1 %v14110_v47 }
 0x520   :  { %4262 = vmatprep.subr.bf16.mxu0 %v14117_v15  ;;  %4468 = vmatprep.subr.bf16.mxu1 %v14117_v15 }
 0x523   :  { %4263 = vmatpush1.bf16.msra.mxu0 %v14124_v53  ;;  %4469 = vmatpush1.bf16.msra.mxu1 %v14124_v53 }
 0x524   :  { %4264 = vmatprep.subr.bf16.mxu0 %v14131_v19  ;;  %4470 = vmatprep.subr.bf16.mxu1 %v14131_v19 }
 0x527   :  { %4265 = vmatpush1.bf16.msra.mxu0 %v14138_v0  ;;  %4471 = vmatpush1.bf16.msra.mxu1 %v14138_v0 }
 0x528   :  { %4266 = vmatprep.subr.bf16.mxu0 %v14145_v30  ;;  %4472 = vmatprep.subr.bf16.mxu1 %v14145_v30 }
 0x52b   :  { %4267 = vmatpush1.bf16.msra.mxu0 %v14152_v31  ;;  %4473 = vmatpush1.bf16.msra.mxu1 %v14152_v31  ;;  %v14173_v31 = vld [vmem:[%s16974_s1 + $0xc4] ss:$8 sps:$4 sm:$0xff]  }
 0x52c   :  { %4268 = vmatprep.subr.bf16.mxu0 %v14159_v32  ;;  %4474 = vmatprep.subr.bf16.mxu1 %v14159_v32  ;;  %17701 = vst [vmem:[#allocation25_spill] sm:$0xff] %v14173_v31  ;;  %v14180_v32 = vld [vmem:[%s16974_s1 + $0xc0] ss:$8 sps:$4 sm:$0xff]  }
 0x52d   :  { %17702 = vst [vmem:[#allocation26_spill] sm:$0xff] %v14180_v32 }
 0x52f   :  { %4269 = vmatpush1.bf16.msra.mxu0 %v14166_v7  ;;  %4475 = vmatpush1.bf16.msra.mxu1 %v14166_v7  ;;  %v14187_v7 = vld [vmem:[%s16974_s1 + $0xd4] ss:$8 sps:$4 sm:$0xff]  }
 0x530   :  { %4270 = vmatprep.subr.bf16.mxu0 %v14173_v31  ;;  %4476 = vmatprep.subr.bf16.mxu1 %v14173_v31  ;;  %17703 = vst [vmem:[#allocation27_spill] sm:$0xff] %v14187_v7 }
 0x533   :  { %4271 = vmatpush1.bf16.msra.mxu0 %v14180_v32  ;;  %4477 = vmatpush1.bf16.msra.mxu1 %v14180_v32  ;;  %v14194_v32 = vld [vmem:[%s16974_s1 + $0xd0] ss:$8 sps:$4 sm:$0xff]  }
 0x534   :  { %4272 = vmatprep.subr.bf16.mxu0 %v14187_v7  ;;  %4478 = vmatprep.subr.bf16.mxu1 %v14187_v7  ;;  %17704 = vst [vmem:[#allocation28_spill] sm:$0xff] %v14194_v32  ;;  %v14201_v7 = vld [vmem:[%s16976_s2] ss:$0 sm:$0xff] }
 0x535   :  { %v3482_v30 = vpop.f32.mrb[48].mxu0  ;;  %v3688_v31 = vpop.f32.mrb[48].mxu1 }
 0x536   :  { %v3705_v0 = vmax.f32 %v3482_v30, %v3688_v31  ;;  %v3484_v19 = vpop.f32.mrb[49].mxu0  ;;  %v3690_v53 = vpop.f32.mrb[49].mxu1 }
 0x537   :  { %v3706_v15 = vmax.f32 %v3484_v19, %v3690_v53  ;;  %v3486_v47 = vpop.f32.mrb[50].mxu0  ;;  %v3692_v10 = vpop.f32.mrb[50].mxu1  ;;  %4273 = vmatpush1.bf16.msra.mxu0 %v14194_v32  ;;  %4479 = vmatpush1.bf16.msra.mxu1 %v14194_v32  ;;  %v14206_v53 = vld [vmem:[%s16974_s1 + $0xe4] ss:$8 sps:$4 sm:$0xff]  }
 0x538   :  { %v3707_v30 = vmax.f32 %v3486_v47, %v3692_v10  ;;  %v3488_v31 = vpop.f32.mrb[51].mxu0  ;;  %v3694_v46 = vpop.f32.mrb[51].mxu1  ;;  %17705 = vst [vmem:[#allocation29_spill] sm:$0xff] %v14206_v53  ;;  %4274 = vmatprep.subr.bf16.mxu0 %v14206_v53  ;;  %4480 = vmatprep.subr.bf16.mxu1 %v14206_v53  ;;  %v14214_v10 = vld [vmem:[%s16974_s1 + $0xe0] ss:$8 sps:$4 sm:$0xff]  }
 0x539   :  { %v3711_v19 = vmax.f32 %v3705_v0, %v3706_v15  ;;  %v3708_v20 = vmax.f32 %v3488_v31, %v3694_v46  ;;  %17706 = vst [vmem:[#allocation30_spill] sm:$0xff] %v14214_v10  ;;  %v14221_v47 = vld [vmem:[%s16974_s1 + $0xf4] ss:$8 sps:$4 sm:$0xff]  }
 0x53b   :  { %v3721_v32 = vadd.f32 %v14201_v7, %v3711_v19  ;;  %v3712_v1 = vmax.f32 %v3707_v30, %v3708_v20  ;;  %4275 = vmatpush1.bf16.msra.mxu0 %v14214_v10  ;;  %4481 = vmatpush1.bf16.msra.mxu1 %v14214_v10 }
 0x53c   :  { %4276 = vmatprep.subr.bf16.mxu0 %v14221_v47  ;;  %4482 = vmatprep.subr.bf16.mxu1 %v14221_v47 }
 0x53d   :  { %v3724_v46 = vmax.f32 %v3721_v32, 0.0  ;;  %v3722_v20 = vadd.f32 %v14201_v7, %v3712_v1  ;;  %v3492_v15 = vpop.f32.mrb[52].mxu0  ;;  %v3698_v0 = vpop.f32.mrb[52].mxu1 }
 0x53e   :  { %v3709_v30 = vmax.f32 %v3492_v15, %v3698_v0  ;;  %v3494_v31 = vpop.f32.mrb[53].mxu0  ;;  %v3700_v19 = vpop.f32.mrb[53].mxu1  ;;  %v14236_v15 = vld [vmem:[%s16974_s1 + $0x104] ss:$8 sps:$4 sm:$0xff]   ;;  %v14288_v0 = vld [vmem:[%s16974_s1 + $0x120] ss:$8 sps:$4 sm:$0xff]  }
 0x53f   :  { %v9335_v53 = vpack.c.bf16 %v3724_v46, %v3724_v46  ;;  %v3725_v42 = vmax.f32 %v3722_v20, 0.0  ;;  %v3710_v10 = vmax.f32 %v3494_v31, %v3700_v19  ;;  %v3496_v2 = vpop.f32.mrb[54].mxu0  ;;  %v3702_v63 = vpop.f32.mrb[54].mxu1  ;;  %4277 = vmatpush1.bf16.msra.mxu0 %v14229_v58  ;;  %4483 = vmatpush1.bf16.msra.mxu1 %v14229_v58  ;;  %v14246_v20 = vld [vmem:[%s16974_s1 + $0x100] ss:$8 sps:$4 sm:$0xff]  }
 0x540   :  { %v3497_v1 = vpop.f32.mrb[55].mxu0  ;;  %v3703_v32 = vpop.f32.mrb[55].mxu1  ;;  %4297 = vmatprep.subr.bf16.mxu0 %v14236_v15  ;;  %4503 = vmatprep.subr.bf16.mxu1 %v14236_v15  ;;  %v14318_v31 = vld [vmem:[%s16974_s1 + $0x140] ss:$8 sps:$4 sm:$0xff]   ;;  %v14325_v19 = vld [vmem:[%s16974_s1 + $0x154] ss:$8 sps:$4 sm:$0xff]  }
 0x541   :  { %3740 = vst [vmem:[#allocation2 + $0x18] sm:$0xf] %v9335_v53  ;;  %v9336_v63 = vpack.c.bf16 %v3725_v42, %v3725_v42  ;;  %v3713_v2 = vmax.f32 %v3709_v30, %v3710_v10  ;;  %v14253_v42 = vld [vmem:[%s16974_s1 + $0x114] ss:$8 sps:$4 sm:$0xff]   ;;  %v14262_v53 = vld [vmem:[%s16974_s1 + $0x110] ss:$8 sps:$4 sm:$0xff]  }
 0x542   :  { %4279 = vmatmul.mubr.bf16.vlgmr.msra.gmra.mrb[64].mxu0 %v13923_v59  ;;  %4485 = vmatmul.mubr.bf16.vlgmr.msra.gmra.mrb[64].mxu1 %v13928_v39  ;;  %v14269_v10 = vld [vmem:[%s16974_s1 + $0x124] ss:$8 sps:$4 sm:$0xff]   ;;  %v14295_v30 = vld [vmem:[%s16974_s1 + $0x134] ss:$8 sps:$4 sm:$0xff]   ;;  %v14332_v1 = vld [vmem:[%s16974_s1 + $0x150] ss:$8 sps:$4 sm:$0xff]  }
 0x543   :  { %3741 = vst [vmem:[#allocation2 + $0x48] sm:$0xf] %v9336_v63  ;;  %v3723_v46 = vadd.f32 %v14201_v7, %v3713_v2  ;;  %4298 = vmatpush1.bf16.msra.mxu0 %v14246_v20  ;;  %4504 = vmatpush1.bf16.msra.mxu1 %v14246_v20  ;;  %v14339_v32 = vld [vmem:[%s16974_s1 + $0x164] ss:$8 sps:$4 sm:$0xff]   ;;  %v14346_v63 = vld [vmem:[%s16974_s1 + $0x160] ss:$8 sps:$4 sm:$0xff]  }
 0x544   :  { %4299 = vmatprep.subr.bf16.mxu0 %v14253_v42  ;;  %4505 = vmatprep.subr.bf16.mxu1 %v14253_v42  ;;  %v14353_v2 = vld [vmem:[%s16974_s1 + $0x174] ss:$8 sps:$4 sm:$0xff]  }
 0x545   :  { %v3726_v59 = vmax.f32 %v3723_v46, 0.0  ;;  %4288 = vmatprep.mubr.bf16.mxu0 %v13940_v62  ;;  %4494 = vmatprep.mubr.bf16.mxu1 %v13942_v24  ;;  %v14276_v62 = vld [vmem:[%s16975_s0 + $0x4c] ss:$112 sps:$4 sm:$0xff]   ;;  %v14281_v24 = vld [vmem:[%s16975_s0 + $0x50] ss:$112 sps:$4 sm:$0xff]  }
 0x547   :  { %v9337_v39 = vpack.c.bf16 %v3726_v59, %v3726_v59  ;;  %4300 = vmatpush1.bf16.msra.mxu0 %v14262_v53  ;;  %4506 = vmatpush1.bf16.msra.mxu1 %v14262_v53 }
 0x548   :  { %4301 = vmatprep.subr.bf16.mxu0 %v14269_v10  ;;  %4507 = vmatprep.subr.bf16.mxu1 %v14269_v10 }
 0x549   :  { %3742 = vst [vmem:[#allocation2 + $0x78] sm:$0xf] %v9337_v39 }
 0x54a   :  { %4289 = vmatmul.mubr.bf16.gmra.mrb[68].mxu0 %v13952_v9  ;;  %4495 = vmatmul.mubr.bf16.gmra.mrb[68].mxu1 %v13954_v33  ;;  %v14304_v9 = vld [vmem:[%s16974_s1 + $0x130] ss:$8 sps:$4 sm:$0xff]   ;;  %v14311_v33 = vld [vmem:[%s16974_s1 + $0x144] ss:$8 sps:$4 sm:$0xff]  }
 0x54b   :  { %4302 = vmatpush1.bf16.msra.mxu0 %v14288_v0  ;;  %4508 = vmatpush1.bf16.msra.mxu1 %v14288_v0 }
 0x54c   :  { %4303 = vmatprep.subr.bf16.mxu0 %v14295_v30  ;;  %4509 = vmatprep.subr.bf16.mxu1 %v14295_v30 }
 0x54d   :  { %4329 = vmatprep.mubr.bf16.mxu0 %v14276_v62  ;;  %4535 = vmatprep.mubr.bf16.mxu1 %v14281_v24 }
 0x54f   :  { %4304 = vmatpush1.bf16.msra.mxu0 %v14304_v9  ;;  %4510 = vmatpush1.bf16.msra.mxu1 %v14304_v9 }
 0x550   :  { %4305 = vmatprep.subr.bf16.mxu0 %v14311_v33  ;;  %4511 = vmatprep.subr.bf16.mxu1 %v14311_v33 }
 0x553   :  { %4306 = vmatpush1.bf16.msra.mxu0 %v14318_v31  ;;  %4512 = vmatpush1.bf16.msra.mxu1 %v14318_v31 }
 0x554   :  { %4307 = vmatprep.subr.bf16.mxu0 %v14325_v19  ;;  %4513 = vmatprep.subr.bf16.mxu1 %v14325_v19 }
 0x557   :  { %4308 = vmatpush1.bf16.msra.mxu0 %v14332_v1  ;;  %4514 = vmatpush1.bf16.msra.mxu1 %v14332_v1 }
 0x558   :  { %4309 = vmatprep.subr.bf16.mxu0 %v14339_v32  ;;  %4515 = vmatprep.subr.bf16.mxu1 %v14339_v32 }
 0x55b   :  { %4310 = vmatpush1.bf16.msra.mxu0 %v14346_v63  ;;  %4516 = vmatpush1.bf16.msra.mxu1 %v14346_v63 }
 0x55c   :  { %4311 = vmatprep.subr.bf16.mxu0 %v14353_v2  ;;  %4517 = vmatprep.subr.bf16.mxu1 %v14353_v2 }
 0x55f   :  { %4312 = vmatpush1.bf16.msra.mxu0 %v13497_v6  ;;  %4518 = vmatpush1.bf16.msra.mxu1 %v13497_v6  ;;  %v14392_v6 = vld [vmem:[%s16975_s0 + $0x48] ss:$112 sps:$4 sm:$0xff]  }
 0x560   :  { %4313 = vmatprep.subr.bf16.mxu0 %v13504_v18  ;;  %4519 = vmatprep.subr.bf16.mxu1 %v13504_v18  ;;  %v14397_v18 = vld [vmem:[%s16975_s0 + $0x4c] ss:$112 sps:$4 sm:$0xff]  }
 0x563   :  { %4314 = vmatpush1.bf16.msra.mxu0 %v13511_v23  ;;  %4520 = vmatpush1.bf16.msra.mxu1 %v13511_v23  ;;  %v4200_v23 = vld [vmem:[%s16975_s0 + $0x128] sm:$0xff] }
 0x564   :  { %4315 = vmatprep.subr.bf16.mxu0 %v13518_v61  ;;  %4521 = vmatprep.subr.bf16.mxu1 %v13518_v61  ;;  %v4406_v61 = vld [vmem:[%s16975_s0 + $0x12c] sm:$0xff] }
 0x567   :  { %4316 = vmatpush1.bf16.msra.mxu0 %v13525_v5  ;;  %4522 = vmatpush1.bf16.msra.mxu1 %v13525_v5  ;;  %v14409_v5 = vcombine.high %v4200_v23, %v4200_v23 }
 0x568   :  { %4317 = vmatprep.subr.bf16.mxu0 %v13532_v25  ;;  %4523 = vmatprep.subr.bf16.mxu1 %v13532_v25  ;;  %v14411_v25 = vcombine.high %v4406_v61, %v4406_v61 }
 0x56b   :  { %4318 = vmatpush1.bf16.msra.mxu0 %v13539_v35  ;;  %4524 = vmatpush1.bf16.msra.mxu1 %v13539_v35  ;;  %v14421_v35 = vcombine.low %v4200_v23, %v4200_v23 }
 0x56c   :  { %4319 = vmatprep.subr.bf16.mxu0 %v13546_v4  ;;  %4525 = vmatprep.subr.bf16.mxu1 %v13546_v4  ;;  %v14423_v4 = vcombine.low %v4406_v61, %v4406_v61 }
 0x56f   :  { %4320 = vmatpush1.bf16.msra.mxu0 %v13553_v14  ;;  %4526 = vmatpush1.bf16.msra.mxu1 %v13553_v14  ;;  %v10216_v14 = vld [vmem:[%s16975_s0 + $0x50] ss:$112 sps:$4 sm:$0xff]  }
 0x570   :  { %4321 = vmatprep.subr.bf16.mxu0 %v13560_v36  ;;  %4527 = vmatprep.subr.bf16.mxu1 %v13560_v36  ;;  %v10217_v36 = vld [vmem:[%s16975_s0 + $0x54] ss:$112 sps:$4 sm:$0xff]  }
 0x573   :  { %4322 = vmatpush1.bf16.msra.mxu0 %v17662_v49  ;;  %4528 = vmatpush1.bf16.msra.mxu1 %v17662_v49  ;;  %v10219_v49 = vld [vmem:[%s16975_s0 + $0x134] ss:$0 sps:$4 sm:$0xff]  }
 0x574   :  { %4323 = vmatprep.subr.bf16.mxu0 %v17663_v55  ;;  %4529 = vmatprep.subr.bf16.mxu1 %v17663_v55  ;;  %v17707_v55 = vld [vmem:[#allocation8_spill] sm:$0xff] }
 0x577   :  { %4324 = vmatpush1.bf16.msra.mxu0 %v17664_v13  ;;  %4530 = vmatpush1.bf16.msra.mxu1 %v17664_v13  ;;  %v17708_v13 = vld [vmem:[#allocation9_spill] sm:$0xff] }
 0x578   :  { %4325 = vmatprep.subr.bf16.mxu0 %v17665_v43  ;;  %4531 = vmatprep.subr.bf16.mxu1 %v17665_v43  ;;  %v17709_v43 = vld [vmem:[#allocation10_spill] sm:$0xff] }
 0x57b   :  { %4326 = vmatpush1.bf16.msra.mxu0 %v17666_v8  ;;  %4532 = vmatpush1.bf16.msra.mxu1 %v17666_v8  ;;  %v17710_v8 = vld [vmem:[#allocation11_spill] sm:$0xff] }
 0x57c   :  { %4327 = vmatprep.subr.bf16.mxu0 %v17667_v50  ;;  %4533 = vmatprep.subr.bf16.mxu1 %v17667_v50  ;;  %v17711_v50 = vld [vmem:[#allocation12_spill] sm:$0xff] }
 0x57f   :  { %4328 = vmatpush1.bf16.msra.mxu0 %v17668_v52  ;;  %4534 = vmatpush1.bf16.msra.mxu1 %v17668_v52  ;;  %v17712_v52 = vld [vmem:[#allocation13_spill] sm:$0xff] }
 0x580   :  { %4348 = vmatprep.subr.bf16.mxu0 %v17669_v11  ;;  %4554 = vmatprep.subr.bf16.mxu1 %v17669_v11  ;;  %v17713_v11 = vld [vmem:[#allocation14_spill] sm:$0xff] }
 0x582   :  { %4330 = vmatmul.mubr.bf16.vlgmr.msra.gmra.mrb[64].mxu0 %v14392_v6  ;;  %4536 = vmatmul.mubr.bf16.vlgmr.msra.gmra.mrb[64].mxu1 %v14397_v18 }
 0x583   :  { %4349 = vmatpush1.bf16.msra.mxu0 %v17670_v44  ;;  %4555 = vmatpush1.bf16.msra.mxu1 %v17670_v44  ;;  %v17714_v44 = vld [vmem:[#allocation15_spill] sm:$0xff] }
 0x584   :  { %4350 = vmatprep.subr.bf16.mxu0 %v17671_v17  ;;  %4556 = vmatprep.subr.bf16.mxu1 %v17671_v17  ;;  %v17715_v17 = vld [vmem:[#allocation16_spill] sm:$0xff] }
 0x585   :  { %4339 = vmatprep.mubr.bf16.mxu0 %v14409_v5  ;;  %4545 = vmatprep.mubr.bf16.mxu1 %v14411_v25 }
 0x587   :  { %4351 = vmatpush1.bf16.msra.mxu0 %v17672_v37  ;;  %4557 = vmatpush1.bf16.msra.mxu1 %v17672_v37  ;;  %v17716_v37 = vld [vmem:[#allocation17_spill] sm:$0xff] }
 0x588   :  { %4352 = vmatprep.subr.bf16.mxu0 %v17673_v27  ;;  %4558 = vmatprep.subr.bf16.mxu1 %v17673_v27  ;;  %v17717_v27 = vld [vmem:[#allocation18_spill] sm:$0xff] }
 0x58a   :  { %4340 = vmatmul.mubr.bf16.gmra.mrb[68].mxu0 %v14421_v35  ;;  %4546 = vmatmul.mubr.bf16.gmra.mrb[68].mxu1 %v14423_v4 }
 0x58b   :  { %4353 = vmatpush1.bf16.msra.mxu0 %v17674_v54  ;;  %4559 = vmatpush1.bf16.msra.mxu1 %v17674_v54  ;;  %v17718_v54 = vld [vmem:[#allocation19_spill] sm:$0xff] }
 0x58c   :  { %4354 = vmatprep.subr.bf16.mxu0 %v17675_v16  ;;  %4560 = vmatprep.subr.bf16.mxu1 %v17675_v16  ;;  %v17719_v16 = vld [vmem:[#allocation20_spill] sm:$0xff] }
 0x58d   :  { %4380 = vmatprep.mubr.bf16.mxu0 %v17463_v38  ;;  %4586 = vmatprep.mubr.bf16.mxu1 %v17463_v38 }
 0x58f   :  { %4355 = vmatpush1.bf16.msra.mxu0 %v17676_v45  ;;  %4561 = vmatpush1.bf16.msra.mxu1 %v17676_v45  ;;  %v17720_v45 = vld [vmem:[#allocation21_spill] sm:$0xff] }
 0x590   :  { %4356 = vmatprep.subr.bf16.mxu0 %v17677_v41  ;;  %4562 = vmatprep.subr.bf16.mxu1 %v17677_v41  ;;  %v17721_v41 = vld [vmem:[#allocation22_spill] sm:$0xff] }
 0x593   :  { %4357 = vmatpush1.bf16.msra.mxu0 %v17678_v48  ;;  %4563 = vmatpush1.bf16.msra.mxu1 %v17678_v48  ;;  %v17722_v48 = vld [vmem:[#allocation23_spill] sm:$0xff] }
 0x594   :  { %4358 = vmatprep.subr.bf16.mxu0 %v17679_v21  ;;  %4564 = vmatprep.subr.bf16.mxu1 %v17679_v21  ;;  %v17723_v21 = vld [vmem:[#allocation24_spill] sm:$0xff] }
 0x597   :  { %4359 = vmatpush1.bf16.msra.mxu0 %v17680_v22  ;;  %4565 = vmatpush1.bf16.msra.mxu1 %v17680_v22  ;;  %v17724_v22 = vld [vmem:[#allocation25_spill] sm:$0xff] }
 0x598   :  { %4360 = vmatprep.subr.bf16.mxu0 %v17681_v26  ;;  %4566 = vmatprep.subr.bf16.mxu1 %v17681_v26  ;;  %v17725_v26 = vld [vmem:[#allocation26_spill] sm:$0xff] }
 0x59b   :  { %4361 = vmatpush1.bf16.msra.mxu0 %v17682_v29  ;;  %4567 = vmatpush1.bf16.msra.mxu1 %v17682_v29  ;;  %v17726_v29 = vld [vmem:[#allocation27_spill] sm:$0xff] }
 0x59c   :  { %4362 = vmatprep.subr.bf16.mxu0 %v13746_v34  ;;  %4568 = vmatprep.subr.bf16.mxu1 %v13746_v34  ;;  %v10218_v34 = vld [vmem:[%s16975_s0 + $0x130] ss:$0 sps:$4 sm:$0xff]  }
 0x59f   :  { %4363 = vmatpush1.bf16.msra.mxu0 %v17683_v60  ;;  %4569 = vmatpush1.bf16.msra.mxu1 %v17683_v60 }
 0x5a0   :  { %4696 = vmatprep.subr.bf16.mxu0 %v13995_v3  ;;  %4902 = vmatprep.subr.bf16.mxu1 %v13995_v3 }
 0x5a2   :  { %4381 = vmatmul.mubr.bf16.vlgmr.msra.gmra.mrb[64].mxu0 %v10216_v14  ;;  %4587 = vmatmul.mubr.bf16.vlgmr.msra.gmra.mrb[64].mxu1 %v10217_v36  ;;  %v17727_v14 = vld [vmem:[#allocation28_spill] sm:$0xff] }
 0x5a3   :  { %4697 = vmatpush1.bf16.msra.mxu0 %v14002_v12  ;;  %4903 = vmatpush1.bf16.msra.mxu1 %v14002_v12 }
 0x5a4   :  { %4698 = vmatprep.subr.bf16.mxu0 %v14009_v28  ;;  %4904 = vmatprep.subr.bf16.mxu1 %v14009_v28 }
 0x5a5   :  { %4390 = vmatprep.mubr.bf16.mxu0 %v17463_v38  ;;  %4596 = vmatprep.mubr.bf16.mxu1 %v17463_v38 }
 0x5a7   :  { %4699 = vmatpush1.bf16.msra.mxu0 %v14024_v40  ;;  %4905 = vmatpush1.bf16.msra.mxu1 %v14024_v40 }
 0x5a8   :  { %4700 = vmatprep.subr.bf16.mxu0 %v14031_v51  ;;  %4906 = vmatprep.subr.bf16.mxu1 %v14031_v51 }
 0x5aa   :  { %4391 = vmatmul.mubr.bf16.gmra.mrb[68].mxu0 %v10218_v34  ;;  %4597 = vmatmul.mubr.bf16.gmra.mrb[68].mxu1 %v10219_v49 }
 0x5ab   :  { %4701 = vmatpush1.bf16.msra.mxu0 %v14038_v56  ;;  %4907 = vmatpush1.bf16.msra.mxu1 %v14038_v56 }
 0x5ac   :  { %4702 = vmatprep.subr.bf16.mxu0 %v14045_v57  ;;  %4908 = vmatprep.subr.bf16.mxu1 %v14045_v57 }
 0x5ad   :  { %4728 = vmatprep.mubr.bf16.mxu0 %v14276_v62  ;;  %4934 = vmatprep.mubr.bf16.mxu1 %v14281_v24 }
 0x5af   :  { %4703 = vmatpush1.bf16.msra.mxu0 %v17707_v55  ;;  %4909 = vmatpush1.bf16.msra.mxu1 %v17707_v55 }
 0x5b0   :  { %4704 = vmatprep.subr.bf16.mxu0 %v17708_v13  ;;  %4910 = vmatprep.subr.bf16.mxu1 %v17708_v13 }
 0x5b3   :  { %4705 = vmatpush1.bf16.msra.mxu0 %v17709_v43  ;;  %4911 = vmatpush1.bf16.msra.mxu1 %v17709_v43 }
 0x5b4   :  { %4706 = vmatprep.subr.bf16.mxu0 %v17710_v8  ;;  %4912 = vmatprep.subr.bf16.mxu1 %v17710_v8 }
 0x5b7   :  { %4707 = vmatpush1.bf16.msra.mxu0 %v17711_v50  ;;  %4913 = vmatpush1.bf16.msra.mxu1 %v17711_v50 }
 0x5b8   :  { %4708 = vmatprep.subr.bf16.mxu0 %v17712_v52  ;;  %4914 = vmatprep.subr.bf16.mxu1 %v17712_v52 }
 0x5bb   :  { %4709 = vmatpush1.bf16.msra.mxu0 %v17713_v11  ;;  %4915 = vmatpush1.bf16.msra.mxu1 %v17713_v11 }
 0x5bc   :  { %4710 = vmatprep.subr.bf16.mxu0 %v17714_v44  ;;  %4916 = vmatprep.subr.bf16.mxu1 %v17714_v44 }
 0x5bf   :  { %4711 = vmatpush1.bf16.msra.mxu0 %v17715_v17  ;;  %4917 = vmatpush1.bf16.msra.mxu1 %v17715_v17 }
 0x5c0   :  { %4712 = vmatprep.subr.bf16.mxu0 %v17716_v37  ;;  %4918 = vmatprep.subr.bf16.mxu1 %v17716_v37 }
 0x5c3   :  { %4713 = vmatpush1.bf16.msra.mxu0 %v17717_v27  ;;  %4919 = vmatpush1.bf16.msra.mxu1 %v17717_v27 }
 0x5c4   :  { %4714 = vmatprep.subr.bf16.mxu0 %v17718_v54  ;;  %4920 = vmatprep.subr.bf16.mxu1 %v17718_v54 }
 0x5c7   :  { %4715 = vmatpush1.bf16.msra.mxu0 %v17719_v16  ;;  %4921 = vmatpush1.bf16.msra.mxu1 %v17719_v16 }
 0x5c8   :  { %4716 = vmatprep.subr.bf16.mxu0 %v17720_v45  ;;  %4922 = vmatprep.subr.bf16.mxu1 %v17720_v45 }
 0x5cb   :  { %4717 = vmatpush1.bf16.msra.mxu0 %v17721_v41  ;;  %4923 = vmatpush1.bf16.msra.mxu1 %v17721_v41 }
 0x5cc   :  { %4718 = vmatprep.subr.bf16.mxu0 %v17722_v48  ;;  %4924 = vmatprep.subr.bf16.mxu1 %v17722_v48 }
 0x5cf   :  { %4719 = vmatpush1.bf16.msra.mxu0 %v17723_v21  ;;  %4925 = vmatpush1.bf16.msra.mxu1 %v17723_v21  ;;  %v17729_v21 = vld [vmem:[#allocation30_spill] sm:$0xff] }
 0x5d0   :  { %4720 = vmatprep.subr.bf16.mxu0 %v17724_v22  ;;  %4926 = vmatprep.subr.bf16.mxu1 %v17724_v22 }
 0x5d3   :  { %4721 = vmatpush1.bf16.msra.mxu0 %v17725_v26  ;;  %4927 = vmatpush1.bf16.msra.mxu1 %v17725_v26  ;;  %v17728_v26 = vld [vmem:[#allocation29_spill] sm:$0xff] }
 0x5d4   :  { %4722 = vmatprep.subr.bf16.mxu0 %v17726_v29  ;;  %4928 = vmatprep.subr.bf16.mxu1 %v17726_v29 }
 0x5d5   :  { %v3932_v60 = vpop.f32.mrb[56].mxu0  ;;  %v4138_v46 = vpop.f32.mrb[56].mxu1 }
 0x5d6   :  { %v4155_v59 = vmax.f32 %v3932_v60, %v4138_v46  ;;  %v3934_v39 = vpop.f32.mrb[57].mxu0  ;;  %v4140_v62 = vpop.f32.mrb[57].mxu1 }
 0x5d7   :  { %v4156_v24 = vmax.f32 %v3934_v39, %v4140_v62  ;;  %v3936_v23 = vpop.f32.mrb[58].mxu0  ;;  %v4142_v61 = vpop.f32.mrb[58].mxu1  ;;  %4723 = vmatpush1.bf16.msra.mxu0 %v17727_v14  ;;  %4929 = vmatpush1.bf16.msra.mxu1 %v17727_v14 }
 0x5d8   :  { %v4157_v36 = vmax.f32 %v3936_v23, %v4142_v61  ;;  %v3938_v34 = vpop.f32.mrb[59].mxu0  ;;  %v4144_v49 = vpop.f32.mrb[59].mxu1  ;;  %4724 = vmatprep.subr.bf16.mxu0 %v17728_v26  ;;  %4930 = vmatprep.subr.bf16.mxu1 %v17728_v26 }
 0x5d9   :  { %v4161_v29 = vmax.f32 %v4155_v59, %v4156_v24  ;;  %v4158_v22 = vmax.f32 %v3938_v34, %v4144_v49 }
 0x5db   :  { %v4171_v60 = vadd.f32 %v14201_v7, %v4161_v29  ;;  %v4162_v46 = vmax.f32 %v4157_v36, %v4158_v22  ;;  %4725 = vmatpush1.bf16.msra.mxu0 %v17729_v21  ;;  %4931 = vmatpush1.bf16.msra.mxu1 %v17729_v21 }
 0x5dc   :  { %4726 = vmatprep.subr.bf16.mxu0 %v14221_v47  ;;  %4932 = vmatprep.subr.bf16.mxu1 %v14221_v47 }
 0x5dd   :  { %v4174_v39 = vmax.f32 %v4171_v60, 0.0  ;;  %v4172_v62 = vadd.f32 %v14201_v7, %v4162_v46  ;;  %v3942_v23 = vpop.f32.mrb[60].mxu0  ;;  %v4148_v61 = vpop.f32.mrb[60].mxu1 }
 0x5de   :  { %v4159_v14 = vmax.f32 %v3942_v23, %v4148_v61  ;;  %v3944_v26 = vpop.f32.mrb[61].mxu0  ;;  %v4150_v59 = vpop.f32.mrb[61].mxu1  ;;  %v14638_v23 = vld [vmem:[%s16974_s1 + $0x1b4] ss:$8 sps:$4 sm:$0xff]   ;;  %v14645_v61 = vld [vmem:[%s16974_s1 + $0x1b0] ss:$8 sps:$4 sm:$0xff]  }
 0x5df   :  { %v9338_v24 = vpack.c.bf16 %v4174_v39, %v4174_v39  ;;  %v4175_v34 = vmax.f32 %v4172_v62, 0.0  ;;  %v4160_v29 = vmax.f32 %v3944_v26, %v4150_v59  ;;  %v3946_v22 = vpop.f32.mrb[62].mxu0  ;;  %v4152_v36 = vpop.f32.mrb[62].mxu1  ;;  %4727 = vmatpush1.bf16.msra.mxu0 %v14229_v58  ;;  %4933 = vmatpush1.bf16.msra.mxu1 %v14229_v58  ;;  %v14624_v39 = vld [vmem:[%s16974_s1 + $0x1a4] ss:$8 sps:$4 sm:$0xff]  }
 0x5e0   :  { %v3947_v49 = vpop.f32.mrb[63].mxu0  ;;  %v4153_v21 = vpop.f32.mrb[63].mxu1  ;;  %4747 = vmatprep.subr.bf16.mxu0 %v14236_v15  ;;  %4953 = vmatprep.subr.bf16.mxu1 %v14236_v15  ;;  %v14631_v62 = vld [vmem:[%s16974_s1 + $0x1a0] ss:$8 sps:$4 sm:$0xff]   ;;  %v14652_v59 = vld [vmem:[%s16974_s1 + $0x1c4] ss:$8 sps:$4 sm:$0xff]  }
 0x5e1   :  { %4190 = vst [vmem:[#allocation2 + $0x1c] sm:$0xf] %v9338_v24  ;;  %v9339_v60 = vpack.c.bf16 %v4175_v34, %v4175_v34  ;;  %v4163_v46 = vmax.f32 %v4159_v14, %v4160_v29  ;;  %v14659_v24 = vld [vmem:[%s16974_s1 + $0x1c0] ss:$8 sps:$4 sm:$0xff]   ;;  %v14666_v34 = vld [vmem:[%s16974_s1 + $0x1d4] ss:$8 sps:$4 sm:$0xff]  }
 0x5e2   :  { %4729 = vmatmul.mubr.bf16.vlgmr.msra.gmra.mrb[72].mxu0 %v14392_v6  ;;  %4935 = vmatmul.mubr.bf16.vlgmr.msra.gmra.mrb[72].mxu1 %v14397_v18  ;;  %v14560_v6 = vld [vmem:[%s16975_s0 + $0x58] ss:$112 sps:$4 sm:$0xff]   ;;  %17730 = vst [vmem:[#allocation31_spill] sm:$0xff] %v14666_v34  ;;  %v14680_v22 = vld [vmem:[%s16974_s1 + $0x1e4] ss:$8 sps:$4 sm:$0xff]  }
 0x5e3   :  { %4191 = vst [vmem:[#allocation2 + $0x4c] sm:$0xf] %v9339_v60  ;;  %v4173_v26 = vadd.f32 %v14201_v7, %v4163_v46  ;;  %4748 = vmatpush1.bf16.msra.mxu0 %v14246_v20  ;;  %4954 = vmatpush1.bf16.msra.mxu1 %v14246_v20  ;;  %v14555_v7 = vld [vmem:[%s16975_s0 + $0x54] ss:$112 sps:$4 sm:$0xff]   ;;  %v14589_v18 = vld [vmem:[%s16974_s1 + $0x170] ss:$8 sps:$4 sm:$0xff]  }
 0x5e4   :  { %4749 = vmatprep.subr.bf16.mxu0 %v14253_v42  ;;  %4955 = vmatprep.subr.bf16.mxu1 %v14253_v42  ;;  %v14673_v29 = vld [vmem:[%s16974_s1 + $0x1d0] ss:$8 sps:$4 sm:$0xff]   ;;  %17732 = vst [vmem:[#allocation5_spill] sm:$0xff] %v14680_v22  ;;  %v14687_v36 = vld [vmem:[%s16974_s1 + $0x1e0] ss:$8 sps:$4 sm:$0xff]  }
 0x5e5   :  { %v4176_v21 = vmax.f32 %v4173_v26, 0.0  ;;  %4738 = vmatprep.mubr.bf16.mxu0 %v14409_v5  ;;  %4944 = vmatprep.mubr.bf16.mxu1 %v14411_v25  ;;  %v14596_v5 = vld [vmem:[%s16974_s1 + $0x184] ss:$8 sps:$4 sm:$0xff]   ;;  %v14603_v25 = vld [vmem:[%s16974_s1 + $0x180] ss:$8 sps:$4 sm:$0xff]   ;;  %17731 = vst [vmem:[#allocation4_spill] sm:$0xff] %v14673_v29 }
 0x5e6   :  { %17733 = vst [vmem:[#allocation6_spill] sm:$0xff] %v14687_v36  ;;  %v14694_v49 = vld [vmem:[%s16974_s1 + $0x1f4] ss:$8 sps:$4 sm:$0xff]   ;;  %v14701_v60 = vld [vmem:[%s16975_s0 + $0x50] ss:$112 sps:$4 sm:$0xff]  }
 0x5e7   :  { %v9340_v14 = vpack.c.bf16 %v4176_v21, %v4176_v21  ;;  %4750 = vmatpush1.bf16.msra.mxu0 %v14262_v53  ;;  %4956 = vmatpush1.bf16.msra.mxu1 %v14262_v53  ;;  %17734 = vst [vmem:[#allocation7_spill] sm:$0xff] %v14694_v49  ;;  %v14706_v46 = vld [vmem:[%s16975_s0 + $0x54] ss:$112 sps:$4 sm:$0xff]  }
 0x5e8   :  { %4751 = vmatprep.subr.bf16.mxu0 %v14269_v10  ;;  %4957 = vmatprep.subr.bf16.mxu1 %v14269_v10  ;;  %v4650_v26 = vld [vmem:[%s16975_s0 + $0x130] sm:$0xff] }
 0x5e9   :  { %4192 = vst [vmem:[#allocation2 + $0x7c] sm:$0xf] %v9340_v14  ;;  %v4856_v21 = vld [vmem:[%s16975_s0 + $0x134] sm:$0xff] }
 0x5ea   :  { %4739 = vmatmul.mubr.bf16.gmra.mrb[76].mxu0 %v14421_v35  ;;  %4945 = vmatmul.mubr.bf16.gmra.mrb[76].mxu1 %v14423_v4  ;;  %v14610_v35 = vld [vmem:[%s16974_s1 + $0x194] ss:$8 sps:$4 sm:$0xff]   ;;  %v14617_v4 = vld [vmem:[%s16974_s1 + $0x190] ss:$8 sps:$4 sm:$0xff]  }
 0x5eb   :  { %4752 = vmatpush1.bf16.msra.mxu0 %v14288_v0  ;;  %4958 = vmatpush1.bf16.msra.mxu1 %v14288_v0  ;;  %v14717_v14 = vld [vmem:[%s16974_s1 + $0x1f0] ss:$8 sps:$4 sm:$0xff]  }
 0x5ec   :  { %4753 = vmatprep.subr.bf16.mxu0 %v14295_v30  ;;  %4959 = vmatprep.subr.bf16.mxu1 %v14295_v30  ;;  %17735 = vst [vmem:[#allocation32_spill] sm:$0xff] %v14717_v14 }
 0x5ed   :  { %4779 = vmatprep.mubr.bf16.mxu0 %v14555_v7  ;;  %4985 = vmatprep.mubr.bf16.mxu1 %v14560_v6 }
 0x5ef   :  { %4754 = vmatpush1.bf16.msra.mxu0 %v14304_v9  ;;  %4960 = vmatpush1.bf16.msra.mxu1 %v14304_v9 }
 0x5f0   :  { %4755 = vmatprep.subr.bf16.mxu0 %v14311_v33  ;;  %4961 = vmatprep.subr.bf16.mxu1 %v14311_v33 }
 0x5f3   :  { %4756 = vmatpush1.bf16.msra.mxu0 %v14318_v31  ;;  %4962 = vmatpush1.bf16.msra.mxu1 %v14318_v31 }
 0x5f4   :  { %4757 = vmatprep.subr.bf16.mxu0 %v14325_v19  ;;  %4963 = vmatprep.subr.bf16.mxu1 %v14325_v19 }
 0x5f7   :  { %4758 = vmatpush1.bf16.msra.mxu0 %v14332_v1  ;;  %4964 = vmatpush1.bf16.msra.mxu1 %v14332_v1 }
 0x5f8   :  { %4759 = vmatprep.subr.bf16.mxu0 %v14339_v32  ;;  %4965 = vmatprep.subr.bf16.mxu1 %v14339_v32 }
 0x5fb   :  { %4760 = vmatpush1.bf16.msra.mxu0 %v14346_v63  ;;  %4966 = vmatpush1.bf16.msra.mxu1 %v14346_v63 }
 0x5fc   :  { %4761 = vmatprep.subr.bf16.mxu0 %v14353_v2  ;;  %4967 = vmatprep.subr.bf16.mxu1 %v14353_v2 }
 0x5ff   :  { %4762 = vmatpush1.bf16.msra.mxu0 %v14589_v18  ;;  %4968 = vmatpush1.bf16.msra.mxu1 %v14589_v18 }
 0x600   :  { %4763 = vmatprep.subr.bf16.mxu0 %v14596_v5  ;;  %4969 = vmatprep.subr.bf16.mxu1 %v14596_v5 }
 0x603   :  { %4764 = vmatpush1.bf16.msra.mxu0 %v14603_v25  ;;  %4970 = vmatpush1.bf16.msra.mxu1 %v14603_v25 }
 0x604   :  { %4765 = vmatprep.subr.bf16.mxu0 %v14610_v35  ;;  %4971 = vmatprep.subr.bf16.mxu1 %v14610_v35 }
 0x607   :  { %4766 = vmatpush1.bf16.msra.mxu0 %v14617_v4  ;;  %4972 = vmatpush1.bf16.msra.mxu1 %v14617_v4 }
 0x608   :  { %4767 = vmatprep.subr.bf16.mxu0 %v14624_v39  ;;  %4973 = vmatprep.subr.bf16.mxu1 %v14624_v39 }
 0x60b   :  { %4768 = vmatpush1.bf16.msra.mxu0 %v14631_v62  ;;  %4974 = vmatpush1.bf16.msra.mxu1 %v14631_v62 }
 0x60c   :  { %4769 = vmatprep.subr.bf16.mxu0 %v14638_v23  ;;  %4975 = vmatprep.subr.bf16.mxu1 %v14638_v23 }
 0x60f   :  { %4770 = vmatpush1.bf16.msra.mxu0 %v14645_v61  ;;  %4976 = vmatpush1.bf16.msra.mxu1 %v14645_v61 }
 0x610   :  { %4771 = vmatprep.subr.bf16.mxu0 %v14652_v59  ;;  %4977 = vmatprep.subr.bf16.mxu1 %v14652_v59 }
 0x613   :  { %4772 = vmatpush1.bf16.msra.mxu0 %v14659_v24  ;;  %4978 = vmatpush1.bf16.msra.mxu1 %v14659_v24 }
 0x614   :  { %4773 = vmatprep.subr.bf16.mxu0 %v14666_v34  ;;  %4979 = vmatprep.subr.bf16.mxu1 %v14666_v34  ;;  %v14752_v34 = vcombine.low %v4856_v21, %v4856_v21 }
 0x617   :  { %4774 = vmatpush1.bf16.msra.mxu0 %v14673_v29  ;;  %4980 = vmatpush1.bf16.msra.mxu1 %v14673_v29  ;;  %v14750_v29 = vcombine.low %v4650_v26, %v4650_v26 }
 0x618   :  { %4775 = vmatprep.subr.bf16.mxu0 %v14680_v22  ;;  %4981 = vmatprep.subr.bf16.mxu1 %v14680_v22  ;;  %v14730_v22 = vcombine.high %v4856_v21, %v4856_v21  ;;  %v14780_v21 = vld [vmem:[%s16974_s1 + $0x234] ss:$8 sps:$4 sm:$0xff]  }
 0x619   :  { %17742 = vst [vmem:[#allocation14_spill] sm:$0xff] %v14780_v21 }
 0x61b   :  { %4776 = vmatpush1.bf16.msra.mxu0 %v14687_v36  ;;  %4982 = vmatpush1.bf16.msra.mxu1 %v14687_v36  ;;  %v14728_v36 = vcombine.high %v4650_v26, %v4650_v26  ;;  %v14773_v26 = vld [vmem:[%s16974_s1 + $0x220] ss:$8 sps:$4 sm:$0xff]  }
 0x61c   :  { %4777 = vmatprep.subr.bf16.mxu0 %v14694_v49  ;;  %4983 = vmatprep.subr.bf16.mxu1 %v14694_v49  ;;  %v14724_v49 = vld [vmem:[%s16974_s1 + $0x204] ss:$8 sps:$4 sm:$0xff]   ;;  %17741 = vst [vmem:[#allocation13_spill] sm:$0xff] %v14773_v26 }
 0x61d   :  { %17736 = vst [vmem:[#allocation8_spill] sm:$0xff] %v14724_v49 }
 0x61f   :  { %4778 = vmatpush1.bf16.msra.mxu0 %v14717_v14  ;;  %4984 = vmatpush1.bf16.msra.mxu1 %v14717_v14  ;;  %v14737_v14 = vld [vmem:[%s16974_s1 + $0x200] ss:$8 sps:$4 sm:$0xff]  }
 0x620   :  { %4798 = vmatprep.subr.bf16.mxu0 %v14724_v49  ;;  %5004 = vmatprep.subr.bf16.mxu1 %v14724_v49  ;;  %17737 = vst [vmem:[#allocation9_spill] sm:$0xff] %v14737_v14  ;;  %v14744_v49 = vld [vmem:[%s16974_s1 + $0x214] ss:$8 sps:$4 sm:$0xff]  }
 0x621   :  { %17738 = vst [vmem:[#allocation10_spill] sm:$0xff] %v14744_v49 }
 0x622   :  { %4780 = vmatmul.mubr.bf16.vlgmr.msra.gmra.mrb[72].mxu0 %v14701_v60  ;;  %4986 = vmatmul.mubr.bf16.vlgmr.msra.gmra.mrb[72].mxu1 %v14706_v46 }
 0x623   :  { %4799 = vmatpush1.bf16.msra.mxu0 %v14737_v14  ;;  %5005 = vmatpush1.bf16.msra.mxu1 %v14737_v14  ;;  %v14757_v14 = vld [vmem:[%s16974_s1 + $0x210] ss:$8 sps:$4 sm:$0xff]  }
 0x624   :  { %4800 = vmatprep.subr.bf16.mxu0 %v14744_v49  ;;  %5006 = vmatprep.subr.bf16.mxu1 %v14744_v49  ;;  %17739 = vst [vmem:[#allocation11_spill] sm:$0xff] %v14757_v14  ;;  %v14764_v49 = vld [vmem:[%s16974_s1 + $0x224] ss:$8 sps:$4 sm:$0xff]  }
 0x625   :  { %4789 = vmatprep.mubr.bf16.mxu0 %v14728_v36  ;;  %4995 = vmatprep.mubr.bf16.mxu1 %v14730_v22  ;;  %17740 = vst [vmem:[#allocation12_spill] sm:$0xff] %v14764_v49 }
 0x627   :  { %4801 = vmatpush1.bf16.msra.mxu0 %v14757_v14  ;;  %5007 = vmatpush1.bf16.msra.mxu1 %v14757_v14  ;;  %v10231_v14 = vld [vmem:[%s16975_s0 + $0x5c] ss:$112 sps:$4 sm:$0xff]  }
 0x628   :  { %4802 = vmatprep.subr.bf16.mxu0 %v14764_v49  ;;  %5008 = vmatprep.subr.bf16.mxu1 %v14764_v49  ;;  %v14789_v49 = vld [vmem:[%s16974_s1 + $0x230] ss:$8 sps:$4 sm:$0xff]  }
 0x629   :  { %17743 = vst [vmem:[#allocation15_spill] sm:$0xff] %v14789_v49 }
 0x62a   :  { %4790 = vmatmul.mubr.bf16.gmra.mrb[76].mxu0 %v14750_v29  ;;  %4996 = vmatmul.mubr.bf16.gmra.mrb[76].mxu1 %v14752_v34 }
 0x62b   :  { %4803 = vmatpush1.bf16.msra.mxu0 %v14773_v26  ;;  %5009 = vmatpush1.bf16.msra.mxu1 %v14773_v26  ;;  %v14796_v26 = vld [vmem:[%s16974_s1 + $0x244] ss:$8 sps:$4 sm:$0xff]  }
 0x62c   :  { %4804 = vmatprep.subr.bf16.mxu0 %v14780_v21  ;;  %5010 = vmatprep.subr.bf16.mxu1 %v14780_v21  ;;  %17744 = vst [vmem:[#allocation16_spill] sm:$0xff] %v14796_v26  ;;  %v14803_v21 = vld [vmem:[%s16974_s1 + $0x240] ss:$8 sps:$4 sm:$0xff]  }
 0x62d   :  { %4830 = vmatprep.mubr.bf16.mxu0 %v17463_v38  ;;  %5036 = vmatprep.mubr.bf16.mxu1 %v17463_v38  ;;  %17745 = vst [vmem:[#allocation17_spill] sm:$0xff] %v14803_v21 }
 0x62f   :  { %4805 = vmatpush1.bf16.msra.mxu0 %v14789_v49  ;;  %5011 = vmatpush1.bf16.msra.mxu1 %v14789_v49  ;;  %v14810_v49 = vld [vmem:[%s16974_s1 + $0x254] ss:$8 sps:$4 sm:$0xff]  }
 0x630   :  { %4806 = vmatprep.subr.bf16.mxu0 %v14796_v26  ;;  %5012 = vmatprep.subr.bf16.mxu1 %v14796_v26  ;;  %17746 = vst [vmem:[#allocation18_spill] sm:$0xff] %v14810_v49  ;;  %v14817_v26 = vld [vmem:[%s16974_s1 + $0x250] ss:$8 sps:$4 sm:$0xff]  }
 0x631   :  { %17747 = vst [vmem:[#allocation19_spill] sm:$0xff] %v14817_v26 }
 0x633   :  { %4807 = vmatpush1.bf16.msra.mxu0 %v14803_v21  ;;  %5013 = vmatpush1.bf16.msra.mxu1 %v14803_v21  ;;  %v14824_v21 = vld [vmem:[%s16974_s1 + $0x264] ss:$8 sps:$4 sm:$0xff]  }
 0x634   :  { %4808 = vmatprep.subr.bf16.mxu0 %v14810_v49  ;;  %5014 = vmatprep.subr.bf16.mxu1 %v14810_v49  ;;  %17748 = vst [vmem:[#allocation20_spill] sm:$0xff] %v14824_v21  ;;  %v14831_v49 = vld [vmem:[%s16974_s1 + $0x260] ss:$8 sps:$4 sm:$0xff]  }
 0x635   :  { %17749 = vst [vmem:[#allocation21_spill] sm:$0xff] %v14831_v49 }
 0x637   :  { %4809 = vmatpush1.bf16.msra.mxu0 %v14817_v26  ;;  %5015 = vmatpush1.bf16.msra.mxu1 %v14817_v26  ;;  %v14838_v26 = vld [vmem:[%s16974_s1 + $0x274] ss:$8 sps:$4 sm:$0xff]  }
 0x638   :  { %4810 = vmatprep.subr.bf16.mxu0 %v14824_v21  ;;  %5016 = vmatprep.subr.bf16.mxu1 %v14824_v21  ;;  %v10230_v21 = vld [vmem:[%s16975_s0 + $0x58] ss:$112 sps:$4 sm:$0xff]  }
 0x63b   :  { %4811 = vmatpush1.bf16.msra.mxu0 %v14831_v49  ;;  %5017 = vmatpush1.bf16.msra.mxu1 %v14831_v49  ;;  %v14851_v49 = vld [vmem:[%s16974_s1 + $0x270] ss:$8 sps:$4 sm:$0xff]  }
 0x63c   :  { %4812 = vmatprep.subr.bf16.mxu0 %v14838_v26  ;;  %5018 = vmatprep.subr.bf16.mxu1 %v14838_v26  ;;  %17750 = vst [vmem:[#allocation22_spill] sm:$0xff] %v14851_v49 }
 0x63f   :  { %4813 = vmatpush1.bf16.msra.mxu0 %v14851_v49  ;;  %5019 = vmatpush1.bf16.msra.mxu1 %v14851_v49  ;;  %v10232_v49 = vld [vmem:[%s16975_s0 + $0x138] ss:$0 sps:$4 sm:$0xff]  }
 0x640   :  { %5146 = vmatprep.subr.bf16.mxu0 %v13995_v3  ;;  %5352 = vmatprep.subr.bf16.mxu1 %v13995_v3  ;;  %v10233_v3 = vld [vmem:[%s16975_s0 + $0x13c] ss:$0 sps:$4 sm:$0xff]  }
 0x642   :  { %4831 = vmatmul.mubr.bf16.vlgmr.msra.gmra.mrb[72].mxu0 %v10230_v21  ;;  %5037 = vmatmul.mubr.bf16.vlgmr.msra.gmra.mrb[72].mxu1 %v10231_v14 }
 0x643   :  { %5147 = vmatpush1.bf16.msra.mxu0 %v14002_v12  ;;  %5353 = vmatpush1.bf16.msra.mxu1 %v14002_v12  ;;  %v17751_v12 = vld [vmem:[#allocation24_spill] sm:$0xff] }
 0x644   :  { %5148 = vmatprep.subr.bf16.mxu0 %v14009_v28  ;;  %5354 = vmatprep.subr.bf16.mxu1 %v14009_v28  ;;  %v17752_v28 = vld [vmem:[#allocation25_spill] sm:$0xff] }
 0x645   :  { %4840 = vmatprep.mubr.bf16.mxu0 %v17463_v38  ;;  %5046 = vmatprep.mubr.bf16.mxu1 %v17463_v38 }
 0x647   :  { %5149 = vmatpush1.bf16.msra.mxu0 %v14024_v40  ;;  %5355 = vmatpush1.bf16.msra.mxu1 %v14024_v40  ;;  %v17753_v40 = vld [vmem:[#allocation26_spill] sm:$0xff] }
 0x648   :  { %5150 = vmatprep.subr.bf16.mxu0 %v14031_v51  ;;  %5356 = vmatprep.subr.bf16.mxu1 %v14031_v51  ;;  %v17754_v51 = vld [vmem:[#allocation27_spill] sm:$0xff] }
 0x64a   :  { %4841 = vmatmul.mubr.bf16.gmra.mrb[76].mxu0 %v10232_v49  ;;  %5047 = vmatmul.mubr.bf16.gmra.mrb[76].mxu1 %v10233_v3 }
 0x64b   :  { %5151 = vmatpush1.bf16.msra.mxu0 %v14038_v56  ;;  %5357 = vmatpush1.bf16.msra.mxu1 %v14038_v56 }
 0x64c   :  { %5152 = vmatprep.subr.bf16.mxu0 %v14045_v57  ;;  %5358 = vmatprep.subr.bf16.mxu1 %v14045_v57 }
 0x64d   :  { %5178 = vmatprep.mubr.bf16.mxu0 %v14555_v7  ;;  %5384 = vmatprep.mubr.bf16.mxu1 %v14560_v6  ;;  %v17757_v7 = vld [vmem:[#allocation30_spill] sm:$0xff] }
 0x64f   :  { %5153 = vmatpush1.bf16.msra.mxu0 %v17707_v55  ;;  %5359 = vmatpush1.bf16.msra.mxu1 %v17707_v55 }
 0x650   :  { %5154 = vmatprep.subr.bf16.mxu0 %v17708_v13  ;;  %5360 = vmatprep.subr.bf16.mxu1 %v17708_v13 }
 0x653   :  { %5155 = vmatpush1.bf16.msra.mxu0 %v17709_v43  ;;  %5361 = vmatpush1.bf16.msra.mxu1 %v17709_v43 }
 0x654   :  { %5156 = vmatprep.subr.bf16.mxu0 %v17710_v8  ;;  %5362 = vmatprep.subr.bf16.mxu1 %v17710_v8 }
 0x657   :  { %5157 = vmatpush1.bf16.msra.mxu0 %v17711_v50  ;;  %5363 = vmatpush1.bf16.msra.mxu1 %v17711_v50 }
 0x658   :  { %5158 = vmatprep.subr.bf16.mxu0 %v17712_v52  ;;  %5364 = vmatprep.subr.bf16.mxu1 %v17712_v52 }
 0x65b   :  { %5159 = vmatpush1.bf16.msra.mxu0 %v17713_v11  ;;  %5365 = vmatpush1.bf16.msra.mxu1 %v17713_v11  ;;  %v17755_v11 = vld [vmem:[#allocation28_spill] sm:$0xff] }
 0x65c   :  { %5160 = vmatprep.subr.bf16.mxu0 %v17714_v44  ;;  %5366 = vmatprep.subr.bf16.mxu1 %v17714_v44  ;;  %v14924_v44 = vld [vmem:[%s16976_s2] ss:$0 sm:$0xff] }
 0x65f   :  { %5161 = vmatpush1.bf16.msra.mxu0 %v17715_v17  ;;  %5367 = vmatpush1.bf16.msra.mxu1 %v17715_v17 }
 0x660   :  { %5162 = vmatprep.subr.bf16.mxu0 %v17716_v37  ;;  %5368 = vmatprep.subr.bf16.mxu1 %v17716_v37 }
 0x663   :  { %5163 = vmatpush1.bf16.msra.mxu0 %v17717_v27  ;;  %5369 = vmatpush1.bf16.msra.mxu1 %v17717_v27 }
 0x664   :  { %5164 = vmatprep.subr.bf16.mxu0 %v17718_v54  ;;  %5370 = vmatprep.subr.bf16.mxu1 %v17718_v54  ;;  %v17756_v54 = vld [vmem:[#allocation29_spill] sm:$0xff] }
 0x667   :  { %5165 = vmatpush1.bf16.msra.mxu0 %v17719_v16  ;;  %5371 = vmatpush1.bf16.msra.mxu1 %v17719_v16 }
 0x668   :  { %5166 = vmatprep.subr.bf16.mxu0 %v17720_v45  ;;  %5372 = vmatprep.subr.bf16.mxu1 %v17720_v45 }
 0x66b   :  { %5167 = vmatpush1.bf16.msra.mxu0 %v17721_v41  ;;  %5373 = vmatpush1.bf16.msra.mxu1 %v17721_v41 }
 0x66c   :  { %5168 = vmatprep.subr.bf16.mxu0 %v17722_v48  ;;  %5374 = vmatprep.subr.bf16.mxu1 %v17722_v48 }
 0x66f   :  { %5169 = vmatpush1.bf16.msra.mxu0 %v17751_v12  ;;  %5375 = vmatpush1.bf16.msra.mxu1 %v17751_v12 }
 0x670   :  { %5170 = vmatprep.subr.bf16.mxu0 %v17752_v28  ;;  %5376 = vmatprep.subr.bf16.mxu1 %v17752_v28 }
 0x673   :  { %5171 = vmatpush1.bf16.msra.mxu0 %v17753_v40  ;;  %5377 = vmatpush1.bf16.msra.mxu1 %v17753_v40 }
 0x674   :  { %5172 = vmatprep.subr.bf16.mxu0 %v17754_v51  ;;  %5378 = vmatprep.subr.bf16.mxu1 %v17754_v51 }
 0x675   :  { %v4382_v56 = vpop.f32.mrb[64].mxu0  ;;  %v4588_v57 = vpop.f32.mrb[64].mxu1 }
 0x676   :  { %v4605_v55 = vmax.f32 %v4382_v56, %v4588_v57  ;;  %v4384_v13 = vpop.f32.mrb[65].mxu0  ;;  %v4590_v43 = vpop.f32.mrb[65].mxu1 }
 0x677   :  { %v4606_v8 = vmax.f32 %v4384_v13, %v4590_v43  ;;  %v4386_v50 = vpop.f32.mrb[66].mxu0  ;;  %v4592_v52 = vpop.f32.mrb[66].mxu1  ;;  %5173 = vmatpush1.bf16.msra.mxu0 %v17755_v11  ;;  %5379 = vmatpush1.bf16.msra.mxu1 %v17755_v11  ;;  %v17778_v11 = vld [vmem:[#allocation22_spill] sm:$0xff] }
 0x678   :  { %v4607_v17 = vmax.f32 %v4386_v50, %v4592_v52  ;;  %v4388_v37 = vpop.f32.mrb[67].mxu0  ;;  %v4594_v27 = vpop.f32.mrb[67].mxu1  ;;  %5174 = vmatprep.subr.bf16.mxu0 %v17756_v54  ;;  %5380 = vmatprep.subr.bf16.mxu1 %v17756_v54  ;;  %v10245_v52 = vld [vmem:[%s16975_s0 + $0x64] ss:$112 sps:$4 sm:$0xff]  }
 0x679   :  { %v4611_v16 = vmax.f32 %v4605_v55, %v4606_v8  ;;  %v4608_v45 = vmax.f32 %v4388_v37, %v4594_v27  ;;  %v10740_v37 = vld [vmem:[%s16974_s1 + $0x14] ss:$8 sps:$4 sm:$0xff]   ;;  %v10246_v27 = vld [vmem:[%s16975_s0 + $0x140] ss:$0 sps:$4 sm:$0xff]   ;;  %v10247_v54 = vld [vmem:[%s16975_s0 + $0x144] ss:$0 sps:$4 sm:$0xff]  }
 0x67b   :  { %v4621_v41 = vadd.f32 %v14924_v44, %v4611_v16  ;;  %v4612_v48 = vmax.f32 %v4607_v17, %v4608_v45  ;;  %5175 = vmatpush1.bf16.msra.mxu0 %v17757_v7  ;;  %5381 = vmatpush1.bf16.msra.mxu1 %v17757_v7  ;;  %v10738_v17 = vld [vmem:[%s16974_s1 + $0x4] ss:$8 sps:$4 sm:$0xff]   ;;  %v10741_v16 = vld [vmem:[%s16974_s1 + $0x10] ss:$8 sps:$4 sm:$0xff]  }
 0x67c   :  { %5176 = vmatprep.subr.bf16.mxu0 %v14221_v47  ;;  %5382 = vmatprep.subr.bf16.mxu1 %v14221_v47  ;;  %v10742_v45 = vld [vmem:[%s16974_s1 + $0x24] ss:$8 sps:$4 sm:$0xff]   ;;  %v10745_v7 = vld [vmem:[%s16974_s1 + $0x30] ss:$8 sps:$4 sm:$0xff]  }
 0x67d   :  { %v4624_v6 = vmax.f32 %v4621_v41, 0.0  ;;  %v4622_v49 = vadd.f32 %v14924_v44, %v4612_v48  ;;  %v4392_v14 = vpop.f32.mrb[68].mxu0  ;;  %v4598_v21 = vpop.f32.mrb[68].mxu1  ;;  %v10743_v41 = vld [vmem:[%s16974_s1 + $0x20] ss:$8 sps:$4 sm:$0xff]  }
 0x67e   :  { %v4609_v3 = vmax.f32 %v4392_v14, %v4598_v21  ;;  %v4394_v12 = vpop.f32.mrb[69].mxu0  ;;  %v4600_v28 = vpop.f32.mrb[69].mxu1  ;;  %v10744_v48 = vld [vmem:[%s16974_s1 + $0x34] ss:$8 sps:$4 sm:$0xff]   ;;  %v10749_v21 = vld [vmem:[%s16974_s1 + $0x50] ss:$8 sps:$4 sm:$0xff]  }
 0x67f   :  { %v9341_v40 = vpack.c.bf16 %v4624_v6, %v4624_v6  ;;  %v4625_v51 = vmax.f32 %v4622_v49, 0.0  ;;  %v4610_v56 = vmax.f32 %v4394_v12, %v4600_v28  ;;  %v4396_v57 = vpop.f32.mrb[70].mxu0  ;;  %v4602_v55 = vpop.f32.mrb[70].mxu1  ;;  %5177 = vmatpush1.bf16.msra.mxu0 %v14229_v58  ;;  %5383 = vmatpush1.bf16.msra.mxu1 %v14229_v58  ;;  %v10746_v6 = vld [vmem:[%s16974_s1 + $0x44] ss:$8 sps:$4 sm:$0xff]  }
 0x680   :  { %v4397_v13 = vpop.f32.mrb[71].mxu0  ;;  %v4603_v43 = vpop.f32.mrb[71].mxu1  ;;  %5197 = vmatprep.subr.bf16.mxu0 %v14236_v15  ;;  %5403 = vmatprep.subr.bf16.mxu1 %v14236_v15  ;;  %v10747_v49 = vld [vmem:[%s16974_s1 + $0x40] ss:$8 sps:$4 sm:$0xff]   ;;  %v10748_v14 = vld [vmem:[%s16974_s1 + $0x54] ss:$8 sps:$4 sm:$0xff]  }
 0x681   :  { %4640 = vst [vmem:[#allocation2 + $0x20] sm:$0xf] %v9341_v40  ;;  %v9342_v47 = vpack.c.bf16 %v4625_v51, %v4625_v51  ;;  %v4613_v8 = vmax.f32 %v4609_v3, %v4610_v56  ;;  %v10750_v3 = vld [vmem:[%s16974_s1 + $0x64] ss:$8 sps:$4 sm:$0xff]   ;;  %v10751_v12 = vld [vmem:[%s16974_s1 + $0x60] ss:$8 sps:$4 sm:$0xff]  }
 0x682   :  { %5179 = vmatmul.mubr.bf16.vlgmr.msra.gmra.mrb[80].mxu0 %v14701_v60  ;;  %5385 = vmatmul.mubr.bf16.vlgmr.msra.gmra.mrb[80].mxu1 %v14706_v46  ;;  %v17777_v60 = vld [vmem:[#allocation21_spill] sm:$0xff]  ;;  %v10244_v46 = vld [vmem:[%s16975_s0 + $0x60] ss:$112 sps:$4 sm:$0xff]   ;;  %v10752_v28 = vld [vmem:[%s16974_s1 + $0x74] ss:$8 sps:$4 sm:$0xff]  }
 0x683   :  { %4641 = vst [vmem:[#allocation2 + $0x50] sm:$0xf] %v9342_v47  ;;  %v4623_v50 = vadd.f32 %v14924_v44, %v4613_v8  ;;  %5198 = vmatpush1.bf16.msra.mxu0 %v14246_v20  ;;  %5404 = vmatpush1.bf16.msra.mxu1 %v14246_v20  ;;  %v14954_v20 = vld [vmem:[%s16975_s0 + $0x5c] ss:$112 sps:$4 sm:$0xff]   ;;  %v10753_v40 = vld [vmem:[%s16974_s1 + $0x70] ss:$8 sps:$4 sm:$0xff]  }
 0x684   :  { %5199 = vmatprep.subr.bf16.mxu0 %v14253_v42  ;;  %5405 = vmatprep.subr.bf16.mxu1 %v14253_v42  ;;  %v14959_v42 = vld [vmem:[%s16975_s0 + $0x60] ss:$112 sps:$4 sm:$0xff]   ;;  %v10754_v51 = vld [vmem:[%s16974_s1 + $0x84] ss:$8 sps:$4 sm:$0xff]   ;;  %v10756_v57 = vld [vmem:[%s16974_s1 + $0x94] ss:$8 sps:$4 sm:$0xff]  }
 0x685   :  { %v4626_v58 = vmax.f32 %v4623_v50, 0.0  ;;  %5188 = vmatprep.mubr.bf16.mxu0 %v14728_v36  ;;  %5394 = vmatprep.mubr.bf16.mxu1 %v14730_v22  ;;  %v17775_v22 = vld [vmem:[#allocation19_spill] sm:$0xff]  ;;  %v17776_v36 = vld [vmem:[#allocation20_spill] sm:$0xff] }
 0x686   :  { %v10755_v56 = vld [vmem:[%s16974_s1 + $0x80] ss:$8 sps:$4 sm:$0xff]   ;;  %v10757_v55 = vld [vmem:[%s16974_s1 + $0x90] ss:$8 sps:$4 sm:$0xff]   ;;  %v10758_v13 = vld [vmem:[%s16974_s1 + $0xa4] ss:$8 sps:$4 sm:$0xff]  }
 0x687   :  { %v9343_v15 = vpack.c.bf16 %v4626_v58, %v4626_v58  ;;  %5200 = vmatpush1.bf16.msra.mxu0 %v14262_v53  ;;  %5406 = vmatpush1.bf16.msra.mxu1 %v14262_v53  ;;  %v17758_v53 = vld [vmem:[#allocation31_spill] sm:$0xff]  ;;  %v10759_v43 = vld [vmem:[%s16974_s1 + $0xa0] ss:$8 sps:$4 sm:$0xff]   ;;  %v10762_v50 = vld [vmem:[%s16974_s1 + $0xc4] ss:$8 sps:$4 sm:$0xff]  }
 0x688   :  { %5201 = vmatprep.subr.bf16.mxu0 %v14269_v10  ;;  %5407 = vmatprep.subr.bf16.mxu1 %v14269_v10  ;;  %v17759_v10 = vld [vmem:[#allocation4_spill] sm:$0xff]  ;;  %v10760_v47 = vld [vmem:[%s16974_s1 + $0xb4] ss:$8 sps:$4 sm:$0xff]   ;;  %v10761_v8 = vld [vmem:[%s16974_s1 + $0xb0] ss:$8 sps:$4 sm:$0xff]  }
 0x689   :  { %4642 = vst [vmem:[#allocation2 + $0x80] sm:$0xf] %v9343_v15  ;;  %v10763_v58 = vld [vmem:[%s16974_s1 + $0xc0] ss:$8 sps:$4 sm:$0xff]   ;;  %v10764_v15 = vld [vmem:[%s16974_s1 + $0xd4] ss:$8 sps:$4 sm:$0xff]  }
 0x68a   :  { %5189 = vmatmul.mubr.bf16.gmra.mrb[84].mxu0 %v14750_v29  ;;  %5395 = vmatmul.mubr.bf16.gmra.mrb[84].mxu1 %v14752_v34  ;;  %v17773_v34 = vld [vmem:[#allocation17_spill] sm:$0xff]  ;;  %v17774_v29 = vld [vmem:[#allocation18_spill] sm:$0xff] }
 0x68b   :  { %5202 = vmatpush1.bf16.msra.mxu0 %v14288_v0  ;;  %5408 = vmatpush1.bf16.msra.mxu1 %v14288_v0  ;;  %v17760_v0 = vld [vmem:[#allocation5_spill] sm:$0xff] }
 0x68c   :  { %5203 = vmatprep.subr.bf16.mxu0 %v14295_v30  ;;  %5409 = vmatprep.subr.bf16.mxu1 %v14295_v30  ;;  %v17761_v30 = vld [vmem:[#allocation6_spill] sm:$0xff] }
 0x68d   :  { %5229 = vmatprep.mubr.bf16.mxu0 %v14954_v20  ;;  %5435 = vmatprep.mubr.bf16.mxu1 %v14959_v42 }
 0x68f   :  { %5204 = vmatpush1.bf16.msra.mxu0 %v14304_v9  ;;  %5410 = vmatpush1.bf16.msra.mxu1 %v14304_v9  ;;  %v17762_v9 = vld [vmem:[#allocation7_spill] sm:$0xff] }
 0x690   :  { %5205 = vmatprep.subr.bf16.mxu0 %v14311_v33  ;;  %5411 = vmatprep.subr.bf16.mxu1 %v14311_v33  ;;  %v15020_v33 = vld [vmem:[%s16975_s0 + $0x58] ss:$112 sps:$4 sm:$0xff]  }
 0x693   :  { %5206 = vmatpush1.bf16.msra.mxu0 %v14318_v31  ;;  %5412 = vmatpush1.bf16.msra.mxu1 %v14318_v31  ;;  %v15025_v31 = vld [vmem:[%s16975_s0 + $0x5c] ss:$112 sps:$4 sm:$0xff]  }
 0x694   :  { %5207 = vmatprep.subr.bf16.mxu0 %v14325_v19  ;;  %5413 = vmatprep.subr.bf16.mxu1 %v14325_v19  ;;  %v5100_v19 = vld [vmem:[%s16975_s0 + $0x138] sm:$0xff] }
 0x697   :  { %5208 = vmatpush1.bf16.msra.mxu0 %v14332_v1  ;;  %5414 = vmatpush1.bf16.msra.mxu1 %v14332_v1  ;;  %v5306_v1 = vld [vmem:[%s16975_s0 + $0x13c] sm:$0xff] }
 0x698   :  { %5209 = vmatprep.subr.bf16.mxu0 %v14339_v32  ;;  %5415 = vmatprep.subr.bf16.mxu1 %v14339_v32  ;;  %v17763_v32 = vld [vmem:[#allocation32_spill] sm:$0xff] }
 0x69b   :  { %5210 = vmatpush1.bf16.msra.mxu0 %v14346_v63  ;;  %5416 = vmatpush1.bf16.msra.mxu1 %v14346_v63  ;;  %v17764_v63 = vld [vmem:[#allocation8_spill] sm:$0xff] }
 0x69c   :  { %5211 = vmatprep.subr.bf16.mxu0 %v14353_v2  ;;  %5417 = vmatprep.subr.bf16.mxu1 %v14353_v2  ;;  %v15037_v2 = vcombine.high %v5100_v19, %v5100_v19 }
 0x69f   :  { %5212 = vmatpush1.bf16.msra.mxu0 %v14589_v18  ;;  %5418 = vmatpush1.bf16.msra.mxu1 %v14589_v18  ;;  %v15039_v18 = vcombine.high %v5306_v1, %v5306_v1 }
 0x6a0   :  { %5213 = vmatprep.subr.bf16.mxu0 %v14596_v5  ;;  %5419 = vmatprep.subr.bf16.mxu1 %v14596_v5  ;;  %v17765_v5 = vld [vmem:[#allocation9_spill] sm:$0xff] }
 0x6a3   :  { %5214 = vmatpush1.bf16.msra.mxu0 %v14603_v25  ;;  %5420 = vmatpush1.bf16.msra.mxu1 %v14603_v25  ;;  %v17766_v25 = vld [vmem:[#allocation10_spill] sm:$0xff] }
 0x6a4   :  { %5215 = vmatprep.subr.bf16.mxu0 %v14610_v35  ;;  %5421 = vmatprep.subr.bf16.mxu1 %v14610_v35  ;;  %v15049_v35 = vcombine.low %v5100_v19, %v5100_v19 }
 0x6a7   :  { %5216 = vmatpush1.bf16.msra.mxu0 %v14617_v4  ;;  %5422 = vmatpush1.bf16.msra.mxu1 %v14617_v4  ;;  %v15051_v4 = vcombine.low %v5306_v1, %v5306_v1  ;;  %v10765_v1 = vld [vmem:[%s16974_s1 + $0xd0] ss:$8 sps:$4 sm:$0xff]  }
 0x6a8   :  { %5217 = vmatprep.subr.bf16.mxu0 %v14624_v39  ;;  %5423 = vmatprep.subr.bf16.mxu1 %v14624_v39  ;;  %v17767_v39 = vld [vmem:[#allocation11_spill] sm:$0xff] }
 0x6ab   :  { %5218 = vmatpush1.bf16.msra.mxu0 %v14631_v62  ;;  %5424 = vmatpush1.bf16.msra.mxu1 %v14631_v62  ;;  %v17768_v62 = vld [vmem:[#allocation12_spill] sm:$0xff] }
 0x6ac   :  { %5219 = vmatprep.subr.bf16.mxu0 %v14638_v23  ;;  %5425 = vmatprep.subr.bf16.mxu1 %v14638_v23  ;;  %v17769_v23 = vld [vmem:[#allocation13_spill] sm:$0xff] }
 0x6af   :  { %5220 = vmatpush1.bf16.msra.mxu0 %v14645_v61  ;;  %5426 = vmatpush1.bf16.msra.mxu1 %v14645_v61  ;;  %v17770_v61 = vld [vmem:[#allocation14_spill] sm:$0xff] }
 0x6b0   :  { %5221 = vmatprep.subr.bf16.mxu0 %v14652_v59  ;;  %5427 = vmatprep.subr.bf16.mxu1 %v14652_v59  ;;  %v17771_v59 = vld [vmem:[#allocation15_spill] sm:$0xff] }
 0x6b3   :  { %5222 = vmatpush1.bf16.msra.mxu0 %v14659_v24  ;;  %5428 = vmatpush1.bf16.msra.mxu1 %v14659_v24  ;;  %v17772_v24 = vld [vmem:[#allocation16_spill] sm:$0xff] }
 0x6b4   :  { %5223 = vmatprep.subr.bf16.mxu0 %v17758_v53  ;;  %5429 = vmatprep.subr.bf16.mxu1 %v17758_v53 }
 0x6b7   :  { %5224 = vmatpush1.bf16.msra.mxu0 %v17759_v10  ;;  %5430 = vmatpush1.bf16.msra.mxu1 %v17759_v10 }
 0x6b8   :  { %5225 = vmatprep.subr.bf16.mxu0 %v17760_v0  ;;  %5431 = vmatprep.subr.bf16.mxu1 %v17760_v0 }
 0x6bb   :  { %5226 = vmatpush1.bf16.msra.mxu0 %v17761_v30  ;;  %5432 = vmatpush1.bf16.msra.mxu1 %v17761_v30 }
 0x6bc   :  { %5227 = vmatprep.subr.bf16.mxu0 %v17762_v9  ;;  %5433 = vmatprep.subr.bf16.mxu1 %v17762_v9 }
 0x6bf   :  { %5228 = vmatpush1.bf16.msra.mxu0 %v17763_v32  ;;  %5434 = vmatpush1.bf16.msra.mxu1 %v17763_v32 }
 0x6c0   :  { %5248 = vmatprep.subr.bf16.mxu0 %v17764_v63  ;;  %5454 = vmatprep.subr.bf16.mxu1 %v17764_v63 }
 0x6c2   :  { %5230 = vmatmul.mubr.bf16.vlgmr.msra.gmra.mrb[80].mxu0 %v15020_v33  ;;  %5436 = vmatmul.mubr.bf16.vlgmr.msra.gmra.mrb[80].mxu1 %v15025_v31 }
 0x6c3   :  { %5249 = vmatpush1.bf16.msra.mxu0 %v17765_v5  ;;  %5455 = vmatpush1.bf16.msra.mxu1 %v17765_v5 }
 0x6c4   :  { %5250 = vmatprep.subr.bf16.mxu0 %v17766_v25  ;;  %5456 = vmatprep.subr.bf16.mxu1 %v17766_v25  ;;  %v10766_v25 = vld [vmem:[%s16974_s1 + $0xe4] ss:$8 sps:$4 sm:$0xff]  }
 0x6c5   :  { %5239 = vmatprep.mubr.bf16.mxu0 %v15037_v2  ;;  %5445 = vmatprep.mubr.bf16.mxu1 %v15039_v18 }
 0x6c7   :  { %5251 = vmatpush1.bf16.msra.mxu0 %v17767_v39  ;;  %5457 = vmatpush1.bf16.msra.mxu1 %v17767_v39 }
 0x6c8   :  { %5252 = vmatprep.subr.bf16.mxu0 %v17768_v62  ;;  %5458 = vmatprep.subr.bf16.mxu1 %v17768_v62 }
 0x6ca   :  { %5240 = vmatmul.mubr.bf16.gmra.mrb[84].mxu0 %v15049_v35  ;;  %5446 = vmatmul.mubr.bf16.gmra.mrb[84].mxu1 %v15051_v4 }
 0x6cb   :  { %5253 = vmatpush1.bf16.msra.mxu0 %v17769_v23  ;;  %5459 = vmatpush1.bf16.msra.mxu1 %v17769_v23 }
 0x6cc   :  { %5254 = vmatprep.subr.bf16.mxu0 %v17770_v61  ;;  %5460 = vmatprep.subr.bf16.mxu1 %v17770_v61 }
 0x6cd   :  { %5280 = vmatprep.mubr.bf16.mxu0 %v17463_v38  ;;  %5486 = vmatprep.mubr.bf16.mxu1 %v17463_v38 }
 0x6cf   :  { %5255 = vmatpush1.bf16.msra.mxu0 %v17771_v59  ;;  %5461 = vmatpush1.bf16.msra.mxu1 %v17771_v59  ;;  %v10767_v59 = vld [vmem:[%s16974_s1 + $0xe0] ss:$8 sps:$4 sm:$0xff]  }
 0x6d0   :  { %5256 = vmatprep.subr.bf16.mxu0 %v17772_v24  ;;  %5462 = vmatprep.subr.bf16.mxu1 %v17772_v24  ;;  %v10768_v24 = vld [vmem:[%s16974_s1 + $0xf4] ss:$8 sps:$4 sm:$0xff]  }
 0x6d3   :  { %5257 = vmatpush1.bf16.msra.mxu0 %v17773_v34  ;;  %5463 = vmatpush1.bf16.msra.mxu1 %v17773_v34 }
 0x6d4   :  { %5258 = vmatprep.subr.bf16.mxu0 %v17774_v29  ;;  %5464 = vmatprep.subr.bf16.mxu1 %v17774_v29 }
 0x6d7   :  { %5259 = vmatpush1.bf16.msra.mxu0 %v17775_v22  ;;  %5465 = vmatpush1.bf16.msra.mxu1 %v17775_v22 }
 0x6d8   :  { %5260 = vmatprep.subr.bf16.mxu0 %v17776_v36  ;;  %5466 = vmatprep.subr.bf16.mxu1 %v17776_v36 }
 0x6db   :  { %5261 = vmatpush1.bf16.msra.mxu0 %v17777_v60  ;;  %5467 = vmatpush1.bf16.msra.mxu1 %v17777_v60 }
 0x6dc   :  { %5262 = vmatprep.subr.bf16.mxu0 %v14838_v26  ;;  %5468 = vmatprep.subr.bf16.mxu1 %v14838_v26  ;;  %v10739_v26 = vld [vmem:[%s16974_s1] ss:$8 sps:$4 sm:$0xff]  }
 0x6df   :  { %5263 = vmatpush1.bf16.msra.mxu0 %v17778_v11  ;;  %5469 = vmatpush1.bf16.msra.mxu1 %v17778_v11 }
 0x6e0   :  { %5596 = vmatprep.subr.bf16.mxu0 %v10738_v17  ;;  %5802 = vmatprep.subr.bf16.mxu1 %v10738_v17 }
 0x6e2   :  { %5281 = vmatmul.mubr.bf16.vlgmr.msra.gmra.mrb[80].mxu0 %v10244_v46  ;;  %5487 = vmatmul.mubr.bf16.vlgmr.msra.gmra.mrb[80].mxu1 %v10245_v52 }
 0x6e3   :  { %5597 = vmatpush1.bf16.msra.mxu0 %v10739_v26  ;;  %5803 = vmatpush1.bf16.msra.mxu1 %v10739_v26 }
 0x6e4   :  { %5598 = vmatprep.subr.bf16.mxu0 %v10740_v37  ;;  %5804 = vmatprep.subr.bf16.mxu1 %v10740_v37 }
 0x6e5   :  { %5290 = vmatprep.mubr.bf16.mxu0 %v17463_v38  ;;  %5496 = vmatprep.mubr.bf16.mxu1 %v17463_v38 }
 0x6e7   :  { %5599 = vmatpush1.bf16.msra.mxu0 %v10741_v16  ;;  %5805 = vmatpush1.bf16.msra.mxu1 %v10741_v16 }
 0x6e8   :  { %5600 = vmatprep.subr.bf16.mxu0 %v10742_v45  ;;  %5806 = vmatprep.subr.bf16.mxu1 %v10742_v45 }
 0x6ea   :  { %5291 = vmatmul.mubr.bf16.gmra.mrb[84].mxu0 %v10246_v27  ;;  %5497 = vmatmul.mubr.bf16.gmra.mrb[84].mxu1 %v10247_v54  ;;  %v10769_v54 = vld [vmem:[%s16974_s1 + $0xf0] ss:$8 sps:$4 sm:$0xff]  }
 0x6eb   :  { %5601 = vmatpush1.bf16.msra.mxu0 %v10743_v41  ;;  %5807 = vmatpush1.bf16.msra.mxu1 %v10743_v41  ;;  %v10770_v41 = vld [vmem:[%s16974_s1 + $0x104] ss:$8 sps:$4 sm:$0xff]  }
 0x6ec   :  { %5602 = vmatprep.subr.bf16.mxu0 %v10744_v48  ;;  %5808 = vmatprep.subr.bf16.mxu1 %v10744_v48 }
 0x6ed   :  { %5628 = vmatprep.mubr.bf16.mxu0 %v14954_v20  ;;  %5834 = vmatprep.mubr.bf16.mxu1 %v14959_v42 }
 0x6ef   :  { %5603 = vmatpush1.bf16.msra.mxu0 %v10745_v7  ;;  %5809 = vmatpush1.bf16.msra.mxu1 %v10745_v7 }
 0x6f0   :  { %5604 = vmatprep.subr.bf16.mxu0 %v10746_v6  ;;  %5810 = vmatprep.subr.bf16.mxu1 %v10746_v6 }
 0x6f3   :  { %5605 = vmatpush1.bf16.msra.mxu0 %v10747_v49  ;;  %5811 = vmatpush1.bf16.msra.mxu1 %v10747_v49  ;;  %v10771_v49 = vld [vmem:[%s16974_s1 + $0x100] ss:$8 sps:$4 sm:$0xff]  }
 0x6f4   :  { %5606 = vmatprep.subr.bf16.mxu0 %v10748_v14  ;;  %5812 = vmatprep.subr.bf16.mxu1 %v10748_v14  ;;  %v10772_v14 = vld [vmem:[%s16974_s1 + $0x114] ss:$8 sps:$4 sm:$0xff]  }
 0x6f7   :  { %5607 = vmatpush1.bf16.msra.mxu0 %v10749_v21  ;;  %5813 = vmatpush1.bf16.msra.mxu1 %v10749_v21 }
 0x6f8   :  { %5608 = vmatprep.subr.bf16.mxu0 %v10750_v3  ;;  %5814 = vmatprep.subr.bf16.mxu1 %v10750_v3  ;;  %v10775_v3 = vld [vmem:[%s16974_s1 + $0x120] ss:$8 sps:$4 sm:$0xff]  }
 0x6fb   :  { %5609 = vmatpush1.bf16.msra.mxu0 %v10751_v12  ;;  %5815 = vmatpush1.bf16.msra.mxu1 %v10751_v12  ;;  %v10776_v12 = vld [vmem:[%s16974_s1 + $0x134] ss:$8 sps:$4 sm:$0xff]  }
 0x6fc   :  { %5610 = vmatprep.subr.bf16.mxu0 %v10752_v28  ;;  %5816 = vmatprep.subr.bf16.mxu1 %v10752_v28  ;;  %v10779_v28 = vld [vmem:[%s16974_s1 + $0x140] ss:$8 sps:$4 sm:$0xff]  }
 0x6ff   :  { %5611 = vmatpush1.bf16.msra.mxu0 %v10753_v40  ;;  %5817 = vmatpush1.bf16.msra.mxu1 %v10753_v40  ;;  %v10780_v40 = vld [vmem:[%s16974_s1 + $0x154] ss:$8 sps:$4 sm:$0xff]  }
 0x700   :  { %5612 = vmatprep.subr.bf16.mxu0 %v10754_v51  ;;  %5818 = vmatprep.subr.bf16.mxu1 %v10754_v51  ;;  %v10781_v51 = vld [vmem:[%s16974_s1 + $0x150] ss:$8 sps:$4 sm:$0xff]  }
 0x703   :  { %5613 = vmatpush1.bf16.msra.mxu0 %v10755_v56  ;;  %5819 = vmatpush1.bf16.msra.mxu1 %v10755_v56  ;;  %v10782_v56 = vld [vmem:[%s16974_s1 + $0x164] ss:$8 sps:$4 sm:$0xff]  }
 0x704   :  { %5614 = vmatprep.subr.bf16.mxu0 %v10756_v57  ;;  %5820 = vmatprep.subr.bf16.mxu1 %v10756_v57  ;;  %v10783_v57 = vld [vmem:[%s16974_s1 + $0x160] ss:$8 sps:$4 sm:$0xff]  }
 0x707   :  { %5615 = vmatpush1.bf16.msra.mxu0 %v10757_v55  ;;  %5821 = vmatpush1.bf16.msra.mxu1 %v10757_v55  ;;  %v10784_v55 = vld [vmem:[%s16974_s1 + $0x174] ss:$8 sps:$4 sm:$0xff]  }
 0x708   :  { %5616 = vmatprep.subr.bf16.mxu0 %v10758_v13  ;;  %5822 = vmatprep.subr.bf16.mxu1 %v10758_v13  ;;  %v10785_v13 = vld [vmem:[%s16974_s1 + $0x170] ss:$8 sps:$4 sm:$0xff]  }
 0x70b   :  { %5617 = vmatpush1.bf16.msra.mxu0 %v10759_v43  ;;  %5823 = vmatpush1.bf16.msra.mxu1 %v10759_v43  ;;  %v10786_v43 = vld [vmem:[%s16974_s1 + $0x184] ss:$8 sps:$4 sm:$0xff]  }
 0x70c   :  { %5618 = vmatprep.subr.bf16.mxu0 %v10760_v47  ;;  %5824 = vmatprep.subr.bf16.mxu1 %v10760_v47  ;;  %v10787_v47 = vld [vmem:[%s16974_s1 + $0x180] ss:$8 sps:$4 sm:$0xff]  }
 0x70f   :  { %5619 = vmatpush1.bf16.msra.mxu0 %v10761_v8  ;;  %5825 = vmatpush1.bf16.msra.mxu1 %v10761_v8  ;;  %v10788_v8 = vld [vmem:[%s16974_s1 + $0x194] ss:$8 sps:$4 sm:$0xff]  }
 0x710   :  { %5620 = vmatprep.subr.bf16.mxu0 %v10762_v50  ;;  %5826 = vmatprep.subr.bf16.mxu1 %v10762_v50  ;;  %v10789_v50 = vld [vmem:[%s16974_s1 + $0x190] ss:$8 sps:$4 sm:$0xff]  }
 0x713   :  { %5621 = vmatpush1.bf16.msra.mxu0 %v10763_v58  ;;  %5827 = vmatpush1.bf16.msra.mxu1 %v10763_v58  ;;  %v10790_v58 = vld [vmem:[%s16974_s1 + $0x1a4] ss:$8 sps:$4 sm:$0xff]  }
 0x714   :  { %5622 = vmatprep.subr.bf16.mxu0 %v10764_v15  ;;  %5828 = vmatprep.subr.bf16.mxu1 %v10764_v15  ;;  %v10791_v15 = vld [vmem:[%s16974_s1 + $0x1a0] ss:$8 sps:$4 sm:$0xff]  }
 0x715   :  { %v4832_v20 = vpop.f32.mrb[72].mxu0  ;;  %v5038_v42 = vpop.f32.mrb[72].mxu1 }
 0x716   :  { %v5055_v53 = vmax.f32 %v4832_v20, %v5038_v42  ;;  %v4834_v10 = vpop.f32.mrb[73].mxu0  ;;  %v5040_v0 = vpop.f32.mrb[73].mxu1  ;;  %v10792_v20 = vld [vmem:[%s16974_s1 + $0x1b4] ss:$8 sps:$4 sm:$0xff]   ;;  %v10793_v42 = vld [vmem:[%s16974_s1 + $0x1b0] ss:$8 sps:$4 sm:$0xff]  }
 0x717   :  { %v5056_v30 = vmax.f32 %v4834_v10, %v5040_v0  ;;  %v4836_v9 = vpop.f32.mrb[74].mxu0  ;;  %v5042_v19 = vpop.f32.mrb[74].mxu1  ;;  %5623 = vmatpush1.bf16.msra.mxu0 %v10765_v1  ;;  %5829 = vmatpush1.bf16.msra.mxu1 %v10765_v1  ;;  %v10795_v10 = vld [vmem:[%s16974_s1 + $0x1c0] ss:$8 sps:$4 sm:$0xff]   ;;  %v10796_v0 = vld [vmem:[%s16974_s1 + $0x1d4] ss:$8 sps:$4 sm:$0xff]  }
 0x718   :  { %v5057_v32 = vmax.f32 %v4836_v9, %v5042_v19  ;;  %v4838_v63 = vpop.f32.mrb[75].mxu0  ;;  %v5044_v5 = vpop.f32.mrb[75].mxu1  ;;  %5624 = vmatprep.subr.bf16.mxu0 %v10766_v25  ;;  %5830 = vmatprep.subr.bf16.mxu1 %v10766_v25  ;;  %v10798_v9 = vld [vmem:[%s16974_s1 + $0x1e4] ss:$8 sps:$4 sm:$0xff]   ;;  %v10799_v19 = vld [vmem:[%s16974_s1 + $0x1e0] ss:$8 sps:$4 sm:$0xff]  }
 0x719   :  { %v5061_v39 = vmax.f32 %v5055_v53, %v5056_v30  ;;  %v5058_v62 = vmax.f32 %v4838_v63, %v5044_v5  ;;  %v10794_v53 = vld [vmem:[%s16974_s1 + $0x1c4] ss:$8 sps:$4 sm:$0xff]   ;;  %v10797_v30 = vld [vmem:[%s16974_s1 + $0x1d0] ss:$8 sps:$4 sm:$0xff]   ;;  %v10800_v1 = vld [vmem:[%s16974_s1 + $0x1f4] ss:$8 sps:$4 sm:$0xff]  }
 0x71a   :  { %v10251_v63 = vld [vmem:[%s16975_s0 + $0x64] ss:$112 sps:$4 sm:$0xff]  }
 0x71b   :  { %v5071_v23 = vadd.f32 %v14924_v44, %v5061_v39  ;;  %v5062_v61 = vmax.f32 %v5057_v32, %v5058_v62  ;;  %5625 = vmatpush1.bf16.msra.mxu0 %v10767_v59  ;;  %5831 = vmatpush1.bf16.msra.mxu1 %v10767_v59  ;;  %v10248_v32 = vld [vmem:[%s16975_s0 + $0x60] ss:$112 sps:$4 sm:$0xff]   ;;  %v5756_v25 = vld [vmem:[%s16975_s0 + $0x144] sm:$0xff] }
 0x71c   :  { %5626 = vmatprep.subr.bf16.mxu0 %v10768_v24  ;;  %5832 = vmatprep.subr.bf16.mxu1 %v10768_v24  ;;  %v5550_v5 = vld [vmem:[%s16975_s0 + $0x140] sm:$0xff]  ;;  %v10801_v39 = vld [vmem:[%s16974_s1 + $0x1f0] ss:$8 sps:$4 sm:$0xff]   ;;  %v10804_v24 = vld [vmem:[%s16974_s1 + $0x214] ss:$8 sps:$4 sm:$0xff]  }
 0x71d   :  { %v5074_v34 = vmax.f32 %v5071_v23, 0.0  ;;  %v5072_v29 = vadd.f32 %v14924_v44, %v5062_v61  ;;  %v4842_v22 = vpop.f32.mrb[76].mxu0  ;;  %v5048_v36 = vpop.f32.mrb[76].mxu1  ;;  %v10802_v62 = vld [vmem:[%s16974_s1 + $0x204] ss:$8 sps:$4 sm:$0xff]   ;;  %v9075_v23 = vcombine.high %v5550_v5, %v5550_v5  ;;  %v9085_v61 = vcombine.high %v5756_v25, %v5756_v25 }
 0x71e   :  { %v5059_v60 = vmax.f32 %v4842_v22, %v5048_v36  ;;  %v4844_v46 = vpop.f32.mrb[77].mxu0  ;;  %v5050_v52 = vpop.f32.mrb[77].mxu1  ;;  %v10803_v59 = vld [vmem:[%s16974_s1 + $0x200] ss:$8 sps:$4 sm:$0xff]   ;;  %v10805_v22 = vld [vmem:[%s16974_s1 + $0x210] ss:$8 sps:$4 sm:$0xff]  }
 0x71f   :  { %v9344_v11 = vpack.c.bf16 %v5074_v34, %v5074_v34  ;;  %v5075_v17 = vmax.f32 %v5072_v29, 0.0  ;;  %v5060_v26 = vmax.f32 %v4844_v46, %v5050_v52  ;;  %v4846_v37 = vpop.f32.mrb[78].mxu0  ;;  %v5052_v27 = vpop.f32.mrb[78].mxu1  ;;  %5627 = vmatpush1.bf16.msra.mxu0 %v10769_v54  ;;  %5833 = vmatpush1.bf16.msra.mxu1 %v10769_v54  ;;  %v9074_v34 = vcombine.low %v5550_v5, %v5550_v5  ;;  %v10806_v36 = vld [vmem:[%s16974_s1 + $0x224] ss:$8 sps:$4 sm:$0xff]  }
 0x720   :  { %v4847_v16 = vpop.f32.mrb[79].mxu0  ;;  %v5053_v45 = vpop.f32.mrb[79].mxu1  ;;  %5647 = vmatprep.subr.bf16.mxu0 %v10770_v41  ;;  %5853 = vmatprep.subr.bf16.mxu1 %v10770_v41  ;;  %v9084_v29 = vcombine.low %v5756_v25, %v5756_v25  ;;  %v10808_v46 = vld [vmem:[%s16974_s1 + $0x234] ss:$8 sps:$4 sm:$0xff]   ;;  %v10809_v52 = vld [vmem:[%s16974_s1 + $0x230] ss:$8 sps:$4 sm:$0xff]  }
 0x721   :  { %5090 = vst [vmem:[#allocation2 + $0x24] sm:$0xf] %v9344_v11  ;;  %v9345_v48 = vpack.c.bf16 %v5075_v17, %v5075_v17  ;;  %v5063_v7 = vmax.f32 %v5059_v60, %v5060_v26  ;;  %v10807_v60 = vld [vmem:[%s16974_s1 + $0x220] ss:$8 sps:$4 sm:$0xff]   ;;  %v10810_v11 = vld [vmem:[%s16974_s1 + $0x244] ss:$8 sps:$4 sm:$0xff]  }
 0x722   :  { %5629 = vmatmul.mubr.bf16.vlgmr.msra.gmra.mrb[88].mxu0 %v15020_v33  ;;  %5835 = vmatmul.mubr.bf16.vlgmr.msra.gmra.mrb[88].mxu1 %v15025_v31  ;;  %v10774_v31 = vld [vmem:[%s16974_s1 + $0x124] ss:$8 sps:$4 sm:$0xff]   ;;  %v10811_v17 = vld [vmem:[%s16974_s1 + $0x240] ss:$8 sps:$4 sm:$0xff]   ;;  %v10812_v26 = vld [vmem:[%s16974_s1 + $0x254] ss:$8 sps:$4 sm:$0xff]  }
 0x723   :  { %5091 = vst [vmem:[#allocation2 + $0x54] sm:$0xf] %v9345_v48  ;;  %v5073_v6 = vadd.f32 %v14924_v44, %v5063_v7  ;;  %5648 = vmatpush1.bf16.msra.mxu0 %v10771_v49  ;;  %5854 = vmatpush1.bf16.msra.mxu1 %v10771_v49  ;;  %v10773_v44 = vld [vmem:[%s16974_s1 + $0x110] ss:$8 sps:$4 sm:$0xff]   ;;  %v10814_v27 = vld [vmem:[%s16974_s1 + $0x264] ss:$8 sps:$4 sm:$0xff]  }
 0x724   :  { %5649 = vmatprep.subr.bf16.mxu0 %v10772_v14  ;;  %5855 = vmatprep.subr.bf16.mxu1 %v10772_v14  ;;  %v10813_v37 = vld [vmem:[%s16974_s1 + $0x250] ss:$8 sps:$4 sm:$0xff]   ;;  %v10815_v54 = vld [vmem:[%s16974_s1 + $0x260] ss:$8 sps:$4 sm:$0xff]   ;;  %v10816_v16 = vld [vmem:[%s16974_s1 + $0x274] ss:$8 sps:$4 sm:$0xff]  }
 0x725   :  { %v5076_v21 = vmax.f32 %v5073_v6, 0.0  ;;  %5638 = vmatprep.mubr.bf16.mxu0 %v15037_v2  ;;  %5844 = vmatprep.mubr.bf16.mxu1 %v15039_v18  ;;  %v10250_v2 = vld [vmem:[%s16975_s0 + $0x64] ss:$112 sps:$4 sm:$0xff]   ;;  %v10253_v18 = vld [vmem:[%s16975_s0 + $0x68] ss:$112 sps:$4 sm:$0xff]  }
 0x726   :  { %v15368_v45 = vld [vmem:[%s16977_s3 + $0x4] ss:$8 sps:$4 sm:$0xff]   ;;  %v10258_v41 = vld [vmem:[%s16975_s0 + $0x68] ss:$112 sps:$4 sm:$0xff]   ;;  %v15389_v49 = vld [vmem:[%s16977_s3 + $0x14] ss:$8 sps:$4 sm:$0xff]  }
 0x727   :  { %v9346_v33 = vpack.c.bf16 %v5076_v21, %v5076_v21  ;;  %5650 = vmatpush1.bf16.msra.mxu0 %v10773_v44  ;;  %5856 = vmatpush1.bf16.msra.mxu1 %v10773_v44  ;;  %v10259_v48 = vld [vmem:[%s16975_s0 + $0x6c] ss:$112 sps:$4 sm:$0xff]   ;;  %v10817_v7 = vld [vmem:[%s16974_s1 + $0x270] ss:$8 sps:$4 sm:$0xff]   ;;  %v15382_v6 = vld [vmem:[%s16977_s3] ss:$8 sps:$4 sm:$0xff]  }
 0x728   :  { %5651 = vmatprep.subr.bf16.mxu0 %v10774_v31  ;;  %5857 = vmatprep.subr.bf16.mxu1 %v10774_v31  ;;  %v15396_v14 = vld [vmem:[%s16977_s3 + $0x10] ss:$8 sps:$4 sm:$0xff]   ;;  %v15403_v21 = vld [vmem:[%s16977_s3 + $0x24] ss:$8 sps:$4 sm:$0xff]   ;;  %v15418_v31 = vld [vmem:[%s16977_s3 + $0x20] ss:$8 sps:$4 sm:$0xff]  }
 0x729   :  { %5092 = vst [vmem:[#allocation2 + $0x84] sm:$0xf] %v9346_v33  ;;  %v10266_v33 = vld [vmem:[%s16975_s0 + $0x148] ss:$0 sps:$4 sm:$0xff]   ;;  %v10267_v44 = vld [vmem:[%s16975_s0 + $0x14c] ss:$0 sps:$4 sm:$0xff]  }
 0x72a   :  { %5639 = vmatmul.mubr.bf16.gmra.mrb[92].mxu0 %v15049_v35  ;;  %5845 = vmatmul.mubr.bf16.gmra.mrb[92].mxu1 %v15051_v4  ;;  %v10777_v35 = vld [vmem:[%s16974_s1 + $0x130] ss:$8 sps:$4 sm:$0xff]   ;;  %v10778_v4 = vld [vmem:[%s16974_s1 + $0x144] ss:$8 sps:$4 sm:$0xff]  }
 0x72b   :  { %5652 = vmatpush1.bf16.msra.mxu0 %v10775_v3  ;;  %5858 = vmatpush1.bf16.msra.mxu1 %v10775_v3  ;;  %v10276_v3 = vld [vmem:[#allocation2 + $0x8] ss:$48 sps:$4 sm:$0xff]  }
 0x72c   :  { %5653 = vmatprep.subr.bf16.mxu0 %v10776_v12  ;;  %5859 = vmatprep.subr.bf16.mxu1 %v10776_v12  ;;  %v15431_v12 = vld [vmem:[%s16977_s3 + $0x30] ss:$8 sps:$4 sm:$0xff]  }
 0x72d   :  { %5679 = vmatprep.mubr.bf16.mxu0 %v10250_v2  ;;  %5885 = vmatprep.mubr.bf16.mxu1 %v10253_v18  ;;  %v10273_v2 = vld [vmem:[#allocation2 + $0x4] ss:$48 sps:$4 sm:$0xff]  }
 0x72e   :  { %v15425_v18 = vld [vmem:[%s16977_s3 + $0x34] ss:$8 sps:$4 sm:$0xff]  }
 0x72f   :  { %5654 = vmatpush1.bf16.msra.mxu0 %v10777_v35  ;;  %5860 = vmatpush1.bf16.msra.mxu1 %v10777_v35  ;;  %v15437_v35 = vld [vmem:[%s16977_s3 + $0x44] ss:$8 sps:$4 sm:$0xff]  }
 0x730   :  { %5655 = vmatprep.subr.bf16.mxu0 %v10778_v4  ;;  %5861 = vmatprep.subr.bf16.mxu1 %v10778_v4  ;;  %v15445_v4 = vld [vmem:[%s16977_s3 + $0x40] ss:$8 sps:$4 sm:$0xff]  }
 0x733   :  { %5656 = vmatpush1.bf16.msra.mxu0 %v10779_v28  ;;  %5862 = vmatpush1.bf16.msra.mxu1 %v10779_v28  ;;  %v15452_v28 = vld [vmem:[%s16977_s3 + $0x54] ss:$8 sps:$4 sm:$0xff]  }
 0x734   :  { %5657 = vmatprep.subr.bf16.mxu0 %v10780_v40  ;;  %5863 = vmatprep.subr.bf16.mxu1 %v10780_v40  ;;  %v15459_v40 = vld [vmem:[%s16977_s3 + $0x50] ss:$8 sps:$4 sm:$0xff]  }
 0x737   :  { %5658 = vmatpush1.bf16.msra.mxu0 %v10781_v51  ;;  %5864 = vmatpush1.bf16.msra.mxu1 %v10781_v51  ;;  %v15466_v51 = vld [vmem:[%s16977_s3 + $0x64] ss:$8 sps:$4 sm:$0xff]  }
 0x738   :  { %5659 = vmatprep.subr.bf16.mxu0 %v10782_v56  ;;  %5865 = vmatprep.subr.bf16.mxu1 %v10782_v56  ;;  %v15473_v56 = vld [vmem:[%s16977_s3 + $0x60] ss:$8 sps:$4 sm:$0xff]  }
 0x73b   :  { %5660 = vmatpush1.bf16.msra.mxu0 %v10783_v57  ;;  %5866 = vmatpush1.bf16.msra.mxu1 %v10783_v57  ;;  %v15480_v57 = vld [vmem:[%s16977_s3 + $0x74] ss:$8 sps:$4 sm:$0xff]  }
 0x73c   :  { %5661 = vmatprep.subr.bf16.mxu0 %v10784_v55  ;;  %5867 = vmatprep.subr.bf16.mxu1 %v10784_v55  ;;  %v15487_v55 = vld [vmem:[%s16977_s3 + $0x70] ss:$8 sps:$4 sm:$0xff]  }
 0x73f   :  { %5662 = vmatpush1.bf16.msra.mxu0 %v10785_v13  ;;  %5868 = vmatpush1.bf16.msra.mxu1 %v10785_v13  ;;  %v15494_v13 = vld [vmem:[%s16977_s3 + $0x84] ss:$8 sps:$4 sm:$0xff]  }
 0x740   :  { %5663 = vmatprep.subr.bf16.mxu0 %v10786_v43  ;;  %5869 = vmatprep.subr.bf16.mxu1 %v10786_v43  ;;  %v15501_v43 = vld [vmem:[%s16977_s3 + $0x80] ss:$8 sps:$4 sm:$0xff]  }
 0x743   :  { %5664 = vmatpush1.bf16.msra.mxu0 %v10787_v47  ;;  %5870 = vmatpush1.bf16.msra.mxu1 %v10787_v47  ;;  %v15508_v47 = vld [vmem:[%s16977_s3 + $0x94] ss:$8 sps:$4 sm:$0xff]  }
 0x744   :  { %5665 = vmatprep.subr.bf16.mxu0 %v10788_v8  ;;  %5871 = vmatprep.subr.bf16.mxu1 %v10788_v8  ;;  %v15515_v8 = vld [vmem:[%s16977_s3 + $0x90] ss:$8 sps:$4 sm:$0xff]  }
 0x747   :  { %5666 = vmatpush1.bf16.msra.mxu0 %v10789_v50  ;;  %5872 = vmatpush1.bf16.msra.mxu1 %v10789_v50  ;;  %v15522_v50 = vld [vmem:[%s16977_s3 + $0xa4] ss:$8 sps:$4 sm:$0xff]  }
 0x748   :  { %5667 = vmatprep.subr.bf16.mxu0 %v10790_v58  ;;  %5873 = vmatprep.subr.bf16.mxu1 %v10790_v58  ;;  %v15529_v58 = vld [vmem:[%s16977_s3 + $0xa0] ss:$8 sps:$4 sm:$0xff]  }
 0x74b   :  { %5668 = vmatpush1.bf16.msra.mxu0 %v10791_v15  ;;  %5874 = vmatpush1.bf16.msra.mxu1 %v10791_v15  ;;  %v15536_v15 = vld [vmem:[%s16977_s3 + $0xb4] ss:$8 sps:$4 sm:$0xff]  }
 0x74c   :  { %5669 = vmatprep.subr.bf16.mxu0 %v10792_v20  ;;  %5875 = vmatprep.subr.bf16.mxu1 %v10792_v20  ;;  %v15543_v20 = vld [vmem:[%s16977_s3 + $0xb0] ss:$8 sps:$4 sm:$0xff]  }
 0x74f   :  { %5670 = vmatpush1.bf16.msra.mxu0 %v10793_v42  ;;  %5876 = vmatpush1.bf16.msra.mxu1 %v10793_v42  ;;  %v15550_v42 = vld [vmem:[%s16977_s3 + $0xc4] ss:$8 sps:$4 sm:$0xff]  }
 0x750   :  { %5671 = vmatprep.subr.bf16.mxu0 %v10794_v53  ;;  %5877 = vmatprep.subr.bf16.mxu1 %v10794_v53  ;;  %v15557_v53 = vld [vmem:[%s16977_s3 + $0xc0] ss:$8 sps:$4 sm:$0xff]  }
 0x753   :  { %5672 = vmatpush1.bf16.msra.mxu0 %v10795_v10  ;;  %5878 = vmatpush1.bf16.msra.mxu1 %v10795_v10  ;;  %v15564_v10 = vld [vmem:[%s16977_s3 + $0xd4] ss:$8 sps:$4 sm:$0xff]  }
 0x754   :  { %5673 = vmatprep.subr.bf16.mxu0 %v10796_v0  ;;  %5879 = vmatprep.subr.bf16.mxu1 %v10796_v0  ;;  %v15571_v0 = vld [vmem:[%s16977_s3 + $0xd0] ss:$8 sps:$4 sm:$0xff]  }
 0x757   :  { %5674 = vmatpush1.bf16.msra.mxu0 %v10797_v30  ;;  %5880 = vmatpush1.bf16.msra.mxu1 %v10797_v30  ;;  %v15578_v30 = vld [vmem:[%s16977_s3 + $0xe4] ss:$8 sps:$4 sm:$0xff]  }
 0x758   :  { %5675 = vmatprep.subr.bf16.mxu0 %v10798_v9  ;;  %5881 = vmatprep.subr.bf16.mxu1 %v10798_v9 }
 0x75b   :  { %5676 = vmatpush1.bf16.msra.mxu0 %v10799_v19  ;;  %5882 = vmatpush1.bf16.msra.mxu1 %v10799_v19 }
 0x75c   :  { %5677 = vmatprep.subr.bf16.mxu0 %v10800_v1  ;;  %5883 = vmatprep.subr.bf16.mxu1 %v10800_v1 }
 0x75f   :  { %5678 = vmatpush1.bf16.msra.mxu0 %v10801_v39  ;;  %5884 = vmatpush1.bf16.msra.mxu1 %v10801_v39 }
 0x760   :  { %5698 = vmatprep.subr.bf16.mxu0 %v10802_v62  ;;  %5904 = vmatprep.subr.bf16.mxu1 %v10802_v62  ;;  %v15585_v62 = vld [vmem:[%s16977_s3 + $0xe0] ss:$8 sps:$4 sm:$0xff]  }
 0x762   :  { %5680 = vmatmul.mubr.bf16.vlgmr.msra.gmra.mrb[88].mxu0 %v10248_v32  ;;  %5886 = vmatmul.mubr.bf16.vlgmr.msra.gmra.mrb[88].mxu1 %v10251_v63 }
 0x763   :  { %5699 = vmatpush1.bf16.msra.mxu0 %v10803_v59  ;;  %5905 = vmatpush1.bf16.msra.mxu1 %v10803_v59 }
 0x764   :  { %5700 = vmatprep.subr.bf16.mxu0 %v10804_v24  ;;  %5906 = vmatprep.subr.bf16.mxu1 %v10804_v24 }
 0x765   :  { %5689 = vmatprep.mubr.bf16.mxu0 %v9075_v23  ;;  %5895 = vmatprep.mubr.bf16.mxu1 %v9085_v61  ;;  %v15590_v23 = vld [vmem:[%s16976_s2] ss:$0 sm:$0xff] }
 0x767   :  { %5701 = vmatpush1.bf16.msra.mxu0 %v10805_v22  ;;  %5907 = vmatpush1.bf16.msra.mxu1 %v10805_v22 }
 0x768   :  { %5702 = vmatprep.subr.bf16.mxu0 %v10806_v36  ;;  %5908 = vmatprep.subr.bf16.mxu1 %v10806_v36 }
 0x76a   :  { %5690 = vmatmul.mubr.bf16.gmra.mrb[92].mxu0 %v9074_v34  ;;  %5896 = vmatmul.mubr.bf16.gmra.mrb[92].mxu1 %v9084_v29  ;;  %v15597_v34 = vld [vmem:[%s16977_s3 + $0xf4] ss:$8 sps:$4 sm:$0xff]  }
 0x76b   :  { %5703 = vmatpush1.bf16.msra.mxu0 %v10807_v60  ;;  %5909 = vmatpush1.bf16.msra.mxu1 %v10807_v60 }
 0x76c   :  { %5704 = vmatprep.subr.bf16.mxu0 %v10808_v46  ;;  %5910 = vmatprep.subr.bf16.mxu1 %v10808_v46  ;;  %v15605_v46 = vld [vmem:[%s16977_s3 + $0xf0] ss:$8 sps:$4 sm:$0xff]  }
 0x76d   :  { %5730 = vmatprep.mubr.bf16.mxu0 %v17463_v38  ;;  %5936 = vmatprep.mubr.bf16.mxu1 %v17463_v38 }
 0x76f   :  { %5705 = vmatpush1.bf16.msra.mxu0 %v10809_v52  ;;  %5911 = vmatpush1.bf16.msra.mxu1 %v10809_v52  ;;  %v15612_v52 = vld [vmem:[%s16977_s3 + $0x104] ss:$8 sps:$4 sm:$0xff]  }
 0x770   :  { %5706 = vmatprep.subr.bf16.mxu0 %v10810_v11  ;;  %5912 = vmatprep.subr.bf16.mxu1 %v10810_v11 }
 0x773   :  { %5707 = vmatpush1.bf16.msra.mxu0 %v10811_v17  ;;  %5913 = vmatpush1.bf16.msra.mxu1 %v10811_v17 }
 0x774   :  { %5708 = vmatprep.subr.bf16.mxu0 %v10812_v26  ;;  %5914 = vmatprep.subr.bf16.mxu1 %v10812_v26 }
 0x777   :  { %5709 = vmatpush1.bf16.msra.mxu0 %v10813_v37  ;;  %5915 = vmatpush1.bf16.msra.mxu1 %v10813_v37 }
 0x778   :  { %5710 = vmatprep.subr.bf16.mxu0 %v10814_v27  ;;  %5916 = vmatprep.subr.bf16.mxu1 %v10814_v27 }
 0x77b   :  { %5711 = vmatpush1.bf16.msra.mxu0 %v10815_v54  ;;  %5917 = vmatpush1.bf16.msra.mxu1 %v10815_v54 }
 0x77c   :  { %5712 = vmatprep.subr.bf16.mxu0 %v10816_v16  ;;  %5918 = vmatprep.subr.bf16.mxu1 %v10816_v16 }
 0x77f   :  { %5713 = vmatpush1.bf16.msra.mxu0 %v10817_v7  ;;  %5919 = vmatpush1.bf16.msra.mxu1 %v10817_v7 }
 0x780   :  { %6446 = vmatprep.subr.bf16.mxu0 %v15368_v45  ;;  %6652 = vmatprep.subr.bf16.mxu1 %v15368_v45 }
 0x782   :  { %5731 = vmatmul.mubr.bf16.vlgmr.msra.gmra.mrb[88].mxu0 %v10258_v41  ;;  %5937 = vmatmul.mubr.bf16.vlgmr.msra.gmra.mrb[88].mxu1 %v10259_v48  ;;  %v5999_v41 = vld [vmem:[#allocation2 + $0x60] sm:$0xff] }
 0x783   :  { %6447 = vmatpush1.bf16.msra.mxu0 %v15382_v6  ;;  %6653 = vmatpush1.bf16.msra.mxu1 %v15382_v6 }
 0x784   :  { %6448 = vmatprep.subr.bf16.mxu0 %v15389_v49  ;;  %6654 = vmatprep.subr.bf16.mxu1 %v15389_v49 }
 0x785   :  { %5740 = vmatprep.mubr.bf16.mxu0 %v17463_v38  ;;  %5946 = vmatprep.mubr.bf16.mxu1 %v17463_v38 }
 0x787   :  { %6449 = vmatpush1.bf16.msra.mxu0 %v15396_v14  ;;  %6655 = vmatpush1.bf16.msra.mxu1 %v15396_v14 }
 0x788   :  { %6450 = vmatprep.subr.bf16.mxu0 %v15403_v21  ;;  %6656 = vmatprep.subr.bf16.mxu1 %v15403_v21 }
 0x78a   :  { %5741 = vmatmul.mubr.bf16.gmra.mrb[92].mxu0 %v10266_v33  ;;  %5947 = vmatmul.mubr.bf16.gmra.mrb[92].mxu1 %v10267_v44 }
 0x78b   :  { %6451 = vmatpush1.bf16.msra.mxu0 %v15418_v31  ;;  %6478 = vmatprep.mubr.bf16.mxu0 %v10273_v2 }
 0x78c   :  { %6657 = vmatpush1.bf16.msra.mxu1 %v15418_v31  ;;  %6684 = vmatprep.mubr.bf16.mxu1 %v10276_v3  ;;  %v6605_v3 = vld [vmem:[#allocation2 + $0x64] sm:$0xff] }
 0x78d   :  { %6452 = vmatprep.subr.bf16.mxu0 %v15425_v18  ;;  %6658 = vmatprep.subr.bf16.mxu1 %v15425_v18 }
 0x78f   :  { %6453 = vmatpush1.bf16.msra.mxu0 %v15431_v12 }
 0x790   :  { %6659 = vmatpush1.bf16.msra.mxu1 %v15431_v12  ;;  %6454 = vmatprep.subr.bf16.mxu0 %v15437_v35 }
 0x791   :  { %6660 = vmatprep.subr.bf16.mxu1 %v15437_v35 }
 0x793   :  { %6455 = vmatpush1.bf16.msra.mxu0 %v15445_v4 }
 0x794   :  { %6661 = vmatpush1.bf16.msra.mxu1 %v15445_v4  ;;  %6456 = vmatprep.subr.bf16.mxu0 %v15452_v28 }
 0x795   :  { %6662 = vmatprep.subr.bf16.mxu1 %v15452_v28 }
 0x797   :  { %6457 = vmatpush1.bf16.msra.mxu0 %v15459_v40 }
 0x798   :  { %6663 = vmatpush1.bf16.msra.mxu1 %v15459_v40  ;;  %6458 = vmatprep.subr.bf16.mxu0 %v15466_v51 }
 0x799   :  { %6664 = vmatprep.subr.bf16.mxu1 %v15466_v51 }
 0x79b   :  { %6459 = vmatpush1.bf16.msra.mxu0 %v15473_v56 }
 0x79c   :  { %6665 = vmatpush1.bf16.msra.mxu1 %v15473_v56  ;;  %6460 = vmatprep.subr.bf16.mxu0 %v15480_v57 }
 0x79d   :  { %6666 = vmatprep.subr.bf16.mxu1 %v15480_v57 }
 0x79f   :  { %6461 = vmatpush1.bf16.msra.mxu0 %v15487_v55 }
 0x7a0   :  { %6667 = vmatpush1.bf16.msra.mxu1 %v15487_v55  ;;  %6462 = vmatprep.subr.bf16.mxu0 %v15494_v13 }
 0x7a1   :  { %6668 = vmatprep.subr.bf16.mxu1 %v15494_v13 }
 0x7a3   :  { %6463 = vmatpush1.bf16.msra.mxu0 %v15501_v43 }
 0x7a4   :  { %6669 = vmatpush1.bf16.msra.mxu1 %v15501_v43  ;;  %6464 = vmatprep.subr.bf16.mxu0 %v15508_v47 }
 0x7a5   :  { %6670 = vmatprep.subr.bf16.mxu1 %v15508_v47 }
 0x7a7   :  { %6465 = vmatpush1.bf16.msra.mxu0 %v15515_v8 }
 0x7a8   :  { %6671 = vmatpush1.bf16.msra.mxu1 %v15515_v8  ;;  %6466 = vmatprep.subr.bf16.mxu0 %v15522_v50 }
 0x7a9   :  { %6672 = vmatprep.subr.bf16.mxu1 %v15522_v50 }
 0x7ab   :  { %6467 = vmatpush1.bf16.msra.mxu0 %v15529_v58 }
 0x7ac   :  { %6673 = vmatpush1.bf16.msra.mxu1 %v15529_v58  ;;  %6468 = vmatprep.subr.bf16.mxu0 %v15536_v15 }
 0x7ad   :  { %6674 = vmatprep.subr.bf16.mxu1 %v15536_v15 }
 0x7af   :  { %6469 = vmatpush1.bf16.msra.mxu0 %v15543_v20 }
 0x7b0   :  { %6675 = vmatpush1.bf16.msra.mxu1 %v15543_v20  ;;  %6470 = vmatprep.subr.bf16.mxu0 %v15550_v42 }
 0x7b1   :  { %6676 = vmatprep.subr.bf16.mxu1 %v15550_v42 }
 0x7b3   :  { %6471 = vmatpush1.bf16.msra.mxu0 %v15557_v53 }
 0x7b4   :  { %6677 = vmatpush1.bf16.msra.mxu1 %v15557_v53  ;;  %6472 = vmatprep.subr.bf16.mxu0 %v15564_v10 }
 0x7b5   :  { %v5282_v9 = vpop.f32.mrb[80].mxu0  ;;  %v5488_v19 = vpop.f32.mrb[80].mxu1  ;;  %6678 = vmatprep.subr.bf16.mxu1 %v15564_v10 }
 0x7b6   :  { %v5505_v1 = vmax.f32 %v5282_v9, %v5488_v19  ;;  %v5284_v32 = vpop.f32.mrb[81].mxu0  ;;  %v5490_v63 = vpop.f32.mrb[81].mxu1  ;;  %v10271_v9 = vld [vmem:[#allocation2] ss:$48 sps:$4 sm:$0xff]  }
 0x7b7   :  { %v5506_v5 = vmax.f32 %v5284_v32, %v5490_v63  ;;  %v5286_v25 = vpop.f32.mrb[82].mxu0  ;;  %v5492_v39 = vpop.f32.mrb[82].mxu1  ;;  %6473 = vmatpush1.bf16.msra.mxu0 %v15571_v0  ;;  %v15622_v32 = vld [vmem:[%s16977_s3 + $0x100] ss:$8 sps:$4 sm:$0xff]   ;;  %v10274_v63 = vld [vmem:[#allocation2 + $0x4] ss:$48 sps:$4 sm:$0xff]  }
 0x7b8   :  { %v5507_v61 = vmax.f32 %v5286_v25, %v5492_v39  ;;  %6679 = vmatpush1.bf16.msra.mxu1 %v15571_v0  ;;  %v5288_v59 = vpop.f32.mrb[83].mxu0  ;;  %v5494_v24 = vpop.f32.mrb[83].mxu1  ;;  %6474 = vmatprep.subr.bf16.mxu0 %v15578_v30  ;;  %v9097_v39 = vcombine.high %v5999_v41, %v5999_v41 }
 0x7b9   :  { %v5511_v29 = vmax.f32 %v5505_v1, %v5506_v5  ;;  %v5508_v22 = vmax.f32 %v5288_v59, %v5494_v24  ;;  %6680 = vmatprep.subr.bf16.mxu1 %v15578_v30  ;;  %v9187_v59 = vcombine.high %v6605_v3, %v6605_v3 }
 0x7bb   :  { %v5521_v36 = vadd.f32 %v15590_v23, %v5511_v29  ;;  %v5512_v60 = vmax.f32 %v5507_v61, %v5508_v22  ;;  %6475 = vmatpush1.bf16.msra.mxu0 %v15585_v62  ;;  %v15628_v61 = vld [vmem:[%s16977_s3 + $0x114] ss:$8 sps:$4 sm:$0xff]   ;;  %v15635_v29 = vld [vmem:[%s16977_s3 + $0x110] ss:$8 sps:$4 sm:$0xff]  }
 0x7bc   :  { %6681 = vmatpush1.bf16.msra.mxu1 %v15585_v62  ;;  %6476 = vmatprep.subr.bf16.mxu0 %v15597_v34 }
 0x7bd   :  { %v5524_v11 = vmax.f32 %v5521_v36, 0.0  ;;  %v5522_v17 = vadd.f32 %v15590_v23, %v5512_v60  ;;  %v5292_v26 = vpop.f32.mrb[84].mxu0  ;;  %v5498_v37 = vpop.f32.mrb[84].mxu1  ;;  %6682 = vmatprep.subr.bf16.mxu1 %v15597_v34  ;;  %v15642_v36 = vld [vmem:[%s16977_s3 + $0x124] ss:$8 sps:$4 sm:$0xff]  }
 0x7be   :  { %v5509_v27 = vmax.f32 %v5292_v26, %v5498_v37  ;;  %v5294_v54 = vpop.f32.mrb[85].mxu0  ;;  %v5500_v16 = vpop.f32.mrb[85].mxu1  ;;  %v9186_v26 = vcombine.low %v6605_v3, %v6605_v3  ;;  %v15653_v37 = vld [vmem:[#allocation2 + $0xc] ss:$48 sps:$4 sm:$0xff]  }
 0x7bf   :  { %v9347_v48 = vpack.c.bf16 %v5524_v11, %v5524_v11  ;;  %v5525_v7 = vmax.f32 %v5522_v17, 0.0  ;;  %v5510_v33 = vmax.f32 %v5294_v54, %v5500_v16  ;;  %v5296_v44 = vpop.f32.mrb[86].mxu0  ;;  %v5502_v2 = vpop.f32.mrb[86].mxu1  ;;  %6477 = vmatpush1.bf16.msra.mxu0 %v15605_v46  ;;  %v9096_v11 = vcombine.low %v5999_v41, %v5999_v41  ;;  %v15649_v17 = vld [vmem:[%s16977_s3 + $0x120] ss:$8 sps:$4 sm:$0xff]  }
 0x7c0   :  { %6683 = vmatpush1.bf16.msra.mxu1 %v15605_v46  ;;  %v5297_v19 = vpop.f32.mrb[87].mxu0  ;;  %v5503_v1 = vpop.f32.mrb[87].mxu1  ;;  %6497 = vmatprep.subr.bf16.mxu0 %v15612_v52  ;;  %v15661_v54 = vld [vmem:[#allocation2 + $0x10] ss:$48 sps:$4 sm:$0xff]   ;;  %v15676_v41 = vld [vmem:[%s16977_s3 + $0x144] ss:$8 sps:$4 sm:$0xff]  }
 0x7c1   :  { %5540 = vst [vmem:[#allocation2 + $0x28] sm:$0xf] %v9347_v48  ;;  %v9348_v5 = vpack.c.bf16 %v5525_v7, %v5525_v7  ;;  %v5513_v25 = vmax.f32 %v5509_v27, %v5510_v33  ;;  %6703 = vmatprep.subr.bf16.mxu1 %v15612_v52  ;;  %v15658_v27 = vld [vmem:[%s16977_s3 + $0x134] ss:$8 sps:$4 sm:$0xff]   ;;  %v15669_v16 = vld [vmem:[%s16977_s3 + $0x130] ss:$8 sps:$4 sm:$0xff]  }
 0x7c2   :  { %6479 = vmatmul.mubr.bf16.vlgmr.msra.gmra.mrb[96].mxu0 %v10271_v9  ;;  %v15683_v48 = vld [vmem:[%s16977_s3 + $0x140] ss:$8 sps:$4 sm:$0xff]   ;;  %v15690_v7 = vld [vmem:[%s16977_s3 + $0x154] ss:$8 sps:$4 sm:$0xff]   ;;  %v15697_v33 = vld [vmem:[%s16977_s3 + $0x150] ss:$8 sps:$4 sm:$0xff]  }
 0x7c3   :  { %5541 = vst [vmem:[#allocation2 + $0x58] sm:$0xf] %v9348_v5  ;;  %v5523_v24 = vadd.f32 %v15590_v23, %v5513_v25  ;;  %6685 = vmatmul.mubr.bf16.vlgmr.msra.gmra.mrb[96].mxu1 %v10274_v63  ;;  %6488 = vmatprep.mubr.bf16.mxu0 %v9097_v39  ;;  %v15704_v44 = vld [vmem:[%s16977_s3 + $0x164] ss:$8 sps:$4 sm:$0xff]   ;;  %v15711_v2 = vld [vmem:[%s16977_s3 + $0x160] ss:$8 sps:$4 sm:$0xff]  }
 0x7c4   :  { %6498 = vmatpush1.bf16.msra.mxu0 %v15622_v32  ;;  %6694 = vmatprep.mubr.bf16.mxu1 %v9187_v59  ;;  %v15718_v3 = vld [vmem:[%s16977_s3 + $0x174] ss:$8 sps:$4 sm:$0xff]   ;;  %v15725_v9 = vld [vmem:[%s16977_s3 + $0x170] ss:$8 sps:$4 sm:$0xff]   ;;  %v15732_v19 = vld [vmem:[%s16977_s3 + $0x184] ss:$8 sps:$4 sm:$0xff]  }
 0x7c5   :  { %v5526_v22 = vmax.f32 %v5523_v24, 0.0  ;;  %6704 = vmatpush1.bf16.msra.mxu1 %v15622_v32  ;;  %6499 = vmatprep.subr.bf16.mxu0 %v15628_v61  ;;  %17779 = vst [vmem:[#allocation23_spill] sm:$0xff] %v15725_v9  ;;  %17780 = vst [vmem:[#allocation24_spill] sm:$0xff] %v15732_v19  ;;  %v15739_v1 = vld [vmem:[%s16977_s3 + $0x180] ss:$8 sps:$4 sm:$0xff]  }
 0x7c6   :  { %6705 = vmatprep.subr.bf16.mxu1 %v15628_v61  ;;  %17781 = vst [vmem:[#allocation25_spill] sm:$0xff] %v15739_v1  ;;  %v15746_v63 = vld [vmem:[%s16977_s3 + $0x194] ss:$8 sps:$4 sm:$0xff]   ;;  %v15753_v5 = vld [vmem:[%s16977_s3 + $0x190] ss:$8 sps:$4 sm:$0xff]  }
 0x7c7   :  { %v9349_v60 = vpack.c.bf16 %v5526_v22, %v5526_v22  ;;  %17782 = vst [vmem:[#allocation26_spill] sm:$0xff] %v15746_v63  ;;  %17783 = vst [vmem:[#allocation27_spill] sm:$0xff] %v15753_v5  ;;  %v15760_v25 = vld [vmem:[%s16977_s3 + $0x1a4] ss:$8 sps:$4 sm:$0xff]   ;;  %v15767_v39 = vld [vmem:[%s16977_s3 + $0x1a0] ss:$8 sps:$4 sm:$0xff]  }
 0x7c8   :  { %6500 = vmatpush1.bf16.msra.mxu0 %v15635_v29  ;;  %17784 = vst [vmem:[#allocation28_spill] sm:$0xff] %v15760_v25  ;;  %17785 = vst [vmem:[#allocation29_spill] sm:$0xff] %v15767_v39  ;;  %v15774_v59 = vld [vmem:[%s16977_s3 + $0x1b4] ss:$8 sps:$4 sm:$0xff]   ;;  %v15781_v24 = vld [vmem:[%s16977_s3 + $0x1b0] ss:$8 sps:$4 sm:$0xff]  }
 0x7c9   :  { %5542 = vst [vmem:[#allocation2 + $0x88] sm:$0xf] %v9349_v60  ;;  %6706 = vmatpush1.bf16.msra.mxu1 %v15635_v29  ;;  %6501 = vmatprep.subr.bf16.mxu0 %v15642_v36  ;;  %17786 = vst [vmem:[#allocation30_spill] sm:$0xff] %v15774_v59  ;;  %v15788_v22 = vld [vmem:[%s16977_s3 + $0x1c4] ss:$8 sps:$4 sm:$0xff]  }
 0x7ca   :  { %6489 = vmatmul.mubr.bf16.gmra.mrb[100].mxu0 %v9096_v11  ;;  %6707 = vmatprep.subr.bf16.mxu1 %v15642_v36  ;;  %17787 = vst [vmem:[#allocation31_spill] sm:$0xff] %v15781_v24  ;;  %17788 = vst [vmem:[#allocation4_spill] sm:$0xff] %v15788_v22  ;;  %v15795_v60 = vld [vmem:[%s16977_s3 + $0x1c0] ss:$8 sps:$4 sm:$0xff]   ;;  %v15802_v11 = vld [vmem:[%s16977_s3 + $0x1d4] ss:$8 sps:$4 sm:$0xff]  }
 0x7cb   :  { %6695 = vmatmul.mubr.bf16.gmra.mrb[100].mxu1 %v9186_v26  ;;  %6529 = vmatprep.mubr.bf16.mxu0 %v15653_v37  ;;  %17789 = vst [vmem:[#allocation5_spill] sm:$0xff] %v15795_v60  ;;  %17790 = vst [vmem:[#allocation6_spill] sm:$0xff] %v15802_v11  ;;  %v15809_v26 = vld [vmem:[%s16977_s3 + $0x1d0] ss:$8 sps:$4 sm:$0xff]  }
 0x7cc   :  { %6502 = vmatpush1.bf16.msra.mxu0 %v15649_v17  ;;  %6735 = vmatprep.mubr.bf16.mxu1 %v15661_v54  ;;  %17791 = vst [vmem:[#allocation7_spill] sm:$0xff] %v15809_v26 }
 0x7cd   :  { %6708 = vmatpush1.bf16.msra.mxu1 %v15649_v17  ;;  %6503 = vmatprep.subr.bf16.mxu0 %v15658_v27 }
 0x7ce   :  { %6709 = vmatprep.subr.bf16.mxu1 %v15658_v27 }
 0x7d0   :  { %6504 = vmatpush1.bf16.msra.mxu0 %v15669_v16 }
 0x7d1   :  { %6710 = vmatpush1.bf16.msra.mxu1 %v15669_v16  ;;  %6505 = vmatprep.subr.bf16.mxu0 %v15676_v41 }
 0x7d2   :  { %6711 = vmatprep.subr.bf16.mxu1 %v15676_v41 }
 0x7d4   :  { %6506 = vmatpush1.bf16.msra.mxu0 %v15683_v48 }
 0x7d5   :  { %6712 = vmatpush1.bf16.msra.mxu1 %v15683_v48  ;;  %6507 = vmatprep.subr.bf16.mxu0 %v15690_v7 }
 0x7d6   :  { %6713 = vmatprep.subr.bf16.mxu1 %v15690_v7 }
 0x7d8   :  { %6508 = vmatpush1.bf16.msra.mxu0 %v15697_v33 }
 0x7d9   :  { %6714 = vmatpush1.bf16.msra.mxu1 %v15697_v33  ;;  %6509 = vmatprep.subr.bf16.mxu0 %v15704_v44 }
 0x7da   :  { %6715 = vmatprep.subr.bf16.mxu1 %v15704_v44 }
 0x7dc   :  { %6510 = vmatpush1.bf16.msra.mxu0 %v15711_v2 }
 0x7dd   :  { %6716 = vmatpush1.bf16.msra.mxu1 %v15711_v2  ;;  %6511 = vmatprep.subr.bf16.mxu0 %v15718_v3 }
 0x7de   :  { %6717 = vmatprep.subr.bf16.mxu1 %v15718_v3 }
 0x7e0   :  { %6512 = vmatpush1.bf16.msra.mxu0 %v15725_v9 }
 0x7e1   :  { %6718 = vmatpush1.bf16.msra.mxu1 %v15725_v9  ;;  %6513 = vmatprep.subr.bf16.mxu0 %v15732_v19  ;;  %v15902_v9 = vld [vmem:[%s16977_s3 + $0x234] ss:$8 sps:$4 sm:$0xff]  }
 0x7e2   :  { %6719 = vmatprep.subr.bf16.mxu1 %v15732_v19  ;;  %v15893_v19 = vld [vmem:[%s16977_s3 + $0x220] ss:$8 sps:$4 sm:$0xff]   ;;  %17800 = vst [vmem:[#allocation15_spill] sm:$0xff] %v15902_v9 }
 0x7e3   :  { %17799 = vst [vmem:[#allocation14_spill] sm:$0xff] %v15893_v19 }
 0x7e4   :  { %6514 = vmatpush1.bf16.msra.mxu0 %v15739_v1 }
 0x7e5   :  { %6720 = vmatpush1.bf16.msra.mxu1 %v15739_v1  ;;  %6515 = vmatprep.subr.bf16.mxu0 %v15746_v63 }
 0x7e6   :  { %6721 = vmatprep.subr.bf16.mxu1 %v15746_v63  ;;  %v15884_v63 = vld [vmem:[%s16977_s3 + $0x224] ss:$8 sps:$4 sm:$0xff]  }
 0x7e7   :  { %17798 = vst [vmem:[#allocation13_spill] sm:$0xff] %v15884_v63 }
 0x7e8   :  { %6516 = vmatpush1.bf16.msra.mxu0 %v15753_v5 }
 0x7e9   :  { %6722 = vmatpush1.bf16.msra.mxu1 %v15753_v5  ;;  %6517 = vmatprep.subr.bf16.mxu0 %v15760_v25  ;;  %v15865_v5 = vld [vmem:[%s16977_s3 + $0x214] ss:$8 sps:$4 sm:$0xff]  }
 0x7ea   :  { %6723 = vmatprep.subr.bf16.mxu1 %v15760_v25  ;;  %v15857_v25 = vld [vmem:[#allocation2 + $0xc] ss:$48 sps:$4 sm:$0xff]  }
 0x7ec   :  { %6518 = vmatpush1.bf16.msra.mxu0 %v15767_v39 }
 0x7ed   :  { %6724 = vmatpush1.bf16.msra.mxu1 %v15767_v39  ;;  %6519 = vmatprep.subr.bf16.mxu0 %v15774_v59  ;;  %v15848_v39 = vld [vmem:[#allocation2 + $0x8] ss:$48 sps:$4 sm:$0xff]  }
 0x7ee   :  { %6725 = vmatprep.subr.bf16.mxu1 %v15774_v59  ;;  %v6000_v59 = vld [vmem:[#allocation2 + $0x68] sm:$0xff] }
 0x7ef   :  { %v15888_v1 = vcombine.low %v6000_v59, %v6000_v59 }
 0x7f0   :  { %6520 = vmatpush1.bf16.msra.mxu0 %v15781_v24 }
 0x7f1   :  { %6726 = vmatpush1.bf16.msra.mxu1 %v15781_v24  ;;  %6521 = vmatprep.subr.bf16.mxu0 %v15788_v22  ;;  %v15816_v24 = vld [vmem:[%s16977_s3 + $0x1e4] ss:$8 sps:$4 sm:$0xff]  }
 0x7f2   :  { %6727 = vmatprep.subr.bf16.mxu1 %v15788_v22  ;;  %17792 = vst [vmem:[#allocation32_spill] sm:$0xff] %v15816_v24  ;;  %v15823_v22 = vld [vmem:[%s16977_s3 + $0x1e0] ss:$8 sps:$4 sm:$0xff]  }
 0x7f3   :  { %17793 = vst [vmem:[#allocation8_spill] sm:$0xff] %v15823_v22 }
 0x7f4   :  { %6522 = vmatpush1.bf16.msra.mxu0 %v15795_v60 }
 0x7f5   :  { %6728 = vmatpush1.bf16.msra.mxu1 %v15795_v60  ;;  %6523 = vmatprep.subr.bf16.mxu0 %v15802_v11  ;;  %v15830_v60 = vld [vmem:[%s16977_s3 + $0x1f4] ss:$8 sps:$4 sm:$0xff]  }
 0x7f6   :  { %6729 = vmatprep.subr.bf16.mxu1 %v15802_v11  ;;  %17794 = vst [vmem:[#allocation9_spill] sm:$0xff] %v15830_v60  ;;  %v15837_v11 = vld [vmem:[%s16977_s3 + $0x1f0] ss:$8 sps:$4 sm:$0xff]  }
 0x7f7   :  { %17795 = vst [vmem:[#allocation10_spill] sm:$0xff] %v15837_v11 }
 0x7f8   :  { %6524 = vmatpush1.bf16.msra.mxu0 %v15809_v26 }
 0x7f9   :  { %6730 = vmatpush1.bf16.msra.mxu1 %v15809_v26  ;;  %6525 = vmatprep.subr.bf16.mxu0 %v15816_v24  ;;  %v15844_v26 = vld [vmem:[%s16977_s3 + $0x204] ss:$8 sps:$4 sm:$0xff]  }
 0x7fa   :  { %6731 = vmatprep.subr.bf16.mxu1 %v15816_v24  ;;  %17796 = vst [vmem:[#allocation11_spill] sm:$0xff] %v15844_v26  ;;  %v6606_v24 = vld [vmem:[#allocation2 + $0x6c] sm:$0xff] }
 0x7fc   :  { %6526 = vmatpush1.bf16.msra.mxu0 %v15823_v22 }
 0x7fd   :  { %6732 = vmatpush1.bf16.msra.mxu1 %v15823_v22  ;;  %6527 = vmatprep.subr.bf16.mxu0 %v15830_v60  ;;  %v15855_v22 = vld [vmem:[%s16977_s3 + $0x200] ss:$8 sps:$4 sm:$0xff]  }
 0x7fe   :  { %6733 = vmatprep.subr.bf16.mxu1 %v15830_v60  ;;  %17797 = vst [vmem:[#allocation12_spill] sm:$0xff] %v15855_v22  ;;  %v15860_v60 = vcombine.high %v6000_v59, %v6000_v59  ;;  %v15912_v59 = vld [vmem:[%s16977_s3 + $0x230] ss:$8 sps:$4 sm:$0xff]  }
 0x7ff   :  { %17801 = vst [vmem:[#allocation16_spill] sm:$0xff] %v15912_v59 }
 0x800   :  { %6528 = vmatpush1.bf16.msra.mxu0 %v15837_v11 }
 0x801   :  { %6734 = vmatpush1.bf16.msra.mxu1 %v15837_v11  ;;  %6548 = vmatprep.subr.bf16.mxu0 %v15844_v26  ;;  %v15868_v11 = vcombine.high %v6606_v24, %v6606_v24 }
 0x802   :  { %6754 = vmatprep.subr.bf16.mxu1 %v15844_v26  ;;  %v15877_v26 = vld [vmem:[%s16977_s3 + $0x210] ss:$8 sps:$4 sm:$0xff]  }
 0x803   :  { %6530 = vmatmul.mubr.bf16.vlgmr.msra.gmra.mrb[96].mxu0 %v15848_v39 }
 0x804   :  { %6736 = vmatmul.mubr.bf16.vlgmr.msra.gmra.mrb[96].mxu1 %v15857_v25  ;;  %6539 = vmatprep.mubr.bf16.mxu0 %v15860_v60 }
 0x805   :  { %6549 = vmatpush1.bf16.msra.mxu0 %v15855_v22  ;;  %6745 = vmatprep.mubr.bf16.mxu1 %v15868_v11 }
 0x806   :  { %6755 = vmatpush1.bf16.msra.mxu1 %v15855_v22  ;;  %6550 = vmatprep.subr.bf16.mxu0 %v15865_v5  ;;  %v15897_v22 = vcombine.low %v6606_v24, %v6606_v24  ;;  %v15920_v24 = vld [vmem:[%s16977_s3 + $0x244] ss:$8 sps:$4 sm:$0xff]  }
 0x807   :  { %6756 = vmatprep.subr.bf16.mxu1 %v15865_v5  ;;  %17802 = vst [vmem:[#allocation17_spill] sm:$0xff] %v15920_v24 }
 0x809   :  { %6551 = vmatpush1.bf16.msra.mxu0 %v15877_v26 }
 0x80a   :  { %6757 = vmatpush1.bf16.msra.mxu1 %v15877_v26  ;;  %6552 = vmatprep.subr.bf16.mxu0 %v15884_v63 }
 0x80b   :  { %6540 = vmatmul.mubr.bf16.gmra.mrb[100].mxu0 %v15888_v1  ;;  %6758 = vmatprep.subr.bf16.mxu1 %v15884_v63  ;;  %v15927_v63 = vld [vmem:[%s16977_s3 + $0x240] ss:$8 sps:$4 sm:$0xff]  }
 0x80c   :  { %6746 = vmatmul.mubr.bf16.gmra.mrb[100].mxu1 %v15897_v22  ;;  %6580 = vmatprep.mubr.bf16.mxu0 %v17463_v38  ;;  %17803 = vst [vmem:[#allocation18_spill] sm:$0xff] %v15927_v63 }
 0x80d   :  { %6553 = vmatpush1.bf16.msra.mxu0 %v15893_v19  ;;  %6786 = vmatprep.mubr.bf16.mxu1 %v17463_v38 }
 0x80e   :  { %6759 = vmatpush1.bf16.msra.mxu1 %v15893_v19  ;;  %6554 = vmatprep.subr.bf16.mxu0 %v15902_v9  ;;  %v15934_v19 = vld [vmem:[%s16977_s3 + $0x254] ss:$8 sps:$4 sm:$0xff]  }
 0x80f   :  { %6760 = vmatprep.subr.bf16.mxu1 %v15902_v9  ;;  %17804 = vst [vmem:[#allocation19_spill] sm:$0xff] %v15934_v19  ;;  %v15941_v9 = vld [vmem:[%s16977_s3 + $0x250] ss:$8 sps:$4 sm:$0xff]  }
 0x810   :  { %17805 = vst [vmem:[#allocation20_spill] sm:$0xff] %v15941_v9 }
 0x811   :  { %6555 = vmatpush1.bf16.msra.mxu0 %v15912_v59 }
 0x812   :  { %6761 = vmatpush1.bf16.msra.mxu1 %v15912_v59  ;;  %6556 = vmatprep.subr.bf16.mxu0 %v15920_v24  ;;  %v15948_v59 = vld [vmem:[%s16977_s3 + $0x264] ss:$8 sps:$4 sm:$0xff]  }
 0x813   :  { %6762 = vmatprep.subr.bf16.mxu1 %v15920_v24  ;;  %17806 = vst [vmem:[#allocation21_spill] sm:$0xff] %v15948_v59  ;;  %v15955_v24 = vld [vmem:[%s16977_s3 + $0x260] ss:$8 sps:$4 sm:$0xff]  }
 0x815   :  { %6557 = vmatpush1.bf16.msra.mxu0 %v15927_v63 }
 0x816   :  { %6763 = vmatpush1.bf16.msra.mxu1 %v15927_v63  ;;  %6558 = vmatprep.subr.bf16.mxu0 %v15934_v19  ;;  %v15962_v63 = vld [vmem:[%s16977_s3 + $0x274] ss:$8 sps:$4 sm:$0xff]  }
 0x817   :  { %6764 = vmatprep.subr.bf16.mxu1 %v15934_v19  ;;  %v15969_v19 = vld [vmem:[%s16977_s3 + $0x270] ss:$8 sps:$4 sm:$0xff]  }
 0x818   :  { %17807 = vst [vmem:[#allocation22_spill] sm:$0xff] %v15969_v19 }
 0x819   :  { %6559 = vmatpush1.bf16.msra.mxu0 %v15941_v9 }
 0x81a   :  { %6765 = vmatpush1.bf16.msra.mxu1 %v15941_v9  ;;  %6560 = vmatprep.subr.bf16.mxu0 %v15948_v59  ;;  %v10402_v9 = vld [vmem:[#allocation2 + $0x10] ss:$48 sps:$4 sm:$0xff]  }
 0x81b   :  { %6766 = vmatprep.subr.bf16.mxu1 %v15948_v59  ;;  %v10403_v59 = vld [vmem:[#allocation2 + $0x14] ss:$48 sps:$4 sm:$0xff]  }
 0x81d   :  { %6561 = vmatpush1.bf16.msra.mxu0 %v15955_v24 }
 0x81e   :  { %6767 = vmatpush1.bf16.msra.mxu1 %v15955_v24  ;;  %6562 = vmatprep.subr.bf16.mxu0 %v15962_v63 }
 0x81f   :  { %6768 = vmatprep.subr.bf16.mxu1 %v15962_v63 }
 0x821   :  { %6563 = vmatpush1.bf16.msra.mxu0 %v15969_v19 }
 0x822   :  { %6769 = vmatpush1.bf16.msra.mxu1 %v15969_v19  ;;  %6896 = vmatprep.subr.bf16.mxu0 %v15368_v45  ;;  %v10404_v19 = vld [vmem:[#allocation2 + $0x70] ss:$0 sps:$4 sm:$0xff]  }
 0x823   :  { %7102 = vmatprep.subr.bf16.mxu1 %v15368_v45  ;;  %v10405_v45 = vld [vmem:[#allocation2 + $0x74] ss:$0 sps:$4 sm:$0xff]  }
 0x824   :  { %6581 = vmatmul.mubr.bf16.vlgmr.msra.gmra.mrb[96].mxu0 %v10402_v9 }
 0x825   :  { %6787 = vmatmul.mubr.bf16.vlgmr.msra.gmra.mrb[96].mxu1 %v10403_v59  ;;  %6897 = vmatpush1.bf16.msra.mxu0 %v15382_v6  ;;  %v16126_v59 = vld [vmem:[#allocation2 + $0x14] ss:$48 sps:$4 sm:$0xff]  }
 0x826   :  { %7103 = vmatpush1.bf16.msra.mxu1 %v15382_v6  ;;  %6898 = vmatprep.subr.bf16.mxu0 %v15389_v49 }
 0x827   :  { %7104 = vmatprep.subr.bf16.mxu1 %v15389_v49  ;;  %6590 = vmatprep.mubr.bf16.mxu0 %v17463_v38 }
 0x828   :  { %6796 = vmatprep.mubr.bf16.mxu1 %v17463_v38 }
 0x829   :  { %6899 = vmatpush1.bf16.msra.mxu0 %v15396_v14 }
 0x82a   :  { %7105 = vmatpush1.bf16.msra.mxu1 %v15396_v14  ;;  %6900 = vmatprep.subr.bf16.mxu0 %v15403_v21 }
 0x82b   :  { %7106 = vmatprep.subr.bf16.mxu1 %v15403_v21 }
 0x82c   :  { %6591 = vmatmul.mubr.bf16.gmra.mrb[100].mxu0 %v10404_v19 }
 0x82d   :  { %6797 = vmatmul.mubr.bf16.gmra.mrb[100].mxu1 %v10405_v45  ;;  %6901 = vmatpush1.bf16.msra.mxu0 %v15418_v31 }
 0x82e   :  { %6928 = vmatprep.mubr.bf16.mxu0 %v15653_v37  ;;  %7107 = vmatpush1.bf16.msra.mxu1 %v15418_v31 }
 0x82f   :  { %7134 = vmatprep.mubr.bf16.mxu1 %v15661_v54  ;;  %6902 = vmatprep.subr.bf16.mxu0 %v15425_v18 }
 0x830   :  { %7108 = vmatprep.subr.bf16.mxu1 %v15425_v18 }
 0x831   :  { %6903 = vmatpush1.bf16.msra.mxu0 %v15431_v12 }
 0x832   :  { %7109 = vmatpush1.bf16.msra.mxu1 %v15431_v12  ;;  %6904 = vmatprep.subr.bf16.mxu0 %v15437_v35 }
 0x833   :  { %7110 = vmatprep.subr.bf16.mxu1 %v15437_v35 }
 0x835   :  { %6905 = vmatpush1.bf16.msra.mxu0 %v15445_v4 }
 0x836   :  { %7111 = vmatpush1.bf16.msra.mxu1 %v15445_v4  ;;  %6906 = vmatprep.subr.bf16.mxu0 %v15452_v28 }
 0x837   :  { %7112 = vmatprep.subr.bf16.mxu1 %v15452_v28 }
 0x839   :  { %6907 = vmatpush1.bf16.msra.mxu0 %v15459_v40 }
 0x83a   :  { %7113 = vmatpush1.bf16.msra.mxu1 %v15459_v40  ;;  %6908 = vmatprep.subr.bf16.mxu0 %v15466_v51 }
 0x83b   :  { %7114 = vmatprep.subr.bf16.mxu1 %v15466_v51 }
 0x83d   :  { %6909 = vmatpush1.bf16.msra.mxu0 %v15473_v56 }
 0x83e   :  { %7115 = vmatpush1.bf16.msra.mxu1 %v15473_v56  ;;  %6910 = vmatprep.subr.bf16.mxu0 %v15480_v57 }
 0x83f   :  { %7116 = vmatprep.subr.bf16.mxu1 %v15480_v57 }
 0x841   :  { %6911 = vmatpush1.bf16.msra.mxu0 %v15487_v55 }
 0x842   :  { %7117 = vmatpush1.bf16.msra.mxu1 %v15487_v55  ;;  %6912 = vmatprep.subr.bf16.mxu0 %v15494_v13 }
 0x843   :  { %7118 = vmatprep.subr.bf16.mxu1 %v15494_v13 }
 0x845   :  { %6913 = vmatpush1.bf16.msra.mxu0 %v15501_v43 }
 0x846   :  { %7119 = vmatpush1.bf16.msra.mxu1 %v15501_v43  ;;  %6914 = vmatprep.subr.bf16.mxu0 %v15508_v47 }
 0x847   :  { %7120 = vmatprep.subr.bf16.mxu1 %v15508_v47 }
 0x849   :  { %6915 = vmatpush1.bf16.msra.mxu0 %v15515_v8 }
 0x84a   :  { %7121 = vmatpush1.bf16.msra.mxu1 %v15515_v8  ;;  %6916 = vmatprep.subr.bf16.mxu0 %v15522_v50 }
 0x84b   :  { %7122 = vmatprep.subr.bf16.mxu1 %v15522_v50 }
 0x84d   :  { %6917 = vmatpush1.bf16.msra.mxu0 %v15529_v58 }
 0x84e   :  { %7123 = vmatpush1.bf16.msra.mxu1 %v15529_v58  ;;  %6918 = vmatprep.subr.bf16.mxu0 %v15536_v15 }
 0x84f   :  { %7124 = vmatprep.subr.bf16.mxu1 %v15536_v15 }
 0x851   :  { %6919 = vmatpush1.bf16.msra.mxu0 %v15543_v20 }
 0x852   :  { %7125 = vmatpush1.bf16.msra.mxu1 %v15543_v20  ;;  %6920 = vmatprep.subr.bf16.mxu0 %v15550_v42 }
 0x853   :  { %7126 = vmatprep.subr.bf16.mxu1 %v15550_v42 }
 0x855   :  { %6921 = vmatpush1.bf16.msra.mxu0 %v15557_v53  ;;  %v5732_v6 = vpop.f32.mrb[88].mxu0  ;;  %v5938_v49 = vpop.f32.mrb[88].mxu1 }
 0x856   :  { %7127 = vmatpush1.bf16.msra.mxu1 %v15557_v53  ;;  %v5955_v14 = vmax.f32 %v5732_v6, %v5938_v49  ;;  %v5734_v21 = vpop.f32.mrb[89].mxu0  ;;  %v5940_v31 = vpop.f32.mrb[89].mxu1  ;;  %6922 = vmatprep.subr.bf16.mxu0 %v15564_v10  ;;  %v17826_v49 = vld [vmem:[#allocation12_spill] sm:$0xff] }
 0x857   :  { %v5956_v18 = vmax.f32 %v5734_v21, %v5940_v31  ;;  %7128 = vmatprep.subr.bf16.mxu1 %v15564_v10  ;;  %v5736_v12 = vpop.f32.mrb[90].mxu0  ;;  %v5942_v35 = vpop.f32.mrb[90].mxu1  ;;  %v17827_v21 = vld [vmem:[#allocation13_spill] sm:$0xff] }
 0x858   :  { %v5957_v4 = vmax.f32 %v5736_v12, %v5942_v35  ;;  %v5738_v28 = vpop.f32.mrb[91].mxu0  ;;  %v5944_v40 = vpop.f32.mrb[91].mxu1  ;;  %v17829_v12 = vld [vmem:[#allocation15_spill] sm:$0xff]  ;;  %v17830_v35 = vld [vmem:[#allocation16_spill] sm:$0xff] }
 0x859   :  { %v5961_v51 = vmax.f32 %v5955_v14, %v5956_v18  ;;  %6923 = vmatpush1.bf16.msra.mxu0 %v15571_v0  ;;  %v5958_v56 = vmax.f32 %v5738_v28, %v5944_v40  ;;  %v17828_v18 = vld [vmem:[#allocation14_spill] sm:$0xff]  ;;  %v17833_v40 = vld [vmem:[#allocation19_spill] sm:$0xff] }
 0x85a   :  { %7129 = vmatpush1.bf16.msra.mxu1 %v15571_v0  ;;  %6924 = vmatprep.subr.bf16.mxu0 %v15578_v30  ;;  %v17832_v28 = vld [vmem:[#allocation18_spill] sm:$0xff] }
 0x85b   :  { %v5971_v57 = vadd.f32 %v15590_v23, %v5961_v51  ;;  %v5962_v55 = vmax.f32 %v5957_v4, %v5958_v56  ;;  %7130 = vmatprep.subr.bf16.mxu1 %v15578_v30  ;;  %v17831_v4 = vld [vmem:[#allocation17_spill] sm:$0xff]  ;;  %v17834_v51 = vld [vmem:[#allocation20_spill] sm:$0xff] }
 0x85c   :  { %v17835_v56 = vld [vmem:[#allocation21_spill] sm:$0xff] }
 0x85d   :  { %v5974_v13 = vmax.f32 %v5971_v57, 0.0  ;;  %v5972_v43 = vadd.f32 %v15590_v23, %v5962_v55  ;;  %6925 = vmatpush1.bf16.msra.mxu0 %v15585_v62  ;;  %v5742_v47 = vpop.f32.mrb[92].mxu0  ;;  %v5948_v8 = vpop.f32.mrb[92].mxu1  ;;  %v17836_v57 = vld [vmem:[#allocation22_spill] sm:$0xff]  ;;  %v10416_v55 = vld [vmem:[#allocation2 + $0x18] ss:$48 sps:$4 sm:$0xff]  }
 0x85e   :  { %7131 = vmatpush1.bf16.msra.mxu1 %v15585_v62  ;;  %v5959_v50 = vmax.f32 %v5742_v47, %v5948_v8  ;;  %v5744_v58 = vpop.f32.mrb[93].mxu0  ;;  %v5950_v15 = vpop.f32.mrb[93].mxu1  ;;  %6926 = vmatprep.subr.bf16.mxu0 %v15597_v34  ;;  %v16185_v47 = vld [vmem:[%s16977_s3] ss:$8 sps:$4 sm:$0xff]   ;;  %v16192_v8 = vld [vmem:[%s16977_s3 + $0x14] ss:$8 sps:$4 sm:$0xff]  }
 0x85f   :  { %v9350_v20 = vpack.c.bf16 %v5974_v13, %v5974_v13  ;;  %v5975_v42 = vmax.f32 %v5972_v43, 0.0  ;;  %v5960_v53 = vmax.f32 %v5744_v58, %v5950_v15  ;;  %7132 = vmatprep.subr.bf16.mxu1 %v15597_v34  ;;  %v5746_v10 = vpop.f32.mrb[94].mxu0  ;;  %v5952_v0 = vpop.f32.mrb[94].mxu1  ;;  %v16178_v13 = vld [vmem:[%s16977_s3 + $0x4] ss:$8 sps:$4 sm:$0xff]  }
 0x860   :  { %v5747_v30 = vpop.f32.mrb[95].mxu0  ;;  %v5953_v37 = vpop.f32.mrb[95].mxu1  ;;  %v10417_v43 = vld [vmem:[#allocation2 + $0x1c] ss:$48 sps:$4 sm:$0xff]   ;;  %v10418_v58 = vld [vmem:[#allocation2 + $0x78] ss:$0 sps:$4 sm:$0xff]  }
 0x861   :  { %5990 = vst [vmem:[#allocation2 + $0x2c] sm:$0xf] %v9350_v20  ;;  %v9351_v54 = vpack.c.bf16 %v5975_v42, %v5975_v42  ;;  %v5963_v9 = vmax.f32 %v5959_v50, %v5960_v53  ;;  %6927 = vmatpush1.bf16.msra.mxu0 %v15605_v46  ;;  %v16201_v50 = vld [vmem:[%s16977_s3 + $0x10] ss:$8 sps:$4 sm:$0xff]   ;;  %v16208_v15 = vld [vmem:[%s16977_s3 + $0x24] ss:$8 sps:$4 sm:$0xff]  }
 0x862   :  { %7133 = vmatpush1.bf16.msra.mxu1 %v15605_v46  ;;  %6947 = vmatprep.subr.bf16.mxu0 %v15612_v52  ;;  %v16064_v46 = vld [vmem:[#allocation2 + $0x18] ss:$48 sps:$4 sm:$0xff]   ;;  %v10419_v20 = vld [vmem:[#allocation2 + $0x7c] ss:$0 sps:$4 sm:$0xff]   ;;  %v16238_v0 = vld [vmem:[%s16977_s3 + $0x44] ss:$8 sps:$4 sm:$0xff]  }
 0x863   :  { %5991 = vst [vmem:[#allocation2 + $0x5c] sm:$0xf] %v9351_v54  ;;  %v5973_v62 = vadd.f32 %v15590_v23, %v5963_v9  ;;  %7153 = vmatprep.subr.bf16.mxu1 %v15612_v52  ;;  %v16060_v23 = vld [vmem:[#allocation2 + $0x14] ss:$48 sps:$4 sm:$0xff]   ;;  %v17808_v52 = vld [vmem:[#allocation23_spill] sm:$0xff] }
 0x864   :  { %6929 = vmatmul.mubr.bf16.vlgmr.msra.gmra.mrb[104].mxu0 %v15848_v39  ;;  %v17824_v39 = vld [vmem:[#allocation10_spill] sm:$0xff]  ;;  %v16215_v42 = vld [vmem:[%s16977_s3 + $0x20] ss:$8 sps:$4 sm:$0xff]   ;;  %v16266_v9 = vld [vmem:[%s16977_s3 + $0x64] ss:$8 sps:$4 sm:$0xff]  }
 0x865   :  { %v5976_v34 = vmax.f32 %v5973_v62, 0.0  ;;  %7135 = vmatmul.mubr.bf16.vlgmr.msra.gmra.mrb[104].mxu1 %v15857_v25  ;;  %6938 = vmatprep.mubr.bf16.mxu0 %v15860_v60  ;;  %v6850_v25 = vld [vmem:[#allocation2 + $0x70] sm:$0xff]  ;;  %v16245_v30 = vld [vmem:[%s16977_s3 + $0x40] ss:$8 sps:$4 sm:$0xff]  }
 0x866   :  { %6948 = vmatpush1.bf16.msra.mxu0 %v15622_v32  ;;  %7144 = vmatprep.mubr.bf16.mxu1 %v15868_v11  ;;  %v16122_v60 = vld [vmem:[#allocation2 + $0x10] ss:$48 sps:$4 sm:$0xff]   ;;  %v17825_v11 = vld [vmem:[#allocation11_spill] sm:$0xff]  ;;  %v16129_v45 = vcombine.high %v6850_v25, %v6850_v25  ;;  %v16142_v14 = vcombine.low %v6850_v25, %v6850_v25 }
 0x867   :  { %v9352_v19 = vpack.c.bf16 %v5976_v34, %v5976_v34  ;;  %7154 = vmatpush1.bf16.msra.mxu1 %v15622_v32  ;;  %6949 = vmatprep.subr.bf16.mxu0 %v15628_v61  ;;  %v17809_v32 = vld [vmem:[#allocation24_spill] sm:$0xff]  ;;  %v16224_v53 = vld [vmem:[%s16977_s3 + $0x34] ss:$8 sps:$4 sm:$0xff]   ;;  %v16231_v10 = vld [vmem:[%s16977_s3 + $0x30] ss:$8 sps:$4 sm:$0xff]  }
 0x868   :  { %7155 = vmatprep.subr.bf16.mxu1 %v15628_v61  ;;  %v17810_v61 = vld [vmem:[#allocation25_spill] sm:$0xff]  ;;  %17837 = vst [vmem:[#allocation23_spill] sm:$0xff] %v16224_v53  ;;  %17838 = vst [vmem:[#allocation24_spill] sm:$0xff] %v16231_v10  ;;  %v16252_v37 = vld [vmem:[%s16977_s3 + $0x54] ss:$8 sps:$4 sm:$0xff]  }
 0x869   :  { %5992 = vst [vmem:[#allocation2 + $0x8c] sm:$0xf] %v9352_v19  ;;  %17839 = vst [vmem:[#allocation25_spill] sm:$0xff] %v16238_v0  ;;  %v16259_v54 = vld [vmem:[%s16977_s3 + $0x50] ss:$8 sps:$4 sm:$0xff]  }
 0x86a   :  { %6950 = vmatpush1.bf16.msra.mxu0 %v15635_v29  ;;  %v16273_v62 = vld [vmem:[%s16977_s3 + $0x60] ss:$8 sps:$4 sm:$0xff]   ;;  %v16280_v34 = vld [vmem:[%s16977_s3 + $0x74] ss:$8 sps:$4 sm:$0xff]   ;;  %v16287_v19 = vld [vmem:[%s16977_s3 + $0x70] ss:$8 sps:$4 sm:$0xff]  }
 0x86b   :  { %7156 = vmatpush1.bf16.msra.mxu1 %v15635_v29  ;;  %6951 = vmatprep.subr.bf16.mxu0 %v15642_v36  ;;  %v17811_v29 = vld [vmem:[#allocation26_spill] sm:$0xff] }
 0x86c   :  { %6939 = vmatmul.mubr.bf16.gmra.mrb[108].mxu0 %v15888_v1  ;;  %7157 = vmatprep.subr.bf16.mxu1 %v15642_v36  ;;  %v17812_v36 = vld [vmem:[#allocation27_spill] sm:$0xff]  ;;  %v17823_v1 = vld [vmem:[#allocation9_spill] sm:$0xff]  ;;  %17840 = vst [vmem:[#allocation26_spill] sm:$0xff] %v16245_v30 }
 0x86d   :  { %7145 = vmatmul.mubr.bf16.gmra.mrb[108].mxu1 %v15897_v22  ;;  %6979 = vmatprep.mubr.bf16.mxu0 %v16060_v23  ;;  %v7056_v22 = vld [vmem:[#allocation2 + $0x74] sm:$0xff]  ;;  %17841 = vst [vmem:[#allocation27_spill] sm:$0xff] %v16252_v37 }
 0x86e   :  { %6952 = vmatpush1.bf16.msra.mxu0 %v15649_v17  ;;  %7185 = vmatprep.mubr.bf16.mxu1 %v16064_v46  ;;  %v16132_v6 = vcombine.high %v7056_v22, %v7056_v22  ;;  %v16146_v31 = vcombine.low %v7056_v22, %v7056_v22  ;;  %v16308_v25 = vld [vmem:[%s16977_s3 + $0x94] ss:$8 sps:$4 sm:$0xff]   ;;  %v16315_v22 = vld [vmem:[%s16977_s3 + $0x90] ss:$8 sps:$4 sm:$0xff]  }
 0x86f   :  { %7158 = vmatpush1.bf16.msra.mxu1 %v15649_v17  ;;  %6953 = vmatprep.subr.bf16.mxu0 %v15658_v27  ;;  %v17813_v17 = vld [vmem:[#allocation28_spill] sm:$0xff] }
 0x870   :  { %7159 = vmatprep.subr.bf16.mxu1 %v15658_v27  ;;  %v17814_v27 = vld [vmem:[#allocation29_spill] sm:$0xff]  ;;  %17842 = vst [vmem:[#allocation28_spill] sm:$0xff] %v16259_v54 }
 0x871   :  { %17843 = vst [vmem:[#allocation29_spill] sm:$0xff] %v16266_v9 }
 0x872   :  { %6954 = vmatpush1.bf16.msra.mxu0 %v15669_v16 }
 0x873   :  { %7160 = vmatpush1.bf16.msra.mxu1 %v15669_v16  ;;  %6955 = vmatprep.subr.bf16.mxu0 %v15676_v41  ;;  %v17815_v16 = vld [vmem:[#allocation30_spill] sm:$0xff] }
 0x874   :  { %7161 = vmatprep.subr.bf16.mxu1 %v15676_v41  ;;  %v17816_v41 = vld [vmem:[#allocation31_spill] sm:$0xff]  ;;  %17844 = vst [vmem:[#allocation30_spill] sm:$0xff] %v16273_v62 }
 0x875   :  { %17845 = vst [vmem:[#allocation31_spill] sm:$0xff] %v16280_v34 }
 0x876   :  { %6956 = vmatpush1.bf16.msra.mxu0 %v15683_v48 }
 0x877   :  { %7162 = vmatpush1.bf16.msra.mxu1 %v15683_v48  ;;  %6957 = vmatprep.subr.bf16.mxu0 %v15690_v7  ;;  %v17817_v48 = vld [vmem:[#allocation4_spill] sm:$0xff] }
 0x878   :  { %7163 = vmatprep.subr.bf16.mxu1 %v15690_v7  ;;  %v17818_v7 = vld [vmem:[#allocation5_spill] sm:$0xff]  ;;  %17846 = vst [vmem:[#allocation4_spill] sm:$0xff] %v16287_v19 }
 0x87a   :  { %6958 = vmatpush1.bf16.msra.mxu0 %v15697_v33 }
 0x87b   :  { %7164 = vmatpush1.bf16.msra.mxu1 %v15697_v33  ;;  %6959 = vmatprep.subr.bf16.mxu0 %v15704_v44  ;;  %v17819_v33 = vld [vmem:[#allocation6_spill] sm:$0xff] }
 0x87c   :  { %7165 = vmatprep.subr.bf16.mxu1 %v15704_v44  ;;  %v17820_v44 = vld [vmem:[#allocation7_spill] sm:$0xff] }
 0x87d   :  { %17849 = vst [vmem:[#allocation7_spill] sm:$0xff] %v16308_v25 }
 0x87e   :  { %6960 = vmatpush1.bf16.msra.mxu0 %v15711_v2 }
 0x87f   :  { %7166 = vmatpush1.bf16.msra.mxu1 %v15711_v2  ;;  %6961 = vmatprep.subr.bf16.mxu0 %v15718_v3  ;;  %v17821_v2 = vld [vmem:[#allocation32_spill] sm:$0xff] }
 0x880   :  { %7167 = vmatprep.subr.bf16.mxu1 %v15718_v3  ;;  %v17822_v3 = vld [vmem:[#allocation8_spill] sm:$0xff]  ;;  %17850 = vst [vmem:[#allocation32_spill] sm:$0xff] %v16315_v22 }
 0x882   :  { %6962 = vmatpush1.bf16.msra.mxu0 %v17808_v52 }
 0x883   :  { %7168 = vmatpush1.bf16.msra.mxu1 %v17808_v52  ;;  %6963 = vmatprep.subr.bf16.mxu0 %v17809_v32 }
 0x884   :  { %7169 = vmatprep.subr.bf16.mxu1 %v17809_v32 }
 0x886   :  { %6964 = vmatpush1.bf16.msra.mxu0 %v17810_v61 }
 0x887   :  { %7170 = vmatpush1.bf16.msra.mxu1 %v17810_v61  ;;  %6965 = vmatprep.subr.bf16.mxu0 %v17811_v29 }
 0x888   :  { %7171 = vmatprep.subr.bf16.mxu1 %v17811_v29 }
 0x88a   :  { %6966 = vmatpush1.bf16.msra.mxu0 %v17812_v36 }
 0x88b   :  { %7172 = vmatpush1.bf16.msra.mxu1 %v17812_v36  ;;  %6967 = vmatprep.subr.bf16.mxu0 %v17813_v17 }
 0x88c   :  { %7173 = vmatprep.subr.bf16.mxu1 %v17813_v17 }
 0x88e   :  { %6968 = vmatpush1.bf16.msra.mxu0 %v17814_v27 }
 0x88f   :  { %7174 = vmatpush1.bf16.msra.mxu1 %v17814_v27  ;;  %6969 = vmatprep.subr.bf16.mxu0 %v17815_v16 }
 0x890   :  { %7175 = vmatprep.subr.bf16.mxu1 %v17815_v16 }
 0x892   :  { %6970 = vmatpush1.bf16.msra.mxu0 %v17816_v41 }
 0x893   :  { %7176 = vmatpush1.bf16.msra.mxu1 %v17816_v41  ;;  %6971 = vmatprep.subr.bf16.mxu0 %v17817_v48 }
 0x894   :  { %7177 = vmatprep.subr.bf16.mxu1 %v17817_v48 }
 0x896   :  { %6972 = vmatpush1.bf16.msra.mxu0 %v17818_v7 }
 0x897   :  { %7178 = vmatpush1.bf16.msra.mxu1 %v17818_v7  ;;  %6973 = vmatprep.subr.bf16.mxu0 %v17819_v33 }
 0x898   :  { %7179 = vmatprep.subr.bf16.mxu1 %v17819_v33 }
 0x89a   :  { %6974 = vmatpush1.bf16.msra.mxu0 %v17820_v44 }
 0x89b   :  { %7180 = vmatpush1.bf16.msra.mxu1 %v17820_v44  ;;  %6975 = vmatprep.subr.bf16.mxu0 %v17821_v2 }
 0x89c   :  { %7181 = vmatprep.subr.bf16.mxu1 %v17821_v2 }
 0x89e   :  { %6976 = vmatpush1.bf16.msra.mxu0 %v17822_v3 }
 0x89f   :  { %7182 = vmatpush1.bf16.msra.mxu1 %v17822_v3  ;;  %6977 = vmatprep.subr.bf16.mxu0 %v17823_v1 }
 0x8a0   :  { %7183 = vmatprep.subr.bf16.mxu1 %v17823_v1 }
 0x8a2   :  { %6978 = vmatpush1.bf16.msra.mxu0 %v17824_v39 }
 0x8a3   :  { %7184 = vmatpush1.bf16.msra.mxu1 %v17824_v39  ;;  %6998 = vmatprep.subr.bf16.mxu0 %v17825_v11 }
 0x8a4   :  { %7204 = vmatprep.subr.bf16.mxu1 %v17825_v11 }
 0x8a5   :  { %6980 = vmatmul.mubr.bf16.vlgmr.msra.gmra.mrb[104].mxu0 %v16122_v60 }
 0x8a6   :  { %7186 = vmatmul.mubr.bf16.vlgmr.msra.gmra.mrb[104].mxu1 %v16126_v59  ;;  %6989 = vmatprep.mubr.bf16.mxu0 %v16129_v45 }
 0x8a7   :  { %6999 = vmatpush1.bf16.msra.mxu0 %v17826_v49  ;;  %7195 = vmatprep.mubr.bf16.mxu1 %v16132_v6 }
 0x8a8   :  { %7205 = vmatpush1.bf16.msra.mxu1 %v17826_v49  ;;  %7000 = vmatprep.subr.bf16.mxu0 %v15865_v5 }
 0x8a9   :  { %7206 = vmatprep.subr.bf16.mxu1 %v15865_v5 }
 0x8ab   :  { %7001 = vmatpush1.bf16.msra.mxu0 %v15877_v26 }
 0x8ac   :  { %7207 = vmatpush1.bf16.msra.mxu1 %v15877_v26  ;;  %7002 = vmatprep.subr.bf16.mxu0 %v17827_v21 }
 0x8ad   :  { %6990 = vmatmul.mubr.bf16.gmra.mrb[108].mxu0 %v16142_v14  ;;  %7208 = vmatprep.subr.bf16.mxu1 %v17827_v21 }
 0x8ae   :  { %7196 = vmatmul.mubr.bf16.gmra.mrb[108].mxu1 %v16146_v31  ;;  %7030 = vmatprep.mubr.bf16.mxu0 %v17463_v38 }
 0x8af   :  { %7003 = vmatpush1.bf16.msra.mxu0 %v17828_v18  ;;  %7236 = vmatprep.mubr.bf16.mxu1 %v17463_v38 }
 0x8b0   :  { %7209 = vmatpush1.bf16.msra.mxu1 %v17828_v18  ;;  %7004 = vmatprep.subr.bf16.mxu0 %v17829_v12 }
 0x8b1   :  { %7210 = vmatprep.subr.bf16.mxu1 %v17829_v12 }
 0x8b3   :  { %7005 = vmatpush1.bf16.msra.mxu0 %v17830_v35 }
 0x8b4   :  { %7211 = vmatpush1.bf16.msra.mxu1 %v17830_v35  ;;  %7006 = vmatprep.subr.bf16.mxu0 %v17831_v4 }
 0x8b5   :  { %7212 = vmatprep.subr.bf16.mxu1 %v17831_v4 }
 0x8b7   :  { %7007 = vmatpush1.bf16.msra.mxu0 %v17832_v28 }
 0x8b8   :  { %7213 = vmatpush1.bf16.msra.mxu1 %v17832_v28  ;;  %7008 = vmatprep.subr.bf16.mxu0 %v17833_v40 }
 0x8b9   :  { %7214 = vmatprep.subr.bf16.mxu1 %v17833_v40 }
 0x8bb   :  { %7009 = vmatpush1.bf16.msra.mxu0 %v17834_v51 }
 0x8bc   :  { %7215 = vmatpush1.bf16.msra.mxu1 %v17834_v51  ;;  %7010 = vmatprep.subr.bf16.mxu0 %v17835_v56 }
 0x8bd   :  { %7216 = vmatprep.subr.bf16.mxu1 %v17835_v56 }
 0x8bf   :  { %7011 = vmatpush1.bf16.msra.mxu0 %v15955_v24 }
 0x8c0   :  { %7217 = vmatpush1.bf16.msra.mxu1 %v15955_v24  ;;  %7012 = vmatprep.subr.bf16.mxu0 %v15962_v63 }
 0x8c1   :  { %7218 = vmatprep.subr.bf16.mxu1 %v15962_v63 }
 0x8c3   :  { %7013 = vmatpush1.bf16.msra.mxu0 %v17836_v57 }
 0x8c4   :  { %7219 = vmatpush1.bf16.msra.mxu1 %v17836_v57  ;;  %7346 = vmatprep.subr.bf16.mxu0 %v16178_v13 }
 0x8c5   :  { %7552 = vmatprep.subr.bf16.mxu1 %v16178_v13 }
 0x8c6   :  { %7031 = vmatmul.mubr.bf16.vlgmr.msra.gmra.mrb[104].mxu0 %v10416_v55  ;;  %v16322_v55 = vld [vmem:[%s16977_s3 + $0xa4] ss:$8 sps:$4 sm:$0xff]  }
 0x8c7   :  { %7237 = vmatmul.mubr.bf16.vlgmr.msra.gmra.mrb[104].mxu1 %v10417_v43  ;;  %7347 = vmatpush1.bf16.msra.mxu0 %v16185_v47  ;;  %17851 = vst [vmem:[#allocation8_spill] sm:$0xff] %v16322_v55  ;;  %v16329_v43 = vld [vmem:[%s16977_s3 + $0xa0] ss:$8 sps:$4 sm:$0xff]  }
 0x8c8   :  { %7553 = vmatpush1.bf16.msra.mxu1 %v16185_v47  ;;  %7348 = vmatprep.subr.bf16.mxu0 %v16192_v8  ;;  %17852 = vst [vmem:[#allocation9_spill] sm:$0xff] %v16329_v43 }
 0x8c9   :  { %7554 = vmatprep.subr.bf16.mxu1 %v16192_v8  ;;  %7040 = vmatprep.mubr.bf16.mxu0 %v17463_v38 }
 0x8ca   :  { %7246 = vmatprep.mubr.bf16.mxu1 %v17463_v38 }
 0x8cb   :  { %7349 = vmatpush1.bf16.msra.mxu0 %v16201_v50 }
 0x8cc   :  { %7555 = vmatpush1.bf16.msra.mxu1 %v16201_v50  ;;  %7350 = vmatprep.subr.bf16.mxu0 %v16208_v15 }
 0x8cd   :  { %7556 = vmatprep.subr.bf16.mxu1 %v16208_v15 }
 0x8ce   :  { %7041 = vmatmul.mubr.bf16.gmra.mrb[108].mxu0 %v10418_v58  ;;  %v16336_v58 = vld [vmem:[%s16977_s3 + $0xb4] ss:$8 sps:$4 sm:$0xff]  }
 0x8cf   :  { %7247 = vmatmul.mubr.bf16.gmra.mrb[108].mxu1 %v10419_v20  ;;  %7351 = vmatpush1.bf16.msra.mxu0 %v16215_v42  ;;  %17853 = vst [vmem:[#allocation10_spill] sm:$0xff] %v16336_v58  ;;  %v16343_v20 = vld [vmem:[%s16977_s3 + $0xb0] ss:$8 sps:$4 sm:$0xff]  }
 0x8d0   :  { %7378 = vmatprep.mubr.bf16.mxu0 %v16060_v23  ;;  %7557 = vmatpush1.bf16.msra.mxu1 %v16215_v42  ;;  %v16294_v23 = vld [vmem:[%s16977_s3 + $0x84] ss:$8 sps:$4 sm:$0xff]   ;;  %17854 = vst [vmem:[#allocation11_spill] sm:$0xff] %v16343_v20 }
 0x8d1   :  { %7584 = vmatprep.mubr.bf16.mxu1 %v16064_v46  ;;  %7352 = vmatprep.subr.bf16.mxu0 %v16224_v53  ;;  %17847 = vst [vmem:[#allocation5_spill] sm:$0xff] %v16294_v23  ;;  %v16301_v46 = vld [vmem:[%s16977_s3 + $0x80] ss:$8 sps:$4 sm:$0xff]  }
 0x8d2   :  { %7558 = vmatprep.subr.bf16.mxu1 %v16224_v53  ;;  %17848 = vst [vmem:[#allocation6_spill] sm:$0xff] %v16301_v46 }
 0x8d3   :  { %7353 = vmatpush1.bf16.msra.mxu0 %v16231_v10 }
 0x8d4   :  { %7559 = vmatpush1.bf16.msra.mxu1 %v16231_v10  ;;  %7354 = vmatprep.subr.bf16.mxu0 %v16238_v0 }
 0x8d5   :  { %7560 = vmatprep.subr.bf16.mxu1 %v16238_v0 }
 0x8d7   :  { %7355 = vmatpush1.bf16.msra.mxu0 %v16245_v30 }
 0x8d8   :  { %7561 = vmatpush1.bf16.msra.mxu1 %v16245_v30  ;;  %7356 = vmatprep.subr.bf16.mxu0 %v16252_v37 }
 0x8d9   :  { %7562 = vmatprep.subr.bf16.mxu1 %v16252_v37 }
 0x8db   :  { %7357 = vmatpush1.bf16.msra.mxu0 %v16259_v54 }
 0x8dc   :  { %7563 = vmatpush1.bf16.msra.mxu1 %v16259_v54  ;;  %7358 = vmatprep.subr.bf16.mxu0 %v16266_v9  ;;  %v16376_v54 = vld [vmem:[%s16977_s3 + $0xd0] ss:$8 sps:$4 sm:$0xff]  }
 0x8dd   :  { %7564 = vmatprep.subr.bf16.mxu1 %v16266_v9  ;;  %17858 = vst [vmem:[#allocation15_spill] sm:$0xff] %v16376_v54 }
 0x8df   :  { %7359 = vmatpush1.bf16.msra.mxu0 %v16273_v62 }
 0x8e0   :  { %7565 = vmatpush1.bf16.msra.mxu1 %v16273_v62  ;;  %7360 = vmatprep.subr.bf16.mxu0 %v16280_v34 }
 0x8e1   :  { %7566 = vmatprep.subr.bf16.mxu1 %v16280_v34 }
 0x8e3   :  { %7361 = vmatpush1.bf16.msra.mxu0 %v16287_v19 }
 0x8e4   :  { %7567 = vmatpush1.bf16.msra.mxu1 %v16287_v19  ;;  %7362 = vmatprep.subr.bf16.mxu0 %v16294_v23 }
 0x8e5   :  { %7568 = vmatprep.subr.bf16.mxu1 %v16294_v23 }
 0x8e7   :  { %7363 = vmatpush1.bf16.msra.mxu0 %v16301_v46 }
 0x8e8   :  { %7569 = vmatpush1.bf16.msra.mxu1 %v16301_v46  ;;  %7364 = vmatprep.subr.bf16.mxu0 %v16308_v25 }
 0x8e9   :  { %7570 = vmatprep.subr.bf16.mxu1 %v16308_v25  ;;  %v16364_v25 = vld [vmem:[%s16977_s3 + $0xd4] ss:$8 sps:$4 sm:$0xff]  }
 0x8ea   :  { %17857 = vst [vmem:[#allocation14_spill] sm:$0xff] %v16364_v25 }
 0x8eb   :  { %7365 = vmatpush1.bf16.msra.mxu0 %v16315_v22 }
 0x8ec   :  { %7571 = vmatpush1.bf16.msra.mxu1 %v16315_v22  ;;  %7366 = vmatprep.subr.bf16.mxu0 %v16322_v55 }
 0x8ed   :  { %7572 = vmatprep.subr.bf16.mxu1 %v16322_v55 }
 0x8ef   :  { %7367 = vmatpush1.bf16.msra.mxu0 %v16329_v43 }
 0x8f0   :  { %7573 = vmatpush1.bf16.msra.mxu1 %v16329_v43  ;;  %7368 = vmatprep.subr.bf16.mxu0 %v16336_v58  ;;  %v16350_v43 = vld [vmem:[%s16977_s3 + $0xc4] ss:$8 sps:$4 sm:$0xff]  }
 0x8f1   :  { %7574 = vmatprep.subr.bf16.mxu1 %v16336_v58  ;;  %17855 = vst [vmem:[#allocation12_spill] sm:$0xff] %v16350_v43  ;;  %v16357_v58 = vld [vmem:[%s16977_s3 + $0xc0] ss:$8 sps:$4 sm:$0xff]  }
 0x8f2   :  { %17856 = vst [vmem:[#allocation13_spill] sm:$0xff] %v16357_v58 }
 0x8f3   :  { %7369 = vmatpush1.bf16.msra.mxu0 %v16343_v20 }
 0x8f4   :  { %7575 = vmatpush1.bf16.msra.mxu1 %v16343_v20  ;;  %7370 = vmatprep.subr.bf16.mxu0 %v16350_v43 }
 0x8f5   :  { %7576 = vmatprep.subr.bf16.mxu1 %v16350_v43 }
 0x8f7   :  { %7371 = vmatpush1.bf16.msra.mxu0 %v16357_v58  ;;  %v6582_v55 = vpop.f32.mrb[96].mxu0 }
 0x8f8   :  { %7577 = vmatpush1.bf16.msra.mxu1 %v16357_v58  ;;  %v6788_v20 = vpop.f32.mrb[96].mxu1  ;;  %v6584_v22 = vpop.f32.mrb[97].mxu0  ;;  %7372 = vmatprep.subr.bf16.mxu0 %v16364_v25  ;;  %v16371_v58 = vld [vmem:[%s16978_s4] ss:$0 sm:$0xff] }
 0x8f9   :  { %v6805_v43 = vmax.f32 %v6582_v55, %v6788_v20  ;;  %v6790_v46 = vpop.f32.mrb[97].mxu1  ;;  %7578 = vmatprep.subr.bf16.mxu1 %v16364_v25  ;;  %v6586_v23 = vpop.f32.mrb[98].mxu0  ;;  %v16391_v25 = vld [vmem:[%s16977_s3 + $0xe0] ss:$8 sps:$4 sm:$0xff]  }
 0x8fa   :  { %v6806_v19 = vmax.f32 %v6584_v22, %v6790_v46  ;;  %v6792_v34 = vpop.f32.mrb[98].mxu1  ;;  %v6588_v62 = vpop.f32.mrb[99].mxu0  ;;  %v16383_v22 = vld [vmem:[%s16977_s3 + $0xe4] ss:$8 sps:$4 sm:$0xff]   ;;  %17860 = vst [vmem:[#allocation17_spill] sm:$0xff] %v16391_v25 }
 0x8fb   :  { %v6807_v9 = vmax.f32 %v6586_v23, %v6792_v34  ;;  %7373 = vmatpush1.bf16.msra.mxu0 %v16376_v54  ;;  %v6794_v55 = vpop.f32.mrb[99].mxu1  ;;  %17859 = vst [vmem:[#allocation16_spill] sm:$0xff] %v16383_v22 }
 0x8fc   :  { %v6811_v20 = vmax.f32 %v6805_v43, %v6806_v19  ;;  %7579 = vmatpush1.bf16.msra.mxu1 %v16376_v54  ;;  %v6808_v46 = vmax.f32 %v6588_v62, %v6794_v55  ;;  %7374 = vmatprep.subr.bf16.mxu0 %v16383_v22 }
 0x8fd   :  { %7580 = vmatprep.subr.bf16.mxu1 %v16383_v22 }
 0x8fe   :  { %v6821_v34 = vadd.f32 %v16371_v58, %v6811_v20  ;;  %v6812_v23 = vmax.f32 %v6807_v9, %v6808_v46  ;;  %v16399_v20 = vld [vmem:[%s16977_s3 + $0xf4] ss:$8 sps:$4 sm:$0xff]  }
 0x8ff   :  { %7375 = vmatpush1.bf16.msra.mxu0 %v16391_v25  ;;  %v6592_v62 = vpop.f32.mrb[100].mxu0 }
 0x900   :  { %v6824_v19 = vmax.f32 %v6821_v34, 0.0  ;;  %v6822_v43 = vadd.f32 %v16371_v58, %v6812_v23  ;;  %7581 = vmatpush1.bf16.msra.mxu1 %v16391_v25  ;;  %v6798_v55 = vpop.f32.mrb[100].mxu1  ;;  %v6594_v54 = vpop.f32.mrb[101].mxu0  ;;  %7376 = vmatprep.subr.bf16.mxu0 %v16399_v20  ;;  %v16406_v25 = vld [vmem:[%s16977_s3 + $0xf0] ss:$8 sps:$4 sm:$0xff]  }
 0x901   :  { %v6809_v9 = vmax.f32 %v6592_v62, %v6798_v55  ;;  %v6800_v46 = vpop.f32.mrb[101].mxu1  ;;  %7582 = vmatprep.subr.bf16.mxu1 %v16399_v20  ;;  %v6596_v22 = vpop.f32.mrb[102].mxu0  ;;  %v16496_v55 = vld [vmem:[%s16977_s3 + $0x154] ss:$8 sps:$4 sm:$0xff]  }
 0x902   :  { %v9353_v37 = vpack.c.bf16 %v6824_v19, %v6824_v19  ;;  %v6825_v34 = vmax.f32 %v6822_v43, 0.0  ;;  %v6810_v30 = vmax.f32 %v6594_v54, %v6800_v46  ;;  %v6802_v23 = vpop.f32.mrb[102].mxu1  ;;  %v6597_v0 = vpop.f32.mrb[103].mxu0  ;;  %v16413_v22 = vld [vmem:[%s16977_s3 + $0x104] ss:$8 sps:$4 sm:$0xff]  }
 0x903   :  { %7377 = vmatpush1.bf16.msra.mxu0 %v16406_v25  ;;  %v6803_v10 = vpop.f32.mrb[103].mxu1  ;;  %v16460_v54 = vld [vmem:[%s16977_s3 + $0x120] ss:$8 sps:$4 sm:$0xff]   ;;  %v16482_v19 = vld [vmem:[%s16977_s3 + $0x144] ss:$8 sps:$4 sm:$0xff]  }
 0x904   :  { %6840 = vst [vmem:[#allocation3] sm:$0xf] %v9353_v37  ;;  %v9354_v53 = vpack.c.bf16 %v6825_v34, %v6825_v34  ;;  %v6813_v62 = vmax.f32 %v6809_v9, %v6810_v30  ;;  %7583 = vmatpush1.bf16.msra.mxu1 %v16406_v25  ;;  %7397 = vmatprep.subr.bf16.mxu0 %v16413_v22  ;;  %v16424_v30 = vld [vmem:[%s16977_s3 + $0x100] ss:$8 sps:$4 sm:$0xff]   ;;  %v16503_v9 = vld [vmem:[%s16977_s3 + $0x150] ss:$8 sps:$4 sm:$0xff]  }
 0x905   :  { %7603 = vmatprep.subr.bf16.mxu1 %v16413_v22  ;;  %v16453_v37 = vld [vmem:[#allocation2 + $0x20] ss:$48 sps:$4 sm:$0xff]   ;;  %v16510_v46 = vld [vmem:[%s16977_s3 + $0x164] ss:$8 sps:$4 sm:$0xff]   ;;  %v16524_v23 = vld [vmem:[%s16977_s3 + $0x174] ss:$8 sps:$4 sm:$0xff]  }
 0x906   :  { %6841 = vst [vmem:[#allocation3 + $0x10] sm:$0xf] %v9354_v53  ;;  %v6823_v0 = vadd.f32 %v16371_v58, %v6813_v62  ;;  %7379 = vmatmul.mubr.bf16.vlgmr.msra.gmra.mrb[112].mxu0 %v16122_v60  ;;  %v16432_v60 = vld [vmem:[%s16977_s3 + $0x114] ss:$8 sps:$4 sm:$0xff]   ;;  %v16489_v43 = vld [vmem:[%s16977_s3 + $0x140] ss:$8 sps:$4 sm:$0xff]  }
 0x907   :  { %7585 = vmatmul.mubr.bf16.vlgmr.msra.gmra.mrb[112].mxu1 %v16126_v59  ;;  %7388 = vmatprep.mubr.bf16.mxu0 %v16129_v45  ;;  %v16439_v45 = vld [vmem:[%s16977_s3 + $0x110] ss:$8 sps:$4 sm:$0xff]   ;;  %v16449_v53 = vld [vmem:[#allocation2 + $0x1c] ss:$48 sps:$4 sm:$0xff]   ;;  %v16517_v34 = vld [vmem:[%s16977_s3 + $0x160] ss:$8 sps:$4 sm:$0xff]  }
 0x908   :  { %v6826_v10 = vmax.f32 %v6823_v0, 0.0  ;;  %7398 = vmatpush1.bf16.msra.mxu0 %v16424_v30  ;;  %7594 = vmatprep.mubr.bf16.mxu1 %v16132_v6  ;;  %v16446_v6 = vld [vmem:[%s16977_s3 + $0x124] ss:$8 sps:$4 sm:$0xff]   ;;  %v16532_v62 = vld [vmem:[%s16977_s3 + $0x170] ss:$8 sps:$4 sm:$0xff]  }
 0x909   :  { %7604 = vmatpush1.bf16.msra.mxu1 %v16424_v30  ;;  %7399 = vmatprep.subr.bf16.mxu0 %v16432_v60 }
 0x90a   :  { %v9355_v59 = vpack.c.bf16 %v6826_v10, %v6826_v10  ;;  %7605 = vmatprep.subr.bf16.mxu1 %v16432_v60 }
 0x90c   :  { %6842 = vst [vmem:[#allocation3 + $0x20] sm:$0xf] %v9355_v59  ;;  %7400 = vmatpush1.bf16.msra.mxu0 %v16439_v45 }
 0x90d   :  { %7606 = vmatpush1.bf16.msra.mxu1 %v16439_v45  ;;  %7401 = vmatprep.subr.bf16.mxu0 %v16446_v6 }
 0x90e   :  { %7389 = vmatmul.mubr.bf16.gmra.mrb[116].mxu0 %v16142_v14  ;;  %7607 = vmatprep.subr.bf16.mxu1 %v16446_v6  ;;  %v16468_v14 = vld [vmem:[%s16977_s3 + $0x134] ss:$8 sps:$4 sm:$0xff]  }
 0x90f   :  { %7595 = vmatmul.mubr.bf16.gmra.mrb[116].mxu1 %v16146_v31  ;;  %7429 = vmatprep.mubr.bf16.mxu0 %v16449_v53  ;;  %v16475_v31 = vld [vmem:[%s16977_s3 + $0x130] ss:$8 sps:$4 sm:$0xff]  }
 0x910   :  { %7402 = vmatpush1.bf16.msra.mxu0 %v16460_v54  ;;  %7635 = vmatprep.mubr.bf16.mxu1 %v16453_v37 }
 0x911   :  { %7608 = vmatpush1.bf16.msra.mxu1 %v16460_v54  ;;  %7403 = vmatprep.subr.bf16.mxu0 %v16468_v14 }
 0x912   :  { %7609 = vmatprep.subr.bf16.mxu1 %v16468_v14 }
 0x914   :  { %7404 = vmatpush1.bf16.msra.mxu0 %v16475_v31 }
 0x915   :  { %7610 = vmatpush1.bf16.msra.mxu1 %v16475_v31  ;;  %7405 = vmatprep.subr.bf16.mxu0 %v16482_v19 }
 0x916   :  { %7611 = vmatprep.subr.bf16.mxu1 %v16482_v19 }
 0x918   :  { %7406 = vmatpush1.bf16.msra.mxu0 %v16489_v43 }
 0x919   :  { %7612 = vmatpush1.bf16.msra.mxu1 %v16489_v43  ;;  %7407 = vmatprep.subr.bf16.mxu0 %v16496_v55 }
 0x91a   :  { %7613 = vmatprep.subr.bf16.mxu1 %v16496_v55 }
 0x91c   :  { %7408 = vmatpush1.bf16.msra.mxu0 %v16503_v9 }
 0x91d   :  { %7614 = vmatpush1.bf16.msra.mxu1 %v16503_v9  ;;  %7409 = vmatprep.subr.bf16.mxu0 %v16510_v46 }
 0x91e   :  { %7615 = vmatprep.subr.bf16.mxu1 %v16510_v46 }
 0x920   :  { %7410 = vmatpush1.bf16.msra.mxu0 %v16517_v34 }
 0x921   :  { %7616 = vmatpush1.bf16.msra.mxu1 %v16517_v34  ;;  %7411 = vmatprep.subr.bf16.mxu0 %v16524_v23 }
 0x922   :  { %7617 = vmatprep.subr.bf16.mxu1 %v16524_v23 }
 0x924   :  { %7412 = vmatpush1.bf16.msra.mxu0 %v17808_v52  ;;  %v7300_v52 = vld [vmem:[#allocation2 + $0x78] sm:$0xff] }
 0x925   :  { %7618 = vmatpush1.bf16.msra.mxu1 %v16532_v62  ;;  %7413 = vmatprep.subr.bf16.mxu0 %v17809_v32 }
 0x926   :  { %7619 = vmatprep.subr.bf16.mxu1 %v17809_v32  ;;  %v7506_v32 = vld [vmem:[#allocation2 + $0x7c] sm:$0xff] }
 0x928   :  { %7414 = vmatpush1.bf16.msra.mxu0 %v17810_v61 }
 0x929   :  { %7620 = vmatpush1.bf16.msra.mxu1 %v17810_v61  ;;  %7415 = vmatprep.subr.bf16.mxu0 %v17811_v29  ;;  %v16566_v61 = vld [vmem:[#allocation2 + $0x18] ss:$48 sps:$4 sm:$0xff]  }
 0x92a   :  { %7621 = vmatprep.subr.bf16.mxu1 %v17811_v29  ;;  %v16570_v29 = vld [vmem:[#allocation2 + $0x1c] ss:$48 sps:$4 sm:$0xff]  }
 0x92c   :  { %7416 = vmatpush1.bf16.msra.mxu0 %v17812_v36 }
 0x92d   :  { %7622 = vmatpush1.bf16.msra.mxu1 %v17812_v36  ;;  %7417 = vmatprep.subr.bf16.mxu0 %v17813_v17  ;;  %v16573_v36 = vcombine.high %v7300_v52, %v7300_v52 }
 0x92e   :  { %7623 = vmatprep.subr.bf16.mxu1 %v17813_v17  ;;  %v16576_v17 = vcombine.high %v7506_v32, %v7506_v32 }
 0x930   :  { %7418 = vmatpush1.bf16.msra.mxu0 %v17814_v27 }
 0x931   :  { %7624 = vmatpush1.bf16.msra.mxu1 %v17814_v27  ;;  %7419 = vmatprep.subr.bf16.mxu0 %v17815_v16  ;;  %v16586_v27 = vcombine.low %v7300_v52, %v7300_v52 }
 0x932   :  { %7625 = vmatprep.subr.bf16.mxu1 %v17815_v16  ;;  %v16590_v16 = vcombine.low %v7506_v32, %v7506_v32 }
 0x934   :  { %7420 = vmatpush1.bf16.msra.mxu0 %v17816_v41 }
 0x935   :  { %7626 = vmatpush1.bf16.msra.mxu1 %v17816_v41  ;;  %7421 = vmatprep.subr.bf16.mxu0 %v17817_v48  ;;  %v17861_v41 = vld [vmem:[#allocation23_spill] sm:$0xff] }
 0x936   :  { %7627 = vmatprep.subr.bf16.mxu1 %v17817_v48  ;;  %v17862_v48 = vld [vmem:[#allocation24_spill] sm:$0xff] }
 0x938   :  { %7422 = vmatpush1.bf16.msra.mxu0 %v17818_v7 }
 0x939   :  { %7628 = vmatpush1.bf16.msra.mxu1 %v17818_v7  ;;  %7423 = vmatprep.subr.bf16.mxu0 %v17819_v33  ;;  %v17863_v7 = vld [vmem:[#allocation25_spill] sm:$0xff] }
 0x93a   :  { %7629 = vmatprep.subr.bf16.mxu1 %v17819_v33  ;;  %v17864_v33 = vld [vmem:[#allocation26_spill] sm:$0xff] }
 0x93c   :  { %7424 = vmatpush1.bf16.msra.mxu0 %v17820_v44 }
 0x93d   :  { %7630 = vmatpush1.bf16.msra.mxu1 %v17820_v44  ;;  %7425 = vmatprep.subr.bf16.mxu0 %v17821_v2  ;;  %v17865_v44 = vld [vmem:[#allocation27_spill] sm:$0xff] }
 0x93e   :  { %7631 = vmatprep.subr.bf16.mxu1 %v17821_v2  ;;  %v17866_v2 = vld [vmem:[#allocation28_spill] sm:$0xff] }
 0x940   :  { %7426 = vmatpush1.bf16.msra.mxu0 %v17822_v3 }
 0x941   :  { %7632 = vmatpush1.bf16.msra.mxu1 %v17822_v3  ;;  %7427 = vmatprep.subr.bf16.mxu0 %v17823_v1  ;;  %v17867_v3 = vld [vmem:[#allocation29_spill] sm:$0xff] }
 0x942   :  { %7633 = vmatprep.subr.bf16.mxu1 %v17823_v1  ;;  %v17868_v1 = vld [vmem:[#allocation30_spill] sm:$0xff] }
 0x944   :  { %7428 = vmatpush1.bf16.msra.mxu0 %v17824_v39 }
 0x945   :  { %7634 = vmatpush1.bf16.msra.mxu1 %v17824_v39  ;;  %7448 = vmatprep.subr.bf16.mxu0 %v17825_v11  ;;  %v17869_v39 = vld [vmem:[#allocation31_spill] sm:$0xff] }
 0x946   :  { %7654 = vmatprep.subr.bf16.mxu1 %v17825_v11  ;;  %v17870_v11 = vld [vmem:[#allocation4_spill] sm:$0xff] }
 0x947   :  { %7430 = vmatmul.mubr.bf16.vlgmr.msra.gmra.mrb[112].mxu0 %v16566_v61 }
 0x948   :  { %7636 = vmatmul.mubr.bf16.vlgmr.msra.gmra.mrb[112].mxu1 %v16570_v29  ;;  %7439 = vmatprep.mubr.bf16.mxu0 %v16573_v36 }
 0x949   :  { %7449 = vmatpush1.bf16.msra.mxu0 %v17826_v49  ;;  %7645 = vmatprep.mubr.bf16.mxu1 %v16576_v17 }
 0x94a   :  { %7655 = vmatpush1.bf16.msra.mxu1 %v17826_v49  ;;  %7450 = vmatprep.subr.bf16.mxu0 %v15865_v5  ;;  %v17871_v49 = vld [vmem:[#allocation5_spill] sm:$0xff] }
 0x94b   :  { %7656 = vmatprep.subr.bf16.mxu1 %v15865_v5  ;;  %v10430_v5 = vld [vmem:[#allocation2 + $0x20] ss:$48 sps:$4 sm:$0xff]  }
 0x94d   :  { %7451 = vmatpush1.bf16.msra.mxu0 %v15877_v26 }
 0x94e   :  { %7657 = vmatpush1.bf16.msra.mxu1 %v15877_v26  ;;  %7452 = vmatprep.subr.bf16.mxu0 %v17827_v21  ;;  %v10431_v26 = vld [vmem:[#allocation2 + $0x24] ss:$48 sps:$4 sm:$0xff]  }
 0x94f   :  { %7440 = vmatmul.mubr.bf16.gmra.mrb[116].mxu0 %v16586_v27  ;;  %7658 = vmatprep.subr.bf16.mxu1 %v17827_v21  ;;  %v17872_v21 = vld [vmem:[#allocation6_spill] sm:$0xff] }
 0x950   :  { %7646 = vmatmul.mubr.bf16.gmra.mrb[116].mxu1 %v16590_v16  ;;  %7480 = vmatprep.mubr.bf16.mxu0 %v17463_v38 }
 0x951   :  { %7453 = vmatpush1.bf16.msra.mxu0 %v17828_v18  ;;  %7686 = vmatprep.mubr.bf16.mxu1 %v17463_v38 }
 0x952   :  { %7659 = vmatpush1.bf16.msra.mxu1 %v17828_v18  ;;  %7454 = vmatprep.subr.bf16.mxu0 %v17829_v12  ;;  %v17873_v18 = vld [vmem:[#allocation7_spill] sm:$0xff] }
 0x953   :  { %7660 = vmatprep.subr.bf16.mxu1 %v17829_v12  ;;  %v17874_v12 = vld [vmem:[#allocation32_spill] sm:$0xff] }
 0x955   :  { %7455 = vmatpush1.bf16.msra.mxu0 %v17830_v35 }
 0x956   :  { %7661 = vmatpush1.bf16.msra.mxu1 %v17830_v35  ;;  %7456 = vmatprep.subr.bf16.mxu0 %v17831_v4  ;;  %v17875_v35 = vld [vmem:[#allocation8_spill] sm:$0xff] }
 0x957   :  { %7662 = vmatprep.subr.bf16.mxu1 %v17831_v4  ;;  %v17876_v4 = vld [vmem:[#allocation9_spill] sm:$0xff] }
 0x959   :  { %7457 = vmatpush1.bf16.msra.mxu0 %v17832_v28 }
 0x95a   :  { %7663 = vmatpush1.bf16.msra.mxu1 %v17832_v28  ;;  %7458 = vmatprep.subr.bf16.mxu0 %v17833_v40  ;;  %v17877_v28 = vld [vmem:[#allocation10_spill] sm:$0xff] }
 0x95b   :  { %7664 = vmatprep.subr.bf16.mxu1 %v17833_v40  ;;  %v17878_v40 = vld [vmem:[#allocation11_spill] sm:$0xff] }
 0x95d   :  { %7459 = vmatpush1.bf16.msra.mxu0 %v17834_v51 }
 0x95e   :  { %7665 = vmatpush1.bf16.msra.mxu1 %v17834_v51  ;;  %7460 = vmatprep.subr.bf16.mxu0 %v17835_v56  ;;  %v17879_v51 = vld [vmem:[#allocation12_spill] sm:$0xff] }
 0x95f   :  { %7666 = vmatprep.subr.bf16.mxu1 %v17835_v56  ;;  %v17880_v56 = vld [vmem:[#allocation13_spill] sm:$0xff] }
 0x961   :  { %7461 = vmatpush1.bf16.msra.mxu0 %v15955_v24 }
 0x962   :  { %7667 = vmatpush1.bf16.msra.mxu1 %v15955_v24  ;;  %7462 = vmatprep.subr.bf16.mxu0 %v15962_v63  ;;  %v10433_v24 = vld [vmem:[#allocation2 + $0x84] ss:$0 sps:$4 sm:$0xff]  }
 0x963   :  { %7668 = vmatprep.subr.bf16.mxu1 %v15962_v63  ;;  %v10432_v63 = vld [vmem:[#allocation2 + $0x80] ss:$0 sps:$4 sm:$0xff]  }
 0x965   :  { %7463 = vmatpush1.bf16.msra.mxu0 %v17836_v57 }
 0x966   :  { %7669 = vmatpush1.bf16.msra.mxu1 %v17836_v57  ;;  %7796 = vmatprep.subr.bf16.mxu0 %v16178_v13 }
 0x967   :  { %8002 = vmatprep.subr.bf16.mxu1 %v16178_v13 }
 0x968   :  { %7481 = vmatmul.mubr.bf16.vlgmr.msra.gmra.mrb[112].mxu0 %v10430_v5 }
 0x969   :  { %7687 = vmatmul.mubr.bf16.vlgmr.msra.gmra.mrb[112].mxu1 %v10431_v26  ;;  %7797 = vmatpush1.bf16.msra.mxu0 %v16185_v47  ;;  %v17883_v26 = vld [vmem:[#allocation16_spill] sm:$0xff] }
 0x96a   :  { %8003 = vmatpush1.bf16.msra.mxu1 %v16185_v47  ;;  %7798 = vmatprep.subr.bf16.mxu0 %v16192_v8 }
 0x96b   :  { %8004 = vmatprep.subr.bf16.mxu1 %v16192_v8  ;;  %7490 = vmatprep.mubr.bf16.mxu0 %v17463_v38  ;;  %v17881_v8 = vld [vmem:[#allocation14_spill] sm:$0xff] }
 0x96c   :  { %7696 = vmatprep.mubr.bf16.mxu1 %v17463_v38 }
 0x96d   :  { %7799 = vmatpush1.bf16.msra.mxu0 %v16201_v50 }
 0x96e   :  { %8005 = vmatpush1.bf16.msra.mxu1 %v16201_v50  ;;  %7800 = vmatprep.subr.bf16.mxu0 %v16208_v15 }
 0x96f   :  { %8006 = vmatprep.subr.bf16.mxu1 %v16208_v15 }
 0x970   :  { %7491 = vmatmul.mubr.bf16.gmra.mrb[116].mxu0 %v10432_v63 }
 0x971   :  { %7697 = vmatmul.mubr.bf16.gmra.mrb[116].mxu1 %v10433_v24  ;;  %7801 = vmatpush1.bf16.msra.mxu0 %v16215_v42 }
 0x972   :  { %7828 = vmatprep.mubr.bf16.mxu0 %v16449_v53  ;;  %8007 = vmatpush1.bf16.msra.mxu1 %v16215_v42 }
 0x973   :  { %8034 = vmatprep.mubr.bf16.mxu1 %v16453_v37  ;;  %7802 = vmatprep.subr.bf16.mxu0 %v17861_v41  ;;  %v17882_v37 = vld [vmem:[#allocation15_spill] sm:$0xff] }
 0x974   :  { %8008 = vmatprep.subr.bf16.mxu1 %v17861_v41  ;;  %v17884_v41 = vld [vmem:[#allocation17_spill] sm:$0xff] }
 0x975   :  { %7803 = vmatpush1.bf16.msra.mxu0 %v17862_v48 }
 0x976   :  { %8009 = vmatpush1.bf16.msra.mxu1 %v17862_v48  ;;  %7804 = vmatprep.subr.bf16.mxu0 %v17863_v7 }
 0x977   :  { %8010 = vmatprep.subr.bf16.mxu1 %v17863_v7 }
 0x979   :  { %7805 = vmatpush1.bf16.msra.mxu0 %v17864_v33 }
 0x97a   :  { %8011 = vmatpush1.bf16.msra.mxu1 %v17864_v33  ;;  %7806 = vmatprep.subr.bf16.mxu0 %v17865_v44 }
 0x97b   :  { %8012 = vmatprep.subr.bf16.mxu1 %v17865_v44 }
 0x97d   :  { %7807 = vmatpush1.bf16.msra.mxu0 %v17866_v2 }
 0x97e   :  { %8013 = vmatpush1.bf16.msra.mxu1 %v17866_v2  ;;  %7808 = vmatprep.subr.bf16.mxu0 %v17867_v3 }
 0x97f   :  { %8014 = vmatprep.subr.bf16.mxu1 %v17867_v3 }
 0x981   :  { %7809 = vmatpush1.bf16.msra.mxu0 %v17868_v1 }
 0x982   :  { %8015 = vmatpush1.bf16.msra.mxu1 %v17868_v1  ;;  %7810 = vmatprep.subr.bf16.mxu0 %v17869_v39 }
 0x983   :  { %8016 = vmatprep.subr.bf16.mxu1 %v17869_v39 }
 0x985   :  { %7811 = vmatpush1.bf16.msra.mxu0 %v17870_v11 }
 0x986   :  { %8017 = vmatpush1.bf16.msra.mxu1 %v17870_v11  ;;  %7812 = vmatprep.subr.bf16.mxu0 %v17871_v49 }
 0x987   :  { %8018 = vmatprep.subr.bf16.mxu1 %v17871_v49 }
 0x989   :  { %7813 = vmatpush1.bf16.msra.mxu0 %v17872_v21 }
 0x98a   :  { %8019 = vmatpush1.bf16.msra.mxu1 %v17872_v21  ;;  %7814 = vmatprep.subr.bf16.mxu0 %v17873_v18 }
 0x98b   :  { %8020 = vmatprep.subr.bf16.mxu1 %v17873_v18 }
 0x98d   :  { %7815 = vmatpush1.bf16.msra.mxu0 %v17874_v12 }
 0x98e   :  { %8021 = vmatpush1.bf16.msra.mxu1 %v17874_v12  ;;  %7816 = vmatprep.subr.bf16.mxu0 %v17875_v35 }
 0x98f   :  { %8022 = vmatprep.subr.bf16.mxu1 %v17875_v35 }
 0x991   :  { %7817 = vmatpush1.bf16.msra.mxu0 %v17876_v4 }
 0x992   :  { %8023 = vmatpush1.bf16.msra.mxu1 %v17876_v4  ;;  %7818 = vmatprep.subr.bf16.mxu0 %v17877_v28 }
 0x993   :  { %8024 = vmatprep.subr.bf16.mxu1 %v17877_v28 }
 0x995   :  { %7819 = vmatpush1.bf16.msra.mxu0 %v17878_v40 }
 0x996   :  { %8025 = vmatpush1.bf16.msra.mxu1 %v17878_v40  ;;  %7820 = vmatprep.subr.bf16.mxu0 %v17879_v51 }
 0x997   :  { %8026 = vmatprep.subr.bf16.mxu1 %v17879_v51 }
 0x999   :  { %7821 = vmatpush1.bf16.msra.mxu0 %v17880_v56  ;;  %v7032_v57 = vpop.f32.mrb[104].mxu0 }
 0x99a   :  { %8027 = vmatpush1.bf16.msra.mxu1 %v17880_v56  ;;  %v7238_v13 = vpop.f32.mrb[104].mxu1  ;;  %v7034_v47 = vpop.f32.mrb[105].mxu0  ;;  %7822 = vmatprep.subr.bf16.mxu0 %v17881_v8 }
 0x99b   :  { %v7255_v50 = vmax.f32 %v7032_v57, %v7238_v13  ;;  %v7240_v15 = vpop.f32.mrb[105].mxu1  ;;  %8028 = vmatprep.subr.bf16.mxu1 %v17881_v8  ;;  %v7036_v42 = vpop.f32.mrb[106].mxu0  ;;  %v10883_v57 = vld [vmem:[%s16977_s3 + $0x200] ss:$8 sps:$4 sm:$0xff]   ;;  %v10884_v13 = vld [vmem:[%s16977_s3 + $0x214] ss:$8 sps:$4 sm:$0xff]  }
 0x99c   :  { %v7256_v0 = vmax.f32 %v7034_v47, %v7240_v15  ;;  %v7242_v10 = vpop.f32.mrb[106].mxu1  ;;  %v7038_v59 = vpop.f32.mrb[107].mxu0  ;;  %v10885_v47 = vld [vmem:[%s16977_s3 + $0x210] ss:$8 sps:$4 sm:$0xff]  }
 0x99d   :  { %v7257_v53 = vmax.f32 %v7036_v42, %v7242_v10  ;;  %7823 = vmatpush1.bf16.msra.mxu0 %v17882_v37  ;;  %v7244_v52 = vpop.f32.mrb[107].mxu1  ;;  %v10887_v42 = vld [vmem:[%s16977_s3 + $0x220] ss:$8 sps:$4 sm:$0xff]   ;;  %v10889_v10 = vld [vmem:[%s16977_s3 + $0x230] ss:$8 sps:$4 sm:$0xff]  }
 0x99e   :  { %v7261_v32 = vmax.f32 %v7255_v50, %v7256_v0  ;;  %8029 = vmatpush1.bf16.msra.mxu1 %v17882_v37  ;;  %v7258_v5 = vmax.f32 %v7038_v59, %v7244_v52  ;;  %7824 = vmatprep.subr.bf16.mxu0 %v17883_v26  ;;  %v10886_v50 = vld [vmem:[%s16977_s3 + $0x224] ss:$8 sps:$4 sm:$0xff]   ;;  %v10888_v0 = vld [vmem:[%s16977_s3 + $0x234] ss:$8 sps:$4 sm:$0xff]   ;;  %v10893_v52 = vld [vmem:[%s16977_s3 + $0x250] ss:$8 sps:$4 sm:$0xff]  }
 0x99f   :  { %8030 = vmatprep.subr.bf16.mxu1 %v17883_v26  ;;  %v10890_v59 = vld [vmem:[%s16977_s3 + $0x244] ss:$8 sps:$4 sm:$0xff]   ;;  %v10892_v37 = vld [vmem:[%s16977_s3 + $0x254] ss:$8 sps:$4 sm:$0xff]  }
 0x9a0   :  { %v7271_v63 = vadd.f32 %v16371_v58, %v7261_v32  ;;  %v7262_v24 = vmax.f32 %v7257_v53, %v7258_v5  ;;  %v10891_v53 = vld [vmem:[%s16977_s3 + $0x240] ss:$8 sps:$4 sm:$0xff]   ;;  %v10894_v32 = vld [vmem:[%s16977_s3 + $0x264] ss:$8 sps:$4 sm:$0xff]   ;;  %v10896_v26 = vld [vmem:[%s16977_s3 + $0x274] ss:$8 sps:$4 sm:$0xff]  }
 0x9a1   :  { %7825 = vmatpush1.bf16.msra.mxu0 %v17884_v41  ;;  %v7042_v48 = vpop.f32.mrb[108].mxu0  ;;  %v10895_v5 = vld [vmem:[%s16977_s3 + $0x260] ss:$8 sps:$4 sm:$0xff]  }
 0x9a2   :  { %v7274_v7 = vmax.f32 %v7271_v63, 0.0  ;;  %v7272_v33 = vadd.f32 %v16371_v58, %v7262_v24  ;;  %8031 = vmatpush1.bf16.msra.mxu1 %v17884_v41  ;;  %v7248_v44 = vpop.f32.mrb[108].mxu1  ;;  %v7044_v2 = vpop.f32.mrb[109].mxu0  ;;  %7826 = vmatprep.subr.bf16.mxu0 %v16399_v20  ;;  %v10446_v63 = vld [vmem:[%s16979_s5 + $0x40] sm:$0xff]   ;;  %v10897_v41 = vld [vmem:[%s16977_s3 + $0x270] ss:$8 sps:$4 sm:$0xff]  }
 0x9a3   :  { %v7259_v3 = vmax.f32 %v7042_v48, %v7248_v44  ;;  %v7250_v1 = vpop.f32.mrb[109].mxu1  ;;  %8032 = vmatprep.subr.bf16.mxu1 %v16399_v20  ;;  %v7046_v39 = vpop.f32.mrb[110].mxu0  ;;  %v10469_v24 = vld [vmem:[%s16979_s5 + $0xc0] sm:$0xff]   ;;  %v10445_v44 = vld [vmem:[#allocation2 + $0x2c] ss:$48 sps:$4 sm:$0xff]  }
 0x9a4   :  { %v9356_v11 = vpack.c.bf16 %v7274_v7, %v7274_v7  ;;  %v7275_v49 = vmax.f32 %v7272_v33, 0.0  ;;  %v7260_v21 = vmax.f32 %v7044_v2, %v7250_v1  ;;  %v7252_v18 = vpop.f32.mrb[110].mxu1  ;;  %v7047_v12 = vpop.f32.mrb[111].mxu0  ;;  %v10447_v48 = vld [vmem:[%s16979_s5] sm:$0xff]   ;;  %v10444_v7 = vld [vmem:[#allocation2 + $0x28] ss:$48 sps:$4 sm:$0xff]  }
 0x9a5   :  { %7827 = vmatpush1.bf16.msra.mxu0 %v16406_v25  ;;  %v7253_v35 = vpop.f32.mrb[111].mxu1  ;;  %v10448_v33 = vld [vmem:[%s16979_s5 + $0x48] sm:$0xff]   ;;  %v10470_v2 = vld [vmem:[%s16979_s5 + $0x80] sm:$0xff]   ;;  %v10452_v39 = vld [vmem:[%s16979_s5 + $0x50] sm:$0xff]  }
 0x9a6   :  { %7290 = vst [vmem:[#allocation3 + $0x4] sm:$0xf] %v9356_v11  ;;  %v9357_v4 = vpack.c.bf16 %v7275_v49, %v7275_v49  ;;  %v7263_v28 = vmax.f32 %v7259_v3, %v7260_v21  ;;  %8033 = vmatpush1.bf16.msra.mxu1 %v16406_v25  ;;  %7847 = vmatprep.subr.bf16.mxu0 %v16413_v22  ;;  %v10471_v3 = vld [vmem:[%s16979_s5 + $0xc8] sm:$0xff]   ;;  %v10453_v49 = vld [vmem:[%s16979_s5 + $0x10] sm:$0xff]   ;;  %v10457_v18 = vld [vmem:[%s16979_s5 + $0x58] sm:$0xff]  }
 0x9a7   :  { %8053 = vmatprep.subr.bf16.mxu1 %v16413_v22  ;;  %v10439_v22 = vld [vmem:[#allocation2 + $0x28] ss:$48 sps:$4 sm:$0xff]   ;;  %v10451_v12 = vld [vmem:[#allocation2 + $0x8c] ss:$0 sps:$4 sm:$0xff]  }
 0x9a8   :  { %7291 = vst [vmem:[#allocation3 + $0x14] sm:$0xf] %v9357_v4  ;;  %v7273_v20 = vadd.f32 %v16371_v58, %v7263_v28  ;;  %7829 = vmatmul.mubr.bf16.vlgmr.msra.gmra.mrb[120].mxu0 %v16566_v61  ;;  %v10436_v58 = vld [vmem:[#allocation2 + $0x24] ss:$48 sps:$4 sm:$0xff]   ;;  %v10449_v1 = vld [vmem:[%s16979_s5 + $0x8] sm:$0xff]   ;;  %v10458_v35 = vld [vmem:[%s16979_s5 + $0x18] sm:$0xff]  }
 0x9a9   :  { %8035 = vmatmul.mubr.bf16.vlgmr.msra.gmra.mrb[120].mxu1 %v16570_v29  ;;  %7838 = vmatprep.mubr.bf16.mxu0 %v16573_v36  ;;  %v7750_v61 = vld [vmem:[#allocation2 + $0x80] sm:$0xff]  ;;  %v10881_v29 = vld [vmem:[%s16977_s3 + $0x1f0] ss:$8 sps:$4 sm:$0xff]   ;;  %v10472_v11 = vld [vmem:[%s16979_s5 + $0x88] sm:$0xff]  }
 0x9aa   :  { %v7276_v40 = vmax.f32 %v7273_v20, 0.0  ;;  %7848 = vmatpush1.bf16.msra.mxu0 %v16424_v30  ;;  %8044 = vmatprep.mubr.bf16.mxu1 %v16576_v17  ;;  %v7956_v36 = vld [vmem:[#allocation2 + $0x84] sm:$0xff]  ;;  %v10434_v17 = vld [vmem:[#allocation2 + $0x20] ss:$48 sps:$4 sm:$0xff]   ;;  %v9251_v51 = vcombine.high %v7750_v61, %v7750_v61  ;;  %v9250_v8 = vcombine.low %v7750_v61, %v7750_v61 }
 0x9ab   :  { %8054 = vmatpush1.bf16.msra.mxu1 %v16424_v30  ;;  %7849 = vmatprep.subr.bf16.mxu0 %v16432_v60  ;;  %v10866_v30 = vld [vmem:[%s16977_s3 + $0x184] ss:$8 sps:$4 sm:$0xff]   ;;  %v9261_v56 = vcombine.high %v7956_v36, %v7956_v36  ;;  %v9260_v15 = vcombine.low %v7956_v36, %v7956_v36  ;;  %v10450_v21 = vld [vmem:[#allocation2 + $0x88] ss:$0 sps:$4 sm:$0xff]  }
 0x9ac   :  { %v9358_v25 = vpack.c.bf16 %v7276_v40, %v7276_v40  ;;  %8055 = vmatprep.subr.bf16.mxu1 %v16432_v60  ;;  %v10867_v60 = vld [vmem:[%s16977_s3 + $0x180] ss:$8 sps:$4 sm:$0xff]  }
 0x9ad   :  { %v10459_v4 = vld [vmem:[%s16979_s5 + $0x60] sm:$0xff]   ;;  %v10461_v20 = vld [vmem:[%s16979_s5 + $0x68] sm:$0xff]  }
 0x9ae   :  { %7292 = vst [vmem:[#allocation3 + $0x24] sm:$0xf] %v9358_v25  ;;  %7850 = vmatpush1.bf16.msra.mxu0 %v16439_v45  ;;  %v10460_v28 = vld [vmem:[%s16979_s5 + $0x20] sm:$0xff]   ;;  %v10462_v40 = vld [vmem:[%s16979_s5 + $0x28] sm:$0xff]   ;;  %v10463_v25 = vld [vmem:[%s16979_s5 + $0x70] sm:$0xff]  }
 0x9af   :  { %8056 = vmatpush1.bf16.msra.mxu1 %v16439_v45  ;;  %7851 = vmatprep.subr.bf16.mxu0 %v16446_v6  ;;  %v10868_v45 = vld [vmem:[%s16977_s3 + $0x194] ss:$8 sps:$4 sm:$0xff]  }
 0x9b0   :  { %7839 = vmatmul.mubr.bf16.gmra.mrb[124].mxu0 %v16586_v27  ;;  %8057 = vmatprep.subr.bf16.mxu1 %v16446_v6  ;;  %v10869_v6 = vld [vmem:[%s16977_s3 + $0x190] ss:$8 sps:$4 sm:$0xff]   ;;  %v10882_v27 = vld [vmem:[%s16977_s3 + $0x204] ss:$8 sps:$4 sm:$0xff]  }
 0x9b1   :  { %8045 = vmatmul.mubr.bf16.gmra.mrb[124].mxu1 %v16590_v16  ;;  %7879 = vmatprep.mubr.bf16.mxu0 %v10436_v58  ;;  %v10437_v16 = vld [vmem:[#allocation2 + $0x24] ss:$48 sps:$4 sm:$0xff]  }
 0x9b2   :  { %7852 = vmatpush1.bf16.msra.mxu0 %v16460_v54  ;;  %8085 = vmatprep.mubr.bf16.mxu1 %v10439_v22  ;;  %v10464_v58 = vld [vmem:[%s16979_s5 + $0x30] sm:$0xff]   ;;  %v10465_v22 = vld [vmem:[%s16979_s5 + $0x78] sm:$0xff]  }
 0x9b3   :  { %8058 = vmatpush1.bf16.msra.mxu1 %v16460_v54  ;;  %7853 = vmatprep.subr.bf16.mxu0 %v16468_v14  ;;  %v10870_v54 = vld [vmem:[%s16977_s3 + $0x1a4] ss:$8 sps:$4 sm:$0xff]  }
 0x9b4   :  { %8059 = vmatprep.subr.bf16.mxu1 %v16468_v14  ;;  %v10871_v14 = vld [vmem:[%s16977_s3 + $0x1a0] ss:$8 sps:$4 sm:$0xff]  }
 0x9b6   :  { %7854 = vmatpush1.bf16.msra.mxu0 %v16475_v31 }
 0x9b7   :  { %8060 = vmatpush1.bf16.msra.mxu1 %v16475_v31  ;;  %7855 = vmatprep.subr.bf16.mxu0 %v16482_v19  ;;  %v10872_v31 = vld [vmem:[%s16977_s3 + $0x1b4] ss:$8 sps:$4 sm:$0xff]  }
 0x9b8   :  { %8061 = vmatprep.subr.bf16.mxu1 %v16482_v19  ;;  %v10873_v19 = vld [vmem:[%s16977_s3 + $0x1b0] ss:$8 sps:$4 sm:$0xff]  }
 0x9ba   :  { %7856 = vmatpush1.bf16.msra.mxu0 %v16489_v43 }
 0x9bb   :  { %8062 = vmatpush1.bf16.msra.mxu1 %v16489_v43  ;;  %7857 = vmatprep.subr.bf16.mxu0 %v16496_v55  ;;  %v10874_v43 = vld [vmem:[%s16977_s3 + $0x1c4] ss:$8 sps:$4 sm:$0xff]  }
 0x9bc   :  { %8063 = vmatprep.subr.bf16.mxu1 %v16496_v55  ;;  %v10875_v55 = vld [vmem:[%s16977_s3 + $0x1c0] ss:$8 sps:$4 sm:$0xff]  }
 0x9be   :  { %7858 = vmatpush1.bf16.msra.mxu0 %v16503_v9 }
 0x9bf   :  { %8064 = vmatpush1.bf16.msra.mxu1 %v16503_v9  ;;  %7859 = vmatprep.subr.bf16.mxu0 %v16510_v46  ;;  %v10876_v9 = vld [vmem:[%s16977_s3 + $0x1d4] ss:$8 sps:$4 sm:$0xff]  }
 0x9c0   :  { %8065 = vmatprep.subr.bf16.mxu1 %v16510_v46  ;;  %v10877_v46 = vld [vmem:[%s16977_s3 + $0x1d0] ss:$8 sps:$4 sm:$0xff]  }
 0x9c2   :  { %7860 = vmatpush1.bf16.msra.mxu0 %v16517_v34 }
 0x9c3   :  { %8066 = vmatpush1.bf16.msra.mxu1 %v16517_v34  ;;  %7861 = vmatprep.subr.bf16.mxu0 %v16524_v23  ;;  %v10878_v34 = vld [vmem:[%s16977_s3 + $0x1e4] ss:$8 sps:$4 sm:$0xff]  }
 0x9c4   :  { %8067 = vmatprep.subr.bf16.mxu1 %v16524_v23  ;;  %v10879_v23 = vld [vmem:[%s16977_s3 + $0x1e0] ss:$8 sps:$4 sm:$0xff]  }
 0x9c6   :  { %7862 = vmatpush1.bf16.msra.mxu0 %v16532_v62 }
 0x9c7   :  { %8068 = vmatpush1.bf16.msra.mxu1 %v16532_v62  ;;  %7863 = vmatprep.subr.bf16.mxu0 %v10866_v30  ;;  %v10880_v62 = vld [vmem:[%s16977_s3 + $0x1f4] ss:$8 sps:$4 sm:$0xff]  }
 0x9c8   :  { %8069 = vmatprep.subr.bf16.mxu1 %v10866_v30  ;;  %v10466_v30 = vld [vmem:[%s16979_s5 + $0x38] sm:$0xff]  }
 0x9ca   :  { %7864 = vmatpush1.bf16.msra.mxu0 %v10867_v60 }
 0x9cb   :  { %8070 = vmatpush1.bf16.msra.mxu1 %v10867_v60  ;;  %7865 = vmatprep.subr.bf16.mxu0 %v10868_v45  ;;  %v8197_v60 = vld [vmem:[#allocation3 + $0x20] sm:$0xff] }
 0x9cc   :  { %8071 = vmatprep.subr.bf16.mxu1 %v10868_v45  ;;  %v10454_v45 = vld [vmem:[#allocation3] ss:$16 sps:$4 sm:$0xff]  }
 0x9ce   :  { %7866 = vmatpush1.bf16.msra.mxu0 %v10869_v6 }
 0x9cf   :  { %8072 = vmatpush1.bf16.msra.mxu1 %v10869_v6  ;;  %7867 = vmatprep.subr.bf16.mxu0 %v10870_v54  ;;  %v9273_v6 = vcombine.high %v8197_v60, %v8197_v60 }
 0x9d0   :  { %8073 = vmatprep.subr.bf16.mxu1 %v10870_v54  ;;  %v9272_v54 = vcombine.low %v8197_v60, %v8197_v60 }
 0x9d2   :  { %7868 = vmatpush1.bf16.msra.mxu0 %v10871_v14 }
 0x9d3   :  { %8074 = vmatpush1.bf16.msra.mxu1 %v10871_v14  ;;  %7869 = vmatprep.subr.bf16.mxu0 %v10872_v31 }
 0x9d4   :  { %8075 = vmatprep.subr.bf16.mxu1 %v10872_v31 }
 0x9d6   :  { %7870 = vmatpush1.bf16.msra.mxu0 %v10873_v19 }
 0x9d7   :  { %8076 = vmatpush1.bf16.msra.mxu1 %v10873_v19  ;;  %7871 = vmatprep.subr.bf16.mxu0 %v10874_v43 }
 0x9d8   :  { %8077 = vmatprep.subr.bf16.mxu1 %v10874_v43 }
 0x9da   :  { %7872 = vmatpush1.bf16.msra.mxu0 %v10875_v55 }
 0x9db   :  { %8078 = vmatpush1.bf16.msra.mxu1 %v10875_v55  ;;  %7873 = vmatprep.subr.bf16.mxu0 %v10876_v9 }
 0x9dc   :  { %8079 = vmatprep.subr.bf16.mxu1 %v10876_v9 }
 0x9de   :  { %7874 = vmatpush1.bf16.msra.mxu0 %v10877_v46 }
 0x9df   :  { %8080 = vmatpush1.bf16.msra.mxu1 %v10877_v46  ;;  %7875 = vmatprep.subr.bf16.mxu0 %v10878_v34 }
 0x9e0   :  { %8081 = vmatprep.subr.bf16.mxu1 %v10878_v34 }
 0x9e2   :  { %7876 = vmatpush1.bf16.msra.mxu0 %v10879_v23 }
 0x9e3   :  { %8082 = vmatpush1.bf16.msra.mxu1 %v10879_v23  ;;  %7877 = vmatprep.subr.bf16.mxu0 %v10880_v62 }
 0x9e4   :  { %8083 = vmatprep.subr.bf16.mxu1 %v10880_v62  ;;  %v16891_v62 = vld [vmem:[%s16978_s4] ss:$0 sm:$0xff] }
 0x9e6   :  { %7878 = vmatpush1.bf16.msra.mxu0 %v10881_v29 }
 0x9e7   :  { %8084 = vmatpush1.bf16.msra.mxu1 %v10881_v29  ;;  %7898 = vmatprep.subr.bf16.mxu0 %v10882_v27 }
 0x9e8   :  { %8104 = vmatprep.subr.bf16.mxu1 %v10882_v27 }
 0x9e9   :  { %7880 = vmatmul.mubr.bf16.vlgmr.msra.gmra.mrb[120].mxu0 %v10434_v17 }
 0x9ea   :  { %8086 = vmatmul.mubr.bf16.vlgmr.msra.gmra.mrb[120].mxu1 %v10437_v16  ;;  %7889 = vmatprep.mubr.bf16.mxu0 %v9251_v51 }
 0x9eb   :  { %7899 = vmatpush1.bf16.msra.mxu0 %v10883_v57  ;;  %8095 = vmatprep.mubr.bf16.mxu1 %v9261_v56 }
 0x9ec   :  { %8105 = vmatpush1.bf16.msra.mxu1 %v10883_v57  ;;  %7900 = vmatprep.subr.bf16.mxu0 %v10884_v13 }
 0x9ed   :  { %8106 = vmatprep.subr.bf16.mxu1 %v10884_v13 }
 0x9ef   :  { %7901 = vmatpush1.bf16.msra.mxu0 %v10885_v47 }
 0x9f0   :  { %8107 = vmatpush1.bf16.msra.mxu1 %v10885_v47  ;;  %7902 = vmatprep.subr.bf16.mxu0 %v10886_v50 }
 0x9f1   :  { %7890 = vmatmul.mubr.bf16.gmra.mrb[124].mxu0 %v9250_v8  ;;  %8108 = vmatprep.subr.bf16.mxu1 %v10886_v50 }
 0x9f2   :  { %8096 = vmatmul.mubr.bf16.gmra.mrb[124].mxu1 %v9260_v15  ;;  %7930 = vmatprep.mubr.bf16.mxu0 %v17463_v38 }
 0x9f3   :  { %7903 = vmatpush1.bf16.msra.mxu0 %v10887_v42  ;;  %8136 = vmatprep.mubr.bf16.mxu1 %v17463_v38 }
 0x9f4   :  { %8109 = vmatpush1.bf16.msra.mxu1 %v10887_v42  ;;  %7904 = vmatprep.subr.bf16.mxu0 %v10888_v0 }
 0x9f5   :  { %8110 = vmatprep.subr.bf16.mxu1 %v10888_v0 }
 0x9f7   :  { %7905 = vmatpush1.bf16.msra.mxu0 %v10889_v10 }
 0x9f8   :  { %8111 = vmatpush1.bf16.msra.mxu1 %v10889_v10  ;;  %7906 = vmatprep.subr.bf16.mxu0 %v10890_v59 }
 0x9f9   :  { %8112 = vmatprep.subr.bf16.mxu1 %v10890_v59 }
 0x9fb   :  { %7907 = vmatpush1.bf16.msra.mxu0 %v10891_v53 }
 0x9fc   :  { %8113 = vmatpush1.bf16.msra.mxu1 %v10891_v53  ;;  %7908 = vmatprep.subr.bf16.mxu0 %v10892_v37 }
 0x9fd   :  { %8114 = vmatprep.subr.bf16.mxu1 %v10892_v37 }
 0x9ff   :  { %7909 = vmatpush1.bf16.msra.mxu0 %v10893_v52 }
 0xa00   :  { %8115 = vmatpush1.bf16.msra.mxu1 %v10893_v52  ;;  %7910 = vmatprep.subr.bf16.mxu0 %v10894_v32 }
 0xa01   :  { %8116 = vmatprep.subr.bf16.mxu1 %v10894_v32 }
 0xa03   :  { %7911 = vmatpush1.bf16.msra.mxu0 %v10895_v5 }
 0xa04   :  { %8117 = vmatpush1.bf16.msra.mxu1 %v10895_v5  ;;  %7912 = vmatprep.subr.bf16.mxu0 %v10896_v26 }
 0xa05   :  { %8118 = vmatprep.subr.bf16.mxu1 %v10896_v26 }
 0xa07   :  { %7913 = vmatpush1.bf16.msra.mxu0 %v10897_v41 }
 0xa08   :  { %8119 = vmatpush1.bf16.msra.mxu1 %v10897_v41  ;;  %9365 = vmatprep.subr.bf16.mxu0 %v10446_v63  ;;  %v10474_v41 = vld [vmem:[%s16979_s5 + $0x90] sm:$0xff]  }
 0xa09   :  { %9393 = vmatprep.subr.bf16.mxu1 %v10469_v24  ;;  %v10473_v24 = vld [vmem:[%s16979_s5 + $0xd0] sm:$0xff]  }
 0xa0a   :  { %7931 = vmatmul.mubr.bf16.vlgmr.msra.gmra.mrb[120].mxu0 %v10444_v7  ;;  %v10476_v7 = vld [vmem:[%s16979_s5 + $0x98] sm:$0xff]  }
 0xa0b   :  { %8137 = vmatmul.mubr.bf16.vlgmr.msra.gmra.mrb[120].mxu1 %v10445_v44  ;;  %9366 = vmatpush3.bf16.msra.mxu0 %v10447_v48  ;;  %v10475_v48 = vld [vmem:[%s16979_s5 + $0xd8] sm:$0xff]   ;;  %v10478_v44 = vld [vmem:[%s16979_s5 + $0xa0] sm:$0xff]  }
 0xa0c   :  { %9367 = vmatprep.subr.bf16.mxu0 %v10448_v33  ;;  %7940 = vmatprep.mubr.bf16.mxu0 %v17463_v38  ;;  %v10477_v33 = vld [vmem:[%s16979_s5 + $0xe0] sm:$0xff]  }
 0xa0d   :  { %8146 = vmatprep.mubr.bf16.mxu1 %v17463_v38  ;;  %9394 = vmatpush3.bf16.msra.mxu1 %v10470_v2  ;;  %v10456_v38 = vld [vmem:[#allocation3 + $0x4] ss:$16 sps:$4 sm:$0xff]   ;;  %v10479_v2 = vld [vmem:[%s16979_s5 + $0xe8] sm:$0xff]  }
 0xa0e   :  { %9395 = vmatprep.subr.bf16.mxu1 %v10471_v3  ;;  %v10480_v3 = vld [vmem:[%s16979_s5 + $0xa8] sm:$0xff]  }
 0xa0f   :  { %9368 = vmatpush3.bf16.msra.mxu0 %v10449_v1  ;;  %v10481_v1 = vld [vmem:[%s16979_s5 + $0xf0] sm:$0xff]  }
 0xa10   :  { %9369 = vmatprep.subr.bf16.mxu0 %v10452_v39  ;;  %v10482_v39 = vld [vmem:[%s16979_s5 + $0xb0] sm:$0xff]  }
 0xa11   :  { %9396 = vmatpush3.bf16.msra.mxu1 %v10472_v11  ;;  %v10483_v11 = vld [vmem:[%s16979_s5 + $0xf8] sm:$0xff]  }
 0xa12   :  { %7941 = vmatmul.mubr.bf16.gmra.mrb[124].mxu0 %v10450_v21  ;;  %9397 = vmatprep.subr.bf16.mxu1 %v10473_v24  ;;  %v10490_v21 = vld [vmem:[%s16980_s7] sm:$0xff]  }
 0xa13   :  { %8147 = vmatmul.mubr.bf16.gmra.mrb[124].mxu1 %v10451_v12  ;;  %9370 = vmatpush3.bf16.msra.mxu0 %v10453_v49  ;;  %v10484_v49 = vld [vmem:[%s16979_s5 + $0xb8] sm:$0xff]   ;;  %v10492_v12 = vld [vmem:[%s16980_s7 + $0x10] sm:$0xff]  }
 0xa14   :  { %8528 = vmatprep.mubr.bf16.mxu0 %v10456_v38  ;;  %9371 = vmatprep.subr.bf16.mxu0 %v10457_v18  ;;  %v10491_v18 = vld [vmem:[%s16980_s7 + $0x8] sm:$0xff]   ;;  %v10493_v38 = vld [vmem:[%s16980_s7 + $0x18] sm:$0xff]  }
 0xa15   :  { %9398 = vmatpush3.bf16.msra.mxu1 %v10474_v41 }
 0xa16   :  { %9399 = vmatprep.subr.bf16.mxu1 %v10475_v48  ;;  %v10494_v48 = vld [vmem:[%s16980_s7 + $0x20] sm:$0xff]  }
 0xa17   :  { %9372 = vmatpush3.bf16.msra.mxu0 %v10458_v35 }
 0xa18   :  { %9373 = vmatprep.subr.bf16.mxu0 %v10459_v4 }
 0xa19   :  { %9400 = vmatpush3.bf16.msra.mxu1 %v10476_v7  ;;  %v10495_v7 = vld [vmem:[%s16980_s7 + $0x28] sm:$0xff]  }
 0xa1a   :  { %9401 = vmatprep.subr.bf16.mxu1 %v10477_v33  ;;  %v10496_v33 = vld [vmem:[%s16980_s7 + $0x30] sm:$0xff]  }
 0xa1b   :  { %9374 = vmatpush3.bf16.msra.mxu0 %v10460_v28 }
 0xa1c   :  { %9375 = vmatprep.subr.bf16.mxu0 %v10461_v20 }
 0xa1d   :  { %9402 = vmatpush3.bf16.msra.mxu1 %v10478_v44  ;;  %v10497_v44 = vld [vmem:[%s16980_s7 + $0x38] sm:$0xff]  }
 0xa1e   :  { %9403 = vmatprep.subr.bf16.mxu1 %v10479_v2  ;;  %v9267_v2 = vld [vmem:[%s16981_s6] ss:$0 sm:$0xff] }
 0xa1f   :  { %9376 = vmatpush3.bf16.msra.mxu0 %v10462_v40 }
 0xa20   :  { %9377 = vmatprep.subr.bf16.mxu0 %v10463_v25 }
 0xa21   :  { %9404 = vmatpush3.bf16.msra.mxu1 %v10480_v3 }
 0xa22   :  { %9405 = vmatprep.subr.bf16.mxu1 %v10481_v1 }
 0xa23   :  { %9378 = vmatpush3.bf16.msra.mxu0 %v10464_v58 }
 0xa24   :  { %9379 = vmatprep.subr.bf16.mxu0 %v10465_v22 }
 0xa25   :  { %9406 = vmatpush3.bf16.msra.mxu1 %v10482_v39 }
 0xa26   :  { %9407 = vmatprep.subr.bf16.mxu1 %v10483_v11 }
 0xa27   :  { %9380 = vmatpush3.bf16.msra.mxu0 %v10466_v30 }
 0xa28   :  { %9431 = vmatprep.subr.bf16.mxu0 %v10490_v21 }
 0xa29   :  { %9408 = vmatpush3.bf16.msra.mxu1 %v10484_v49 }
 0xa2a   :  { %8529 = vmatmul.mubr.bf16.vlgmr.msra.gmra.mrb[128].mxu0 %v10454_v45 }
 0xa2b   :  { %8536 = vmatprep.mubr.bf16.mxu0 %v9273_v6  ;;  %9432 = vmatpush3.bf16.msra.mxu0 %v10490_v21 }
 0xa2c   :  { %9433 = vmatprep.subr.bf16.mxu0 %v10491_v18 }
 0xa2f   :  { %9434 = vmatpush3.bf16.msra.mxu0 %v10491_v18 }
 0xa30   :  { %9435 = vmatprep.subr.bf16.mxu0 %v10492_v12 }
 0xa32   :  { %8537 = vmatmul.mubr.bf16.gmra.mrb[132].mxu0 %v9272_v54 }
 0xa33   :  { %9436 = vmatpush3.bf16.msra.mxu0 %v10492_v12 }
 0xa34   :  { %9437 = vmatprep.subr.bf16.mxu0 %v10493_v38 }
 0xa37   :  { %9438 = vmatpush3.bf16.msra.mxu0 %v10493_v38 }
 0xa38   :  { %9439 = vmatprep.subr.bf16.mxu0 %v10494_v48 }
 0xa3b   :  { %v7482_v14 = vpop.f32.mrb[112].mxu0  ;;  %9440 = vmatpush3.bf16.msra.mxu0 %v10494_v48 }
 0xa3c   :  { %v7688_v31 = vpop.f32.mrb[112].mxu1  ;;  %v7484_v19 = vpop.f32.mrb[113].mxu0  ;;  %9441 = vmatprep.subr.bf16.mxu0 %v10495_v7 }
 0xa3d   :  { %v7705_v43 = vmax.f32 %v7482_v14, %v7688_v31  ;;  %v7690_v55 = vpop.f32.mrb[113].mxu1  ;;  %v7486_v9 = vpop.f32.mrb[114].mxu0 }
 0xa3e   :  { %v7706_v46 = vmax.f32 %v7484_v19, %v7690_v55  ;;  %v7692_v34 = vpop.f32.mrb[114].mxu1  ;;  %v7488_v23 = vpop.f32.mrb[115].mxu0 }
 0xa3f   :  { %v7707_v61 = vmax.f32 %v7486_v9, %v7692_v34  ;;  %v7694_v29 = vpop.f32.mrb[115].mxu1  ;;  %9442 = vmatpush3.bf16.msra.mxu0 %v10495_v7 }
 0xa40   :  { %v7711_v36 = vmax.f32 %v7705_v43, %v7706_v46  ;;  %v7708_v17 = vmax.f32 %v7488_v23, %v7694_v29  ;;  %9443 = vmatprep.subr.bf16.mxu0 %v10496_v33 }
 0xa42   :  { %v7721_v27 = vadd.f32 %v16891_v62, %v7711_v36  ;;  %v7712_v16 = vmax.f32 %v7707_v61, %v7708_v17 }
 0xa43   :  { %v7492_v51 = vpop.f32.mrb[116].mxu0  ;;  %9444 = vmatpush3.bf16.msra.mxu0 %v10496_v33 }
 0xa44   :  { %v7724_v56 = vmax.f32 %v7721_v27, 0.0  ;;  %v7722_v57 = vadd.f32 %v16891_v62, %v7712_v16  ;;  %v7698_v13 = vpop.f32.mrb[116].mxu1  ;;  %v7494_v47 = vpop.f32.mrb[117].mxu0  ;;  %9445 = vmatprep.subr.bf16.mxu0 %v10497_v44 }
 0xa45   :  { %v7709_v8 = vmax.f32 %v7492_v51, %v7698_v13  ;;  %v7700_v50 = vpop.f32.mrb[117].mxu1  ;;  %v7496_v15 = vpop.f32.mrb[118].mxu0 }
 0xa46   :  { %v9359_v42 = vpack.c.bf16 %v7724_v56, %v7724_v56  ;;  %v7725_v0 = vmax.f32 %v7722_v57, 0.0  ;;  %v7710_v10 = vmax.f32 %v7494_v47, %v7700_v50  ;;  %v7702_v59 = vpop.f32.mrb[118].mxu1  ;;  %v7497_v53 = vpop.f32.mrb[119].mxu0 }
 0xa47   :  { %v7703_v37 = vpop.f32.mrb[119].mxu1  ;;  %9446 = vmatpush3.bf16.msra.mxu0 %v10497_v44 }
 0xa48   :  { %7740 = vst [vmem:[#allocation3 + $0x8] sm:$0xf] %v9359_v42  ;;  %v9360_v52 = vpack.c.bf16 %v7725_v0, %v7725_v0  ;;  %v7713_v32 = vmax.f32 %v7709_v8, %v7710_v10 }
 0xa4a   :  { %7741 = vst [vmem:[#allocation3 + $0x18] sm:$0xf] %v9360_v52  ;;  %v7723_v5 = vadd.f32 %v16891_v62, %v7713_v32 }
 0xa4c   :  { %v7726_v26 = vmax.f32 %v7723_v5, 0.0 }
 0xa4e   :  { %v9361_v63 = vpack.c.bf16 %v7726_v26, %v7726_v26 }
 0xa50   :  { %7742 = vst [vmem:[#allocation3 + $0x28] sm:$0xf] %v9361_v63 }
 0xa51   :  { %v10485_v50 = vld [vmem:[#allocation3 + $0x8] ss:$16 sps:$4 sm:$0xff]  }
 0xadd   :  { %v7932_v35 = vpop.f32.mrb[120].mxu0 }
 0xade   :  { %v8138_v4 = vpop.f32.mrb[120].mxu1  ;;  %v7934_v28 = vpop.f32.mrb[121].mxu0 }
 0xadf   :  { %v8155_v20 = vmax.f32 %v7932_v35, %v8138_v4  ;;  %v8140_v40 = vpop.f32.mrb[121].mxu1  ;;  %v7936_v25 = vpop.f32.mrb[122].mxu0 }
 0xae0   :  { %v8156_v58 = vmax.f32 %v7934_v28, %v8140_v40  ;;  %v8142_v22 = vpop.f32.mrb[122].mxu1  ;;  %v7938_v30 = vpop.f32.mrb[123].mxu0 }
 0xae1   :  { %v8157_v60 = vmax.f32 %v7936_v25, %v8142_v22  ;;  %v8144_v45 = vpop.f32.mrb[123].mxu1 }
 0xae2   :  { %v8161_v6 = vmax.f32 %v8155_v20, %v8156_v58  ;;  %v8158_v54 = vmax.f32 %v7938_v30, %v8144_v45 }
 0xae4   :  { %v8171_v14 = vadd.f32 %v16891_v62, %v8161_v6  ;;  %v8162_v31 = vmax.f32 %v8157_v60, %v8158_v54 }
 0xae5   :  { %v7942_v19 = vpop.f32.mrb[124].mxu0 }
 0xae6   :  { %v8174_v43 = vmax.f32 %v8171_v14, 0.0  ;;  %v8172_v55 = vadd.f32 %v16891_v62, %v8162_v31  ;;  %v8148_v9 = vpop.f32.mrb[124].mxu1  ;;  %v7944_v46 = vpop.f32.mrb[125].mxu0  ;;  %v9308_v14 = vld [vmem:[%s16982_s8] ss:$0 sm:$0xff] }
 0xae7   :  { %v8159_v34 = vmax.f32 %v7942_v19, %v8148_v9  ;;  %v8150_v23 = vpop.f32.mrb[125].mxu1  ;;  %v7946_v61 = vpop.f32.mrb[126].mxu0 }
 0xae8   :  { %v9362_v29 = vpack.c.bf16 %v8174_v43, %v8174_v43  ;;  %v8175_v36 = vmax.f32 %v8172_v55, 0.0  ;;  %v8160_v17 = vmax.f32 %v7944_v46, %v8150_v23  ;;  %v8152_v27 = vpop.f32.mrb[126].mxu1  ;;  %v7947_v16 = vpop.f32.mrb[127].mxu0 }
 0xae9   :  { %v8153_v51 = vpop.f32.mrb[127].mxu1 }
 0xaea   :  { %8190 = vst [vmem:[#allocation3 + $0xc] sm:$0xf] %v9362_v29  ;;  %v9363_v56 = vpack.c.bf16 %v8175_v36, %v8175_v36  ;;  %v8163_v57 = vmax.f32 %v8159_v34, %v8160_v17 }
 0xaec   :  { %8191 = vst [vmem:[#allocation3 + $0x1c] sm:$0xf] %v9363_v56  ;;  %v8173_v13 = vadd.f32 %v16891_v62, %v8163_v57 }
 0xaee   :  { %v8176_v47 = vmax.f32 %v8173_v13, 0.0 }
 0xaf0   :  { %v9364_v8 = vpack.c.bf16 %v8176_v47, %v8176_v47 }
 0xaf2   :  { %8192 = vst [vmem:[#allocation3 + $0x2c] sm:$0xf] %v9364_v8 }
 0xaf3   :  { %v10487_v15 = vld [vmem:[#allocation3 + $0xc] ss:$16 sps:$4 sm:$0xff]  }
 0xaf4   :  { %8576 = vmatprep.mubr.bf16.mxu1 %v10487_v15 }
 0xaf5   :  { %8577 = vmatmul.mubr.bf16.vlgmr.msra.gmra.mrb[128].mxu1 %v10485_v50 }
 0xaf9   :  { %v8198_v42 = vld [vmem:[#allocation3 + $0x28] sm:$0xff] }
 0xafa   :  { %v9275_v0 = vcombine.high %v8198_v42, %v8198_v42  ;;  %v9274_v10 = vcombine.low %v8198_v42, %v8198_v42 }
 0xafc   :  { %8584 = vmatprep.mubr.bf16.mxu1 %v9275_v0 }
 0xafd   :  { %v9381_v59 = vpop.f32.mrb[128].mxu0  ;;  %8585 = vmatmul.mubr.bf16.gmra.mrb[132].mxu1 %v9274_v10 }
 0xafe   :  { %v9382_v53 = vpop.f32.mrb[129].mxu0 }
 0xaff   :  { %v9383_v37 = vadd.f32 %v9382_v53, %v9381_v59  ;;  %v9384_v52 = vpop.f32.mrb[130].mxu0 }
 0xb00   :  { %v9385_v32 = vpop.f32.mrb[131].mxu0 }
 0xb01   :  { %v9386_v5 = vadd.f32 %v9385_v32, %v9384_v52  ;;  %v8531_v39 = vadd.f32 %v9383_v37, %v9267_v2 }
 0xb03   :  { %v8534_v18 = vadd.f32 %v9386_v5, %v9267_v2 }
 0xb05   :  { %v9387_v26 = vpop.f32.mrb[132].mxu0 }
 0xb06   :  { %v9388_v62 = vpop.f32.mrb[133].mxu0 }
 0xb07   :  { %v9389_v63 = vadd.f32 %v9388_v62, %v9387_v26  ;;  %v9390_v24 = vpop.f32.mrb[134].mxu0 }
 0xb08   :  { %v9391_v41 = vpop.f32.mrb[135].mxu0 }
 0xb09   :  { %v8539_v25 = vadd.f32 %v9389_v63, %v9267_v2 }
 0xbc8   :  { %v9409_v3 = vpop.f32.mrb[128].mxu1 }
 0xbc9   :  { %v9410_v1 = vpop.f32.mrb[129].mxu1 }
 0xbca   :  { %v9411_v11 = vadd.f32 %v9410_v1, %v9409_v3  ;;  %v9412_v49 = vpop.f32.mrb[130].mxu1 }
 0xbcb   :  { %v9413_v21 = vpop.f32.mrb[131].mxu1 }
 0xbcc   :  { %v8579_v12 = vadd.f32 %v9411_v11, %v8531_v39  ;;  %v9414_v38 = vadd.f32 %v9413_v21, %v9412_v49 }
 0xbce   :  { %v8582_v35 = vadd.f32 %v9414_v38, %v8534_v18  ;;  %v8592_v4 = vmax.f32 %v8579_v12, 0.0 }
 0xbd0   :  { %v8593_v28 = vmax.f32 %v8582_v35, 0.0  ;;  %v9415_v20 = vpop.f32.mrb[132].mxu1 }
 0xbd1   :  { %v9416_v40 = vpop.f32.mrb[133].mxu1 }
 0xbd2   :  { %v9417_v58 = vadd.f32 %v9416_v40, %v9415_v20  ;;  %v9418_v22 = vpop.f32.mrb[134].mxu1  ;;  %v8595_v30 = vpack.c.bf16 %v8593_v28, %v8592_v4 }
 0xbd3   :  { %v9419_v60 = vpop.f32.mrb[135].mxu1 }
 0xbd4   :  { %v8587_v45 = vadd.f32 %v9417_v58, %v8539_v25  ;;  %9447 = vmatprep.mubr.bf16.mxu0 %v8595_v30 }
 0xbd6   :  { %v8594_v6 = vmax.f32 %v8587_v45, 0.0 }
 0xbd8   :  { %v8596_v54 = vpack.c.bf16 %v8594_v6, %v8594_v6 }
 0xbda   :  { %9448 = vmatmul.mubr.bf16.vlgmr.msra.gmra.mrb[136].mxu0 %v8596_v54 }
 0xcad   :  { %v9449_v31 = vpop.f32.mrb[136].mxu0 }
 0xcae   :  { %v8711_v19 = vadd.f32 %v9449_v31, %v9308_v14  ;;  %v8702_v43 = vpop.f32.mrb[137].mxu0 }
 0xcaf   :  { %v8703_v55 = vadd.f32 %v9308_v14, %v8702_v43  ;;  %v9450_v9 = vpop.f32.mrb[138].mxu0 }
 0xcb0   :  { %8718 = vst [vmem:[%s16983_s9 + $0x10] sm:$0xff] %v8711_v19  ;;  %v8705_v46 = vpop.f32.mrb[139].mxu0 }
 0xcb1   :  { %8716 = vst [vmem:[%s16983_s9] sm:$0xff] %v8703_v55  ;;  %v8706_v34 = vadd.f32 %v9308_v14, %v8705_v46 }
 0xcb3   :  { %8717 = vst [vmem:[%s16983_s9 + $0x8] sm:$0xff] %v8706_v34 }

</bundles_post_ra>
